<compile_context>
chip_gen: v6e
topology: v6e:2x2x1
jax: 0.10.0
libtpu: 0.0.40
codegen_flags: <defaults>
</compile_context>

<pallas_src>
import functools

import jax
import jax.numpy as jnp
from jax import lax
from jax.experimental import pallas as pl
from jax.experimental.pallas import tpu as pltpu

EPS = 1e-5
_LANE = 128


def _round_up(x, m):
    return (x + m - 1) // m * m


def _vmem_limit_bytes():
    """Generation-aware scoped-VMEM limit (v5e/v6e: 128 MiB phys, v7x: 64 MiB)."""
    cap = 128 * 1024 * 1024
    try:
        info = pltpu.get_tpu_info()
        cap = int(getattr(info, "vmem_capacity_bytes", cap))
    except Exception:
        pass
    if cap <= 64 * 1024 * 1024:
        return 48 * 1024 * 1024          # v7x-class: stay well under 64 MiB
    return 100 * 1024 * 1024             # v5e / v6e: use the 128 MiB generously


def _pick_batch_block(n, per_image_bytes, budget_bytes):
    """Largest divisor of n (<= 8) whose per-step footprint fits the budget."""
    nb = 1
    for cand in range(1, n + 1):
        if cand > 8:
            break
        if n % cand == 0 and cand * per_image_bytes <= budget_bytes:
            nb = cand
    return nb


# --------------------------------------------------------------------------
# Pass 1: per-block per-channel sum and sum-of-squares of x (single sweep).
# --------------------------------------------------------------------------
def _stats_kernel(x_ref, s_ref):
    # x_ref: (Nb, H, W, C)   s_ref: (1, 2, C)
    nb, h, w, c = x_ref.shape
    xs = x_ref[...].reshape(nb * h * w, c)
    s0 = jnp.sum(xs, axis=0, keepdims=True)            # (1, C)
    s1 = jnp.sum(xs * xs, axis=0, keepdims=True)       # (1, C)
    s_ref[...] = jnp.concatenate([s0, s1], axis=0)[None, :, :]


# --------------------------------------------------------------------------
# Pass 2: BN1+ReLU (f32), 1x1 conv as channel matmul (MXU), emit h + h stats.
# --------------------------------------------------------------------------
def _conv1_kernel(x_ref, w1_ref, sc1_ref, sh1_ref, h_ref, hstat_ref):
    # x_ref: (Nb,H,W,C)  w1_ref: (C,ICp)  sc1/sh1: (1,C)
    # h_ref: (Nb,H,W,ICp) [bf16 or f32]   hstat_ref: (1,2,ICp)
    nb, h, w, c = x_ref.shape
    icp = w1_ref.shape[1]

    xs = x_ref[...].reshape(nb * h * w, c)
    a = jnp.maximum(xs * sc1_ref[...] + sh1_ref[...], 0.0)          # f32 BN+ReLU

    hmat = jnp.dot(a.astype(w1_ref.dtype), w1_ref[...],
                   preferred_element_type=jnp.float32)              # (Nb*H*W, ICp)

    # BN2 statistics from the f32 accumulator (before the bf16 HBM round-trip).
    s0 = jnp.sum(hmat, axis=0, keepdims=True)
    s1 = jnp.sum(hmat * hmat, axis=0, keepdims=True)
    hstat_ref[...] = jnp.concatenate([s0, s1], axis=0)[None, :, :]

    h_ref[...] = hmat.astype(h_ref.dtype).reshape(nb, h, w, icp)


# --------------------------------------------------------------------------
# Pass 3: BN2+ReLU (f32), 3x3 conv (pad=1) as 3 fat K=3*ICp matmuls using a
# zero-padded VMEM scratch; accumulation kept in registers, single output store.
# --------------------------------------------------------------------------
def _conv2_kernel(h_ref, w2_ref, sc2_ref, sh2_ref, out_ref, bp_ref):
    # h_ref : (Nb,H,W,ICp)    w2_ref: (3, 3*ICp, Gp)   sc2/sh2: (1, ICp)
    # out   : (Nb,H,W,Gp)     bp_ref: (Nb, H+2, W+2, ICp) scratch
    nb, h, w, icp = h_ref.shape
    gp = w2_ref.shape[2]
    pdt = bp_ref.dtype

    # BN2 + ReLU in f32, cast only at the scratch store.
    b = jnp.maximum(
        h_ref[...].astype(jnp.float32) * sc2_ref[...] + sh2_ref[...], 0.0)

    # Zero the 1-pixel border only (tiny stores, re-written every step so it is
    # safe under megacore sharding); single interior store, no concatenates.
    bp_ref[:, 0:1, :, :] = jnp.zeros((nb, 1, w + 2, icp), pdt)
    bp_ref[:, h + 1:h + 2, :, :] = jnp.zeros((nb, 1, w + 2, icp), pdt)
    bp_ref[:, :, 0:1, :] = jnp.zeros((nb, h + 2, 1, icp), pdt)
    bp_ref[:, :, w + 1:w + 2, :] = jnp.zeros((nb, h + 2, 1, icp), pdt)
    bp_ref[:, 1:h + 1, 1:w + 1, :] = b.astype(pdt)

    # 3 fat matmuls: for each ky, fold the 3 kx taps into one K = 3*ICp dot.
    # (ICp is a multiple of 128, so the lane-axis concat is pure vreg placement.)
    acc = None
    for ky in range(3):
        slab = bp_ref[:, ky:ky + h, :, :]                      # (Nb, H, W+2, ICp)
        win = jnp.concatenate(
            [slab[:, :, 0:w, :], slab[:, :, 1:w + 1, :], slab[:, :, 2:w + 2, :]],
            axis=-1)                                           # (Nb, H, W, 3*ICp)
        lhs = win.reshape(nb * h * w, 3 * icp)
        contrib = jnp.dot(lhs, w2_ref[ky], preferred_element_type=jnp.float32)
        acc = contrib if acc is None else acc + contrib

    out_ref[...] = acc.reshape(nb, h, w, gp)                   # lane-dense store


# --------------------------------------------------------------------------
# Wrapper
# --------------------------------------------------------------------------
@functools.partial(jax.jit, static_argnames=("growth_rate", "use_bf16"))
def bottleneck_forward(x_nchw, params, *, growth_rate, use_bf16=True):
    """Pallas implementation of Bottleneck.forward. x_nchw: (N, C, H, W) f32."""
    N, C, H, W = x_nchw.shape
    IC = 4 * growth_rate
    G = growth_rate
    ICp = _round_up(IC, _LANE)                 # lane-dense conv1 output channels
    Gp = _round_up(G, _LANE)                   # lane-dense conv2 output channels
    cdt = jnp.bfloat16 if use_bf16 else jnp.float32   # MXU operand / h / scratch

    # TODO(synk): keep the surrounding model NHWC end-to-end and fuse the final
    # channel concat into the pass-3 output to drop these XLA-level relayouts.
    x_nhwc = jnp.transpose(x_nchw, (0, 2, 3, 1)).astype(jnp.float32)

    # Re-pack PyTorch-shaped weights; zero-pad IC->ICp and G->Gp (padded h
    # channels are exactly zero, padded BN2 gamma/beta are zero, so results
    # are unaffected and sliced off below).
    w1 = jnp.transpose(params["conv1_w"][:, :, 0, 0], (1, 0))            # (C, IC)
    w1 = jnp.pad(w1, ((0, 0), (0, ICp - IC))).astype(cdt)                # (C, ICp)
    w2 = jnp.transpose(params["conv2_w"], (2, 3, 1, 0))                  # (3,3,IC,G)
    w2 = jnp.pad(w2, ((0, 0), (0, 0), (0, ICp - IC), (0, Gp - G)))
    w2 = w2.reshape(3, 3 * ICp, Gp).astype(cdt)                          # (3,3ICp,Gp)
    g1, be1 = params["bn1_gamma"], params["bn1_beta"]
    g2 = jnp.pad(params["bn2_gamma"], (0, ICp - IC))
    be2 = jnp.pad(params["bn2_beta"], (0, ICp - IC))

    vmem_limit = _vmem_limit_bytes()
    cparams = pltpu.CompilerParams(
        dimension_semantics=("parallel",),          # megacore sharding over batch
        vmem_limit_bytes=vmem_limit)

    # Batch several images per grid step when images are small: amortizes the
    # ~0.35us/step overhead, enlarges M for the MXU, reuses resident weights.
    es = 2 if use_bf16 else 4
    per_image = (H * W * ICp * es                 # h block
                 + (H + 2) * (W + 2) * ICp * es   # bp scratch
                 + 3 * H * W * ICp * es           # window temp
                 + 2 * H * W * Gp * 4             # acc + out
                 + H * W * C * 4)                 # x block
    Nb = _pick_batch_block(N, per_image,
                           budget_bytes=min(vmem_limit // 4, 12 * 1024 * 1024))
    NB = N // Nb
    total = jnp.float32(N * H * W)

    # ---- Pass 1: x statistics -> BN1 scale/shift ----
    # TODO(synk): E[x^2]-E[x]^2 in f32 can lose precision at ImageNet scale;
    # switch to a centered / Welford-style combine if stats drift matters.
    xstats = pl.pallas_call(
        _stats_kernel,
        out_shape=jax.ShapeDtypeStruct((NB, 2, C), jnp.float32),
        grid=(NB,),
        in_specs=[pl.BlockSpec((Nb, H, W, C), lambda i: (i, 0, 0, 0))],
        out_specs=pl.BlockSpec((1, 2, C), lambda i: (i, 0, 0)),
        compiler_params=cparams,
    )(x_nhwc)
    mean1 = jnp.sum(xstats[:, 0, :], axis=0) / total
    var1 = jnp.maximum(jnp.sum(xstats[:, 1, :], axis=0) / total - mean1 * mean1,
                       0.0)
    inv1 = lax.rsqrt(var1 + EPS)
    scale1 = (g1 * inv1).reshape(1, C)
    shift1 = (be1 - mean1 * g1 * inv1).reshape(1, C)

    # ---- Pass 2: BN1+ReLU, conv1x1, h statistics -> BN2 scale/shift ----
    h_full, hstats = pl.pallas_call(
        _conv1_kernel,
        out_shape=(jax.ShapeDtypeStruct((N, H, W, ICp), cdt),
                   jax.ShapeDtypeStruct((NB, 2, ICp), jnp.float32)),
        grid=(NB,),
        in_specs=[pl.BlockSpec((Nb, H, W, C), lambda i: (i, 0, 0, 0)),
                  pl.BlockSpec((C, ICp), lambda i: (0, 0)),
                  pl.BlockSpec((1, C), lambda i: (0, 0)),
                  pl.BlockSpec((1, C), lambda i: (0, 0))],
        out_specs=(pl.BlockSpec((Nb, H, W, ICp), lambda i: (i, 0, 0, 0)),
                   pl.BlockSpec((1, 2, ICp), lambda i: (i, 0, 0))),
        compiler_params=cparams,
    )(x_nhwc, w1, scale1, shift1)
    mean2 = jnp.sum(hstats[:, 0, :], axis=0) / total
    var2 = jnp.maximum(jnp.sum(hstats[:, 1, :], axis=0) / total - mean2 * mean2,
                       0.0)
    inv2 = lax.rsqrt(var2 + EPS)
    scale2 = (g2 * inv2).reshape(1, ICp)
    shift2 = (be2 - mean2 * g2 * inv2).reshape(1, ICp)

    # ---- Pass 3: BN2+ReLU, conv3x3 (pad=1) ----
    # TODO(synk): for ImageNet-scale H*W on 64-MiB-VMEM chips add row tiling of
    # this pass with a 1-row halo; per-(Nb images) blocks are used here.
    out_p = pl.pallas_call(
        _conv2_kernel,
        out_shape=jax.ShapeDtypeStruct((N, H, W, Gp), jnp.float32),
        grid=(NB,),
        in_specs=[pl.BlockSpec((Nb, H, W, ICp), lambda i: (i, 0, 0, 0)),
                  pl.BlockSpec((3, 3 * ICp, Gp), lambda i: (0, 0, 0)),
                  pl.BlockSpec((1, ICp), lambda i: (0, 0)),
                  pl.BlockSpec((1, ICp), lambda i: (0, 0))],
        out_specs=pl.BlockSpec((Nb, H, W, Gp), lambda i: (i, 0, 0, 0)),
        scratch_shapes=[pltpu.VMEM((Nb, H + 2, W + 2, ICp), cdt)],
        compiler_params=cparams,
    )(h_full, w2, scale2, shift2)

    out_nhwc = out_p[..., :G]                                  # drop lane padding
    out_nchw = jnp.transpose(out_nhwc, (0, 3, 1, 2))
    return jnp.concatenate([x_nchw, out_nchw], axis=1)         # (N, C+G, H, W)


# --------------------------------------------------------------------------
# Pure-JAX reference (mirrors the PyTorch module in train mode).
# --------------------------------------------------------------------------
def bottleneck_reference(x, params, growth_rate):
    def bn_relu(t, gamma, beta):
        mean = jnp.mean(t, axis=(0, 2, 3), keepdims=True)
        var = jnp.mean(jnp.square(t), axis=(0, 2, 3), keepdims=True) - mean**2
        t = (t - mean) * lax.rsqrt(var + EPS)
        t = t * gamma.reshape(1, -1, 1, 1) + beta.reshape(1, -1, 1, 1)
        return jnp.maximum(t, 0.0)

    dn = ("NCHW", "OIHW", "NCHW")
    a = bn_relu(x, params["bn1_gamma"], params["bn1_beta"])
    h = lax.conv_general_dilated(a, params["conv1_w"], (1, 1), "VALID",
                                 dimension_numbers=dn)
    b = bn_relu(h, params["bn2_gamma"], params["bn2_beta"])
    o = lax.conv_general_dilated(b, params["conv2_w"], (1, 1),
                                 ((1, 1), (1, 1)), dimension_numbers=dn)
    return jnp.concatenate([x, o], axis=1)


def make_params(key, in_channels, growth_rate):
    ic = 4 * growth_rate
    k1, k2 = jax.random.split(key)
    return {
        # PyTorch-shaped conv weights (OIHW), deterministic synthetic init.
        "conv1_w": 0.1 * jax.random.normal(k1, (ic, in_channels, 1, 1), jnp.float32),
        "conv2_w": 0.1 * jax.random.normal(k2, (growth_rate, ic, 3, 3), jnp.float32),
        # BatchNorm affine params at their PyTorch defaults.
        "bn1_gamma": jnp.ones((in_channels,), jnp.float32),
        "bn1_beta": jnp.zeros((in_channels,), jnp.float32),
        "bn2_gamma": jnp.ones((ic,), jnp.float32),
        "bn2_beta": jnp.zeros((ic,), jnp.float32),
    }


if __name__ == "__main__":
    key = jax.random.PRNGKey(0)
    kx, kp = jax.random.split(key)

    N, C, H, W = 2, 4, 16, 16
    growth_rate = 4

    x = jax.random.normal(kx, (N, C, H, W), jnp.float32)
    params = make_params(kp, C, growth_rate)
    ref = bottleneck_reference(x, params, growth_rate)

    # Exact-precision path (f32 MXU operands, f32 h): tight correctness check.
    out_f32 = jax.block_until_ready(
        bottleneck_forward(x, params, growth_rate=growth_rate, use_bf16=False))
    assert out_f32.shape == (N, C + growth_rate, H, W), out_f32.shape
    err_f32 = float(jnp.max(jnp.abs(out_f32 - ref)))
    assert jnp.allclose(out_f32, ref, atol=1e-4, rtol=1e-4), err_f32

    # Default fast path (bf16 MXU operands + bf16 h intermediate, f32 accumulate):
    # looser tolerance is expected from the reduced operand precision.
    out_bf16 = jax.block_until_ready(
        bottleneck_forward(x, params, growth_rate=growth_rate))
    err_bf16 = float(jnp.max(jnp.abs(out_bf16 - ref)))
    assert jnp.allclose(out_bf16, ref, atol=1e-1, rtol=1e-1), err_bf16

    print("KERNEL_OK")
</pallas_src>

<mosaic_0001>
module attributes {stable_mosaic.version = 11 : i64} {
  func.func @_stats_kernel(%arg0: i32, %arg1: memref<2x16x16x4xf32, #tpu.memory_space<vmem>>, %arg2: memref<1x2x4xf32, #tpu.memory_space<vmem>>) attributes {dimension_semantics = [#tpu.dimension_semantics<parallel>], iteration_bounds = array<i64: 1>, scalar_prefetch = 0 : i64, scratch_operands = 0 : i64, tpu.core_type = #tpu.core_type<tc>, window_params = [{transform_indices = @transform_0, window_bounds = array<i64: 2, 16, 16, 4>}, {transform_indices = @transform_1, window_bounds = array<i64: 1, 2, 4>}]} {
    %c0 = arith.constant 0 : index
    %c0_0 = arith.constant 0 : index
    %c0_1 = arith.constant 0 : index
    %c0_2 = arith.constant 0 : index
    %0 = vector.load %arg1[%c0, %c0_0, %c0_1, %c0_2] : memref<2x16x16x4xf32, #tpu.memory_space<vmem>>, vector<2x16x16x4xf32>
    %1 = vector.shape_cast %0 : vector<2x16x16x4xf32> to vector<512x4xf32>
    %cst = arith.constant dense<0.000000e+00> : vector<4xf32>
    %2 = vector.multi_reduction <add>, %1, %cst [0] : vector<512x4xf32> to vector<4xf32>
    %3 = vector.shape_cast %2 : vector<4xf32> to vector<1x4xf32>
    %4 = arith.mulf %1, %1 : vector<512x4xf32>
    %cst_3 = arith.constant dense<0.000000e+00> : vector<4xf32>
    %5 = vector.multi_reduction <add>, %4, %cst_3 [0] : vector<512x4xf32> to vector<4xf32>
    %6 = vector.shape_cast %5 : vector<4xf32> to vector<1x4xf32>
    %7 = tpu.concatenate %3, %6 in 0 : vector<1x4xf32>, vector<1x4xf32> -> vector<2x4xf32>
    %8 = vector.shape_cast %7 : vector<2x4xf32> to vector<1x2x4xf32>
    %c0_4 = arith.constant 0 : index
    %c0_5 = arith.constant 0 : index
    %c0_6 = arith.constant 0 : index
    %9 = vector.load %arg2[%c0_4, %c0_5, %c0_6] : memref<1x2x4xf32, #tpu.memory_space<vmem>>, vector<1x2x4xf32>
    tpu.vector_store %arg2[%c0_4, %c0_5, %c0_6], %8 {strides = array<i32>} : memref<1x2x4xf32, #tpu.memory_space<vmem>>, vector<1x2x4xf32>,
    return
  }
  func.func @transform_0(%arg0: i32) -> (i32, i32, i32, i32) {
    %c0_i32 = arith.constant 0 : i32
    %c0_i32_0 = arith.constant 0 : i32
    %c0_i32_1 = arith.constant 0 : i32
    %c0_i32_2 = arith.constant 0 : i32
    return %arg0, %c0_i32, %c0_i32_0, %c0_i32_1 : i32, i32, i32, i32
  }
  func.func @transform_1(%arg0: i32) -> (i32, i32, i32) {
    %c0_i32 = arith.constant 0 : i32
    %c0_i32_0 = arith.constant 0 : i32
    %c0_i32_1 = arith.constant 0 : i32
    return %arg0, %c0_i32, %c0_i32_0 : i32, i32, i32
  }
}

module attributes {stable_mosaic.version = 11 : i64} {
  func.func @_conv1_kernel(%arg0: i32, %arg1: memref<2x16x16x4xf32, #tpu.memory_space<vmem>>, %arg2: memref<4x128xf32, #tpu.memory_space<vmem>>, %arg3: memref<1x4xf32, #tpu.memory_space<vmem>>, %arg4: memref<1x4xf32, #tpu.memory_space<vmem>>, %arg5: memref<2x16x16x128xf32, #tpu.memory_space<vmem>>, %arg6: memref<1x2x128xf32, #tpu.memory_space<vmem>>) attributes {dimension_semantics = [#tpu.dimension_semantics<parallel>], iteration_bounds = array<i64: 1>, scalar_prefetch = 0 : i64, scratch_operands = 0 : i64, tpu.core_type = #tpu.core_type<tc>, window_params = [{transform_indices = @transform_0, window_bounds = array<i64: 2, 16, 16, 4>}, {pipeline_mode = #tpu.pipeline_mode<synchronous>, transform_indices = @transform_1, window_bounds = array<i64: 4, 128>}, {pipeline_mode = #tpu.pipeline_mode<synchronous>, transform_indices = @transform_2, window_bounds = array<i64: 1, 4>}, {pipeline_mode = #tpu.pipeline_mode<synchronous>, transform_indices = @transform_3, window_bounds = array<i64: 1, 4>}, {transform_indices = @transform_4, window_bounds = array<i64: 2, 16, 16, 128>}, {transform_indices = @transform_5, window_bounds = array<i64: 1, 2, 128>}]} {
    %c0 = arith.constant 0 : index
    %c0_0 = arith.constant 0 : index
    %c0_1 = arith.constant 0 : index
    %c0_2 = arith.constant 0 : index
    %0 = vector.load %arg1[%c0, %c0_0, %c0_1, %c0_2] : memref<2x16x16x4xf32, #tpu.memory_space<vmem>>, vector<2x16x16x4xf32>
    %1 = vector.shape_cast %0 : vector<2x16x16x4xf32> to vector<512x4xf32>
    %c0_3 = arith.constant 0 : index
    %c0_4 = arith.constant 0 : index
    %2 = vector.load %arg3[%c0_3, %c0_4] : memref<1x4xf32, #tpu.memory_space<vmem>>, vector<1x4xf32>
    %3 = vector.broadcast %2 : vector<1x4xf32> to vector<512x4xf32>
    %4 = arith.mulf %1, %3 : vector<512x4xf32>
    %c0_5 = arith.constant 0 : index
    %c0_6 = arith.constant 0 : index
    %5 = vector.load %arg4[%c0_5, %c0_6] : memref<1x4xf32, #tpu.memory_space<vmem>>, vector<1x4xf32>
    %6 = vector.broadcast %5 : vector<1x4xf32> to vector<512x4xf32>
    %7 = arith.addf %4, %6 : vector<512x4xf32>
    %cst = arith.constant 0.000000e+00 : f32
    %8 = vector.broadcast %cst : f32 to vector<512x4xf32>
    %9 = arith.maximumf %7, %8 : vector<512x4xf32>
    %c0_7 = arith.constant 0 : index
    %c0_8 = arith.constant 0 : index
    %10 = vector.load %arg2[%c0_7, %c0_8] : memref<4x128xf32, #tpu.memory_space<vmem>>, vector<4x128xf32>
    %cst_9 = arith.constant dense<0.000000e+00> : vector<512x128xf32>
    %11 = tpu.matmul %9, %10, %cst_9 {dimension_numbers = #tpu.dot_dimension_numbers<[1], [0], [0], [1], [0, 0, 1, 1], [], []>} : vector<512x4xf32>, vector<4x128xf32>, vector<512x128xf32> -> vector<512x128xf32>
    %cst_10 = arith.constant dense<0.000000e+00> : vector<128xf32>
    %12 = vector.multi_reduction <add>, %11, %cst_10 [0] : vector<512x128xf32> to vector<128xf32>
    %13 = vector.shape_cast %12 : vector<128xf32> to vector<1x128xf32>
    %14 = arith.mulf %11, %11 : vector<512x128xf32>
    %cst_11 = arith.constant dense<0.000000e+00> : vector<128xf32>
    %15 = vector.multi_reduction <add>, %14, %cst_11 [0] : vector<512x128xf32> to vector<128xf32>
    %16 = vector.shape_cast %15 : vector<128xf32> to vector<1x128xf32>
    %17 = tpu.concatenate %13, %16 in 0 : vector<1x128xf32>, vector<1x128xf32> -> vector<2x128xf32>
    %18 = vector.shape_cast %17 : vector<2x128xf32> to vector<1x2x128xf32>
    %c0_12 = arith.constant 0 : index
    %c0_13 = arith.constant 0 : index
    %c0_14 = arith.constant 0 : index
    %19 = vector.load %arg6[%c0_12, %c0_13, %c0_14] : memref<1x2x128xf32, #tpu.memory_space<vmem>>, vector<1x2x128xf32>
    tpu.vector_store %arg6[%c0_12, %c0_13, %c0_14], %18 {strides = array<i32>} : memref<1x2x128xf32, #tpu.memory_space<vmem>>, vector<1x2x128xf32>,
    %20 = vector.shape_cast %11 : vector<512x128xf32> to vector<2x16x16x128xf32>
    %c0_15 = arith.constant 0 : index
    %c0_16 = arith.constant 0 : index
    %c0_17 = arith.constant 0 : index
    %c0_18 = arith.constant 0 : index
    %21 = vector.load %arg5[%c0_15, %c0_16, %c0_17, %c0_18] : memref<2x16x16x128xf32, #tpu.memory_space<vmem>>, vector<2x16x16x128xf32>
    tpu.vector_store %arg5[%c0_15, %c0_16, %c0_17, %c0_18], %20 {strides = array<i32>} : memref<2x16x16x128xf32, #tpu.memory_space<vmem>>, vector<2x16x16x128xf32>,
    return
  }
  func.func @transform_0(%arg0: i32) -> (i32, i32, i32, i32) {
    %c0_i32 = arith.constant 0 : i32
    %c0_i32_0 = arith.constant 0 : i32
    %c0_i32_1 = arith.constant 0 : i32
    %c0_i32_2 = arith.constant 0 : i32
    return %arg0, %c0_i32, %c0_i32_0, %c0_i32_1 : i32, i32, i32, i32
  }
  func.func @transform_1(%arg0: i32) -> (i32, i32) {
    %c0_i32 = arith.constant 0 : i32
    %c0_i32_0 = arith.constant 0 : i32
    %c0_i32_1 = arith.constant 0 : i32
    return %c0_i32, %c0_i32_0 : i32, i32
  }
  func.func @transform_2(%arg0: i32) -> (i32, i32) {
    %c0_i32 = arith.constant 0 : i32
    %c0_i32_0 = arith.constant 0 : i32
    %c0_i32_1 = arith.constant 0 : i32
    return %c0_i32, %c0_i32_0 : i32, i32
  }
  func.func @transform_3(%arg0: i32) -> (i32, i32) {
    %c0_i32 = arith.constant 0 : i32
    %c0_i32_0 = arith.constant 0 : i32
    %c0_i32_1 = arith.constant 0 : i32
    return %c0_i32, %c0_i32_0 : i32, i32
  }
  func.func @transform_4(%arg0: i32) -> (i32, i32, i32, i32) {
    %c0_i32 = arith.constant 0 : i32
    %c0_i32_0 = arith.constant 0 : i32
    %c0_i32_1 = arith.constant 0 : i32
    %c0_i32_2 = arith.constant 0 : i32
    return %arg0, %c0_i32, %c0_i32_0, %c0_i32_1 : i32, i32, i32, i32
  }
  func.func @transform_5(%arg0: i32) -> (i32, i32, i32) {
    %c0_i32 = arith.constant 0 : i32
    %c0_i32_0 = arith.constant 0 : i32
    %c0_i32_1 = arith.constant 0 : i32
    return %arg0, %c0_i32, %c0_i32_0 : i32, i32, i32
  }
}

module attributes {stable_mosaic.version = 11 : i64} {
  func.func @_conv2_kernel(%arg0: i32, %arg1: memref<2x16x16x128xf32, #tpu.memory_space<vmem>>, %arg2: memref<3x384x128xf32, #tpu.memory_space<vmem>>, %arg3: memref<1x128xf32, #tpu.memory_space<vmem>>, %arg4: memref<1x128xf32, #tpu.memory_space<vmem>>, %arg5: memref<2x16x16x128xf32, #tpu.memory_space<vmem>>, %arg6: memref<2x18x18x128xf32, #tpu.memory_space<vmem>>) attributes {dimension_semantics = [#tpu.dimension_semantics<parallel>], iteration_bounds = array<i64: 1>, scalar_prefetch = 0 : i64, scratch_operands = 1 : i64, tpu.core_type = #tpu.core_type<tc>, window_params = [{transform_indices = @transform_0, window_bounds = array<i64: 2, 16, 16, 128>}, {pipeline_mode = #tpu.pipeline_mode<synchronous>, transform_indices = @transform_1, window_bounds = array<i64: 3, 384, 128>}, {pipeline_mode = #tpu.pipeline_mode<synchronous>, transform_indices = @transform_2, window_bounds = array<i64: 1, 128>}, {pipeline_mode = #tpu.pipeline_mode<synchronous>, transform_indices = @transform_3, window_bounds = array<i64: 1, 128>}, {transform_indices = @transform_4, window_bounds = array<i64: 2, 16, 16, 128>}]} {
    %c0 = arith.constant 0 : index
    %c0_0 = arith.constant 0 : index
    %c0_1 = arith.constant 0 : index
    %c0_2 = arith.constant 0 : index
    %0 = vector.load %arg1[%c0, %c0_0, %c0_1, %c0_2] : memref<2x16x16x128xf32, #tpu.memory_space<vmem>>, vector<2x16x16x128xf32>
    %c0_3 = arith.constant 0 : index
    %c0_4 = arith.constant 0 : index
    %1 = vector.load %arg3[%c0_3, %c0_4] : memref<1x128xf32, #tpu.memory_space<vmem>>, vector<1x128xf32>
    %2 = vector.shape_cast %1 : vector<1x128xf32> to vector<1x1x1x128xf32>
    %3 = vector.broadcast %2 : vector<1x1x1x128xf32> to vector<2x16x16x128xf32>
    %4 = arith.mulf %0, %3 : vector<2x16x16x128xf32>
    %c0_5 = arith.constant 0 : index
    %c0_6 = arith.constant 0 : index
    %5 = vector.load %arg4[%c0_5, %c0_6] : memref<1x128xf32, #tpu.memory_space<vmem>>, vector<1x128xf32>
    %6 = vector.shape_cast %5 : vector<1x128xf32> to vector<1x1x1x128xf32>
    %7 = vector.broadcast %6 : vector<1x1x1x128xf32> to vector<2x16x16x128xf32>
    %8 = arith.addf %4, %7 : vector<2x16x16x128xf32>
    %cst = arith.constant 0.000000e+00 : f32
    %9 = vector.broadcast %cst : f32 to vector<2x16x16x128xf32>
    %10 = arith.maximumf %8, %9 : vector<2x16x16x128xf32>
    %cst_7 = arith.constant 0.000000e+00 : f32
    %11 = vector.broadcast %cst_7 : f32 to vector<2x1x18x128xf32>
    %c0_8 = arith.constant 0 : index
    %c0_9 = arith.constant 0 : index
    %c0_10 = arith.constant 0 : index
    %c0_11 = arith.constant 0 : index
    %12 = vector.load %arg6[%c0_8, %c0_9, %c0_10, %c0_11] : memref<2x18x18x128xf32, #tpu.memory_space<vmem>>, vector<2x1x18x128xf32>
    tpu.vector_store %arg6[%c0_8, %c0_9, %c0_10, %c0_11], %11 {strides = array<i32>} : memref<2x18x18x128xf32, #tpu.memory_space<vmem>>, vector<2x1x18x128xf32>,
    %cst_12 = arith.constant 0.000000e+00 : f32
    %13 = vector.broadcast %cst_12 : f32 to vector<2x1x18x128xf32>
    %c0_13 = arith.constant 0 : index
    %c17 = arith.constant 17 : index
    %c0_14 = arith.constant 0 : index
    %c0_15 = arith.constant 0 : index
    %14 = vector.load %arg6[%c0_13, %c17, %c0_14, %c0_15] : memref<2x18x18x128xf32, #tpu.memory_space<vmem>>, vector<2x1x18x128xf32>
    tpu.vector_store %arg6[%c0_13, %c17, %c0_14, %c0_15], %13 {strides = array<i32>} : memref<2x18x18x128xf32, #tpu.memory_space<vmem>>, vector<2x1x18x128xf32>,
    %cst_16 = arith.constant 0.000000e+00 : f32
    %15 = vector.broadcast %cst_16 : f32 to vector<2x18x1x128xf32>
    %c0_17 = arith.constant 0 : index
    %c0_18 = arith.constant 0 : index
    %c0_19 = arith.constant 0 : index
    %c0_20 = arith.constant 0 : index
    %16 = vector.load %arg6[%c0_17, %c0_18, %c0_19, %c0_20] : memref<2x18x18x128xf32, #tpu.memory_space<vmem>>, vector<2x18x1x128xf32>
    tpu.vector_store %arg6[%c0_17, %c0_18, %c0_19, %c0_20], %15 {strides = array<i32>} : memref<2x18x18x128xf32, #tpu.memory_space<vmem>>, vector<2x18x1x128xf32>,
    %cst_21 = arith.constant 0.000000e+00 : f32
    %17 = vector.broadcast %cst_21 : f32 to vector<2x18x1x128xf32>
    %c0_22 = arith.constant 0 : index
    %c0_23 = arith.constant 0 : index
    %c17_24 = arith.constant 17 : index
    %c0_25 = arith.constant 0 : index
    %18 = vector.load %arg6[%c0_22, %c0_23, %c17_24, %c0_25] : memref<2x18x18x128xf32, #tpu.memory_space<vmem>>, vector<2x18x1x128xf32>
    tpu.vector_store %arg6[%c0_22, %c0_23, %c17_24, %c0_25], %17 {strides = array<i32>} : memref<2x18x18x128xf32, #tpu.memory_space<vmem>>, vector<2x18x1x128xf32>,
    %c0_26 = arith.constant 0 : index
    %c1 = arith.constant 1 : index
    %c1_27 = arith.constant 1 : index
    %c0_28 = arith.constant 0 : index
    %19 = vector.load %arg6[%c0_26, %c1, %c1_27, %c0_28] : memref<2x18x18x128xf32, #tpu.memory_space<vmem>>, vector<2x16x16x128xf32>
    tpu.vector_store %arg6[%c0_26, %c1, %c1_27, %c0_28], %10 {strides = array<i32>} : memref<2x18x18x128xf32, #tpu.memory_space<vmem>>, vector<2x16x16x128xf32>,
    %c0_29 = arith.constant 0 : index
    %c0_30 = arith.constant 0 : index
    %c0_31 = arith.constant 0 : index
    %c0_32 = arith.constant 0 : index
    %20 = vector.load %arg6[%c0_29, %c0_30, %c0_31, %c0_32] : memref<2x18x18x128xf32, #tpu.memory_space<vmem>>, vector<2x16x18x128xf32>
    %21 = vector.extract_strided_slice %20 {offsets = [0, 0, 0, 0], sizes = [2, 16, 16, 128], strides = [1, 1, 1, 1]} : vector<2x16x18x128xf32> to vector<2x16x16x128xf32>
    %22 = vector.extract_strided_slice %20 {offsets = [0, 0, 1, 0], sizes = [2, 16, 16, 128], strides = [1, 1, 1, 1]} : vector<2x16x18x128xf32> to vector<2x16x16x128xf32>
    %23 = vector.extract_strided_slice %20 {offsets = [0, 0, 2, 0], sizes = [2, 16, 16, 128], strides = [1, 1, 1, 1]} : vector<2x16x18x128xf32> to vector<2x16x16x128xf32>
    %24 = tpu.concatenate %21, %22, %23 in 3 : vector<2x16x16x128xf32>, vector<2x16x16x128xf32>, vector<2x16x16x128xf32> -> vector<2x16x16x384xf32>
    %25 = vector.shape_cast %24 : vector<2x16x16x384xf32> to vector<512x384xf32>
    %c0_33 = arith.constant 0 : index
    %c0_34 = arith.constant 0 : index
    %c0_35 = arith.constant 0 : index
    %26 = vector.load %arg2[%c0_33, %c0_34, %c0_35] : memref<3x384x128xf32, #tpu.memory_space<vmem>>, vector<1x384x128xf32>
    %27 = vector.shape_cast %26 : vector<1x384x128xf32> to vector<384x128xf32>
    %cst_36 = arith.constant dense<0.000000e+00> : vector<512x128xf32>
    %28 = tpu.matmul %25, %27, %cst_36 {dimension_numbers = #tpu.dot_dimension_numbers<[1], [0], [0], [1], [0, 0, 1, 1], [], []>} : vector<512x384xf32>, vector<384x128xf32>, vector<512x128xf32> -> vector<512x128xf32>
    %c0_37 = arith.constant 0 : index
    %c1_38 = arith.constant 1 : index
    %c0_39 = arith.constant 0 : index
    %c0_40 = arith.constant 0 : index
    %29 = vector.load %arg6[%c0_37, %c1_38, %c0_39, %c0_40] : memref<2x18x18x128xf32, #tpu.memory_space<vmem>>, vector<2x16x18x128xf32>
    %30 = vector.extract_strided_slice %29 {offsets = [0, 0, 0, 0], sizes = [2, 16, 16, 128], strides = [1, 1, 1, 1]} : vector<2x16x18x128xf32> to vector<2x16x16x128xf32>
    %31 = vector.extract_strided_slice %29 {offsets = [0, 0, 1, 0], sizes = [2, 16, 16, 128], strides = [1, 1, 1, 1]} : vector<2x16x18x128xf32> to vector<2x16x16x128xf32>
    %32 = vector.extract_strided_slice %29 {offsets = [0, 0, 2, 0], sizes = [2, 16, 16, 128], strides = [1, 1, 1, 1]} : vector<2x16x18x128xf32> to vector<2x16x16x128xf32>
    %33 = tpu.concatenate %30, %31, %32 in 3 : vector<2x16x16x128xf32>, vector<2x16x16x128xf32>, vector<2x16x16x128xf32> -> vector<2x16x16x384xf32>
    %34 = vector.shape_cast %33 : vector<2x16x16x384xf32> to vector<512x384xf32>
    %c1_41 = arith.constant 1 : index
    %c0_42 = arith.constant 0 : index
    %c0_43 = arith.constant 0 : index
    %35 = vector.load %arg2[%c1_41, %c0_42, %c0_43] : memref<3x384x128xf32, #tpu.memory_space<vmem>>, vector<1x384x128xf32>
    %36 = vector.shape_cast %35 : vector<1x384x128xf32> to vector<384x128xf32>
    %cst_44 = arith.constant dense<0.000000e+00> : vector<512x128xf32>
    %37 = tpu.matmul %34, %36, %cst_44 {dimension_numbers = #tpu.dot_dimension_numbers<[1], [0], [0], [1], [0, 0, 1, 1], [], []>} : vector<512x384xf32>, vector<384x128xf32>, vector<512x128xf32> -> vector<512x128xf32>
    %38 = arith.addf %28, %37 : vector<512x128xf32>
    %c0_45 = arith.constant 0 : index
    %c2 = arith.constant 2 : index
    %c0_46 = arith.constant 0 : index
    %c0_47 = arith.constant 0 : index
    %39 = vector.load %arg6[%c0_45, %c2, %c0_46, %c0_47] : memref<2x18x18x128xf32, #tpu.memory_space<vmem>>, vector<2x16x18x128xf32>
    %40 = vector.extract_strided_slice %39 {offsets = [0, 0, 0, 0], sizes = [2, 16, 16, 128], strides = [1, 1, 1, 1]} : vector<2x16x18x128xf32> to vector<2x16x16x128xf32>
    %41 = vector.extract_strided_slice %39 {offsets = [0, 0, 1, 0], sizes = [2, 16, 16, 128], strides = [1, 1, 1, 1]} : vector<2x16x18x128xf32> to vector<2x16x16x128xf32>
    %42 = vector.extract_strided_slice %39 {offsets = [0, 0, 2, 0], sizes = [2, 16, 16, 128], strides = [1, 1, 1, 1]} : vector<2x16x18x128xf32> to vector<2x16x16x128xf32>
    %43 = tpu.concatenate %40, %41, %42 in 3 : vector<2x16x16x128xf32>, vector<2x16x16x128xf32>, vector<2x16x16x128xf32> -> vector<2x16x16x384xf32>
    %44 = vector.shape_cast %43 : vector<2x16x16x384xf32> to vector<512x384xf32>
    %c2_48 = arith.constant 2 : index
    %c0_49 = arith.constant 0 : index
    %c0_50 = arith.constant 0 : index
    %45 = vector.load %arg2[%c2_48, %c0_49, %c0_50] : memref<3x384x128xf32, #tpu.memory_space<vmem>>, vector<1x384x128xf32>
    %46 = vector.shape_cast %45 : vector<1x384x128xf32> to vector<384x128xf32>
    %cst_51 = arith.constant dense<0.000000e+00> : vector<512x128xf32>
    %47 = tpu.matmul %44, %46, %cst_51 {dimension_numbers = #tpu.dot_dimension_numbers<[1], [0], [0], [1], [0, 0, 1, 1], [], []>} : vector<512x384xf32>, vector<384x128xf32>, vector<512x128xf32> -> vector<512x128xf32>
    %48 = arith.addf %38, %47 : vector<512x128xf32>
    %49 = vector.shape_cast %48 : vector<512x128xf32> to vector<2x16x16x128xf32>
    %c0_52 = arith.constant 0 : index
    %c0_53 = arith.constant 0 : index
    %c0_54 = arith.constant 0 : index
    %c0_55 = arith.constant 0 : index
    %50 = vector.load %arg5[%c0_52, %c0_53, %c0_54, %c0_55] : memref<2x16x16x128xf32, #tpu.memory_space<vmem>>, vector<2x16x16x128xf32>
    tpu.vector_store %arg5[%c0_52, %c0_53, %c0_54, %c0_55], %49 {strides = array<i32>} : memref<2x16x16x128xf32, #tpu.memory_space<vmem>>, vector<2x16x16x128xf32>,
    return
  }
  func.func @transform_0(%arg0: i32) -> (i32, i32, i32, i32) {
    %c0_i32 = arith.constant 0 : i32
    %c0_i32_0 = arith.constant 0 : i32
    %c0_i32_1 = arith.constant 0 : i32
    %c0_i32_2 = arith.constant 0 : i32
    return %arg0, %c0_i32, %c0_i32_0, %c0_i32_1 : i32, i32, i32, i32
  }
  func.func @transform_1(%arg0: i32) -> (i32, i32, i32) {
    %c0_i32 = arith.constant 0 : i32
    %c0_i32_0 = arith.constant 0 : i32
    %c0_i32_1 = arith.constant 0 : i32
    %c0_i32_2 = arith.constant 0 : i32
    return %c0_i32, %c0_i32_0, %c0_i32_1 : i32, i32, i32
  }
  func.func @transform_2(%arg0: i32) -> (i32, i32) {
    %c0_i32 = arith.constant 0 : i32
    %c0_i32_0 = arith.constant 0 : i32
    %c0_i32_1 = arith.constant 0 : i32
    return %c0_i32, %c0_i32_0 : i32, i32
  }
  func.func @transform_3(%arg0: i32) -> (i32, i32) {
    %c0_i32 = arith.constant 0 : i32
    %c0_i32_0 = arith.constant 0 : i32
    %c0_i32_1 = arith.constant 0 : i32
    return %c0_i32, %c0_i32_0 : i32, i32
  }
  func.func @transform_4(%arg0: i32) -> (i32, i32, i32, i32) {
    %c0_i32 = arith.constant 0 : i32
    %c0_i32_0 = arith.constant 0 : i32
    %c0_i32_1 = arith.constant 0 : i32
    %c0_i32_2 = arith.constant 0 : i32
    return %arg0, %c0_i32, %c0_i32_0, %c0_i32_1 : i32, i32, i32, i32
  }
}

</mosaic_0001>

<bundles_post_ra>
// kernel: bottleneck_forward.3
= control target key start
LH: loop header
LB: loop body
LE: loop exit
PB: predicated region body
PF: predicated region fallthrough
CT: control target
= control target key end

     0   :  { %vm72_vm0 = vcmask 31744   ;;  %vm403_vm1 = vcmask 1040384   ;;  %vm405_vm2 = vcmask 25600   ;;  %s1276_s0 = inlined_call_operand.vmem [shape: f32[2,16,16,4], index: 0, kind: input, shape index: {}]   ;;  %s1277_s1 = inlined_call_operand.vmem [shape: f32[1,2,4], index: 1, kind: output, shape index: {}]  }
   0x1   :  { %v424_v0 = vld [vmem:[%s1276_s0] sm:$0xff]  ;;  %v429_v1 = vld [vmem:[%s1276_s0 + $0x8] sm:$0xff]  ;;  %v434_v2 = vld [vmem:[%s1276_s0 + $0x10] sm:$0xff] }
   0x2   :  { %v73_v3 = vsel %vm72_vm0, %v424_v0, 0.0  ;;  %v74_v4 = vsel %vm72_vm0, %v429_v1, 0.0  ;;  %v76_v5 = vsel %vm72_vm0, %v434_v2, 0.0  ;;  %v445_v6 = vld [vmem:[%s1276_s0 + $0x18] sm:$0xff]  ;;  %v452_v9 = vld [vmem:[%s1276_s0 + $0x20] sm:$0xff]  ;;  %v459_v12 = vld [vmem:[%s1276_s0 + $0x28] sm:$0xff] }
   0x3   :  { %v75_v7 = vadd.f32 %v74_v4, %v73_v3  ;;  %v78_v8 = vsel %vm72_vm0, %v445_v6, 0.0  ;;  %v80_v11 = vsel %vm72_vm0, %v452_v9, 0.0  ;;  %v82_v14 = vsel %vm72_vm0, %v459_v12, 0.0  ;;  %v466_v15 = vld [vmem:[%s1276_s0 + $0x30] sm:$0xff]  ;;  %v471_v17 = vld [vmem:[%s1276_s0 + $0x38] sm:$0xff]  ;;  %v476_v18 = vld [vmem:[%s1276_s0 + $0x40] sm:$0xff] }
   0x4   :  { %v84_v19 = vsel %vm72_vm0, %v466_v15, 0.0  ;;  %v483_v20 = vld [vmem:[%s1276_s0 + $0x48] sm:$0xff]  ;;  %v488_v21 = vld [vmem:[%s1276_s0 + $0x50] sm:$0xff]  ;;  %v493_v22 = vld [vmem:[%s1276_s0 + $0x58] sm:$0xff]  ;;  %v86_v24 = vsel %vm72_vm0, %v471_v17, 0.0  ;;  %v88_v25 = vsel %vm72_vm0, %v476_v18, 0.0 }
   0x5   :  { %v77_v10 = vadd.f32 %v76_v5, %v75_v7  ;;  %v502_v26 = vld [vmem:[%s1276_s0 + $0x108] sm:$0xff]  ;;  %v507_v27 = vld [vmem:[%s1276_s0 + $0x110] sm:$0xff]  ;;  %v512_v28 = vld [vmem:[%s1276_s0 + $0x118] sm:$0xff]  ;;  %v90_v29 = vsel %vm72_vm0, %v483_v20, 0.0  ;;  %v92_v30 = vsel %vm72_vm0, %v488_v21, 0.0  ;;  %v520_v31 = vsel %vm72_vm0, %v493_v22, 0.0 }
   0x6   :  { %v525_v32 = vld [vmem:[%s1276_s0 + $0x120] sm:$0xff]  ;;  %v530_v33 = vld [vmem:[%s1276_s0 + $0x128] sm:$0xff]  ;;  %v535_v34 = vld [vmem:[%s1276_s0 + $0x130] sm:$0xff]  ;;  %v539_v36 = vsel %vm72_vm0, %v502_v26, 0.0  ;;  %v543_v37 = vsel %vm72_vm0, %v507_v27, 0.0  ;;  %v547_v38 = vsel %vm72_vm0, %v512_v28, 0.0 }
   0x7   :  { %v79_v13 = vadd.f32 %v78_v8, %v77_v10  ;;  %1296 = vst [vmem:[#allocation2_spill] sm:$0xff] %v539_v36  ;;  %1297 = vst [vmem:[#allocation3_spill] sm:$0xff] %v543_v37  ;;  %v552_v39 = vld [vmem:[%s1276_s0 + $0x138] sm:$0xff]  ;;  %v557_v40 = vld [vmem:[%s1276_s0 + $0x140] sm:$0xff]  ;;  %v566_v42 = vsel %vm72_vm0, %v525_v32, 0.0  ;;  %v570_v43 = vsel %vm72_vm0, %v530_v33, 0.0  ;;  %v208_v36 = vmul.f32 %v434_v2, %v434_v2 }
   0x8   :  { %1298 = vst [vmem:[#allocation4_spill] sm:$0xff] %v547_v38  ;;  %v562_v41 = vld [vmem:[%s1276_s0 + $0x148] sm:$0xff]  ;;  %1299 = vst [vmem:[#allocation5_spill] sm:$0xff] %v566_v42  ;;  %v574_v44 = vsel %vm72_vm0, %v535_v34, 0.0  ;;  %v579_v45 = vld [vmem:[%s1276_s0 + $0x150] sm:$0xff]  ;;  %v593_v49 = vsel %vm72_vm0, %v552_v39, 0.0 }
   0x9   :  { %v81_v16 = vadd.f32 %v80_v11, %v79_v13  ;;  %1300 = vst [vmem:[#allocation6_spill] sm:$0xff] %v570_v43  ;;  %1301 = vst [vmem:[#allocation7_spill] sm:$0xff] %v574_v44  ;;  %v584_v46 = vld [vmem:[%s1276_s0 + $0x158] sm:$0xff]  ;;  %v589_v47 = vld [vmem:[%s1276_s0 + $0x160] sm:$0xff]  ;;  %v597_v50 = vsel %vm72_vm0, %v557_v40, 0.0  ;;  %v601_v51 = vsel %vm72_vm0, %v562_v41, 0.0 }
   0xa   :  { %1302 = vst [vmem:[#allocation8_spill] sm:$0xff] %v593_v49  ;;  %1303 = vst [vmem:[#allocation9_spill] sm:$0xff] %v597_v50  ;;  %v606_v52 = vld [vmem:[%s1276_s0 + $0x168] sm:$0xff]  ;;  %v611_v53 = vld [vmem:[%s1276_s0 + $0x170] sm:$0xff]  ;;  %v620_v55 = vsel %vm72_vm0, %v579_v45, 0.0  ;;  %v624_v56 = vsel %vm72_vm0, %v584_v46, 0.0 }
   0xb   :  { %v83_v23 = vadd.f32 %v82_v14, %v81_v16  ;;  %1304 = vst [vmem:[#allocation10_spill] sm:$0xff] %v601_v51  ;;  %v616_v54 = vld [vmem:[%s1276_s0 + $0x178] sm:$0xff]  ;;  %1305 = vst [vmem:[#allocation11_spill] sm:$0xff] %v620_v55  ;;  %v628_v57 = vsel %vm72_vm0, %v589_v47, 0.0  ;;  %v633_v58 = vld [vmem:[%s1276_s0 + $0x180] sm:$0xff]  ;;  %v647_v62 = vsel %vm72_vm0, %v606_v52, 0.0 }
   0xc   :  { %1306 = vst [vmem:[#allocation12_spill] sm:$0xff] %v624_v56  ;;  %1307 = vst [vmem:[#allocation13_spill] sm:$0xff] %v628_v57  ;;  %v638_v59 = vld [vmem:[%s1276_s0 + $0x188] sm:$0xff]  ;;  %v643_v60 = vld [vmem:[%s1276_s0 + $0x190] sm:$0xff]  ;;  %v651_v63 = vsel %vm72_vm0, %v611_v53, 0.0  ;;  %v655_v3 = vsel %vm72_vm0, %v616_v54, 0.0 }
   0xd   :  { %v85_v35 = vadd.f32 %v84_v19, %v83_v23  ;;  %1308 = vst [vmem:[#allocation14_spill] sm:$0xff] %v647_v62  ;;  %1309 = vst [vmem:[#allocation15_spill] sm:$0xff] %v651_v63  ;;  %v660_v4 = vld [vmem:[%s1276_s0 + $0x198] sm:$0xff]  ;;  %v665_v5 = vld [vmem:[%s1276_s0 + $0x1a0] sm:$0xff]  ;;  %v674_v8 = vsel %vm72_vm0, %v633_v58, 0.0  ;;  %v678_v10 = vsel %vm72_vm0, %v638_v59, 0.0 }
   0xe   :  { %1310 = vst [vmem:[#allocation16_spill] sm:$0xff] %v655_v3  ;;  %v670_v7 = vld [vmem:[%s1276_s0 + $0x1a8] sm:$0xff]  ;;  %1311 = vst [vmem:[#allocation17_spill] sm:$0xff] %v674_v8  ;;  %v682_v11 = vsel %vm72_vm0, %v643_v60, 0.0  ;;  %v687_v13 = vld [vmem:[%s1276_s0 + $0x60] sm:$0xff] }
   0xf   :  { %v87_v48 = vadd.f32 %v86_v24, %v85_v35  ;;  %1312 = vst [vmem:[#allocation18_spill] sm:$0xff] %v678_v10  ;;  %1313 = vst [vmem:[#allocation19_spill] sm:$0xff] %v682_v11  ;;  %v692_v14 = vld [vmem:[%s1276_s0 + $0x1b0] sm:$0xff]  ;;  %v697_v16 = vld [vmem:[%s1276_s0 + $0x1b8] sm:$0xff]  ;;  %v706_v24 = vsel %vm72_vm0, %v660_v4, 0.0  ;;  %v714_v35 = vsel %vm72_vm0, %v670_v7, 0.0 }
  0x10   :  { %v702_v19 = vld [vmem:[%s1276_s0 + $0x1c0] sm:$0xff]  ;;  %1314 = vst [vmem:[#allocation20_spill] sm:$0xff] %v706_v24  ;;  %1316 = vst [vmem:[#allocation22_spill] sm:$0xff] %v714_v35  ;;  %v737_v35 = vsel %vm72_vm0, %v697_v16, 0.0  ;;  %v751_v10 = vld [vmem:[%s1276_s0 + $0x1e8] sm:$0xff] }
  0x11   :  { %v89_v61 = vadd.f32 %v88_v25, %v87_v48  ;;  %v710_v25 = vsel %vm72_vm0, %v665_v5, 0.0  ;;  %v719_v48 = vld [vmem:[%s1276_s0 + $0x1c8] sm:$0xff]  ;;  %1318 = vst [vmem:[#allocation24_spill] sm:$0xff] %v737_v35  ;;  %v741_v24 = vsel %vm72_vm0, %v702_v19, 0.0  ;;  %v746_v11 = vld [vmem:[%s1276_s0 + $0x1e0] sm:$0xff]  ;;  %v773_v63 = vld [vmem:[%s1276_s0 + $0x1f8] sm:$0xff] }
  0x12   :  { %1315 = vst [vmem:[#allocation21_spill] sm:$0xff] %v710_v25  ;;  %v733_v25 = vsel %vm72_vm0, %v692_v14, 0.0  ;;  %1319 = vst [vmem:[#allocation25_spill] sm:$0xff] %v741_v24  ;;  %v760_v8 = vsel %vm72_vm0, %v719_v48, 0.0  ;;  %v795_v57 = vsel %vm72_vm0, %v773_v63, 0.0  ;;  %v824_v55 = vld [vmem:[%s1276_s0 + $0x90] sm:$0xff] }
  0x13   :  { %v91_v23 = vadd.f32 %v90_v29, %v89_v61  ;;  %v724_v29 = vld [vmem:[%s1276_s0 + $0x1d0] sm:$0xff]  ;;  %v729_v61 = vld [vmem:[%s1276_s0 + $0x1d8] sm:$0xff]  ;;  %1317 = vst [vmem:[#allocation23_spill] sm:$0xff] %v733_v25  ;;  %1321 = vst [vmem:[#allocation27_spill] sm:$0xff] %v760_v8  ;;  %v783_v8 = vsel %vm72_vm0, %v751_v10, 0.0 }
  0x14   :  { %v756_v25 = vld [vmem:[%s1276_s0 + $0x1f0] sm:$0xff]  ;;  %v764_v24 = vsel %vm72_vm0, %v724_v29, 0.0  ;;  %v768_v3 = vsel %vm72_vm0, %v729_v61, 0.0  ;;  %1324 = vst [vmem:[#allocation30_spill] sm:$0xff] %v773_v63  ;;  %1326 = vst [vmem:[#allocation32_spill] sm:$0xff] %v783_v8  ;;  %v829_v51 = vld [vmem:[%s1276_s0 + $0x98] sm:$0xff] }
  0x15   :  { %1320 = vst [vmem:[#allocation26_spill] sm:$0xff] %v756_v25  ;;  %v93_v35 = vadd.f32 %v92_v30, %v91_v23  ;;  %1322 = vst [vmem:[#allocation28_spill] sm:$0xff] %v764_v24  ;;  %v96_v30 = vsel %vm72_vm0, %v687_v13, 0.0  ;;  %v779_v23 = vsel %vm72_vm0, %v746_v11, 0.0  ;;  %v787_v24 = vsel %vm72_vm0, %v756_v25, 0.0  ;;  %v22_v8 = vld [vmem:[%s1276_s0 + $0x70] sm:$0xff] }
  0x16   :  { %1323 = vst [vmem:[#allocation29_spill] sm:$0xff] %v768_v3  ;;  %1325 = vst [vmem:[#allocation31_spill] sm:$0xff] %v779_v23  ;;  %v21_v3 = vld [vmem:[%s1276_s0 + $0x68] sm:$0xff]  ;;  %v834_v50 = vld [vmem:[%s1276_s0 + $0xa0] sm:$0xff]  ;;  %v110_v38 = vsel %vm72_vm0, %v829_v51, 0.0 }
  0x17   :  { %1327 = vst [vmem:[#allocation33_spill] sm:$0xff] %v787_v24  ;;  %v95_v62 = vadd.f32 %v520_v31, %v93_v35  ;;  %1328 = vst [vmem:[#allocation34_spill] sm:$0xff] %v795_v57  ;;  %v98_v23 = vsel %vm72_vm0, %v21_v3, 0.0  ;;  %v804_v24 = vld [vmem:[%s1276_s0 + $0x78] sm:$0xff]  ;;  %v809_v31 = vld [vmem:[%s1276_s0 + $0x80] sm:$0xff]  ;;  %v100_v57 = vsel %vm72_vm0, %v22_v8, 0.0 }
  0x18   :  { %1329 = vst [vmem:[#allocation35_spill] sm:$0xff] %v804_v24  ;;  %1330 = vst [vmem:[#allocation36_spill] sm:$0xff] %v809_v31  ;;  %v814_v35 = vld [vmem:[%s1276_s0 + $0x88] sm:$0xff]  ;;  %v850_v42 = vld [vmem:[%s1276_s0 + $0xb0] sm:$0xff]  ;;  %v112_v37 = vsel %vm72_vm0, %v834_v50, 0.0 }
  0x19   :  { %v97_v56 = vadd.f32 %v96_v30, %v95_v62  ;;  %1331 = vst [vmem:[#allocation37_spill] sm:$0xff] %v814_v35  ;;  %v206_v62 = vmul.f32 %v424_v0, %v424_v0  ;;  %v207_v30 = vmul.f32 %v429_v1, %v429_v1  ;;  %1332 = vst [vmem:[#allocation38_spill] sm:$0xff] %v824_v55  ;;  %v102_v0 = vsel %vm72_vm0, %v804_v24, 0.0  ;;  %v845_v43 = vld [vmem:[%s1276_s0 + $0xa8] sm:$0xff]  ;;  %v891_v63 = vld [vmem:[%s1276_s0 + $0xd8] sm:$0xff] }
  0x1a   :  { %1333 = vst [vmem:[#allocation39_spill] sm:$0xff] %v829_v51  ;;  %1334 = vst [vmem:[#allocation40_spill] sm:$0xff] %v834_v50  ;;  %v104_v1 = vsel %vm72_vm0, %v809_v31, 0.0  ;;  %v106_v44 = vsel %vm72_vm0, %v814_v35, 0.0  ;;  %v868_v35 = vld [vmem:[%s1276_s0 + $0xc0] sm:$0xff]  ;;  %v873_v31 = vld [vmem:[%s1276_s0 + $0xc8] sm:$0xff]  ;;  %v209_v24 = vmul.f32 %v445_v6, %v445_v6 }
  0x1b   :  { %v99_v49 = vadd.f32 %v98_v23, %v97_v56  ;;  %1335 = vst [vmem:[#allocation41_spill] sm:$0xff] %v845_v43  ;;  %1336 = vst [vmem:[#allocation42_spill] sm:$0xff] %v850_v42  ;;  %v855_v56 = vld [vmem:[%s1276_s0 + $0xb8] sm:$0xff]  ;;  %v108_v23 = vsel %vm72_vm0, %v824_v55, 0.0  ;;  %v878_v51 = vld [vmem:[%s1276_s0 + $0xd0] sm:$0xff]  ;;  %v114_v50 = vsel %vm72_vm0, %v845_v43, 0.0 }
  0x1c   :  { %1337 = vst [vmem:[#allocation43_spill] sm:$0xff] %v855_v56  ;;  %1338 = vst [vmem:[#allocation44_spill] sm:$0xff] %v868_v35  ;;  %v884_v2 = vsel %vm72_vm0, %v850_v42, 0.0  ;;  %v896_v25 = vld [vmem:[%s1276_s0 + $0xe0] sm:$0xff]  ;;  %v908_v6 = vsel %vm72_vm0, %v873_v31, 0.0  ;;  %v912_v42 = vsel %vm72_vm0, %v878_v51, 0.0 }
  0x1d   :  { %1339 = vst [vmem:[#allocation45_spill] sm:$0xff] %v873_v31  ;;  %1340 = vst [vmem:[#allocation46_spill] sm:$0xff] %v878_v51  ;;  %v101_v55 = vadd.f32 %v100_v57, %v99_v49  ;;  %v900_v49 = vsel %vm72_vm0, %v855_v56, 0.0  ;;  %v904_v57 = vsel %vm72_vm0, %v868_v35, 0.0  ;;  %v917_v43 = vld [vmem:[%s1276_s0 + $0xe8] sm:$0xff]  ;;  %v922_v56 = vld [vmem:[%s1276_s0 + $0xf0] sm:$0xff]  ;;  %v210_v51 = vmul.f32 %v452_v9, %v452_v9 }
  0x1e   :  { %1341 = vst [vmem:[#allocation47_spill] sm:$0xff] %v891_v63  ;;  %1342 = vst [vmem:[#allocation48_spill] sm:$0xff] %v896_v25  ;;  %v930_v31 = vsel %vm72_vm0, %v896_v25, 0.0  ;;  %v213_v25 = vmul.f32 %v471_v17, %v471_v17  ;;  %v214_v9 = vmul.f32 %v476_v18, %v476_v18  ;;  %v239_v17 = vmul.f32 %v502_v26, %v502_v26 }
  0x1f   :  { %1343 = vst [vmem:[#allocation49_spill] sm:$0xff] %v904_v57  ;;  %1344 = vst [vmem:[#allocation50_spill] sm:$0xff] %v908_v6  ;;  %v103_v35 = vadd.f32 %v102_v0, %v101_v55  ;;  %v926_v57 = vsel %vm72_vm0, %v891_v63, 0.0  ;;  %v940_v6 = vsel %vm72_vm0, %v922_v56, 0.0  ;;  %v211_v55 = vmul.f32 %v459_v12, %v459_v12 }
  0x20   :  { %1345 = vst [vmem:[#allocation51_spill] sm:$0xff] %v912_v42  ;;  %1346 = vst [vmem:[#allocation52_spill] sm:$0xff] %v917_v43  ;;  %v936_v42 = vsel %vm72_vm0, %v917_v43, 0.0  ;;  %v212_v0 = vmul.f32 %v466_v15, %v466_v15  ;;  %v215_v43 = vmul.f32 %v483_v20, %v483_v20  ;;  %v218_v12 = vmul.f32 %v687_v13, %v687_v13 }
  0x21   :  { %1347 = vst [vmem:[#allocation53_spill] sm:$0xff] %v922_v56  ;;  %1348 = vst [vmem:[#allocation54_spill] sm:$0xff] %v940_v6  ;;  %v105_v63 = vadd.f32 %v104_v1, %v103_v35  ;;  %v216_v56 = vmul.f32 %v488_v21, %v488_v21  ;;  %v217_v6 = vmul.f32 %v493_v22, %v493_v22 }
  0x22   :  { %v958_v15 = vmul.f32 %v21_v3, %v21_v3  ;;  %v960_v1 = vmul.f32 %v22_v8, %v22_v8  ;;  %v240_v18 = vmul.f32 %v507_v27, %v507_v27  ;;  %v241_v20 = vmul.f32 %v512_v28, %v512_v28 }
  0x23   :  { %v107_v35 = vadd.f32 %v106_v44, %v105_v63  ;;  %v242_v21 = vmul.f32 %v525_v32, %v525_v32  ;;  %v243_v22 = vmul.f32 %v530_v33, %v530_v33  ;;  %v244_v44 = vmul.f32 %v535_v34, %v535_v34 }
  0x24   :  { %v245_v3 = vmul.f32 %v552_v39, %v552_v39  ;;  %v246_v26 = vmul.f32 %v557_v40, %v557_v40  ;;  %v247_v27 = vmul.f32 %v562_v41, %v562_v41  ;;  %v248_v28 = vmul.f32 %v579_v45, %v579_v45 }
  0x25   :  { %v109_v63 = vadd.f32 %v108_v23, %v107_v35  ;;  %v249_v32 = vmul.f32 %v584_v46, %v584_v46  ;;  %v270_v33 = vsel %vm72_vm0, %v206_v62, 0.0  ;;  %v271_v34 = vsel %vm72_vm0, %v207_v30, 0.0 }
  0x26   :  { %v250_v39 = vmul.f32 %v589_v47, %v589_v47  ;;  %v272_v13 = vadd.f32 %v271_v34, %v270_v33  ;;  %v273_v40 = vsel %vm72_vm0, %v208_v36, 0.0  ;;  %v251_v41 = vmul.f32 %v606_v52, %v606_v52  ;;  %v1350_v33 = vld [vmem:[#allocation30_spill] sm:$0xff] }
  0x27   :  { %v111_v8 = vadd.f32 %v110_v38, %v109_v63  ;;  %v252_v45 = vmul.f32 %v611_v53, %v611_v53  ;;  %v253_v46 = vmul.f32 %v616_v54, %v616_v54  ;;  %v275_v62 = vsel %vm72_vm0, %v209_v24, 0.0  ;;  %v1349_v63 = vld [vmem:[#allocation26_spill] sm:$0xff] }
  0x28   :  { %v254_v38 = vmul.f32 %v633_v58, %v633_v58  ;;  %v255_v47 = vmul.f32 %v638_v59, %v638_v59  ;;  %v274_v30 = vadd.f32 %v273_v40, %v272_v13  ;;  %v256_v36 = vmul.f32 %v643_v60, %v643_v60  ;;  %v1351_v40 = vld [vmem:[#allocation49_spill] sm:$0xff] }
  0x29   :  { %v113_v23 = vadd.f32 %v112_v37, %v111_v8  ;;  %v257_v52 = vmul.f32 %v660_v4, %v660_v4  ;;  %v258_v53 = vmul.f32 %v665_v5, %v665_v5  ;;  %v277_v54 = vsel %vm72_vm0, %v210_v51, 0.0 }
  0x2a   :  { %v259_v37 = vmul.f32 %v670_v7, %v670_v7  ;;  %v260_v58 = vmul.f32 %v692_v14, %v692_v14  ;;  %v276_v59 = vadd.f32 %v275_v62, %v274_v30  ;;  %v261_v35 = vmul.f32 %v697_v16, %v697_v16 }
  0x2b   :  { %v115_v24 = vadd.f32 %v114_v50, %v113_v23  ;;  %v262_v60 = vmul.f32 %v702_v19, %v702_v19  ;;  %v263_v4 = vmul.f32 %v719_v48, %v719_v48  ;;  %v279_v5 = vsel %vm72_vm0, %v211_v55, 0.0 }
  0x2c   :  { %v264_v51 = vmul.f32 %v724_v29, %v724_v29  ;;  %v265_v7 = vmul.f32 %v729_v61, %v729_v61  ;;  %v278_v14 = vadd.f32 %v277_v54, %v276_v59  ;;  %v266_v16 = vmul.f32 %v746_v11, %v746_v11 }
  0x2d   :  { %v117_v50 = vadd.f32 %v884_v2, %v115_v24  ;;  %v267_v19 = vmul.f32 %v751_v10, %v751_v10  ;;  %v268_v48 = vmul.f32 %v1349_v63, %v1349_v63  ;;  %v281_v55 = vsel %vm72_vm0, %v212_v0, 0.0  ;;  %v1353_v24 = vld [vmem:[#allocation51_spill] sm:$0xff] }
  0x2e   :  { %v269_v29 = vmul.f32 %v1350_v33, %v1350_v33  ;;  %v280_v34 = vadd.f32 %v279_v5, %v278_v14  ;;  %v283_v61 = vsel %vm72_vm0, %v213_v25, 0.0  ;;  %v285_v8 = vsel %vm72_vm0, %v214_v9, 0.0  ;;  %v1355_v33 = vld [vmem:[#allocation54_spill] sm:$0xff] }
  0x2f   :  { %v119_v2 = vadd.f32 %v900_v49, %v117_v50  ;;  %v287_v11 = vsel %vm72_vm0, %v215_v43, 0.0  ;;  %v289_v13 = vsel %vm72_vm0, %v216_v56, 0.0  ;;  %v291_v10 = vsel %vm72_vm0, %v217_v6, 0.0  ;;  %v1352_v6 = vld [vmem:[#allocation50_spill] sm:$0xff] }
  0x30   :  { %v282_v23 = vadd.f32 %v281_v55, %v280_v34  ;;  %v293_v0 = vsel %vm72_vm0, %v218_v12, 0.0  ;;  %v1041_v49 = vsel %vm72_vm0, %v239_v17, 0.0  ;;  %v1044_v30 = vsel %vm72_vm0, %v240_v18, 0.0  ;;  %v1354_v55 = vld [vmem:[#allocation35_spill] sm:$0xff] }
  0x31   :  { %v121_v62 = vadd.f32 %v1351_v40, %v119_v2  ;;  %v1047_v25 = vsel %vm72_vm0, %v241_v20, 0.0  ;;  %v1050_v43 = vsel %vm72_vm0, %v242_v21, 0.0  ;;  %v1053_v56 = vsel %vm72_vm0, %v243_v22, 0.0 }
  0x32   :  { %v284_v54 = vadd.f32 %v283_v61, %v282_v23  ;;  %v1057_v12 = vsel %vm72_vm0, %v244_v44, 0.0  ;;  %v1060_v17 = vsel %vm72_vm0, %v245_v3, 0.0  ;;  %v1063_v18 = vsel %vm72_vm0, %v246_v26, 0.0  ;;  %v1356_v61 = vld [vmem:[#allocation36_spill] sm:$0xff] }
  0x33   :  { %v123_v9 = vadd.f32 %v1352_v6, %v121_v62  ;;  %v1066_v20 = vsel %vm72_vm0, %v247_v27, 0.0  ;;  %v1069_v21 = vsel %vm72_vm0, %v248_v28, 0.0  ;;  %v1072_v22 = vsel %vm72_vm0, %v249_v32, 0.0 }
  0x34   :  { %v286_v5 = vadd.f32 %v285_v8, %v284_v54  ;;  %v1076_v44 = vsel %vm72_vm0, %v250_v39, 0.0  ;;  %v1079_v3 = vsel %vm72_vm0, %v251_v41, 0.0  ;;  %v1082_v26 = vsel %vm72_vm0, %v252_v45, 0.0 }
  0x35   :  { %v125_v59 = vadd.f32 %v1353_v24, %v123_v9  ;;  %v1085_v27 = vsel %vm72_vm0, %v253_v46, 0.0  ;;  %v1088_v28 = vsel %vm72_vm0, %v254_v38, 0.0  ;;  %v1091_v32 = vsel %vm72_vm0, %v255_v47, 0.0  ;;  %v1358_v9 = vld [vmem:[#allocation38_spill] sm:$0xff] }
  0x36   :  { %v288_v14 = vadd.f32 %v287_v11, %v286_v5  ;;  %v1095_v39 = vsel %vm72_vm0, %v256_v36, 0.0  ;;  %v1098_v41 = vsel %vm72_vm0, %v257_v52, 0.0  ;;  %v1101_v45 = vsel %vm72_vm0, %v258_v53, 0.0  ;;  %v1359_v24 = vld [vmem:[#allocation2_spill] sm:$0xff] }
  0x37   :  { %v127_v50 = vadd.f32 %v926_v57, %v125_v59  ;;  %v1104_v46 = vsel %vm72_vm0, %v259_v37, 0.0  ;;  %v1107_v38 = vsel %vm72_vm0, %v260_v58, 0.0  ;;  %v1110_v47 = vsel %vm72_vm0, %v261_v35, 0.0 }
  0x38   :  { %v290_v63 = vadd.f32 %v289_v13, %v288_v14  ;;  %v1114_v36 = vsel %vm72_vm0, %v262_v60, 0.0  ;;  %v1117_v52 = vsel %vm72_vm0, %v263_v4, 0.0  ;;  %v1120_v53 = vsel %vm72_vm0, %v264_v51, 0.0 }
  0x39   :  { %v129_v57 = vadd.f32 %v930_v31, %v127_v50  ;;  %v1123_v37 = vsel %vm72_vm0, %v265_v7, 0.0  ;;  %v1126_v58 = vsel %vm72_vm0, %v266_v16, 0.0  ;;  %v1129_v35 = vsel %vm72_vm0, %v267_v19, 0.0  ;;  %v1134_v31 = vld [vmem:[%s1276_s0 + $0xf8] sm:$0xff]  ;;  %v1360_v50 = vld [vmem:[#allocation39_spill] sm:$0xff] }
  0x3a   :  { %v292_v4 = vadd.f32 %v291_v10, %v290_v63  ;;  %v1138_v51 = vsel %vm72_vm0, %v268_v48, 0.0  ;;  %v1141_v7 = vsel %vm72_vm0, %v269_v29, 0.0  ;;  %v134_v16 = vsel %vm72_vm0, %v1134_v31, 0.0 }
  0x3b   :  { %v131_v60 = vadd.f32 %v936_v42, %v129_v57  ;;  %v221_v19 = vmul.f32 %v1354_v55, %v1354_v55  ;;  %v295_v2 = vsel %vm72_vm0, %v958_v15, 0.0  ;;  %v1152_v42 = vld [vmem:[%s1276_s0 + $0x100] sm:$0xff]  ;;  %v222_v8 = vmul.f32 %v1356_v61, %v1356_v61  ;;  %v1357_v15 = vld [vmem:[#allocation37_spill] sm:$0xff]  ;;  %v1361_v57 = vld [vmem:[#allocation3_spill] sm:$0xff] }
  0x3c   :  { %v294_v34 = vadd.f32 %v293_v0, %v292_v4  ;;  %v136_v29 = vsel %vm72_vm0, %v1152_v42, 0.0  ;;  %v297_v11 = vsel %vm72_vm0, %v960_v1, 0.0  ;;  %v223_v40 = vmul.f32 %v1357_v15, %v1357_v15  ;;  %v1362_v4 = vld [vmem:[#allocation40_spill] sm:$0xff]  ;;  %v1365_v61 = vld [vmem:[#allocation5_spill] sm:$0xff] }
  0x3d   :  { %v133_v48 = vadd.f32 %v1355_v33, %v131_v60  ;;  %v299_v62 = vsel %vm72_vm0, %v221_v19, 0.0  ;;  %v224_v0 = vmul.f32 %v1358_v9, %v1358_v9  ;;  %v301_v54 = vsel %vm72_vm0, %v222_v8, 0.0  ;;  %v1363_v19 = vld [vmem:[#allocation4_spill] sm:$0xff] }
  0x3e   :  { %v296_v10 = vadd.f32 %v295_v2, %v294_v34  ;;  %v225_v1 = vmul.f32 %v1360_v50, %v1360_v50  ;;  %v303_v14 = vsel %vm72_vm0, %v223_v40, 0.0  ;;  %v1367_v40 = vld [vmem:[#allocation6_spill] sm:$0xff] }
  0x3f   :  { %v135_v13 = vadd.f32 %v134_v16, %v133_v48  ;;  %v226_v16 = vmul.f32 %v1362_v4, %v1362_v4  ;;  %v305_v55 = vsel %vm72_vm0, %v224_v0, 0.0  ;;  %v1364_v48 = vld [vmem:[#allocation41_spill] sm:$0xff] }
  0x40   :  { %v298_v6 = vadd.f32 %v297_v11, %v296_v10  ;;  %v227_v34 = vmul.f32 %v1364_v48, %v1364_v48 }
  0x41   :  { %v137_v23 = vadd.f32 %v136_v29, %v135_v13  ;;  %v307_v29 = vsel %vm72_vm0, %v225_v1, 0.0  ;;  %v1366_v13 = vld [vmem:[#allocation42_spill] sm:$0xff]  ;;  %v309_v15 = vsel %vm72_vm0, %v226_v16, 0.0 }
  0x42   :  { %v300_v5 = vadd.f32 %v299_v62, %v298_v6  ;;  %v228_v10 = vmul.f32 %v1366_v13, %v1366_v13  ;;  %v1368_v6 = vld [vmem:[#allocation43_spill] sm:$0xff]  ;;  %v311_v0 = vsel %vm72_vm0, %v227_v34, 0.0 }
  0x43   :  { %v139_v59 = vadd.f32 %v1359_v24, %v137_v23  ;;  %v229_v9 = vmul.f32 %v1368_v6, %v1368_v6 }
  0x44   :  { %v302_v60 = vadd.f32 %v301_v54, %v300_v5  ;;  %v1369_v54 = vld [vmem:[#allocation7_spill] sm:$0xff]  ;;  %v1370_v5 = vld [vmem:[#allocation44_spill] sm:$0xff]  ;;  %v313_v1 = vsel %vm72_vm0, %v228_v10, 0.0 }
  0x45   :  { %v141_v63 = vadd.f32 %v1361_v57, %v139_v59  ;;  %v230_v50 = vmul.f32 %v1370_v5, %v1370_v5  ;;  %v315_v16 = vsel %vm72_vm0, %v229_v9, 0.0 }
  0x46   :  { %v304_v33 = vadd.f32 %v303_v14, %v302_v60  ;;  %v1371_v14 = vld [vmem:[#allocation8_spill] sm:$0xff]  ;;  %v1372_v60 = vld [vmem:[#allocation45_spill] sm:$0xff] }
  0x47   :  { %v143_v2 = vadd.f32 %v1363_v19, %v141_v63  ;;  %v231_v4 = vmul.f32 %v1372_v60, %v1372_v60  ;;  %v317_v34 = vsel %vm72_vm0, %v230_v50, 0.0 }
  0x48   :  { %v306_v11 = vadd.f32 %v305_v55, %v304_v33  ;;  %v1373_v55 = vld [vmem:[#allocation9_spill] sm:$0xff]  ;;  %v1374_v33 = vld [vmem:[#allocation46_spill] sm:$0xff] }
  0x49   :  { %v145_v8 = vadd.f32 %v1365_v61, %v143_v2  ;;  %v232_v48 = vmul.f32 %v1374_v33, %v1374_v33  ;;  %v319_v10 = vsel %vm72_vm0, %v231_v4, 0.0 }
  0x4a   :  { %v308_v23 = vadd.f32 %v307_v29, %v306_v11  ;;  %v1375_v29 = vld [vmem:[#allocation10_spill] sm:$0xff]  ;;  %v1376_v11 = vld [vmem:[#allocation47_spill] sm:$0xff] }
  0x4b   :  { %v147_v62 = vadd.f32 %v1367_v40, %v145_v8  ;;  %v233_v13 = vmul.f32 %v1376_v11, %v1376_v11  ;;  %v321_v9 = vsel %vm72_vm0, %v232_v48, 0.0  ;;  %v1384_v48 = vld [vmem:[#allocation15_spill] sm:$0xff]  ;;  %v1385_v11 = vld [vmem:[#allocation16_spill] sm:$0xff] }
  0x4c   :  { %v310_v59 = vadd.f32 %v309_v15, %v308_v23  ;;  %v1377_v15 = vld [vmem:[#allocation11_spill] sm:$0xff]  ;;  %v1378_v23 = vld [vmem:[#allocation48_spill] sm:$0xff] }
  0x4d   :  { %v149_v24 = vadd.f32 %v1369_v54, %v147_v62  ;;  %v234_v6 = vmul.f32 %v1378_v23, %v1378_v23  ;;  %v323_v50 = vsel %vm72_vm0, %v233_v13, 0.0 }
  0x4e   :  { %v312_v63 = vadd.f32 %v311_v0, %v310_v59  ;;  %v1379_v0 = vld [vmem:[#allocation12_spill] sm:$0xff] }
  0x4f   :  { %v151_v57 = vadd.f32 %v1371_v14, %v149_v24  ;;  %v1380_v59 = vld [vmem:[#allocation52_spill] sm:$0xff]  ;;  %v325_v4 = vsel %vm72_vm0, %v234_v6, 0.0  ;;  %v1387_v6 = vld [vmem:[#allocation18_spill] sm:$0xff] }
  0x50   :  { %v314_v2 = vadd.f32 %v313_v1, %v312_v63  ;;  %v235_v5 = vmul.f32 %v1380_v59, %v1380_v59  ;;  %v1381_v1 = vld [vmem:[#allocation13_spill] sm:$0xff] }
  0x51   :  { %v153_v19 = vadd.f32 %v1373_v55, %v151_v57  ;;  %v1382_v63 = vld [vmem:[#allocation53_spill] sm:$0xff] }
  0x52   :  { %v316_v8 = vadd.f32 %v315_v16, %v314_v2  ;;  %v236_v60 = vmul.f32 %v1382_v63, %v1382_v63  ;;  %v1383_v16 = vld [vmem:[#allocation14_spill] sm:$0xff]  ;;  %v237_v2 = vmul.f32 %v1134_v31, %v1134_v31  ;;  %v327_v33 = vsel %vm72_vm0, %v235_v5, 0.0  ;;  %v1389_v5 = vld [vmem:[#allocation20_spill] sm:$0xff] }
  0x53   :  { %v155_v61 = vadd.f32 %v1375_v29, %v153_v19  ;;  %v1391_v63 = vld [vmem:[#allocation22_spill] sm:$0xff] }
  0x54   :  { %v318_v62 = vadd.f32 %v317_v34, %v316_v8  ;;  %v329_v8 = vsel %vm72_vm0, %v236_v60, 0.0 }
  0x55   :  { %v157_v40 = vadd.f32 %v1377_v15, %v155_v61  ;;  %v238_v61 = vmul.f32 %v1152_v42, %v1152_v42  ;;  %v331_v15 = vsel %vm72_vm0, %v237_v2, 0.0  ;;  %v1393_v2 = vld [vmem:[#allocation24_spill] sm:$0xff] }
  0x56   :  { %v320_v24 = vadd.f32 %v319_v10, %v318_v62 }
  0x57   :  { %v159_v54 = vadd.f32 %v1379_v0, %v157_v40  ;;  %v1386_v40 = vld [vmem:[#allocation17_spill] sm:$0xff]  ;;  %v333_v31 = vsel %vm72_vm0, %v238_v61, 0.0  ;;  %v1395_v61 = vld [vmem:[#allocation27_spill] sm:$0xff] }
  0x58   :  { %v322_v57 = vadd.f32 %v321_v9, %v320_v24 }
  0x59   :  { %v161_v14 = vadd.f32 %v1381_v1, %v159_v54  ;;  %v1388_v54 = vld [vmem:[#allocation19_spill] sm:$0xff]  ;;  %v1390_v1 = vld [vmem:[#allocation21_spill] sm:$0xff] }
  0x5a   :  { %v324_v19 = vadd.f32 %v323_v50, %v322_v57 }
  0x5b   :  { %v163_v55 = vadd.f32 %v1383_v16, %v161_v14  ;;  %v1392_v16 = vld [vmem:[#allocation23_spill] sm:$0xff] }
  0x5c   :  { %v326_v29 = vadd.f32 %v325_v4, %v324_v19 }
  0x5d   :  { %v165_v34 = vadd.f32 %v1384_v48, %v163_v55 }
  0x5e   :  { %v328_v10 = vadd.f32 %v327_v33, %v326_v29 }
  0x5f   :  { %v167_v13 = vadd.f32 %v1385_v11, %v165_v34  ;;  %v1394_v34 = vld [vmem:[#allocation25_spill] sm:$0xff]  ;;  %v1396_v11 = vld [vmem:[#allocation28_spill] sm:$0xff] }
  0x60   :  { %v330_v23 = vadd.f32 %v329_v8, %v328_v10  ;;  %v1397_v10 = vld [vmem:[#allocation29_spill] sm:$0xff] }
  0x61   :  { %v169_v62 = vadd.f32 %v1386_v40, %v167_v13  ;;  %v1398_v40 = vld [vmem:[#allocation31_spill] sm:$0xff] }
  0x62   :  { %v332_v0 = vadd.f32 %v331_v15, %v330_v23  ;;  %v1399_v23 = vld [vmem:[#allocation32_spill] sm:$0xff] }
  0x63   :  { %v171_v9 = vadd.f32 %v1387_v6, %v169_v62  ;;  %v1400_v6 = vld [vmem:[#allocation33_spill] sm:$0xff] }
  0x64   :  { %v334_v59 = vadd.f32 %v333_v31, %v332_v0  ;;  %v1401_v0 = vld [vmem:[#allocation34_spill] sm:$0xff] }
  0x65   :  { %v173_v24 = vadd.f32 %v1388_v54, %v171_v9 }
  0x66   :  { %v336_v50 = vadd.f32 %v1041_v49, %v334_v59 }
  0x67   :  { %v175_v42 = vadd.f32 %v1389_v5, %v173_v24 }
  0x68   :  { %v338_v57 = vadd.f32 %v1044_v30, %v336_v50 }
  0x69   :  { %v177_v14 = vadd.f32 %v1390_v1, %v175_v42 }
  0x6a   :  { %v340_v4 = vadd.f32 %v1047_v25, %v338_v57 }
  0x6b   :  { %v179_v60 = vadd.f32 %v1391_v63, %v177_v14 }
  0x6c   :  { %v342_v19 = vadd.f32 %v1050_v43, %v340_v4 }
  0x6d   :  { %v181_v55 = vadd.f32 %v1392_v16, %v179_v60 }
  0x6e   :  { %v344_v48 = vadd.f32 %v1053_v56, %v342_v19 }
  0x6f   :  { %v183_v33 = vadd.f32 %v1393_v2, %v181_v55 }
  0x70   :  { %v346_v49 = vadd.f32 %v1057_v12, %v344_v48 }
  0x71   :  { %v185_v29 = vadd.f32 %v1394_v34, %v183_v33 }
  0x72   :  { %v348_v30 = vadd.f32 %v1060_v17, %v346_v49 }
  0x73   :  { %v187_v8 = vadd.f32 %v1395_v61, %v185_v29 }
  0x74   :  { %v350_v25 = vadd.f32 %v1063_v18, %v348_v30 }
  0x75   :  { %v189_v13 = vadd.f32 %v1396_v11, %v187_v8 }
  0x76   :  { %v352_v43 = vadd.f32 %v1066_v20, %v350_v25 }
  0x77   :  { %v191_v15 = vadd.f32 %v1397_v10, %v189_v13 }
  0x78   :  { %v354_v56 = vadd.f32 %v1069_v21, %v352_v43 }
  0x79   :  { %v193_v62 = vadd.f32 %v1398_v40, %v191_v15 }
  0x7a   :  { %v356_v12 = vadd.f32 %v1072_v22, %v354_v56 }
  0x7b   :  { %v195_v31 = vadd.f32 %v1399_v23, %v193_v62 }
  0x7c   :  { %v358_v17 = vadd.f32 %v1076_v44, %v356_v12 }
  0x7d   :  { %v197_v9 = vadd.f32 %v1400_v6, %v195_v31 }
  0x7e   :  { %v360_v18 = vadd.f32 %v1079_v3, %v358_v17 }
  0x7f   :  { %v199_v54 = vadd.f32 %v1401_v0, %v197_v9 }
  0x80   :  { %v362_v24 = vadd.f32 %v1082_v26, %v360_v18 }
  0x81   :  { %v200_v1 = vrot.slane %v199_v54, 4 }
  0x82   :  { %v364_v20 = vadd.f32 %v1085_v27, %v362_v24 }
  0x84   :  { %v366_v59 = vadd.f32 %v1088_v28, %v364_v20 }
  0x86   :  { %v368_v21 = vadd.f32 %v1091_v32, %v366_v59 }
  0x88   :  { %v370_v5 = vadd.f32 %v1095_v39, %v368_v21  ;;  %v201_v39 = vadd.f32 %v200_v1, %v199_v54 }
  0x8a   :  { %v372_v22 = vadd.f32 %v1098_v41, %v370_v5  ;;  %v202_v14 = vrot.slane %v201_v39, 2 }
  0x8c   :  { %v374_v42 = vadd.f32 %v1101_v45, %v372_v22 }
  0x8e   :  { %v376_v44 = vadd.f32 %v1104_v46, %v374_v42 }
  0x90   :  { %v378_v50 = vadd.f32 %v1107_v38, %v376_v44 }
  0x92   :  { %v380_v3 = vadd.f32 %v1110_v47, %v378_v50  ;;  %v203_v47 = vadd.f32 %v202_v14, %v201_v39 }
  0x94   :  { %v382_v26 = vadd.f32 %v1114_v36, %v380_v3  ;;  %v204_v63 = vrot.slane %v203_v47, 1 }
  0x96   :  { %v384_v27 = vadd.f32 %v1117_v52, %v382_v26  ;;  %v205_v4 = vadd.f32 %v204_v63, %v203_v47 }
  0x98   :  { %v386_v28 = vadd.f32 %v1120_v53, %v384_v27 }
  0x9a   :  { %v388_v32 = vadd.f32 %v1123_v37, %v386_v28 }
  0x9c   :  { %v390_v41 = vadd.f32 %v1126_v58, %v388_v32 }
  0x9e   :  { %v392_v45 = vadd.f32 %v1129_v35, %v390_v41 }
  0xa0   :  { %v394_v46 = vadd.f32 %v1138_v51, %v392_v45 }
  0xa2   :  { %v396_v38 = vadd.f32 %v1141_v7, %v394_v46 }
  0xa4   :  { %v397_v57 = vrot.slane %v396_v38, 4 }
  0xa6   :  { %v398_v36 = vadd.f32 %v397_v57, %v396_v38 }
  0xa8   :  { %v399_v52 = vrot.slane %v398_v36, 2 }
  0xaa   :  { %v400_v60 = vadd.f32 %v399_v52, %v398_v36 }
  0xac   :  { %v401_v53 = vrot.slane %v400_v60, 1 }
  0xae   :  { %v402_v37 = vadd.f32 %v401_v53, %v400_v60 }
  0xb0   :  { %v404_v16 = vsel %vm403_vm1, %v205_v4, %v402_v37 }
  0xb1   :  { %406 = vst.msk [vmem:[%s1277_s1] sm:$0x3] %vm405_vm2, %v404_v16 }

// kernel: bottleneck_forward.4
= control target key start
LH: loop header
LB: loop body
LE: loop exit
PB: predicated region body
PF: predicated region fallthrough
CT: control target
= control target key end

     0   :  { %vm483_vm0 = vcmask 1043456   ;;  %vm290_vm1 = vcmask 31744   ;;  %vm1074_vm2 = vcmask 1040384   ;;  %s2274_s1 = inlined_call_operand.vmem [shape: f32[4,128], index: 1, kind: input, shape index: {}]   ;;  %s2275_s0 = inlined_call_operand.vmem [shape: f32[2,16,16,4], index: 0, kind: input, shape index: {}]   ;;  %s2276_s2 = inlined_call_operand.vmem [shape: f32[1,4], index: 2, kind: input, shape index: {}]   ;;  %s2277_s3 = inlined_call_operand.vmem [shape: f32[1,4], index: 3, kind: input, shape index: {}]   ;;  %s2278_s4 = inlined_call_operand.vmem [shape: f32[2,16,16,128], index: 4, kind: output, shape index: {0}]   ;;  %s2279_s5 = inlined_call_operand.vmem [shape: f32[1,2,128], index: 5, kind: output, shape index: {1}]  }
   0x1   :  { %v289_v0 = vld [vmem:[%s2274_s1] sm:$0xf]  ;;  %v20_v5 = vld [vmem:[%s2275_s0 + $0x8] sm:$0xff]  ;;  %v21_v6 = vld [vmem:[%s2275_s0 + $0x10] sm:$0xff] }
   0x2   :  { %v19_v1 = vld [vmem:[%s2275_s0] sm:$0xff]  ;;  %1281 = vmatprep.subr.msk.mxu0 %vm483_vm0, %v289_v0  ;;  %1379 = vmatprep.subr.msk.mxu1 %vm483_vm0, %v289_v0  ;;  %v22_v9 = vld [vmem:[%s2275_s0 + $0x18] sm:$0xff]  ;;  %v24_v11 = vld [vmem:[%s2275_s0 + $0x28] sm:$0xff] }
   0x3   :  { %v1420_v2 = vld [vmem:[%s2276_s2] ss:$0 sm:$0xff]  ;;  %1282 = vmatpush3.msk.msra.mxu0 %vm483_vm0, %v289_v0  ;;  %1380 = vmatpush3.msk.msra.mxu1 %vm483_vm0, %v289_v0  ;;  %v25_v15 = vld [vmem:[%s2275_s0 + $0x30] sm:$0xff]  ;;  %v26_v19 = vld [vmem:[%s2275_s0 + $0x38] sm:$0xff] }
   0x4   :  { %v90_v3 = vmul.f32 %v1420_v2, %v19_v1  ;;  %v1427_v4 = vld [vmem:[%s2277_s3] ss:$0 sm:$0xff]  ;;  %v91_v7 = vmul.f32 %v1420_v2, %v20_v5  ;;  %v92_v8 = vmul.f32 %v1420_v2, %v21_v6  ;;  %v93_v13 = vmul.f32 %v1420_v2, %v22_v9  ;;  %v28_v33 = vld [vmem:[%s2275_s0 + $0x48] sm:$0xff]  ;;  %v29_v34 = vld [vmem:[%s2275_s0 + $0x50] sm:$0xff] }
   0x5   :  { %v23_v10 = vld [vmem:[%s2275_s0 + $0x20] sm:$0xff]  ;;  %v95_v18 = vmul.f32 %v1420_v2, %v24_v11  ;;  %v96_v23 = vmul.f32 %v1420_v2, %v25_v15  ;;  %v97_v27 = vmul.f32 %v1420_v2, %v26_v19  ;;  %v99_v37 = vmul.f32 %v1420_v2, %v28_v33  ;;  %v30_v41 = vld [vmem:[%s2275_s0 + $0x58] sm:$0xff]  ;;  %v32_v43 = vld [vmem:[%s2275_s0 + $0x68] sm:$0xff] }
   0x6   :  { %v161_v12 = vadd.f32 %v1427_v4, %v90_v3  ;;  %v94_v14 = vmul.f32 %v1420_v2, %v23_v10  ;;  %v162_v16 = vadd.f32 %v1427_v4, %v91_v7  ;;  %v163_v17 = vadd.f32 %v1427_v4, %v92_v8  ;;  %v27_v26 = vld [vmem:[%s2275_s0 + $0x40] sm:$0xff]  ;;  %v33_v44 = vld [vmem:[%s2275_s0 + $0x70] sm:$0xff]  ;;  %v34_v50 = vld [vmem:[%s2275_s0 + $0x78] sm:$0xff] }
   0x7   :  { %v164_v21 = vadd.f32 %v1427_v4, %v93_v13  ;;  %v166_v29 = vadd.f32 %v1427_v4, %v95_v18  ;;  %v167_v31 = vadd.f32 %v1427_v4, %v96_v23  ;;  %v98_v32 = vmul.f32 %v1420_v2, %v27_v26  ;;  %v31_v42 = vld [vmem:[%s2275_s0 + $0x60] sm:$0xff]  ;;  %v36_v63 = vld [vmem:[%s2275_s0 + $0x88] sm:$0xff]  ;;  %v37_v0 = vld [vmem:[%s2275_s0 + $0x90] sm:$0xff] }
   0x8   :  { %v225_v20 = vmax.f32 %v161_v12, 0.0  ;;  %v165_v22 = vadd.f32 %v1427_v4, %v94_v14  ;;  %v226_v24 = vmax.f32 %v162_v16, 0.0  ;;  %v227_v25 = vmax.f32 %v163_v17, 0.0  ;;  %v35_v55 = vld [vmem:[%s2275_s0 + $0x80] sm:$0xff]  ;;  %v38_v3 = vld [vmem:[%s2275_s0 + $0x98] sm:$0xff]  ;;  %v52_v5 = vld [vmem:[%s2275_s0 + $0x108] sm:$0xff] }
   0x9   :  { %v228_v28 = vmax.f32 %v164_v21, 0.0  ;;  %v168_v35 = vadd.f32 %v1427_v4, %v97_v27  ;;  %v230_v36 = vmax.f32 %v166_v29, 0.0  ;;  %v231_v38 = vmax.f32 %v167_v31, 0.0  ;;  %v51_v1 = vld [vmem:[%s2275_s0 + $0x100] sm:$0xff]  ;;  %v53_v6 = vld [vmem:[%s2275_s0 + $0x110] sm:$0xff]  ;;  %v54_v12 = vld [vmem:[%s2275_s0 + $0x118] sm:$0xff] }
   0xa   :  { %1283 = vmatprep.mubr.msk.f32.mxu0 %vm290_vm1, %v225_v20  ;;  %v229_v30 = vmax.f32 %v165_v22, 0.0  ;;  %v169_v39 = vadd.f32 %v1427_v4, %v98_v32  ;;  %v100_v40 = vmul.f32 %v1420_v2, %v29_v34  ;;  %v170_v46 = vadd.f32 %v1427_v4, %v99_v37  ;;  %v39_v11 = vld [vmem:[%s2275_s0 + $0xa0] sm:$0xff]  ;;  %v40_v17 = vld [vmem:[%s2275_s0 + $0xa8] sm:$0xff]  ;;  %v41_v26 = vld [vmem:[%s2275_s0 + $0xb0] sm:$0xff] }
   0xb   :  { %1284 = vmatmul.mubr.msk.f32.vlgmr.msra.gmra.mxu0 %vm290_vm1, %v226_v24  ;;  %v232_v45 = vmax.f32 %v168_v35, 0.0  ;;  %v101_v47 = vmul.f32 %v1420_v2, %v30_v41  ;;  %v102_v48 = vmul.f32 %v1420_v2, %v31_v42  ;;  %v103_v49 = vmul.f32 %v1420_v2, %v32_v43  ;;  %v55_v13 = vld [vmem:[%s2275_s0 + $0x120] sm:$0xff]  ;;  %v56_v19 = vld [vmem:[%s2275_s0 + $0x128] sm:$0xff]  ;;  %v57_v24 = vld [vmem:[%s2275_s0 + $0x130] sm:$0xff] }
   0xc   :  { %1286 = vmatprep.mubr.msk.f32.mxu0 %vm290_vm1, %v227_v25  ;;  %v233_v51 = vmax.f32 %v169_v39, 0.0  ;;  %v171_v52 = vadd.f32 %v1427_v4, %v100_v40  ;;  %v104_v53 = vmul.f32 %v1420_v2, %v33_v44  ;;  %v105_v54 = vmul.f32 %v1420_v2, %v34_v50  ;;  %v42_v27 = vld [vmem:[%s2275_s0 + $0xb8] sm:$0xff]  ;;  %v59_v44 = vld [vmem:[%s2275_s0 + $0x140] sm:$0xff] }
   0xd   :  { %v234_v56 = vmax.f32 %v170_v46, 0.0  ;;  %v172_v57 = vadd.f32 %v1427_v4, %v101_v47  ;;  %v173_v58 = vadd.f32 %v1427_v4, %v102_v48  ;;  %v174_v59 = vadd.f32 %v1427_v4, %v103_v49  ;;  %v58_v39 = vld [vmem:[%s2275_s0 + $0x138] sm:$0xff]  ;;  %v43_v49 = vld [vmem:[%s2275_s0 + $0xc0] sm:$0xff] }
   0xe   :  { %v235_v60 = vmax.f32 %v171_v52, 0.0  ;;  %v1519_v61 = vadd.f32 %v1427_v4, %v104_v53  ;;  %v106_v62 = vmul.f32 %v1420_v2, %v35_v55  ;;  %v1542_v10 = vadd.f32 %v1427_v4, %v105_v54  ;;  %v44_v55 = vld [vmem:[%s2275_s0 + $0xc8] sm:$0xff] }
   0xf   :  { %1287 = vmatmul.mubr.msk.f32.gmra.mxu0 %vm290_vm1, %v228_v28  ;;  %v236_v7 = vmax.f32 %v172_v57, 0.0  ;;  %v237_v8 = vmax.f32 %v173_v58, 0.0  ;;  %v238_v9 = vmax.f32 %v174_v59, 0.0  ;;  %v107_v15 = vmul.f32 %v1420_v2, %v36_v63  ;;  %v60_v59 = vld [vmem:[%s2275_s0 + $0x148] sm:$0xff] }
  0x10   :  { %1289 = vmatprep.mubr.msk.f32.mxu0 %vm290_vm1, %v229_v30  ;;  %v239_v14 = vmax.f32 %v1519_v61, 0.0  ;;  %v108_v16 = vmul.f32 %v1420_v2, %v37_v0  ;;  %v122_v18 = vmul.f32 %v1420_v2, %v51_v1  ;;  %v1565_v20 = vadd.f32 %v1427_v4, %v106_v62  ;;  %v45_v0 = vld [vmem:[%s2275_s0 + $0xd0] sm:$0xff] }
  0x11   :  { %v109_v21 = vmul.f32 %v1420_v2, %v38_v3  ;;  %v123_v22 = vmul.f32 %v1420_v2, %v52_v5  ;;  %v124_v23 = vmul.f32 %v1420_v2, %v53_v6  ;;  %v110_v25 = vmul.f32 %v1420_v2, %v39_v11  ;;  %v61_v1 = vld [vmem:[%s2275_s0 + $0x150] sm:$0xff] }
  0x12   :  { %v193_v28 = vadd.f32 %v1427_v4, %v122_v18  ;;  %v125_v29 = vmul.f32 %v1420_v2, %v54_v12  ;;  %v126_v30 = vmul.f32 %v1420_v2, %v55_v13  ;;  %v111_v31 = vmul.f32 %v1420_v2, %v40_v17 }
  0x13   :  { %1290 = vmatmul.mubr.msk.f32.gmra.mxu0 %vm290_vm1, %v230_v36  ;;  %v194_v32 = vadd.f32 %v1427_v4, %v123_v22  ;;  %v195_v33 = vadd.f32 %v1427_v4, %v124_v23  ;;  %v127_v34 = vmul.f32 %v1420_v2, %v56_v19  ;;  %v112_v40 = vmul.f32 %v1420_v2, %v41_v26 }
  0x14   :  { %1292 = vmatprep.mubr.msk.f32.mxu0 %vm290_vm1, %v231_v38  ;;  %v257_v35 = vmax.f32 %v193_v28, 0.0  ;;  %v196_v36 = vadd.f32 %v1427_v4, %v125_v29  ;;  %v197_v37 = vadd.f32 %v1427_v4, %v126_v30  ;;  %v128_v38 = vmul.f32 %v1420_v2, %v57_v24  ;;  %v64_v30 = vld [vmem:[%s2275_s0 + $0x168] sm:$0xff] }
  0x15   :  { %v113_v41 = vmul.f32 %v1420_v2, %v42_v27  ;;  %v258_v42 = vmax.f32 %v194_v32, 0.0  ;;  %v259_v43 = vmax.f32 %v195_v33, 0.0  ;;  %v1602_v46 = vadd.f32 %v1427_v4, %v108_v16  ;;  %v74_v32 = vld [vmem:[%s2275_s0 + $0x1b8] sm:$0xff] }
  0x16   :  { %v1605_v47 = vadd.f32 %v1427_v4, %v109_v21  ;;  %v1608_v48 = vadd.f32 %v1427_v4, %v110_v25  ;;  %1331 = vmatprep.mubr.msk.f32.mxu1 %vm290_vm1, %v257_v35  ;;  %v240_v50 = vmax.f32 %v1542_v10, 0.0  ;;  %v198_v52 = vadd.f32 %v1427_v4, %v127_v34  ;;  %v47_v10 = vld [vmem:[%s2275_s0 + $0xe0] sm:$0xff]  ;;  %v73_v25 = vld [vmem:[%s2275_s0 + $0x1b0] sm:$0xff] }
  0x17   :  { %1293 = vmatmul.mubr.msk.f32.gmra.mxu0 %vm290_vm1, %v232_v45  ;;  %v178_v45 = vadd.f32 %v1427_v4, %v107_v15  ;;  %1332 = vmatmul.mubr.msk.f32.vlgmr.msra.gmra.mxu1 %vm290_vm1, %v258_v42  ;;  %v129_v53 = vmul.f32 %v1420_v2, %v58_v39  ;;  %v241_v54 = vmax.f32 %v1565_v20, 0.0  ;;  %v199_v57 = vadd.f32 %v1427_v4, %v128_v38  ;;  %v63_v15 = vld [vmem:[%s2275_s0 + $0x160] sm:$0xff]  ;;  %v72_v20 = vld [vmem:[%s2275_s0 + $0x1a8] sm:$0xff] }
  0x18   :  { %1295 = vmatprep.mubr.msk.f32.mxu0 %vm290_vm1, %v233_v51  ;;  %v260_v51 = vmax.f32 %v196_v36, 0.0  ;;  %1334 = vmatprep.mubr.msk.f32.mxu1 %vm290_vm1, %v259_v43  ;;  %v130_v58 = vmul.f32 %v1420_v2, %v59_v44  ;;  %v1634_v61 = vadd.f32 %v1427_v4, %v112_v40  ;;  %v1637_v62 = vadd.f32 %v1427_v4, %v113_v41  ;;  %v76_v42 = vld [vmem:[%s2275_s0 + $0x1c8] sm:$0xff]  ;;  %v77_v43 = vld [vmem:[%s2275_s0 + $0x1d0] sm:$0xff] }
  0x19   :  { %v114_v63 = vmul.f32 %v1420_v2, %v43_v49  ;;  %v242_v3 = vmax.f32 %v178_v45, 0.0  ;;  %v243_v5 = vmax.f32 %v1602_v46, 0.0  ;;  %v244_v6 = vmax.f32 %v1605_v47, 0.0  ;;  %v78_v49 = vld [vmem:[%s2275_s0 + $0x1d8] sm:$0xff] }
  0x1a   :  { %v262_v11 = vmax.f32 %v198_v52, 0.0  ;;  %v200_v12 = vadd.f32 %v1427_v4, %v129_v53  ;;  %v131_v13 = vmul.f32 %v1420_v2, %v60_v59  ;;  %v116_v16 = vmul.f32 %v1420_v2, %v45_v0 }
  0x1b   :  { %1296 = vmatmul.mubr.msk.f32.gmra.mxu0 %vm290_vm1, %v234_v56  ;;  %v261_v56 = vmax.f32 %v197_v37, 0.0  ;;  %1335 = vmatmul.mubr.msk.f32.gmra.mxu1 %vm290_vm1, %v260_v51  ;;  %v263_v17 = vmax.f32 %v199_v57, 0.0  ;;  %v201_v18 = vadd.f32 %v1427_v4, %v130_v58  ;;  %v132_v19 = vmul.f32 %v1420_v2, %v61_v1  ;;  %v75_v37 = vld [vmem:[%s2275_s0 + $0x1c0] sm:$0xff]  ;;  %v66_v57 = vld [vmem:[%s2275_s0 + $0x178] sm:$0xff] }
  0x1c   :  { %1298 = vmatprep.mubr.msk.f32.mxu0 %vm290_vm1, %v235_v60  ;;  %v1631_v60 = vadd.f32 %v1427_v4, %v111_v31  ;;  %v247_v22 = vmax.f32 %v1634_v61, 0.0  ;;  %v248_v23 = vmax.f32 %v1637_v62, 0.0  ;;  %v1678_v24 = vadd.f32 %v1427_v4, %v114_v63  ;;  %v65_v31 = vld [vmem:[%s2275_s0 + $0x170] sm:$0xff] }
  0x1d   :  { %1337 = vmatprep.mubr.msk.f32.mxu1 %vm290_vm1, %v261_v56  ;;  %v1687_v27 = vmul.f32 %v1420_v2, %v47_v10  ;;  %v134_v29 = vmul.f32 %v1420_v2, %v63_v15  ;;  %v264_v34 = vmax.f32 %v200_v12, 0.0  ;;  %v202_v35 = vadd.f32 %v1427_v4, %v131_v13  ;;  %v81_v63 = vld [vmem:[%s2275_s0 + $0x1f0] sm:$0xff]  ;;  %v48_v15 = vld [vmem:[%s2275_s0 + $0xe8] sm:$0xff] }
  0x1e   :  { %v246_v21 = vmax.f32 %v1631_v60, 0.0  ;;  %v143_v36 = vmul.f32 %v1420_v2, %v72_v20  ;;  %v1712_v38 = vadd.f32 %v1427_v4, %v116_v16  ;;  %v265_v39 = vmax.f32 %v201_v18, 0.0  ;;  %v49_v16 = vld [vmem:[%s2275_s0 + $0xf0] sm:$0xff] }
  0x1f   :  { %1299 = vmatmul.mubr.msk.f32.gmra.mxu0 %vm290_vm1, %v236_v7  ;;  %v245_v7 = vmax.f32 %v1608_v48, 0.0  ;;  %1338 = vmatmul.mubr.msk.f32.gmra.mxu1 %vm290_vm1, %v262_v11  ;;  %v203_v40 = vadd.f32 %v1427_v4, %v132_v19  ;;  %v144_v41 = vmul.f32 %v1420_v2, %v73_v25  ;;  %v135_v44 = vmul.f32 %v1420_v2, %v64_v30  ;;  %v67_v48 = vld [vmem:[%s2275_s0 + $0x180] sm:$0xff]  ;;  %v69_v61 = vld [vmem:[%s2275_s0 + $0x190] sm:$0xff] }
  0x20   :  { %1301 = vmatprep.mubr.msk.f32.mxu0 %vm290_vm1, %v237_v8  ;;  %v46_v8 = vld [vmem:[%s2275_s0 + $0xd8] sm:$0xff]  ;;  %1340 = vmatprep.mubr.msk.f32.mxu1 %vm290_vm1, %v263_v17  ;;  %v136_v45 = vmul.f32 %v1420_v2, %v65_v31  ;;  %v1726_v46 = vadd.f32 %v1427_v4, %v143_v36  ;;  %v145_v47 = vmul.f32 %v1420_v2, %v74_v32  ;;  %v266_v56 = vmax.f32 %v202_v35, 0.0 }
  0x21   :  { %v1684_v26 = vmul.f32 %v1420_v2, %v46_v8  ;;  %v205_v52 = vadd.f32 %v1427_v4, %v134_v29  ;;  %v1738_v53 = vadd.f32 %v1427_v4, %v144_v41  ;;  %v147_v59 = vmul.f32 %v1420_v2, %v76_v42  ;;  %v50_v36 = vld [vmem:[%s2275_s0 + $0xf8] sm:$0xff]  ;;  %v71_v41 = vld [vmem:[%s2275_s0 + $0x1a0] sm:$0xff] }
  0x22   :  { %v1750_v58 = vadd.f32 %v1427_v4, %v145_v47  ;;  %v148_v60 = vmul.f32 %v1420_v2, %v77_v43  ;;  %v267_v0 = vmax.f32 %v203_v40, 0.0  ;;  %v249_v8 = vmax.f32 %v1678_v24, 0.0  ;;  %v70_v40 = vld [vmem:[%s2275_s0 + $0x198] sm:$0xff] }
  0x23   :  { %1302 = vmatmul.mubr.msk.f32.gmra.mxu0 %vm290_vm1, %v238_v9  ;;  %v115_v9 = vmul.f32 %v1420_v2, %v44_v55  ;;  %v80_v55 = vld [vmem:[%s2275_s0 + $0x1e8] sm:$0xff]  ;;  %1341 = vmatmul.mubr.msk.f32.gmra.mxu1 %vm290_vm1, %v264_v34  ;;  %v137_v11 = vmul.f32 %v1420_v2, %v66_v57  ;;  %v206_v18 = vadd.f32 %v1427_v4, %v135_v44 }
  0x24   :  { %1304 = vmatprep.mubr.msk.f32.mxu0 %vm290_vm1, %v239_v14  ;;  %v62_v14 = vld [vmem:[%s2275_s0 + $0x158] sm:$0xff]  ;;  %1343 = vmatprep.mubr.msk.f32.mxu1 %vm290_vm1, %v265_v39  ;;  %v151_v10 = vmul.f32 %v1420_v2, %v80_v55  ;;  %v207_v24 = vadd.f32 %v1427_v4, %v136_v45  ;;  %v138_v25 = vmul.f32 %v1420_v2, %v67_v48  ;;  %v251_v39 = vmax.f32 %v1712_v38, 0.0 }
  0x25   :  { %v133_v28 = vmul.f32 %v1420_v2, %v62_v14  ;;  %v1702_v33 = vadd.f32 %v1427_v4, %v115_v9  ;;  %v1777_v9 = vadd.f32 %v1427_v4, %v148_v60  ;;  %v152_v14 = vmul.f32 %v1420_v2, %v81_v63 }
  0x26   :  { %v1798_v19 = vadd.f32 %v1427_v4, %v151_v10  ;;  %v188_v30 = vadd.f32 %v1427_v4, %v1684_v26  ;;  %v189_v31 = vadd.f32 %v1427_v4, %v1687_v27  ;;  %v119_v32 = vmul.f32 %v1420_v2, %v48_v15 }
  0x27   :  { %1305 = vmatmul.mubr.msk.f32.gmra.mxu0 %vm290_vm1, %v240_v50  ;;  %v79_v50 = vld [vmem:[%s2275_s0 + $0x1e0] sm:$0xff]  ;;  %v204_v51 = vadd.f32 %v1427_v4, %v133_v28  ;;  %1344 = vmatmul.mubr.msk.f32.gmra.mxu1 %vm290_vm1, %v266_v56  ;;  %v68_v28 = vld [vmem:[%s2275_s0 + $0x188] sm:$0xff]  ;;  %v1811_v29 = vadd.f32 %v1427_v4, %v152_v14  ;;  %v120_v34 = vmul.f32 %v1420_v2, %v49_v16  ;;  %v250_v35 = vmax.f32 %v1702_v33, 0.0 }
  0x28   :  { %1307 = vmatprep.mubr.msk.f32.mxu0 %vm290_vm1, %v241_v54  ;;  %v146_v54 = vmul.f32 %v1420_v2, %v75_v37  ;;  %1346 = vmatprep.mubr.msk.f32.mxu1 %vm290_vm1, %v267_v0  ;;  %v270_v26 = vmax.f32 %v206_v18, 0.0  ;;  %v208_v37 = vadd.f32 %v1427_v4, %v137_v11  ;;  %v139_v27 = vmul.f32 %v1420_v2, %v68_v28 }
  0x29   :  { %v268_v17 = vmax.f32 %v204_v51, 0.0  ;;  %v271_v62 = vmax.f32 %v207_v24, 0.0  ;;  %v140_v33 = vmul.f32 %v1420_v2, %v69_v61  ;;  %v190_v42 = vadd.f32 %v1427_v4, %v119_v32 }
  0x2a   :  { %v1762_v1 = vadd.f32 %v1427_v4, %v146_v54  ;;  %v191_v43 = vadd.f32 %v1427_v4, %v120_v34  ;;  %v121_v38 = vmul.f32 %v1420_v2, %v50_v36  ;;  %v252_v44 = vmax.f32 %v188_v30, 0.0 }
  0x2b   :  { %1308 = vmatmul.mubr.msk.f32.gmra.mxu0 %vm290_vm1, %v242_v3  ;;  %v149_v3 = vmul.f32 %v1420_v2, %v78_v49  ;;  %1347 = vmatmul.mubr.msk.f32.gmra.mxu1 %vm290_vm1, %v268_v17  ;;  %v272_v45 = vmax.f32 %v208_v37, 0.0  ;;  %v210_v47 = vadd.f32 %v1427_v4, %v139_v27  ;;  %v141_v49 = vmul.f32 %v1420_v2, %v70_v40 }
  0x2c   :  { %1310 = vmatprep.mubr.msk.f32.mxu0 %vm290_vm1, %v243_v5  ;;  %v150_v5 = vmul.f32 %v1420_v2, %v79_v50  ;;  %v253_v50 = vmax.f32 %v189_v31, 0.0  ;;  %v142_v54 = vmul.f32 %v1420_v2, %v71_v41  ;;  %v254_v55 = vmax.f32 %v190_v42, 0.0 }
  0x2d   :  { %v1782_v12 = vadd.f32 %v1427_v4, %v149_v3  ;;  %v192_v56 = vadd.f32 %v1427_v4, %v121_v38  ;;  %v274_v57 = vmax.f32 %v210_v47, 0.0  ;;  %v255_v60 = vmax.f32 %v191_v43, 0.0 }
  0x2e   :  { %v1785_v13 = vadd.f32 %v1427_v4, %v150_v5  ;;  %v213_v0 = vadd.f32 %v1427_v4, %v142_v54  ;;  %v281_v48 = vmax.f32 %v1762_v1, 0.0  ;;  %v286_v1 = vmax.f32 %v1798_v19, 0.0 }
  0x2f   :  { %1311 = vmatmul.mubr.msk.f32.gmra.mxu0 %vm290_vm1, %v244_v6  ;;  %v82_v6 = vld [vmem:[%s2275_s0 + $0x1f8] sm:$0xff] }
  0x30   :  { %1313 = vmatprep.mubr.msk.f32.mxu0 %vm290_vm1, %v245_v7  ;;  %v1774_v7 = vadd.f32 %v1427_v4, %v147_v59  ;;  %v153_v20 = vmul.f32 %v1420_v2, %v82_v6  ;;  %v212_v59 = vadd.f32 %v1427_v4, %v141_v49  ;;  %v256_v2 = vmax.f32 %v192_v56, 0.0 }
  0x31   :  { %v277_v5 = vmax.f32 %v213_v0, 0.0  ;;  %v278_v6 = vmax.f32 %v1726_v46, 0.0  ;;  %v283_v46 = vmax.f32 %v1777_v9, 0.0 }
  0x32   :  { %v276_v3 = vmax.f32 %v212_v59, 0.0  ;;  %v282_v10 = vmax.f32 %v1774_v7, 0.0  ;;  %v287_v7 = vmax.f32 %v1811_v29, 0.0 }
  0x33   :  { %1314 = vmatmul.mubr.msk.f32.gmra.mxu0 %vm290_vm1, %v246_v21  ;;  %v269_v21 = vmax.f32 %v205_v52, 0.0  ;;  %v211_v52 = vadd.f32 %v1427_v4, %v140_v33 }
  0x34   :  { %1316 = vmatprep.mubr.msk.f32.mxu0 %vm290_vm1, %v247_v22  ;;  %v1817_v22 = vadd.f32 %v1427_v4, %v153_v20 }
  0x35   :  { %1349 = vmatprep.mubr.msk.f32.mxu1 %vm290_vm1, %v269_v21  ;;  %v275_v63 = vmax.f32 %v211_v52, 0.0 }
  0x36   :  { %1350 = vmatmul.mubr.msk.f32.gmra.mxu1 %vm290_vm1, %v270_v26  ;;  %v288_v9 = vmax.f32 %v1817_v22, 0.0 }
  0x37   :  { %1317 = vmatmul.mubr.msk.f32.gmra.mxu0 %vm290_vm1, %v248_v23  ;;  %v209_v23 = vadd.f32 %v1427_v4, %v138_v25  ;;  %1352 = vmatprep.mubr.msk.f32.mxu1 %vm290_vm1, %v271_v62  ;;  %v279_v4 = vmax.f32 %v1738_v53, 0.0  ;;  %v284_v53 = vmax.f32 %v1782_v12, 0.0 }
  0x38   :  { %1319 = vmatprep.mubr.msk.f32.mxu0 %vm290_vm1, %v249_v8  ;;  %v280_v8 = vmax.f32 %v1750_v58, 0.0  ;;  %v285_v58 = vmax.f32 %v1785_v13, 0.0 }
  0x39   :  { %v273_v51 = vmax.f32 %v209_v23, 0.0 }
  0x3a   :  { %1353 = vmatmul.mubr.msk.f32.gmra.mxu1 %vm290_vm1, %v272_v45 }
  0x3b   :  { %1320 = vmatmul.mubr.msk.f32.gmra.mxu0 %vm290_vm1, %v250_v35  ;;  %1355 = vmatprep.mubr.msk.f32.mxu1 %vm290_vm1, %v273_v51 }
  0x3c   :  { %1322 = vmatprep.mubr.msk.f32.mxu0 %vm290_vm1, %v251_v39 }
  0x3e   :  { %1356 = vmatmul.mubr.msk.f32.gmra.mxu1 %vm290_vm1, %v274_v57 }
  0x3f   :  { %1323 = vmatmul.mubr.msk.f32.gmra.mxu0 %vm290_vm1, %v252_v44  ;;  %1358 = vmatprep.mubr.msk.f32.mxu1 %vm290_vm1, %v275_v63 }
  0x40   :  { %1325 = vmatprep.mubr.msk.f32.mxu0 %vm290_vm1, %v253_v50 }
  0x42   :  { %1359 = vmatmul.mubr.msk.f32.gmra.mxu1 %vm290_vm1, %v276_v3 }
  0x43   :  { %1326 = vmatmul.mubr.msk.f32.gmra.mxu0 %vm290_vm1, %v254_v55  ;;  %1361 = vmatprep.mubr.msk.f32.mxu1 %vm290_vm1, %v277_v5 }
  0x44   :  { %1328 = vmatprep.mubr.msk.f32.mxu0 %vm290_vm1, %v255_v60 }
  0x46   :  { %1362 = vmatmul.mubr.msk.f32.gmra.mxu1 %vm290_vm1, %v278_v6 }
  0x47   :  { %1329 = vmatmul.mubr.msk.f32.gmra.mxu0 %vm290_vm1, %v256_v2  ;;  %1364 = vmatprep.mubr.msk.f32.mxu1 %vm290_vm1, %v279_v4 }
  0x4a   :  { %1365 = vmatmul.mubr.msk.f32.gmra.mxu1 %vm290_vm1, %v280_v8 }
  0x4b   :  { %1367 = vmatprep.mubr.msk.f32.mxu1 %vm290_vm1, %v281_v48 }
  0x4e   :  { %1368 = vmatmul.mubr.msk.f32.gmra.mxu1 %vm290_vm1, %v282_v10 }
  0x4f   :  { %1370 = vmatprep.mubr.msk.f32.mxu1 %vm290_vm1, %v283_v46 }
  0x52   :  { %1371 = vmatmul.mubr.msk.f32.gmra.mxu1 %vm290_vm1, %v284_v53 }
  0x53   :  { %1373 = vmatprep.mubr.msk.f32.mxu1 %vm290_vm1, %v285_v58 }
  0x56   :  { %1374 = vmatmul.mubr.msk.f32.gmra.mxu1 %vm290_vm1, %v286_v1 }
  0x57   :  { %1376 = vmatprep.mubr.msk.f32.mxu1 %vm290_vm1, %v287_v7 }
  0x5a   :  { %1377 = vmatmul.mubr.msk.f32.gmra.mxu1 %vm290_vm1, %v288_v9 }
  0xcb   :  { %v1285_v11 = vpop.f32.mrf.mxu0 }
  0xcc   :  { %1078 = vst [vmem:[%s2278_s4 + $0x8] sm:$0xff] %v1285_v11  ;;  %v942_v15 = vmul.f32 %v1285_v11, %v1285_v11 }
  0xcd   :  { %v553_v12 = vpop.f32.mrf.mxu0 }
  0xce   :  { %v941_v13 = vmul.f32 %v553_v12, %v553_v12  ;;  %1077 = vst [vmem:[%s2278_s4] sm:$0xff] %v553_v12  ;;  %v872_v16 = vadd.f32 %v1285_v11, %v553_v12 }
  0xcf   :  { %v1288_v14 = vpop.f32.mrf.mxu0 }
  0xd0   :  { %1080 = vst [vmem:[%s2278_s4 + $0x18] sm:$0xff] %v1288_v14  ;;  %v1005_v18 = vadd.f32 %v942_v15, %v941_v13  ;;  %v944_v24 = vmul.f32 %v1288_v14, %v1288_v14 }
  0xd1   :  { %v563_v17 = vpop.f32.mrf.mxu0 }
  0xd2   :  { %v873_v19 = vadd.f32 %v872_v16, %v563_v17  ;;  %v943_v20 = vmul.f32 %v563_v17, %v563_v17  ;;  %1079 = vst [vmem:[%s2278_s4 + $0x10] sm:$0xff] %v563_v17 }
  0xd3   :  { %v1291_v21 = vpop.f32.mrf.mxu0 }
  0xd4   :  { %v1006_v25 = vadd.f32 %v1005_v18, %v943_v20  ;;  %1082 = vst [vmem:[%s2278_s4 + $0x28] sm:$0xff] %v1291_v21  ;;  %v874_v28 = vadd.f32 %v1288_v14, %v873_v19  ;;  %v946_v32 = vmul.f32 %v1291_v21, %v1291_v21 }
  0xd5   :  { %v573_v29 = vpop.f32.mrf.mxu0 }
  0xd6   :  { %v875_v61 = vadd.f32 %v874_v28, %v573_v29  ;;  %v945_v22 = vmul.f32 %v573_v29, %v573_v29  ;;  %v1007_v30 = vadd.f32 %v1006_v25, %v944_v24  ;;  %1081 = vst [vmem:[%s2278_s4 + $0x20] sm:$0xff] %v573_v29 }
  0xd7   :  { %v1294_v31 = vpop.f32.mrf.mxu0  ;;  %v1929_v55 = vpop.f32.mrf.mxu1 }
  0xd8   :  { %v1008_v34 = vadd.f32 %v1007_v30, %v945_v22  ;;  %1084 = vst [vmem:[%s2278_s4 + $0x38] sm:$0xff] %v1294_v31  ;;  %v876_v35 = vadd.f32 %v1291_v21, %v875_v61  ;;  %v948_v62 = vmul.f32 %v1294_v31, %v1294_v31  ;;  %1110 = vst [vmem:[%s2278_s4 + $0x108] sm:$0xff] %v1929_v55 }
  0xd9   :  { %v583_v36 = vpop.f32.mrf.mxu0  ;;  %v1938_v63 = vpop.f32.mrf.mxu1 }
  0xda   :  { %v877_v26 = vadd.f32 %v876_v35, %v583_v36  ;;  %v947_v37 = vmul.f32 %v583_v36, %v583_v36  ;;  %v1009_v27 = vadd.f32 %v1008_v34, %v946_v32  ;;  %1083 = vst [vmem:[%s2278_s4 + $0x30] sm:$0xff] %v583_v36  ;;  %1109 = vst [vmem:[%s2278_s4 + $0x100] sm:$0xff] %v1938_v63 }
  0xdb   :  { %v1297_v39 = vpop.f32.mrf.mxu0  ;;  %v1947_v6 = vpop.f32.mrf.mxu1 }
  0xdc   :  { %v1010_v23 = vadd.f32 %v1009_v27, %v947_v37  ;;  %1086 = vst [vmem:[%s2278_s4 + $0x48] sm:$0xff] %v1297_v39  ;;  %v878_v33 = vadd.f32 %v1294_v31, %v877_v26  ;;  %v950_v44 = vmul.f32 %v1297_v39, %v1297_v39  ;;  %1112 = vst [vmem:[%s2278_s4 + $0x118] sm:$0xff] %v1947_v6 }
  0xdd   :  { %v593_v40 = vpop.f32.mrf.mxu0  ;;  %v1956_v46 = vpop.f32.mrf.mxu1 }
  0xde   :  { %v879_v41 = vadd.f32 %v878_v33, %v593_v40  ;;  %v949_v42 = vmul.f32 %v593_v40, %v593_v40  ;;  %v1011_v43 = vadd.f32 %v1010_v23, %v948_v62  ;;  %1085 = vst [vmem:[%s2278_s4 + $0x40] sm:$0xff] %v593_v40  ;;  %1111 = vst [vmem:[%s2278_s4 + $0x110] sm:$0xff] %v1956_v46 }
  0xdf   :  { %v1300_v38 = vpop.f32.mrf.mxu0  ;;  %v1965_v9 = vpop.f32.mrf.mxu1 }
  0xe0   :  { %v1012_v45 = vadd.f32 %v1011_v43, %v949_v42  ;;  %1088 = vst [vmem:[%s2278_s4 + $0x58] sm:$0xff] %v1300_v38  ;;  %v880_v47 = vadd.f32 %v1297_v39, %v879_v41  ;;  %v952_v56 = vmul.f32 %v1300_v38, %v1300_v38  ;;  %1114 = vst [vmem:[%s2278_s4 + $0x128] sm:$0xff] %v1965_v9 }
  0xe1   :  { %v603_v49 = vpop.f32.mrf.mxu0  ;;  %v1974_v15 = vpop.f32.mrf.mxu1 }
  0xe2   :  { %v881_v50 = vadd.f32 %v880_v47, %v603_v49  ;;  %v951_v51 = vmul.f32 %v603_v49, %v603_v49  ;;  %v1013_v52 = vadd.f32 %v1012_v45, %v950_v44  ;;  %1087 = vst [vmem:[%s2278_s4 + $0x50] sm:$0xff] %v603_v49  ;;  %1113 = vst [vmem:[%s2278_s4 + $0x120] sm:$0xff] %v1974_v15 }
  0xe3   :  { %v1303_v54 = vpop.f32.mrf.mxu0  ;;  %v1983_v20 = vpop.f32.mrf.mxu1 }
  0xe4   :  { %v1014_v57 = vadd.f32 %v1013_v52, %v951_v51  ;;  %1090 = vst [vmem:[%s2278_s4 + $0x68] sm:$0xff] %v1303_v54  ;;  %v882_v59 = vadd.f32 %v1300_v38, %v881_v50  ;;  %v954_v4 = vmul.f32 %v1303_v54, %v1303_v54  ;;  %1116 = vst [vmem:[%s2278_s4 + $0x138] sm:$0xff] %v1983_v20 }
  0xe5   :  { %v613_v60 = vpop.f32.mrf.mxu0  ;;  %v1992_v29 = vpop.f32.mrf.mxu1 }
  0xe6   :  { %v883_v0 = vadd.f32 %v882_v59, %v613_v60  ;;  %v953_v2 = vmul.f32 %v613_v60, %v613_v60  ;;  %v1015_v3 = vadd.f32 %v1014_v57, %v952_v56  ;;  %1089 = vst [vmem:[%s2278_s4 + $0x60] sm:$0xff] %v613_v60  ;;  %1115 = vst [vmem:[%s2278_s4 + $0x130] sm:$0xff] %v1992_v29 }
  0xe7   :  { %v1306_v5 = vpop.f32.mrf.mxu0  ;;  %v2001_v32 = vpop.f32.mrf.mxu1 }
  0xe8   :  { %v1016_v8 = vadd.f32 %v1015_v3, %v953_v2  ;;  %1092 = vst [vmem:[%s2278_s4 + $0x78] sm:$0xff] %v1306_v5  ;;  %v884_v48 = vadd.f32 %v1303_v54, %v883_v0  ;;  %v956_v11 = vmul.f32 %v1306_v5, %v1306_v5  ;;  %1118 = vst [vmem:[%s2278_s4 + $0x148] sm:$0xff] %v2001_v32 }
  0xe9   :  { %v623_v10 = vpop.f32.mrf.mxu0  ;;  %v2010_v37 = vpop.f32.mrf.mxu1 }
  0xea   :  { %v885_v53 = vadd.f32 %v884_v48, %v623_v10  ;;  %v955_v58 = vmul.f32 %v623_v10, %v623_v10  ;;  %v1017_v1 = vadd.f32 %v1016_v8, %v954_v4  ;;  %1091 = vst [vmem:[%s2278_s4 + $0x70] sm:$0xff] %v623_v10  ;;  %1117 = vst [vmem:[%s2278_s4 + $0x140] sm:$0xff] %v2010_v37 }
  0xeb   :  { %v1309_v7 = vpop.f32.mrf.mxu0  ;;  %v2019_v33 = vpop.f32.mrf.mxu1 }
  0xec   :  { %v1018_v12 = vadd.f32 %v1017_v1, %v955_v58  ;;  %1094 = vst [vmem:[%s2278_s4 + $0x88] sm:$0xff] %v1309_v7  ;;  %v886_v13 = vadd.f32 %v1306_v5, %v885_v53  ;;  %v958_v21 = vmul.f32 %v1309_v7, %v1309_v7  ;;  %1120 = vst [vmem:[%s2278_s4 + $0x158] sm:$0xff] %v2019_v33 }
  0xed   :  { %v633_v14 = vpop.f32.mrf.mxu0  ;;  %v2028_v38 = vpop.f32.mrf.mxu1 }
  0xee   :  { %v887_v16 = vadd.f32 %v886_v13, %v633_v14  ;;  %v957_v17 = vmul.f32 %v633_v14, %v633_v14  ;;  %v1019_v18 = vadd.f32 %v1018_v12, %v956_v11  ;;  %1093 = vst [vmem:[%s2278_s4 + $0x80] sm:$0xff] %v633_v14  ;;  %1119 = vst [vmem:[%s2278_s4 + $0x150] sm:$0xff] %v2028_v38 }
  0xef   :  { %v1312_v19 = vpop.f32.mrf.mxu0 }
  0xf0   :  { %v1020_v24 = vadd.f32 %v1019_v18, %v957_v17  ;;  %1096 = vst [vmem:[%s2278_s4 + $0x98] sm:$0xff] %v1312_v19  ;;  %v888_v25 = vadd.f32 %v1309_v7, %v887_v16  ;;  %v960_v34 = vmul.f32 %v1312_v19, %v1312_v19 }
  0xf1   :  { %v643_v28 = vpop.f32.mrf.mxu0 }
  0xf2   :  { %v889_v61 = vadd.f32 %v888_v25, %v643_v28  ;;  %v959_v22 = vmul.f32 %v643_v28, %v643_v28  ;;  %v1021_v30 = vadd.f32 %v1020_v24, %v958_v21  ;;  %1095 = vst [vmem:[%s2278_s4 + $0x90] sm:$0xff] %v643_v28 }
  0xf3   :  { %v1315_v31 = vpop.f32.mrf.mxu0 }
  0xf4   :  { %v1022_v35 = vadd.f32 %v1021_v30, %v959_v22  ;;  %1098 = vst [vmem:[%s2278_s4 + $0xa8] sm:$0xff] %v1315_v31  ;;  %v890_v36 = vadd.f32 %v1312_v19, %v889_v61  ;;  %v962_v40 = vmul.f32 %v1315_v31, %v1315_v31 }
  0xf5   :  { %v653_v26 = vpop.f32.mrf.mxu0 }
  0xf6   :  { %v891_v27 = vadd.f32 %v890_v36, %v653_v26  ;;  %v961_v39 = vmul.f32 %v653_v26, %v653_v26  ;;  %v1023_v62 = vadd.f32 %v1022_v35, %v960_v34  ;;  %1097 = vst [vmem:[%s2278_s4 + $0xa0] sm:$0xff] %v653_v26  ;;  %v2037_v50 = vpop.f32.mrf.mxu1 }
  0xf7   :  { %v1318_v23 = vpop.f32.mrf.mxu0  ;;  %1122 = vst [vmem:[%s2278_s4 + $0x168] sm:$0xff] %v2037_v50 }
  0xf8   :  { %v1024_v41 = vadd.f32 %v1023_v62, %v961_v39  ;;  %1100 = vst [vmem:[%s2278_s4 + $0xb8] sm:$0xff] %v1318_v23  ;;  %v892_v42 = vadd.f32 %v1315_v31, %v891_v27  ;;  %v964_v51 = vmul.f32 %v1318_v23, %v1318_v23  ;;  %v2046_v57 = vpop.f32.mrf.mxu1 }
  0xf9   :  { %v663_v43 = vpop.f32.mrf.mxu0  ;;  %1121 = vst [vmem:[%s2278_s4 + $0x160] sm:$0xff] %v2046_v57 }
  0xfa   :  { %v893_v44 = vadd.f32 %v892_v42, %v663_v43  ;;  %v963_v45 = vmul.f32 %v663_v43, %v663_v43  ;;  %v1025_v47 = vadd.f32 %v1024_v41, %v962_v40  ;;  %1099 = vst [vmem:[%s2278_s4 + $0xb0] sm:$0xff] %v663_v43  ;;  %v2055_v3 = vpop.f32.mrf.mxu1  ;;  %v973_v42 = vmul.f32 %v1938_v63, %v1938_v63 }
  0xfb   :  { %v1321_v49 = vpop.f32.mrf.mxu0  ;;  %1124 = vst [vmem:[%s2278_s4 + $0x178] sm:$0xff] %v2055_v3 }
  0xfc   :  { %v1026_v52 = vadd.f32 %v1025_v47, %v963_v45  ;;  %1102 = vst [vmem:[%s2278_s4 + $0xc8] sm:$0xff] %v1321_v49  ;;  %v894_v54 = vadd.f32 %v1318_v23, %v893_v44  ;;  %v966_v5 = vmul.f32 %v1321_v49, %v1321_v49  ;;  %v2064_v10 = vpop.f32.mrf.mxu1  ;;  %v974_v44 = vmul.f32 %v1929_v55, %v1929_v55 }
  0xfd   :  { %v673_v56 = vpop.f32.mrf.mxu0  ;;  %1123 = vst [vmem:[%s2278_s4 + $0x170] sm:$0xff] %v2064_v10 }
  0xfe   :  { %v895_v59 = vadd.f32 %v894_v54, %v673_v56  ;;  %v965_v60 = vmul.f32 %v673_v56, %v673_v56  ;;  %v1027_v0 = vadd.f32 %v1026_v52, %v964_v51  ;;  %1101 = vst [vmem:[%s2278_s4 + $0xc0] sm:$0xff] %v673_v56  ;;  %v2073_v11 = vpop.f32.mrf.mxu1  ;;  %v975_v51 = vmul.f32 %v1956_v46, %v1956_v46 }
  0xff   :  { %v1324_v2 = vpop.f32.mrf.mxu0  ;;  %1126 = vst [vmem:[%s2278_s4 + $0x188] sm:$0xff] %v2073_v11 }
 0x100   :  { %v1028_v4 = vadd.f32 %v1027_v0, %v965_v60  ;;  %1104 = vst [vmem:[%s2278_s4 + $0xd8] sm:$0xff] %v1324_v2  ;;  %v896_v8 = vadd.f32 %v1321_v49, %v895_v59  ;;  %v968_v12 = vmul.f32 %v1324_v2, %v1324_v2  ;;  %v2082_v17 = vpop.f32.mrf.mxu1  ;;  %v977_v0 = vmul.f32 %v1974_v15, %v1974_v15 }
 0x101   :  { %v683_v48 = vpop.f32.mrf.mxu0  ;;  %1125 = vst [vmem:[%s2278_s4 + $0x180] sm:$0xff] %v2082_v17 }
 0x102   :  { %v897_v53 = vadd.f32 %v896_v8, %v683_v48  ;;  %v967_v58 = vmul.f32 %v683_v48, %v683_v48  ;;  %v1029_v1 = vadd.f32 %v1028_v4, %v966_v5  ;;  %1103 = vst [vmem:[%s2278_s4 + $0xd0] sm:$0xff] %v683_v48  ;;  %v2091_v25 = vpop.f32.mrf.mxu1 }
 0x103   :  { %v1327_v7 = vpop.f32.mrf.mxu0  ;;  %1128 = vst [vmem:[%s2278_s4 + $0x198] sm:$0xff] %v2091_v25 }
 0x104   :  { %v1030_v13 = vadd.f32 %v1029_v1, %v967_v58  ;;  %1106 = vst [vmem:[%s2278_s4 + $0xe8] sm:$0xff] %v1327_v7  ;;  %v898_v14 = vadd.f32 %v1324_v2, %v897_v53  ;;  %v970_v28 = vmul.f32 %v1327_v7, %v1327_v7  ;;  %v2100_v31 = vpop.f32.mrf.mxu1  ;;  %v979_v53 = vmul.f32 %v1992_v29, %v1992_v29 }
 0x105   :  { %v693_v16 = vpop.f32.mrf.mxu0  ;;  %1127 = vst [vmem:[%s2278_s4 + $0x190] sm:$0xff] %v2100_v31 }
 0x106   :  { %v899_v18 = vadd.f32 %v898_v14, %v693_v16  ;;  %v969_v19 = vmul.f32 %v693_v16, %v693_v16  ;;  %v1031_v21 = vadd.f32 %v1030_v13, %v968_v12  ;;  %1105 = vst [vmem:[%s2278_s4 + $0xe0] sm:$0xff] %v693_v16  ;;  %v2109_v26 = vpop.f32.mrf.mxu1  ;;  %v981_v14 = vmul.f32 %v2010_v37, %v2010_v37 }
 0x107   :  { %v1330_v24 = vpop.f32.mrf.mxu0  ;;  %1130 = vst [vmem:[%s2278_s4 + $0x1a8] sm:$0xff] %v2109_v26 }
 0x108   :  { %v1032_v61 = vadd.f32 %v1031_v21, %v969_v19  ;;  %1108 = vst [vmem:[%s2278_s4 + $0xf8] sm:$0xff] %v1330_v24  ;;  %v900_v22 = vadd.f32 %v1327_v7, %v899_v18  ;;  %v972_v27 = vmul.f32 %v1330_v24, %v1330_v24  ;;  %v2115_v23 = vpop.f32.mrf.mxu1 }
 0x109   :  { %v703_v30 = vpop.f32.mrf.mxu0  ;;  %1129 = vst [vmem:[%s2278_s4 + $0x1a0] sm:$0xff] %v2115_v23 }
 0x10a   :  { %v901_v34 = vadd.f32 %v900_v22, %v703_v30  ;;  %v971_v35 = vmul.f32 %v703_v30, %v703_v30  ;;  %v1033_v36 = vadd.f32 %v1032_v61, %v970_v28  ;;  %1107 = vst [vmem:[%s2278_s4 + $0xf0] sm:$0xff] %v703_v30  ;;  %v2124_v43 = vpop.f32.mrf.mxu1  ;;  %v983_v28 = vmul.f32 %v2028_v38, %v2028_v38 }
 0x10b   :  { %1132 = vst [vmem:[%s2278_s4 + $0x1b8] sm:$0xff] %v2124_v43  ;;  %v984_v22 = vmul.f32 %v2019_v33, %v2019_v33 }
 0x10c   :  { %v902_v39 = vadd.f32 %v1330_v24, %v901_v34  ;;  %v1034_v62 = vadd.f32 %v1033_v36, %v971_v35  ;;  %v2133_v49 = vpop.f32.mrf.mxu1  ;;  %v985_v35 = vmul.f32 %v2046_v57, %v2046_v57 }
 0x10d   :  { %1131 = vst [vmem:[%s2278_s4 + $0x1b0] sm:$0xff] %v2133_v49 }
 0x10e   :  { %v1035_v40 = vadd.f32 %v1034_v62, %v972_v27  ;;  %v903_v41 = vadd.f32 %v902_v39, %v1938_v63  ;;  %v2142_v54 = vpop.f32.mrf.mxu1 }
 0x10f   :  { %1134 = vst [vmem:[%s2278_s4 + $0x1c8] sm:$0xff] %v2142_v54 }
 0x110   :  { %v1036_v45 = vadd.f32 %v1035_v40, %v973_v42  ;;  %v904_v47 = vadd.f32 %v1929_v55, %v903_v41  ;;  %v976_v55 = vmul.f32 %v1947_v6, %v1947_v6  ;;  %v987_v40 = vmul.f32 %v2064_v10, %v2064_v10 }
 0x112   :  { %v905_v63 = vadd.f32 %v904_v47, %v1956_v46  ;;  %v1037_v52 = vadd.f32 %v1036_v45, %v974_v44  ;;  %v2151_v46 = vpop.f32.mrf.mxu1  ;;  %v989_v45 = vmul.f32 %v2082_v17, %v2082_v17 }
 0x113   :  { %1133 = vst [vmem:[%s2278_s4 + $0x1c0] sm:$0xff] %v2151_v46 }
 0x114   :  { %v1038_v56 = vadd.f32 %v1037_v52, %v975_v51  ;;  %v906_v59 = vadd.f32 %v1947_v6, %v905_v63  ;;  %v2160_v5 = vpop.f32.mrf.mxu1  ;;  %v978_v6 = vmul.f32 %v1965_v9, %v1965_v9  ;;  %v991_v52 = vmul.f32 %v2100_v31, %v2100_v31 }
 0x115   :  { %1136 = vst [vmem:[%s2278_s4 + $0x1d8] sm:$0xff] %v2160_v5 }
 0x116   :  { %v907_v60 = vadd.f32 %v906_v59, %v1974_v15  ;;  %v1039_v2 = vadd.f32 %v1038_v56, %v976_v55  ;;  %v2169_v15 = vpop.f32.mrf.mxu1 }
 0x117   :  { %1135 = vst [vmem:[%s2278_s4 + $0x1d0] sm:$0xff] %v2169_v15 }
 0x118   :  { %v1040_v4 = vadd.f32 %v1039_v2, %v977_v0  ;;  %v908_v8 = vadd.f32 %v1965_v9, %v907_v60  ;;  %v2178_v1 = vpop.f32.mrf.mxu1  ;;  %v980_v9 = vmul.f32 %v1983_v20, %v1983_v20  ;;  %v993_v60 = vmul.f32 %v2115_v23, %v2115_v23 }
 0x119   :  { %1138 = vst [vmem:[%s2278_s4 + $0x1e8] sm:$0xff] %v2178_v1 }
 0x11a   :  { %v909_v48 = vadd.f32 %v908_v8, %v1992_v29  ;;  %v1041_v58 = vadd.f32 %v1040_v4, %v978_v6  ;;  %v2187_v29 = vpop.f32.mrf.mxu1  ;;  %v995_v4 = vmul.f32 %v2133_v49, %v2133_v49 }
 0x11b   :  { %1137 = vst [vmem:[%s2278_s4 + $0x1e0] sm:$0xff] %v2187_v29 }
 0x11c   :  { %v1042_v7 = vadd.f32 %v1041_v58, %v979_v53  ;;  %v910_v12 = vadd.f32 %v1983_v20, %v909_v48  ;;  %v2196_v18 = vpop.f32.mrf.mxu1  ;;  %v982_v20 = vmul.f32 %v2001_v32, %v2001_v32  ;;  %v997_v58 = vmul.f32 %v2151_v46, %v2151_v46 }
 0x11d   :  { %1140 = vst [vmem:[%s2278_s4 + $0x1f8] sm:$0xff] %v2196_v18 }
 0x11e   :  { %v911_v13 = vadd.f32 %v910_v12, %v2010_v37  ;;  %v1043_v16 = vadd.f32 %v1042_v7, %v980_v9  ;;  %v863_v37 = vpop.f32.mrf.mxu1 }
 0x11f   :  { %1139 = vst [vmem:[%s2278_s4 + $0x1f0] sm:$0xff] %v863_v37 }
 0x120   :  { %v1044_v19 = vadd.f32 %v1043_v16, %v981_v14  ;;  %v912_v21 = vadd.f32 %v2001_v32, %v911_v13  ;;  %v999_v13 = vmul.f32 %v2169_v15, %v2169_v15 }
 0x122   :  { %v913_v24 = vadd.f32 %v912_v21, %v2028_v38  ;;  %v1045_v61 = vadd.f32 %v1044_v19, %v982_v20  ;;  %v986_v38 = vmul.f32 %v2037_v50, %v2037_v50  ;;  %v1001_v19 = vmul.f32 %v2187_v29, %v2187_v29 }
 0x124   :  { %v1046_v32 = vadd.f32 %v1045_v61, %v983_v28  ;;  %v914_v30 = vadd.f32 %v2019_v33, %v913_v24  ;;  %v988_v33 = vmul.f32 %v2055_v3, %v2055_v3  ;;  %v1003_v61 = vmul.f32 %v863_v37, %v863_v37 }
 0x126   :  { %v915_v34 = vadd.f32 %v914_v30, %v2046_v57  ;;  %v1047_v36 = vadd.f32 %v1046_v32, %v984_v22  ;;  %v1004_v32 = vmul.f32 %v2196_v18, %v2196_v18 }
 0x128   :  { %v1048_v27 = vadd.f32 %v1047_v36, %v985_v35  ;;  %v916_v39 = vadd.f32 %v2037_v50, %v915_v34  ;;  %v990_v50 = vmul.f32 %v2073_v11, %v2073_v11 }
 0x12a   :  { %v917_v62 = vadd.f32 %v916_v39, %v2064_v10  ;;  %v1049_v41 = vadd.f32 %v1048_v27, %v986_v38 }
 0x12c   :  { %v1050_v42 = vadd.f32 %v1049_v41, %v987_v40  ;;  %v918_v44 = vadd.f32 %v2055_v3, %v917_v62  ;;  %v992_v3 = vmul.f32 %v2091_v25, %v2091_v25 }
 0x12e   :  { %v919_v57 = vadd.f32 %v918_v44, %v2082_v17  ;;  %v1051_v47 = vadd.f32 %v1050_v42, %v988_v33 }
 0x130   :  { %v1052_v63 = vadd.f32 %v1051_v47, %v989_v45  ;;  %v920_v51 = vadd.f32 %v2073_v11, %v919_v57  ;;  %v994_v11 = vmul.f32 %v2109_v26, %v2109_v26 }
 0x132   :  { %v921_v10 = vadd.f32 %v920_v51, %v2100_v31  ;;  %v1053_v55 = vadd.f32 %v1052_v63, %v990_v50 }
 0x134   :  { %v1054_v56 = vadd.f32 %v1053_v55, %v991_v52  ;;  %v922_v59 = vadd.f32 %v2091_v25, %v921_v10  ;;  %v996_v25 = vmul.f32 %v2124_v43, %v2124_v43 }
 0x136   :  { %v923_v17 = vadd.f32 %v922_v59, %v2115_v23  ;;  %v1055_v0 = vadd.f32 %v1054_v56, %v992_v3 }
 0x138   :  { %v1056_v2 = vadd.f32 %v1055_v0, %v993_v60  ;;  %v924_v6 = vadd.f32 %v2109_v26, %v923_v17  ;;  %v998_v26 = vmul.f32 %v2142_v54, %v2142_v54 }
 0x13a   :  { %v925_v31 = vadd.f32 %v924_v6, %v2133_v49  ;;  %v1057_v8 = vadd.f32 %v1056_v2, %v994_v11 }
 0x13c   :  { %v1058_v48 = vadd.f32 %v1057_v8, %v995_v4  ;;  %v926_v53 = vadd.f32 %v2124_v43, %v925_v31  ;;  %v1000_v43 = vmul.f32 %v2160_v5, %v2160_v5 }
 0x13e   :  { %v927_v23 = vadd.f32 %v926_v53, %v2151_v46  ;;  %v1059_v9 = vadd.f32 %v1058_v48, %v996_v25 }
 0x140   :  { %v1060_v7 = vadd.f32 %v1059_v9, %v997_v58  ;;  %v928_v12 = vadd.f32 %v2142_v54, %v927_v23  ;;  %v1002_v54 = vmul.f32 %v2178_v1, %v2178_v1 }
 0x142   :  { %v929_v49 = vadd.f32 %v928_v12, %v2169_v15  ;;  %v1061_v14 = vadd.f32 %v1060_v7, %v998_v26 }
 0x144   :  { %v1062_v16 = vadd.f32 %v1061_v14, %v999_v13  ;;  %v930_v20 = vadd.f32 %v2160_v5, %v929_v49 }
 0x146   :  { %v931_v46 = vadd.f32 %v930_v20, %v2187_v29  ;;  %v1063_v21 = vadd.f32 %v1062_v16, %v1000_v43 }
 0x148   :  { %v1064_v24 = vadd.f32 %v1063_v21, %v1001_v19  ;;  %v932_v28 = vadd.f32 %v2178_v1, %v931_v46 }
 0x14a   :  { %v933_v15 = vadd.f32 %v932_v28, %v863_v37  ;;  %v1065_v22 = vadd.f32 %v1064_v24, %v1002_v54 }
 0x14c   :  { %v934_v5 = vadd.f32 %v2196_v18, %v933_v15  ;;  %v1066_v30 = vadd.f32 %v1065_v22, %v1003_v61 }
 0x14e   :  { %v935_v34 = vrot.slane %v934_v5, 4  ;;  %v1067_v35 = vadd.f32 %v1066_v30, %v1004_v32 }
 0x150   :  { %v936_v36 = vadd.f32 %v935_v34, %v934_v5  ;;  %v1068_v29 = vrot.slane %v1067_v35, 4 }
 0x152   :  { %v937_v38 = vrot.slane %v936_v36, 2  ;;  %v1069_v27 = vadd.f32 %v1068_v29, %v1067_v35 }
 0x154   :  { %v938_v39 = vadd.f32 %v937_v38, %v936_v36  ;;  %v1070_v62 = vrot.slane %v1069_v27, 2 }
 0x156   :  { %v939_v40 = vrot.slane %v938_v39, 1  ;;  %v1071_v41 = vadd.f32 %v1070_v62, %v1069_v27 }
 0x158   :  { %v1072_v1 = vrot.slane %v1071_v41, 1  ;;  %v940_v37 = vadd.f32 %v939_v40, %v938_v39 }
 0x15a   :  { %v1073_v33 = vadd.f32 %v1072_v1, %v1071_v41 }
 0x15c   :  { %v1075_v42 = vsel %vm1074_vm2, %v940_v37, %v1073_v33 }
 0x15d   :  { %1076 = vst [vmem:[%s2279_s5] sm:$0x3] %v1075_v42 }

// kernel: bottleneck_forward.5
= control target key start
LH: loop header
LB: loop body
LE: loop exit
PB: predicated region body
PF: predicated region fallthrough
CT: control target
= control target key end

     0   :  { %v5909_v0 = vmov 0.0   ;;  %vm854_vm0 = vcmask 1045504   ;;  %vm629_vm1 = vcmask 1046528   ;;  %s9377_s1 = inlined_call_operand.vmem [shape: f32[3,384,128], index: 1, kind: input, shape index: {}]   ;;  %s9378_s0 = inlined_call_operand.vmem [shape: f32[2,16,16,128], index: 0, kind: input, shape index: {}]   ;;  %s9379_s2 = inlined_call_operand.vmem [shape: f32[1,128], index: 2, kind: input, shape index: {}]   ;;  %s9380_s3 = inlined_call_operand.vmem [shape: f32[1,128], index: 3, kind: input, shape index: {}]   ;;  %s9381_s4 = inlined_call_operand.vmem [shape: f32[2,16,16,128], index: 4, kind: output, shape index: {}]  }
   0x1   :  { %1816 = vmatprep.subr.mxu0 %v5909_v0  ;;  %287 = vst [vmem:[#allocation2] sm:$0xff] %v5909_v0  ;;  %288 = vst [vmem:[#allocation2 + $0x8] sm:$0xff] %v5909_v0  ;;  %v4965_v1 = vld [vmem:[%s9377_s1 + $0x1f8] sm:$0xff]  ;;  %v4964_v3 = vld [vmem:[%s9377_s1 + $0x1f0] sm:$0xff] }
   0x2   :  { %289 = vst [vmem:[#allocation2 + $0x10] sm:$0x3] %v5909_v0  ;;  %290 = vst [vmem:[#allocation2 + $0x1b0] sm:$0xff] %v5909_v0  ;;  %v4997_v2 = vld [vmem:[%s9377_s1 + $0x2f8] sm:$0xff]  ;;  %1817 = vmatpush1.msra.mxu0 %v4965_v1  ;;  %v4996_v4 = vld [vmem:[%s9377_s1 + $0x2f0] sm:$0xff] }
   0x3   :  { %292 = vst [vmem:[#allocation2 + $0x1c0] sm:$0x3] %v5909_v0  ;;  %294 = vst [vmem:[#allocation2 + $0x198] sm:$0xff] %v5909_v0  ;;  %5670 = vmatprep.subr.mxu1 %v4997_v2  ;;  %1818 = vmatprep.subr.mxu0 %v5909_v0  ;;  %v4963_v5 = vld [vmem:[%s9377_s1 + $0x1e8] sm:$0xff]  ;;  %v4962_v7 = vld [vmem:[%s9377_s1 + $0x1e0] sm:$0xff] }
   0x4   :  { %296 = vst [vmem:[#allocation2 + $0x1a8] sm:$0x3] %v5909_v0  ;;  %297 = vst [vmem:[#allocation2 + $0x348] sm:$0xff] %v5909_v0  ;;  %5686 = vmatpush3.msra.mxu1 %v4997_v2  ;;  %v4995_v6 = vld [vmem:[%s9377_s1 + $0x2e8] sm:$0xff]  ;;  %1819 = vmatpush1.msra.mxu0 %v4964_v3  ;;  %v4994_v8 = vld [vmem:[%s9377_s1 + $0x2e0] sm:$0xff] }
   0x5   :  { %299 = vst [vmem:[#allocation2 + $0x358] sm:$0x3] %v5909_v0  ;;  %301 = vst [vmem:[#allocation2 + $0x18] sm:$0x1] %v5909_v0  ;;  %5671 = vmatprep.subr.mxu1 %v4996_v4  ;;  %1820 = vmatprep.subr.mxu0 %v5909_v0  ;;  %v4961_v9 = vld [vmem:[%s9377_s1 + $0x1d8] sm:$0xff]  ;;  %v4960_v11 = vld [vmem:[%s9377_s1 + $0x1d0] sm:$0xff] }
   0x6   :  { %302 = vst [vmem:[#allocation2 + $0x30] sm:$0x1] %v5909_v0  ;;  %303 = vst [vmem:[#allocation2 + $0x48] sm:$0x1] %v5909_v0  ;;  %5687 = vmatpush3.msra.mxu1 %v4996_v4  ;;  %1821 = vmatpush1.msra.mxu0 %v4963_v5  ;;  %v4993_v10 = vld [vmem:[%s9377_s1 + $0x2d8] sm:$0xff]  ;;  %v4992_v12 = vld [vmem:[%s9377_s1 + $0x2d0] sm:$0xff] }
   0x7   :  { %304 = vst [vmem:[#allocation2 + $0x60] sm:$0x1] %v5909_v0  ;;  %305 = vst [vmem:[#allocation2 + $0x78] sm:$0x1] %v5909_v0  ;;  %5672 = vmatprep.subr.mxu1 %v4995_v6  ;;  %1822 = vmatprep.subr.mxu0 %v5909_v0  ;;  %v4959_v13 = vld [vmem:[%s9377_s1 + $0x1c8] sm:$0xff]  ;;  %v41_v15 = vld [vmem:[%s9378_s0 + $0xc0] sm:$0xff] }
   0x8   :  { %306 = vst [vmem:[#allocation2 + $0x90] sm:$0x1] %v5909_v0  ;;  %307 = vst [vmem:[#allocation2 + $0xa8] sm:$0x1] %v5909_v0  ;;  %5688 = vmatpush3.msra.mxu1 %v4995_v6  ;;  %1823 = vmatpush1.msra.mxu0 %v4962_v7  ;;  %v4991_v14 = vld [vmem:[%s9377_s1 + $0x2c8] sm:$0xff]  ;;  %v4958_v19 = vld [vmem:[%s9377_s1 + $0x1c0] sm:$0xff] }
   0x9   :  { %308 = vst [vmem:[#allocation2 + $0xc0] sm:$0x1] %v5909_v0  ;;  %309 = vst [vmem:[#allocation2 + $0xd8] sm:$0x1] %v5909_v0  ;;  %5673 = vmatprep.subr.mxu1 %v4994_v8  ;;  %1824 = vmatprep.subr.mxu0 %v5909_v0  ;;  %v42_v16 = vld [vmem:[%s9378_s0 + $0xc8] sm:$0xff]  ;;  %v4990_v20 = vld [vmem:[%s9377_s1 + $0x2c0] sm:$0xff] }
   0xa   :  { %310 = vst [vmem:[#allocation2 + $0xf0] sm:$0x1] %v5909_v0  ;;  %311 = vst [vmem:[#allocation2 + $0x108] sm:$0x1] %v5909_v0  ;;  %5689 = vmatpush3.msra.mxu1 %v4994_v8  ;;  %1825 = vmatpush1.msra.mxu0 %v4961_v9  ;;  %v6073_v17 = vld [vmem:[%s9379_s2] ss:$0 sm:$0xff] }
   0xb   :  { %312 = vst [vmem:[#allocation2 + $0x120] sm:$0x1] %v5909_v0  ;;  %313 = vst [vmem:[#allocation2 + $0x138] sm:$0x1] %v5909_v0  ;;  %5674 = vmatprep.subr.mxu1 %v4993_v10  ;;  %1826 = vmatprep.subr.mxu0 %v5909_v0  ;;  %v6078_v18 = vld [vmem:[%s9380_s3] ss:$0 sm:$0xff]  ;;  %v112_v21 = vmul.f32 %v6073_v17, %v41_v15  ;;  %v113_v22 = vmul.f32 %v6073_v17, %v42_v16 }
   0xc   :  { %314 = vst [vmem:[#allocation2 + $0x150] sm:$0x1] %v5909_v0  ;;  %315 = vst [vmem:[#allocation2 + $0x168] sm:$0x1] %v5909_v0  ;;  %5690 = vmatpush3.msra.mxu1 %v4993_v10  ;;  %1827 = vmatpush1.msra.mxu0 %v4960_v11  ;;  %v43_v23 = vld [vmem:[%s9378_s0 + $0xd0] sm:$0xff]  ;;  %v44_v24 = vld [vmem:[%s9378_s0 + $0xd8] sm:$0xff] }
   0xd   :  { %316 = vst [vmem:[#allocation2 + $0x180] sm:$0x1] %v5909_v0  ;;  %319 = vst [vmem:[#allocation2 + $0x1c8] sm:$0x1] %v5909_v0  ;;  %5675 = vmatprep.subr.mxu1 %v4992_v12  ;;  %1828 = vmatprep.subr.mxu0 %v5909_v0  ;;  %v4957_v25 = vld [vmem:[%s9377_s1 + $0x1b8] sm:$0xff]  ;;  %v183_v27 = vadd.f32 %v6078_v18, %v112_v21  ;;  %v184_v28 = vadd.f32 %v6078_v18, %v113_v22  ;;  %v45_v30 = vld [vmem:[%s9378_s0 + $0xe0] sm:$0xff] }
   0xe   :  { %320 = vst [vmem:[#allocation2 + $0x1e0] sm:$0x1] %v5909_v0  ;;  %321 = vst [vmem:[#allocation2 + $0x1f8] sm:$0x1] %v5909_v0  ;;  %5691 = vmatpush3.msra.mxu1 %v4992_v12  ;;  %1829 = vmatpush1.msra.mxu0 %v4959_v13  ;;  %v4989_v26 = vld [vmem:[%s9377_s1 + $0x2b8] sm:$0xff]  ;;  %v114_v29 = vmul.f32 %v6073_v17, %v43_v23  ;;  %v115_v31 = vmul.f32 %v6073_v17, %v44_v24  ;;  %v46_v32 = vld [vmem:[%s9378_s0 + $0xe8] sm:$0xff] }
   0xf   :  { %322 = vst [vmem:[#allocation2 + $0x210] sm:$0x1] %v5909_v0  ;;  %323 = vst [vmem:[#allocation2 + $0x228] sm:$0x1] %v5909_v0  ;;  %5676 = vmatprep.subr.mxu1 %v4991_v14  ;;  %1830 = vmatprep.subr.mxu0 %v5909_v0  ;;  %v116_v33 = vmul.f32 %v6073_v17, %v45_v30  ;;  %v4956_v34 = vld [vmem:[%s9377_s1 + $0x1b0] sm:$0xff]  ;;  %v247_v36 = vmax.f32 %v183_v27, 0.0  ;;  %v117_v39 = vmul.f32 %v6073_v17, %v46_v32 }
  0x10   :  { %324 = vst [vmem:[#allocation2 + $0x240] sm:$0x1] %v5909_v0  ;;  %325 = vst [vmem:[#allocation2 + $0x258] sm:$0x1] %v5909_v0  ;;  %5692 = vmatpush3.msra.mxu1 %v4991_v14  ;;  %1831 = vmatpush1.msra.mxu0 %v4958_v19  ;;  %v4988_v35 = vld [vmem:[%s9377_s1 + $0x2b0] sm:$0xff]  ;;  %v248_v37 = vmax.f32 %v184_v28, 0.0  ;;  %v185_v38 = vadd.f32 %v6078_v18, %v114_v29  ;;  %v186_v42 = vadd.f32 %v6078_v18, %v115_v31 }
  0x11   :  { %326 = vst [vmem:[#allocation2 + $0x270] sm:$0x1] %v5909_v0  ;;  %327 = vst [vmem:[#allocation2 + $0x288] sm:$0x1] %v5909_v0  ;;  %5677 = vmatprep.subr.mxu1 %v4990_v20  ;;  %1832 = vmatprep.subr.mxu0 %v5909_v0  ;;  %v47_v40 = vld [vmem:[%s9378_s0 + $0xf0] sm:$0xff]  ;;  %v4955_v41 = vld [vmem:[%s9377_s1 + $0x1a8] sm:$0xff]  ;;  %v187_v43 = vadd.f32 %v6078_v18, %v116_v33  ;;  %v188_v48 = vadd.f32 %v6078_v18, %v117_v39 }
  0x12   :  { %328 = vst [vmem:[#allocation2 + $0x2a0] sm:$0x1] %v5909_v0  ;;  %329 = vst [vmem:[#allocation2 + $0x2b8] sm:$0x1] %v5909_v0  ;;  %5693 = vmatpush3.msra.mxu1 %v4990_v20  ;;  %1833 = vmatpush1.msra.mxu0 %v4957_v25  ;;  %v48_v44 = vld [vmem:[%s9378_s0 + $0xf8] sm:$0xff]  ;;  %v118_v45 = vmul.f32 %v6073_v17, %v47_v40  ;;  %v4987_v46 = vld [vmem:[%s9377_s1 + $0x2a8] sm:$0xff] }
  0x13   :  { %330 = vst [vmem:[#allocation2 + $0x2d0] sm:$0x1] %v5909_v0  ;;  %331 = vst [vmem:[#allocation2 + $0x2e8] sm:$0x1] %v5909_v0  ;;  %5678 = vmatprep.subr.mxu1 %v4989_v26  ;;  %1834 = vmatprep.subr.mxu0 %v5909_v0  ;;  %v249_v47 = vmax.f32 %v185_v38, 0.0  ;;  %v119_v49 = vmul.f32 %v6073_v17, %v48_v44  ;;  %v49_v50 = vld [vmem:[%s9378_s0 + $0x100] sm:$0xff] }
  0x14   :  { %332 = vst [vmem:[#allocation2 + $0x300] sm:$0x1] %v5909_v0  ;;  %333 = vst [vmem:[#allocation2 + $0x318] sm:$0x1] %v5909_v0  ;;  %5694 = vmatpush3.msra.mxu1 %v4989_v26  ;;  %v50_v51 = vld [vmem:[%s9378_s0 + $0x108] sm:$0xff]  ;;  %1835 = vmatpush1.msra.mxu0 %v4956_v34  ;;  %v4954_v52 = vld [vmem:[%s9377_s1 + $0x1a0] sm:$0xff]  ;;  %v189_v55 = vadd.f32 %v6078_v18, %v118_v45  ;;  %v120_v56 = vmul.f32 %v6073_v17, %v49_v50 }
  0x15   :  { %334 = vst [vmem:[#allocation2 + $0x330] sm:$0x1] %v5909_v0  ;;  %337 = vst [vmem:[#allocation2 + $0x29] sm:$0x1] %v5909_v0  ;;  %5679 = vmatprep.subr.mxu1 %v4988_v35  ;;  %v250_v53 = vmax.f32 %v186_v42, 0.0  ;;  %v251_v54 = vmax.f32 %v187_v43, 0.0  ;;  %1836 = vmatprep.subr.mxu0 %v5909_v0  ;;  %v190_v59 = vadd.f32 %v6078_v18, %v119_v49 }
  0x16   :  { %338 = vst [vmem:[#allocation2 + $0x41] sm:$0x1] %v5909_v0  ;;  %339 = vst [vmem:[#allocation2 + $0x59] sm:$0x1] %v5909_v0  ;;  %5695 = vmatpush3.msra.mxu1 %v4988_v35  ;;  %v4986_v57 = vld [vmem:[%s9377_s1 + $0x2a0] sm:$0xff]  ;;  %v252_v58 = vmax.f32 %v188_v48, 0.0  ;;  %v121_v60 = vmul.f32 %v6073_v17, %v50_v51  ;;  %1837 = vmatpush1.msra.mxu0 %v4955_v41  ;;  %v191_v2 = vadd.f32 %v6078_v18, %v120_v56 }
  0x17   :  { %340 = vst [vmem:[#allocation2 + $0x71] sm:$0x1] %v5909_v0  ;;  %341 = vst [vmem:[#allocation2 + $0x89] sm:$0x1] %v5909_v0  ;;  %v51_v61 = vld [vmem:[%s9378_s0 + $0x110] sm:$0xff]  ;;  %v52_v62 = vld [vmem:[%s9378_s0 + $0x118] sm:$0xff]  ;;  %5680 = vmatprep.subr.mxu1 %v4987_v46  ;;  %1838 = vmatprep.subr.mxu0 %v5909_v0 }
  0x18   :  { %342 = vst [vmem:[#allocation2 + $0xa1] sm:$0x1] %v5909_v0  ;;  %343 = vst [vmem:[#allocation2 + $0xb9] sm:$0x1] %v5909_v0  ;;  %v4953_v63 = vld [vmem:[%s9377_s1 + $0x198] sm:$0xff]  ;;  %v253_v1 = vmax.f32 %v189_v55, 0.0  ;;  %v122_v3 = vmul.f32 %v6073_v17, %v51_v61  ;;  %v123_v4 = vmul.f32 %v6073_v17, %v52_v62  ;;  %5696 = vmatpush3.msra.mxu1 %v4987_v46  ;;  %1839 = vmatpush1.msra.mxu0 %v4954_v52 }
  0x19   :  { %344 = vst [vmem:[#allocation2 + $0xd1] sm:$0x1] %v5909_v0  ;;  %345 = vst [vmem:[#allocation2 + $0xe9] sm:$0x1] %v5909_v0  ;;  %v4985_v5 = vld [vmem:[%s9377_s1 + $0x298] sm:$0xff]  ;;  %v254_v6 = vmax.f32 %v190_v59, 0.0  ;;  %v192_v7 = vadd.f32 %v6078_v18, %v121_v60  ;;  %5681 = vmatprep.subr.mxu1 %v4986_v57  ;;  %1840 = vmatprep.subr.mxu0 %v5909_v0 }
  0x1a   :  { %346 = vst [vmem:[#allocation2 + $0x101] sm:$0x1] %v5909_v0  ;;  %347 = vst [vmem:[#allocation2 + $0x119] sm:$0x1] %v5909_v0  ;;  %v53_v8 = vld [vmem:[%s9378_s0 + $0x120] sm:$0xff]  ;;  %v54_v9 = vld [vmem:[%s9378_s0 + $0x128] sm:$0xff]  ;;  %v193_v12 = vadd.f32 %v6078_v18, %v122_v3  ;;  %v194_v13 = vadd.f32 %v6078_v18, %v123_v4  ;;  %5697 = vmatpush3.msra.mxu1 %v4986_v57  ;;  %1841 = vmatpush1.msra.mxu0 %v4953_v63 }
  0x1b   :  { %348 = vst [vmem:[#allocation2 + $0x131] sm:$0x1] %v5909_v0  ;;  %349 = vst [vmem:[#allocation2 + $0x149] sm:$0x1] %v5909_v0  ;;  %v4952_v10 = vld [vmem:[%s9377_s1 + $0x190] sm:$0xff]  ;;  %v255_v11 = vmax.f32 %v191_v2, 0.0  ;;  %v124_v14 = vmul.f32 %v6073_v17, %v53_v8  ;;  %v125_v19 = vmul.f32 %v6073_v17, %v54_v9  ;;  %5682 = vmatprep.subr.mxu1 %v4985_v5  ;;  %1842 = vmatprep.subr.mxu0 %v5909_v0 }
  0x1c   :  { %350 = vst [vmem:[#allocation2 + $0x161] sm:$0x1] %v5909_v0  ;;  %351 = vst [vmem:[#allocation2 + $0x179] sm:$0x1] %v5909_v0  ;;  %v4984_v15 = vld [vmem:[%s9377_s1 + $0x290] sm:$0xff]  ;;  %v256_v16 = vmax.f32 %v192_v7, 0.0  ;;  %5698 = vmatpush3.msra.mxu1 %v4985_v5  ;;  %1843 = vmatpush1.msra.mxu0 %v4952_v10 }
  0x1d   :  { %352 = vst [vmem:[#allocation2 + $0x191] sm:$0x1] %v5909_v0  ;;  %355 = vst [vmem:[#allocation2 + $0x1d9] sm:$0x1] %v5909_v0  ;;  %v55_v20 = vld [vmem:[%s9378_s0 + $0x130] sm:$0xff]  ;;  %v56_v21 = vld [vmem:[%s9378_s0 + $0x138] sm:$0xff]  ;;  %v195_v27 = vadd.f32 %v6078_v18, %v124_v14  ;;  %v196_v33 = vadd.f32 %v6078_v18, %v125_v19  ;;  %5683 = vmatprep.subr.mxu1 %v4984_v15  ;;  %1844 = vmatprep.subr.mxu0 %v5909_v0 }
  0x1e   :  { %356 = vst [vmem:[#allocation2 + $0x1f1] sm:$0x1] %v5909_v0  ;;  %357 = vst [vmem:[#allocation2 + $0x209] sm:$0x1] %v5909_v0  ;;  %v257_v25 = vmax.f32 %v193_v12, 0.0  ;;  %v258_v26 = vmax.f32 %v194_v13, 0.0  ;;  %v126_v28 = vmul.f32 %v6073_v17, %v55_v20  ;;  %v127_v39 = vmul.f32 %v6073_v17, %v56_v21  ;;  %5699 = vmatpush3.msra.mxu1 %v4984_v15 }
  0x1f   :  { %358 = vst [vmem:[#allocation2 + $0x221] sm:$0x1] %v5909_v0  ;;  %359 = vst [vmem:[#allocation2 + $0x239] sm:$0x1] %v5909_v0  ;;  %v4951_v29 = vld [vmem:[%s9377_s1 + $0x188] sm:$0xff]  ;;  %v17_v34 = vld [vmem:[%s9378_s0] sm:$0xff] }
  0x20   :  { %360 = vst [vmem:[#allocation2 + $0x251] sm:$0x1] %v5909_v0  ;;  %361 = vst [vmem:[#allocation2 + $0x269] sm:$0x1] %v5909_v0  ;;  %v4983_v30 = vld [vmem:[%s9377_s1 + $0x288] sm:$0xff]  ;;  %v4950_v35 = vld [vmem:[%s9377_s1 + $0x180] sm:$0xff]  ;;  %v197_v40 = vadd.f32 %v6078_v18, %v126_v28  ;;  %1845 = vmatpush1.msra.mxu0 %v4951_v29  ;;  %v88_v48 = vmul.f32 %v6073_v17, %v17_v34 }
  0x21   :  { %362 = vst [vmem:[#allocation2 + $0x281] sm:$0x1] %v5909_v0  ;;  %363 = vst [vmem:[#allocation2 + $0x299] sm:$0x1] %v5909_v0  ;;  %v259_v38 = vmax.f32 %v195_v27, 0.0  ;;  %v18_v41 = vld [vmem:[%s9378_s0 + $0x8] sm:$0xff]  ;;  %5684 = vmatprep.subr.mxu1 %v4983_v30  ;;  %1846 = vmatprep.subr.mxu0 %v5909_v0 }
  0x22   :  { %364 = vst [vmem:[#allocation2 + $0x2b1] sm:$0x1] %v5909_v0  ;;  %365 = vst [vmem:[#allocation2 + $0x2c9] sm:$0x1] %v5909_v0  ;;  %v4982_v42 = vld [vmem:[%s9377_s1 + $0x280] sm:$0xff]  ;;  %v260_v45 = vmax.f32 %v196_v33, 0.0  ;;  %5700 = vmatpush3.msra.mxu1 %v4983_v30  ;;  %1847 = vmatpush1.msra.mxu0 %v4950_v35  ;;  %v159_v2 = vadd.f32 %v6078_v18, %v88_v48 }
  0x23   :  { %366 = vst [vmem:[#allocation2 + $0x2e1] sm:$0x1] %v5909_v0  ;;  %367 = vst [vmem:[#allocation2 + $0x2f9] sm:$0x1] %v5909_v0  ;;  %v4981_v49 = vld [vmem:[%s9377_s1 + $0x278] sm:$0xff]  ;;  %v261_v52 = vmax.f32 %v197_v40, 0.0  ;;  %5685 = vmatprep.subr.mxu1 %v4982_v42  ;;  %1848 = vmatprep.subr.mxu0 %v5909_v0 }
  0x24   :  { %368 = vst [vmem:[#allocation2 + $0x311] sm:$0x1] %v5909_v0  ;;  %369 = vst [vmem:[#allocation2 + $0x329] sm:$0x1] %v5909_v0  ;;  %5701 = vmatpush3.msra.mxu1 %v4982_v42  ;;  %v4980_v60 = vld [vmem:[%s9377_s1 + $0x270] sm:$0xff]  ;;  %v1094_v61 = vld [vmem:[%s9377_s1 + $0x78] sm:$0xff]  ;;  %1849 = vmatpush2.msra.mxu0 %v4981_v49 }
  0x25   :  { %370 = vst [vmem:[#allocation2 + $0x341] sm:$0x1] %v5909_v0  ;;  %300 = vst [vmem:[#allocation2] sm:$0x1] %v5909_v0  ;;  %v58_v4 = vld [vmem:[%s9378_s0 + $0x148] sm:$0xff]  ;;  %1850 = vmatprep.subr.mxu0 %v5909_v0  ;;  %2586 = vmatprep.subr.mxu1 %v5909_v0  ;;  %v1093_v12 = vld [vmem:[%s9377_s1 + $0x70] sm:$0xff] }
  0x26   :  { %317 = vst [vmem:[#allocation2 + $0x198] sm:$0x1] %v5909_v0  ;;  %318 = vst [vmem:[#allocation2 + $0x1b0] sm:$0x1] %v5909_v0  ;;  %v4979_v7 = vld [vmem:[%s9377_s1 + $0x268] sm:$0xff]  ;;  %1851 = vmatpush2.msra.mxu0 %v4980_v60  ;;  %v223_v14 = vmax.f32 %v159_v2, 0.0  ;;  %v129_v21 = vmul.f32 %v6073_v17, %v58_v4 }
  0x27   :  { %335 = vst [vmem:[#allocation2 + $0x348] sm:$0x1] %v5909_v0  ;;  %336 = vst [vmem:[#allocation2 + $0x11] sm:$0x1] %v5909_v0  ;;  %v59_v15 = vld [vmem:[%s9378_s0 + $0x150] sm:$0xff]  ;;  %1852 = vmatprep.subr.mxu0 %v5909_v0  ;;  %v1092_v29 = vld [vmem:[%s9377_s1 + $0x68] sm:$0xff] }
  0x28   :  { %353 = vst [vmem:[#allocation2 + $0x1a9] sm:$0x1] %v5909_v0  ;;  %354 = vst [vmem:[#allocation2 + $0x1c1] sm:$0x1] %v5909_v0  ;;  %1853 = vmatpush2.msra.mxu0 %v4979_v7  ;;  %v4977_v33 = vld [vmem:[%s9377_s1 + $0x258] sm:$0xff] }
  0x29   :  { %371 = vst [vmem:[#allocation2 + $0x359] sm:$0x1] %v5909_v0  ;;  %397 = vst [vmem:[#allocation2 + $0x139] sm:$0xff] %v247_v36  ;;  %1854 = vmatprep.subr.mxu0 %v5909_v0  ;;  %v1090_v7 = vld [vmem:[%s9377_s1 + $0x58] sm:$0xff] }
  0x2a   :  { %398 = vst [vmem:[#allocation2 + $0x141] sm:$0xff] %v248_v37  ;;  %399 = vst [vmem:[#allocation2 + $0x151] sm:$0xff] %v249_v47  ;;  %v198_v47 = vadd.f32 %v6078_v18, %v127_v39  ;;  %v61_v39 = vld [vmem:[%s9378_s0 + $0x160] sm:$0xff] }
  0x2b   :  { %400 = vst [vmem:[#allocation2 + $0x159] sm:$0xff] %v250_v53  ;;  %401 = vst [vmem:[#allocation2 + $0x169] sm:$0xff] %v251_v54  ;;  %v89_v53 = vmul.f32 %v6073_v17, %v18_v41  ;;  %v57_v54 = vld [vmem:[%s9378_s0 + $0x140] sm:$0xff]  ;;  %v4976_v41 = vld [vmem:[%s9377_s1 + $0x250] sm:$0xff] }
  0x2c   :  { %402 = vst [vmem:[#allocation2 + $0x171] sm:$0xff] %v252_v58  ;;  %403 = vst [vmem:[#allocation2 + $0x181] sm:$0xff] %v253_v1  ;;  %v262_v59 = vmax.f32 %v198_v47, 0.0  ;;  %v128_v5 = vmul.f32 %v6073_v17, %v57_v54 }
  0x2d   :  { %404 = vst [vmem:[#allocation2 + $0x189] sm:$0xff] %v254_v6  ;;  %405 = vst [vmem:[#allocation2 + $0x1c9] sm:$0xff] %v255_v11  ;;  %v160_v3 = vadd.f32 %v6078_v18, %v89_v53 }
  0x2e   :  { %406 = vst [vmem:[#allocation2 + $0x1d1] sm:$0xff] %v256_v16  ;;  %407 = vst [vmem:[#allocation2 + $0x1e1] sm:$0xff] %v257_v25  ;;  %v4978_v25 = vld [vmem:[%s9377_s1 + $0x260] sm:$0xff]  ;;  %v199_v27 = vadd.f32 %v6078_v18, %v128_v5 }
  0x2f   :  { %408 = vst [vmem:[#allocation2 + $0x1e9] sm:$0xff] %v258_v26  ;;  %409 = vst [vmem:[#allocation2 + $0x1f9] sm:$0xff] %v259_v38  ;;  %v224_v20 = vmax.f32 %v160_v3, 0.0  ;;  %1855 = vmatpush2.msra.mxu0 %v4978_v25 }
  0x30   :  { %v1163_v22 = vld [vmem:[#allocation2 + $0x138] sm:$0xff]  ;;  %410 = vst [vmem:[#allocation2 + $0x201] sm:$0xff] %v260_v45  ;;  %411 = vst [vmem:[#allocation2 + $0x211] sm:$0xff] %v261_v52  ;;  %v263_v35 = vmax.f32 %v199_v27, 0.0  ;;  %1856 = vmatprep.subr.mxu0 %v5909_v0  ;;  %v62_v52 = vld [vmem:[%s9378_s0 + $0x168] sm:$0xff] }
  0x31   :  { %v1164_v23 = vld [vmem:[#allocation2 + $0x140] sm:$0xff]  ;;  %v1165_v24 = vld [vmem:[#allocation2 + $0x148] sm:$0x3]  ;;  %v1603_v31 = vrot.slane %v1163_v22, 2  ;;  %v1166_v37 = vld [vmem:[#allocation2 + $0x150] sm:$0xff]  ;;  %412 = vst [vmem:[#allocation2 + $0x219] sm:$0xff] %v262_v59  ;;  %1857 = vmatpush2.msra.mxu0 %v4977_v33  ;;  %v133_v4 = vmul.f32 %v6073_v17, %v62_v52 }
  0x32   :  { %v1604_v32 = vrot.slane %v1164_v23, 2  ;;  %v1606_v36 = vrot.slane %v1165_v24, 2  ;;  %v1167_v43 = vld [vmem:[#allocation2 + $0x158] sm:$0xff]  ;;  %v1168_v44 = vld [vmem:[#allocation2 + $0x160] sm:$0x3]  ;;  %v1608_v50 = vrot.slane %v1166_v37, 2  ;;  %1858 = vmatprep.subr.mxu0 %v5909_v0 }
  0x33   :  { %v1609_v51 = vrot.slane %v1167_v43, 2  ;;  %v1611_v56 = vrot.slane %v1168_v44, 2  ;;  %v1169_v57 = vld [vmem:[#allocation2 + $0x168] sm:$0xff]  ;;  %v6234_v58 = vld [vmem:[#allocation2 + $0x170] sm:$0xff]  ;;  %v1171_v62 = vld [vmem:[#allocation2 + $0x178] sm:$0x3]  ;;  %1859 = vmatpush2.msra.mxu0 %v4976_v41 }
  0x34   :  { %v1605_v46 = vsel %vm854_vm0, %v1603_v31, %v1604_v32  ;;  %v1607_v55 = vsel %vm854_vm0, %v1604_v32, %v1606_v36  ;;  %v1172_v63 = vld [vmem:[#allocation2 + $0x180] sm:$0xff]  ;;  %v6243_v1 = vld [vmem:[#allocation2 + $0x188] sm:$0xff]  ;;  %v1613_v8 = vrot.slane %v1169_v57, 2  ;;  %v1614_v9 = vrot.slane %v6234_v58, 2  ;;  %v1174_v10 = vld [vmem:[#allocation2 + $0x190] sm:$0x3]  ;;  %1860 = vmatprep.subr.mxu0 %v5909_v0 }
  0x35   :  { %5354 = vmatprep.mubr.f32.mxu1 %v1605_v46  ;;  %v1610_v6 = vsel %vm854_vm0, %v1608_v50, %v1609_v51  ;;  %v1612_v11 = vsel %vm854_vm0, %v1609_v51, %v1611_v56  ;;  %v1616_v13 = vrot.slane %v1171_v62, 2  ;;  %v1618_v16 = vrot.slane %v1172_v63, 2  ;;  %v60_v22 = vld [vmem:[%s9378_s0 + $0x158] sm:$0xff]  ;;  %v19_v23 = vld [vmem:[%s9378_s0 + $0x10] sm:$0xff]  ;;  %373 = vst [vmem:[#allocation2 + $0x19] sm:$0xff] %v223_v14  ;;  %v6286_v30 = vld [vmem:[#allocation2 + $0x1c8] sm:$0xff] }
  0x36   :  { %5355 = vmatmul.mubr.f32.vlgmr.msra.gmra.mxu1 %v1607_v55  ;;  %v1619_v19 = vrot.slane %v6243_v1, 2  ;;  %v20_v24 = vld [vmem:[%s9378_s0 + $0x18] sm:$0xff]  ;;  %v1621_v26 = vrot.slane %v1174_v10, 2  ;;  %v1615_v28 = vsel %vm854_vm0, %v1613_v8, %v1614_v9  ;;  %374 = vst [vmem:[#allocation2 + $0x21] sm:$0xff] %v224_v20  ;;  %v200_v31 = vadd.f32 %v6078_v18, %v129_v21  ;;  %v6294_v34 = vld [vmem:[#allocation2 + $0x1d0] sm:$0xff]  ;;  %v6310_v44 = vld [vmem:[#allocation2 + $0x1e0] sm:$0xff] }
  0x37   :  { %2587 = vmatpush1.msra.mxu1 %v1094_v61  ;;  %5357 = vmatprep.mubr.f32.mxu1 %v1610_v6  ;;  %v130_v32 = vmul.f32 %v6073_v17, %v59_v15  ;;  %v131_v36 = vmul.f32 %v6073_v17, %v60_v22  ;;  %v90_v37 = vmul.f32 %v6073_v17, %v19_v23  ;;  %v6308_v43 = vld [vmem:[#allocation2 + $0x1d8] sm:$0x3]  ;;  %v1091_v46 = vld [vmem:[%s9377_s1 + $0x60] sm:$0xff]  ;;  %v1623_v48 = vrot.slane %v6286_v30, 2  ;;  %v6318_v49 = vld [vmem:[#allocation2 + $0x1e8] sm:$0xff] }
  0x38   :  { %2588 = vmatprep.subr.mxu1 %v5909_v0  ;;  %v91_v38 = vmul.f32 %v6073_v17, %v20_v24  ;;  %v1617_v40 = vsel %vm854_vm0, %v1614_v9, %v1616_v13  ;;  %v1620_v42 = vsel %vm854_vm0, %v1618_v16, %v1619_v19  ;;  %v264_v45 = vmax.f32 %v200_v31, 0.0  ;;  %413 = vst [vmem:[#allocation2 + $0x229] sm:$0xff] %v263_v35  ;;  %v63_v57 = vld [vmem:[%s9378_s0 + $0x170] sm:$0xff]  ;;  %v64_v58 = vld [vmem:[%s9378_s0 + $0x178] sm:$0xff]  ;;  %v21_v59 = vld [vmem:[%s9378_s0 + $0x20] sm:$0xff] }
  0x39   :  { %2589 = vmatpush1.msra.mxu1 %v1093_v12  ;;  %v1622_v47 = vsel %vm854_vm0, %v1619_v19, %v1621_v26  ;;  %v201_v50 = vadd.f32 %v6078_v18, %v130_v32  ;;  %v202_v51 = vadd.f32 %v6078_v18, %v131_v36  ;;  %v1624_v53 = vrot.slane %v6294_v34, 2  ;;  %v4975_v1 = vld [vmem:[%s9377_s1 + $0x248] sm:$0xff]  ;;  %v6355_v9 = vld [vmem:[#allocation2 + $0x1f0] sm:$0x3]  ;;  %v4974_v13 = vld [vmem:[%s9377_s1 + $0x240] sm:$0xff] }
  0x3a   :  { %5358 = vmatmul.mubr.f32.gmra.mxu1 %v1612_v11  ;;  %2590 = vmatprep.subr.mxu1 %v5909_v0  ;;  %414 = vst [vmem:[#allocation2 + $0x231] sm:$0xff] %v264_v45  ;;  %v161_v54 = vadd.f32 %v6078_v18, %v90_v37  ;;  %v162_v55 = vadd.f32 %v6078_v18, %v91_v38  ;;  %v1626_v60 = vrot.slane %v6308_v43, 2  ;;  %v1628_v61 = vrot.slane %v6310_v44, 2  ;;  %v22_v6 = vld [vmem:[%s9378_s0 + $0x28] sm:$0xff]  ;;  %v1089_v15 = vld [vmem:[%s9377_s1 + $0x50] sm:$0xff]  ;;  %v4973_v16 = vld [vmem:[%s9377_s1 + $0x238] sm:$0xff] }
  0x3b   :  { %5360 = vmatprep.mubr.f32.mxu1 %v1615_v28  ;;  %2591 = vmatpush1.msra.mxu1 %v1092_v29  ;;  %v132_v56 = vmul.f32 %v6073_v17, %v61_v39  ;;  %v265_v62 = vmax.f32 %v201_v50, 0.0  ;;  %v266_v63 = vmax.f32 %v202_v51, 0.0  ;;  %v1629_v8 = vrot.slane %v6318_v49, 2  ;;  %v6372_v20 = vld [vmem:[#allocation2 + $0x1f8] sm:$0xff]  ;;  %v6374_v21 = vld [vmem:[#allocation2 + $0x200] sm:$0xff]  ;;  %v66_v32 = vld [vmem:[%s9378_s0 + $0x188] sm:$0xff] }
  0x3c   :  { %2592 = vmatprep.subr.mxu1 %v5909_v0  ;;  %v225_v2 = vmax.f32 %v161_v54, 0.0  ;;  %v226_v3 = vmax.f32 %v162_v55, 0.0  ;;  %v134_v10 = vmul.f32 %v6073_v17, %v63_v57  ;;  %v135_v11 = vmul.f32 %v6073_v17, %v64_v58  ;;  %1861 = vmatpush2.msra.mxu0 %v4975_v1  ;;  %v65_v26 = vld [vmem:[%s9378_s0 + $0x180] sm:$0xff]  ;;  %v1183_v29 = vld [vmem:[#allocation2 + $0x208] sm:$0x3]  ;;  %v67_v33 = vld [vmem:[%s9378_s0 + $0x190] sm:$0xff] }
  0x3d   :  { %v203_v5 = vadd.f32 %v6078_v18, %v132_v56  ;;  %2593 = vmatpush1.msra.mxu1 %v1091_v46  ;;  %415 = vst [vmem:[#allocation2 + $0x241] sm:$0xff] %v265_v62  ;;  %416 = vst [vmem:[#allocation2 + $0x249] sm:$0xff] %v266_v63  ;;  %v92_v12 = vmul.f32 %v6073_v17, %v21_v59  ;;  %v1625_v14 = vsel %vm854_vm0, %v1623_v48, %v1624_v53  ;;  %v68_v38 = vld [vmem:[%s9378_s0 + $0x198] sm:$0xff]  ;;  %v1088_v39 = vld [vmem:[%s9377_s1 + $0x48] sm:$0xff] }
  0x3e   :  { %5361 = vmatmul.mubr.f32.gmra.mxu1 %v1617_v40  ;;  %2594 = vmatprep.subr.mxu1 %v5909_v0  ;;  %375 = vst [vmem:[#allocation2 + $0x31] sm:$0xff] %v225_v2  ;;  %376 = vst [vmem:[#allocation2 + $0x39] sm:$0xff] %v226_v3  ;;  %v204_v19 = vadd.f32 %v6078_v18, %v133_v4  ;;  %v205_v23 = vadd.f32 %v6078_v18, %v134_v10  ;;  %v1631_v28 = vrot.slane %v6355_v9, 2  ;;  %v4972_v44 = vld [vmem:[%s9377_s1 + $0x230] sm:$0xff]  ;;  %v4971_v45 = vld [vmem:[%s9377_s1 + $0x228] sm:$0xff] }
  0x3f   :  { %5363 = vmatprep.mubr.f32.mxu1 %v1620_v42  ;;  %v267_v22 = vmax.f32 %v203_v5, 0.0  ;;  %v206_v24 = vadd.f32 %v6078_v18, %v135_v11  ;;  %v93_v25 = vmul.f32 %v6073_v17, %v22_v6  ;;  %2595 = vmatpush1.msra.mxu1 %v1090_v7  ;;  %v1627_v27 = vsel %vm854_vm0, %v1624_v53, %v1626_v60  ;;  %v1087_v51 = vld [vmem:[%s9377_s1 + $0x40] sm:$0xff]  ;;  %v6419_v52 = vld [vmem:[#allocation2 + $0x210] sm:$0xff]  ;;  %v6421_v53 = vld [vmem:[#allocation2 + $0x218] sm:$0xff] }
  0x40   :  { %1862 = vmatprep.subr.mxu0 %v5909_v0  ;;  %v268_v30 = vmax.f32 %v204_v19, 0.0  ;;  %v163_v31 = vadd.f32 %v6078_v18, %v92_v12  ;;  %2596 = vmatprep.subr.mxu1 %v5909_v0  ;;  %v1630_v34 = vsel %vm854_vm0, %v1628_v61, %v1629_v8  ;;  %v269_v35 = vmax.f32 %v205_v23, 0.0  ;;  %v4970_v57 = vld [vmem:[%s9377_s1 + $0x220] sm:$0xff]  ;;  %v6434_v59 = vld [vmem:[#allocation2 + $0x18] sm:$0xff]  ;;  %v23_v61 = vld [vmem:[%s9378_s0 + $0x30] sm:$0xff] }
  0x41   :  { %1863 = vmatpush2.msra.mxu0 %v4974_v13  ;;  %417 = vst [vmem:[#allocation2 + $0x259] sm:$0xff] %v267_v22  ;;  %v270_v36 = vmax.f32 %v206_v24, 0.0  ;;  %v164_v37 = vadd.f32 %v6078_v18, %v93_v25  ;;  %v1633_v40 = vrot.slane %v6372_v20, 2  ;;  %v1634_v41 = vrot.slane %v6374_v21, 2  ;;  %2597 = vmatpush1.msra.mxu1 %v1089_v15  ;;  %v6432_v58 = vld [vmem:[#allocation2 + $0x220] sm:$0x3] }
  0x42   :  { %5364 = vmatmul.mubr.f32.gmra.mxu1 %v1622_v47  ;;  %1864 = vmatprep.subr.mxu0 %v5909_v0  ;;  %418 = vst [vmem:[#allocation2 + $0x261] sm:$0xff] %v268_v30  ;;  %v227_v42 = vmax.f32 %v163_v31, 0.0  ;;  %v136_v43 = vmul.f32 %v6073_v17, %v65_v26  ;;  %v1636_v46 = vrot.slane %v1183_v29, 2  ;;  %419 = vst [vmem:[#allocation2 + $0x271] sm:$0xff] %v269_v35  ;;  %v6441_v62 = vld [vmem:[#allocation2 + $0x20] sm:$0xff]  ;;  %v24_v3 = vld [vmem:[%s9378_s0 + $0x38] sm:$0xff] }
  0x43   :  { %5366 = vmatprep.mubr.f32.mxu1 %v1625_v14  ;;  %1865 = vmatpush2.msra.mxu0 %v4973_v16  ;;  %420 = vst [vmem:[#allocation2 + $0x279] sm:$0xff] %v270_v36  ;;  %v228_v47 = vmax.f32 %v164_v37, 0.0  ;;  %v137_v48 = vmul.f32 %v6073_v17, %v66_v32  ;;  %v138_v50 = vmul.f32 %v6073_v17, %v67_v33  ;;  %v1129_v63 = vld [vmem:[#allocation2 + $0x28] sm:$0x3]  ;;  %v1086_v4 = vld [vmem:[%s9377_s1 + $0x38] sm:$0xff]  ;;  %v1638_v6 = vrot.slane %v6419_v52, 2 }
  0x44   :  { %2598 = vmatprep.subr.mxu1 %v5909_v0  ;;  %377 = vst [vmem:[#allocation2 + $0x49] sm:$0xff] %v227_v42  ;;  %v207_v54 = vadd.f32 %v6078_v18, %v136_v43  ;;  %v139_v55 = vmul.f32 %v6073_v17, %v68_v38  ;;  %1866 = vmatprep.subr.mxu0 %v5909_v0  ;;  %v1639_v7 = vrot.slane %v6421_v53, 2  ;;  %v69_v9 = vld [vmem:[%s9378_s0 + $0x1a0] sm:$0xff]  ;;  %v70_v10 = vld [vmem:[%s9378_s0 + $0x1a8] sm:$0xff]  ;;  %v1641_v11 = vrot.slane %v6432_v58, 2  ;;  %v1188_v13 = vld [vmem:[#allocation2 + $0x230] sm:$0xff] }
  0x45   :  { %2599 = vmatpush1.msra.mxu1 %v1088_v39  ;;  %v1632_v56 = vsel %vm854_vm0, %v1629_v8, %v1631_v28  ;;  %378 = vst [vmem:[#allocation2 + $0x51] sm:$0xff] %v228_v47  ;;  %v208_v60 = vadd.f32 %v6078_v18, %v137_v48  ;;  %1867 = vmatpush2.msra.mxu0 %v4972_v44  ;;  %v1187_v12 = vld [vmem:[#allocation2 + $0x228] sm:$0xff]  ;;  %v1189_v14 = vld [vmem:[#allocation2 + $0x238] sm:$0x3]  ;;  %v1319_v21 = vrot.slane %v6434_v59, 1  ;;  %v6470_v22 = vrot.slane %v6441_v62, 1 }
  0x46   :  { %5367 = vmatmul.mubr.f32.gmra.mxu1 %v1627_v27  ;;  %v1635_v49 = vsel %vm854_vm0, %v1633_v40, %v1634_v41  ;;  %v271_v1 = vmax.f32 %v207_v54, 0.0  ;;  %v209_v2 = vadd.f32 %v6078_v18, %v138_v50  ;;  %1868 = vmatprep.subr.mxu0 %v5909_v0  ;;  %v1637_v5 = vsel %vm854_vm0, %v1634_v41, %v1636_v46  ;;  %v4969_v20 = vld [vmem:[%s9377_s1 + $0x218] sm:$0xff]  ;;  %v1085_v28 = vld [vmem:[%s9377_s1 + $0x30] sm:$0xff]  ;;  %v6488_v35 = vld [vmem:[#allocation2 + $0x240] sm:$0xff] }
  0x47   :  { %5369 = vmatprep.mubr.f32.mxu1 %v1630_v34  ;;  %2600 = vmatprep.subr.mxu1 %v5909_v0  ;;  %v272_v8 = vmax.f32 %v208_v60, 0.0  ;;  %v210_v15 = vadd.f32 %v6078_v18, %v139_v55  ;;  %v94_v19 = vmul.f32 %v6073_v17, %v23_v61  ;;  %v1322_v23 = vrot.slane %v1129_v63, 1  ;;  %v4968_v29 = vld [vmem:[%s9377_s1 + $0x210] sm:$0xff]  ;;  %v6494_v38 = vld [vmem:[#allocation2 + $0x8] sm:$0xff]  ;;  %v72_v44 = vld [vmem:[%s9378_s0 + $0x1b8] sm:$0xff] }
  0x48   :  { %1869 = vmatpush2.msra.mxu0 %v4971_v45  ;;  %421 = vst [vmem:[#allocation2 + $0x289] sm:$0xff] %v271_v1  ;;  %v273_v16 = vmax.f32 %v209_v2, 0.0  ;;  %2601 = vmatpush1.msra.mxu1 %v1087_v51  ;;  %v95_v24 = vmul.f32 %v6073_v17, %v24_v3  ;;  %v140_v26 = vmul.f32 %v6073_v17, %v69_v9  ;;  %v1643_v30 = vrot.slane %v1187_v12, 2  ;;  %v71_v37 = vld [vmem:[%s9378_s0 + $0x1b0] sm:$0xff]  ;;  %v4967_v39 = vld [vmem:[%s9377_s1 + $0x208] sm:$0xff]  ;;  %v4966_v45 = vld [vmem:[%s9377_s1 + $0x200] sm:$0xff] }
  0x49   :  { %1870 = vmatprep.subr.mxu0 %v5909_v0  ;;  %422 = vst [vmem:[#allocation2 + $0x291] sm:$0xff] %v272_v8  ;;  %2602 = vmatprep.subr.mxu1 %v5909_v0  ;;  %v165_v25 = vadd.f32 %v6078_v18, %v94_v19  ;;  %v141_v27 = vmul.f32 %v6073_v17, %v70_v10  ;;  %v1644_v31 = vrot.slane %v1188_v13, 2  ;;  %v1646_v32 = vrot.slane %v1189_v14, 2  ;;  %v6509_v43 = vld [vmem:[#allocation2 + $0x248] sm:$0xff]  ;;  %v6518_v46 = vld [vmem:[#allocation2 + $0x250] sm:$0x3] }
  0x4a   :  { %5370 = vmatmul.mubr.f32.gmra.mxu1 %v1632_v56  ;;  %1871 = vmatpush2.msra.mxu0 %v4970_v57  ;;  %423 = vst [vmem:[#allocation2 + $0x2a1] sm:$0xff] %v273_v16  ;;  %v274_v33 = vmax.f32 %v210_v15, 0.0  ;;  %v1640_v34 = vsel %vm854_vm0, %v1638_v6, %v1639_v7  ;;  %v166_v36 = vadd.f32 %v6078_v18, %v95_v24  ;;  %v6520_v47 = vld [vmem:[#allocation2 + $0x30] sm:$0xff]  ;;  %v25_v53 = vld [vmem:[%s9378_s0 + $0x40] sm:$0xff]  ;;  %v1648_v56 = vrot.slane %v6488_v35, 2  ;;  %v6533_v57 = vld [vmem:[#allocation2 + $0x38] sm:$0xff] }
  0x4b   :  { %2603 = vmatpush1.msra.mxu1 %v1086_v4  ;;  %1872 = vmatprep.subr.mxu0 %v5909_v0  ;;  %v1084_v0 = vld [vmem:[%s9377_s1 + $0x28] sm:$0xff]  ;;  %v1642_v40 = vsel %vm854_vm0, %v1639_v7, %v1641_v11  ;;  %v6503_v41 = vsel %vm629_vm1, %v1319_v21, %v6470_v22  ;;  %v6507_v42 = vsel %vm629_vm1, %v6470_v22, %v1322_v23  ;;  %v229_v48 = vmax.f32 %v165_v25, 0.0  ;;  %v73_v61 = vld [vmem:[%s9378_s0 + $0x1c0] sm:$0xff]  ;;  %v6544_v63 = vld [vmem:[#allocation2 + $0x258] sm:$0xff] }
  0x4c   :  { %5372 = vmatprep.mubr.f32.mxu1 %v1635_v49  ;;  %1873 = vmatpush2.msra.mxu0 %v4969_v20  ;;  %424 = vst [vmem:[#allocation2 + $0x2a9] sm:$0xff] %v274_v33  ;;  %v230_v50 = vmax.f32 %v166_v36, 0.0  ;;  %v211_v51 = vadd.f32 %v6078_v18, %v140_v26  ;;  %v212_v52 = vadd.f32 %v6078_v18, %v141_v27  ;;  %v26_v60 = vld [vmem:[%s9378_s0 + $0x48] sm:$0xff]  ;;  %v1649_v49 = vrot.slane %v6509_v43, 2  ;;  %v6546_v1 = vld [vmem:[#allocation2 + $0x40] sm:$0x3] }
  0x4d   :  { %2604 = vmatprep.subr.mxu1 %v6494_v38  ;;  %1874 = vmatprep.subr.mxu0 %v6494_v38  ;;  %v1645_v54 = vsel %vm854_vm0, %v1643_v30, %v1644_v31  ;;  %v6530_v55 = vsel %vm854_vm0, %v1644_v31, %v1646_v32  ;;  %v142_v58 = vmul.f32 %v6073_v17, %v71_v37  ;;  %v1651_v6 = vrot.slane %v6518_v46, 2  ;;  %v74_v10 = vld [vmem:[%s9378_s0 + $0x1c8] sm:$0xff]  ;;  %v6563_v12 = vld [vmem:[#allocation2 + $0x260] sm:$0xff]  ;;  %v75_v16 = vld [vmem:[%s9378_s0 + $0x1d0] sm:$0xff] }
  0x4e   :  { %5373 = vmatmul.mubr.f32.gmra.mxu1 %v1637_v5  ;;  %1875 = vmatpush2.msra.mxu0 %v4968_v29  ;;  %379 = vst [vmem:[#allocation2 + $0x61] sm:$0xff] %v229_v48  ;;  %380 = vst [vmem:[#allocation2 + $0x69] sm:$0xff] %v230_v50  ;;  %v275_v2 = vmax.f32 %v211_v51, 0.0  ;;  %v276_v3 = vmax.f32 %v212_v52, 0.0  ;;  %v143_v4 = vmul.f32 %v6073_v17, %v72_v44  ;;  %v1083_v5 = vld [vmem:[%s9377_s1 + $0x20] sm:$0xff]  ;;  %v1324_v7 = vrot.slane %v6520_v47, 1 }
  0x4f   :  { %2605 = vmatpush1.msra.mxu1 %v1085_v28  ;;  %1876 = vmatprep.subr.mxu0 %v6494_v38  ;;  %v213_v8 = vadd.f32 %v6078_v18, %v142_v58  ;;  %v96_v9 = vmul.f32 %v6073_v17, %v25_v53  ;;  %v6561_v11 = vrot.slane %v6533_v57, 1  ;;  %v97_v14 = vmul.f32 %v6073_v17, %v26_v60  ;;  %v76_v24 = vld [vmem:[%s9378_s0 + $0x1d8] sm:$0xff]  ;;  %v6593_v33 = vld [vmem:[#allocation2 + $0x268] sm:$0x3]  ;;  %v27_v44 = vld [vmem:[%s9378_s0 + $0x50] sm:$0xff] }
  0x50   :  { %2606 = vmatprep.subr.mxu1 %v6494_v38  ;;  %5375 = vmatprep.mubr.f32.mxu1 %v1640_v34  ;;  %425 = vst [vmem:[#allocation2 + $0x2b9] sm:$0xff] %v275_v2  ;;  %426 = vst [vmem:[#allocation2 + $0x2c1] sm:$0xff] %v276_v3  ;;  %v214_v13 = vadd.f32 %v6078_v18, %v143_v4  ;;  %v144_v15 = vmul.f32 %v6073_v17, %v73_v61  ;;  %v1653_v19 = vrot.slane %v6544_v63, 2  ;;  %v1082_v25 = vld [vmem:[%s9377_s1 + $0x18] sm:$0xff]  ;;  %v6595_v34 = vld [vmem:[#allocation2 + $0x270] sm:$0xff] }
  0x51   :  { %2607 = vmatpush1.msra.mxu1 %v1084_v0  ;;  %1877 = vmatpush2.msra.mxu0 %v4967_v39  ;;  %v1327_v20 = vrot.slane %v6546_v1, 1  ;;  %v277_v21 = vmax.f32 %v213_v8, 0.0  ;;  %v167_v23 = vadd.f32 %v6078_v18, %v96_v9  ;;  %v168_v27 = vadd.f32 %v6078_v18, %v97_v14  ;;  %v5704_v30 = vld [vmem:[%s9377_s1 + $0x2f8] sm:$0xff]  ;;  %v1081_v46 = vld [vmem:[%s9377_s1 + $0x10] sm:$0xff]  ;;  %v6620_v50 = vld [vmem:[#allocation2 + $0x280] sm:$0x3] }
  0x52   :  { %5376 = vmatmul.mubr.f32.gmra.mxu1 %v1642_v40  ;;  %1878 = vmatprep.subr.mxu0 %v6494_v38  ;;  %v278_v26 = vmax.f32 %v214_v13, 0.0  ;;  %v145_v28 = vmul.f32 %v6073_v17, %v74_v10  ;;  %v215_v29 = vadd.f32 %v6078_v18, %v144_v15  ;;  %v1650_v31 = vsel %vm854_vm0, %v1648_v56, %v1649_v49  ;;  %v6597_v0 = vld [vmem:[#allocation2 + $0x278] sm:$0xff]  ;;  %v6622_v51 = vld [vmem:[#allocation2 + $0x48] sm:$0xff]  ;;  %v6632_v56 = vld [vmem:[#allocation2 + $0x50] sm:$0xff] }
  0x53   :  { %2608 = vmatprep.subr.mxu1 %v6494_v38  ;;  %1879 = vmatpush2.msra.mxu0 %v4966_v45  ;;  %v1654_v32 = vrot.slane %v6563_v12, 2  ;;  %427 = vst [vmem:[#allocation2 + $0x2d1] sm:$0xff] %v277_v21  ;;  %v231_v35 = vmax.f32 %v167_v23, 0.0  ;;  %v232_v36 = vmax.f32 %v168_v27, 0.0  ;;  %v147_v40 = vmul.f32 %v6073_v17, %v76_v24  ;;  %v28_v45 = vld [vmem:[%s9378_s0 + $0x58] sm:$0xff]  ;;  %v1080_v43 = vld [vmem:[%s9377_s1 + $0x8] sm:$0xff] }
  0x54   :  { %1880 = vmatprep.mubr.f32.mxu0 %v6503_v41  ;;  %2609 = vmatpush1.msra.mxu1 %v1083_v5  ;;  %428 = vst [vmem:[#allocation2 + $0x2d9] sm:$0xff] %v278_v26  ;;  %v216_v37 = vadd.f32 %v6078_v18, %v145_v28  ;;  %v279_v39 = vmax.f32 %v215_v29, 0.0  ;;  %v1652_v48 = vsel %vm854_vm0, %v1649_v49, %v1651_v6  ;;  %v1656_v53 = vrot.slane %v6593_v33, 2  ;;  %v6638_v60 = vld [vmem:[#allocation2 + $0x290] sm:$0xff]  ;;  %v6644_v2 = vld [vmem:[%s9379_s2] ss:$0 sm:$0xff] }
  0x55   :  { %1881 = vmatmul.mubr.f32.vlgmr.msra.gmra.mxu0 %v6434_v59  ;;  %5286 = vmatprep.subr.mxu0 %v5704_v30  ;;  %v146_v59 = vmul.f32 %v6073_v17, %v75_v16  ;;  %v6618_v17 = vsel %vm629_vm1, %v1324_v7, %v6561_v11  ;;  %381 = vst [vmem:[#allocation2 + $0x79] sm:$0xff] %v231_v35  ;;  %382 = vst [vmem:[#allocation2 + $0x81] sm:$0xff] %v232_v36  ;;  %v1661_v6 = vrot.slane %v6620_v50, 2  ;;  %v78_v8 = vld [vmem:[%s9378_s0 + $0x1e8] sm:$0xff]  ;;  %v6669_v9 = vld [vmem:[#allocation2 + $0x298] sm:$0x3] }
  0x56   :  { %5378 = vmatprep.mubr.f32.mxu1 %v1645_v54  ;;  %2610 = vmatprep.subr.mxu1 %v6494_v38  ;;  %v1658_v54 = vrot.slane %v6595_v34, 2  ;;  %v280_v58 = vmax.f32 %v216_v37, 0.0  ;;  %429 = vst [vmem:[#allocation2 + $0x2e9] sm:$0xff] %v279_v39  ;;  %v218_v61 = vadd.f32 %v6078_v18, %v147_v40  ;;  %v98_v3 = vmul.f32 %v6644_v2, %v27_v44  ;;  %v6674_v10 = vld [vmem:[%s9380_s3] ss:$0 sm:$0xff]  ;;  %v79_v15 = vld [vmem:[%s9378_s0 + $0x1f0] sm:$0xff] }
  0x57   :  { %5287 = vmatpush3.msra.mxu0 %v5704_v30  ;;  %5379 = vmatmul.mubr.f32.gmra.mxu1 %v6530_v55  ;;  %v217_v52 = vadd.f32 %v6078_v18, %v146_v59  ;;  %v1659_v55 = vrot.slane %v6597_v0, 2  ;;  %v99_v4 = vmul.f32 %v6644_v2, %v28_v45  ;;  %v1655_v18 = vsel %vm854_vm0, %v1653_v19, %v1654_v32  ;;  %v1079_v19 = vld [vmem:[%s9377_s1] sm:$0xff]  ;;  %v80_v24 = vld [vmem:[%s9378_s0 + $0x1f8] sm:$0xff]  ;;  %v6707_v33 = vld [vmem:[#allocation2 + $0x2a8] sm:$0xff] }
  0x58   :  { %2611 = vmatpush1.msra.mxu1 %v1082_v25  ;;  %1885 = vmatprep.mubr.f32.mxu0 %v6507_v42  ;;  %v6636_v42 = vld [vmem:[#allocation2 + $0x288] sm:$0xff]  ;;  %v1328_v5 = vsel %vm629_vm1, %v6561_v11, %v1327_v20  ;;  %v1329_v7 = vrot.slane %v6622_v51, 1  ;;  %430 = vst [vmem:[#allocation2 + $0x2f1] sm:$0xff] %v280_v58  ;;  %v6667_v63 = vrot.slane %v6632_v56, 1  ;;  %v282_v1 = vmax.f32 %v218_v61, 0.0  ;;  %v6698_v26 = vld [vmem:[#allocation2 + $0x2a0] sm:$0xff] }
  0x59   :  { %2612 = vmatprep.subr.mxu1 %v6494_v38  ;;  %1886 = vmatmul.mubr.f32.gmra.mxu0 %v6441_v62  ;;  %v281_v49 = vmax.f32 %v217_v52, 0.0  ;;  %v77_v62 = vld [vmem:[%s9378_s0 + $0x1e0] sm:$0xff]  ;;  %v169_v13 = vadd.f32 %v6674_v10, %v98_v3  ;;  %v170_v14 = vadd.f32 %v6674_v10, %v99_v4  ;;  %v1657_v16 = vsel %vm854_vm0, %v1654_v32, %v1656_v53  ;;  %v6696_v25 = vld [vmem:[#allocation2 + $0x58] sm:$0x3]  ;;  %v5707_v36 = vld [vmem:[%s9377_s1 + $0x2f0] sm:$0xff] }
  0x5a   :  { %5381 = vmatprep.mubr.f32.mxu1 %v1650_v31  ;;  %2613 = vmatpush1.msra.mxu1 %v1081_v46  ;;  %v1663_v20 = vrot.slane %v6636_v42, 2  ;;  %v1664_v21 = vrot.slane %v6638_v60, 2  ;;  %v148_v23 = vmul.f32 %v6644_v2, %v77_v62  ;;  %v1660_v12 = vsel %vm854_vm0, %v1658_v54, %v1659_v55  ;;  %432 = vst [vmem:[#allocation2 + $0x309] sm:$0xff] %v282_v1  ;;  %v29_v30 = vld [vmem:[%s9378_s0 + $0x60] sm:$0xff]  ;;  %v1110_v35 = vld [vmem:[%s9377_s1 + $0xf8] sm:$0xff]  ;;  %v6730_v50 = vld [vmem:[#allocation2 + $0x68] sm:$0xff] }
  0x5b   :  { %5382 = vmatmul.mubr.f32.gmra.mxu1 %v1652_v48  ;;  %2614 = vmatprep.subr.mxu1 %v6494_v38  ;;  %431 = vst [vmem:[#allocation2 + $0x301] sm:$0xff] %v281_v49  ;;  %v233_v27 = vmax.f32 %v169_v13, 0.0  ;;  %v234_v28 = vmax.f32 %v170_v14, 0.0  ;;  %v149_v29 = vmul.f32 %v6644_v2, %v78_v8  ;;  %v1662_v31 = vsel %vm854_vm0, %v1659_v55, %v1661_v6  ;;  %v6721_v37 = vld [vmem:[#allocation2 + $0x2b0] sm:$0x3]  ;;  %v6728_v48 = vld [vmem:[#allocation2 + $0x60] sm:$0xff] }
  0x5c   :  { %2615 = vmatpush1.msra.mxu1 %v1080_v43  ;;  %1890 = vmatprep.mubr.f32.mxu0 %v6618_v17  ;;  %v1666_v32 = vrot.slane %v6669_v9, 2  ;;  %v219_v34 = vadd.f32 %v6674_v10, %v148_v23  ;;  %v150_v0 = vmul.f32 %v6644_v2, %v79_v15  ;;  %v6716_v59 = vsel %vm629_vm1, %v1329_v7, %v6667_v63  ;;  %v30_v52 = vld [vmem:[%s9378_s0 + $0x68] sm:$0xff]  ;;  %v1109_v53 = vld [vmem:[%s9377_s1 + $0xf0] sm:$0xff]  ;;  %v1205_v55 = vld [vmem:[#allocation2 + $0x2b8] sm:$0xff] }
  0x5d   :  { %1891 = vmatmul.mubr.f32.gmra.mxu0 %v6520_v47  ;;  %5384 = vmatprep.mubr.f32.mxu1 %v1655_v18  ;;  %383 = vst [vmem:[#allocation2 + $0x91] sm:$0xff] %v233_v27  ;;  %384 = vst [vmem:[#allocation2 + $0x99] sm:$0xff] %v234_v28  ;;  %v220_v39 = vadd.f32 %v6674_v10, %v149_v29  ;;  %v151_v40 = vmul.f32 %v6644_v2, %v80_v24  ;;  %v1332_v45 = vrot.slane %v6696_v25, 1  ;;  %v6742_v58 = vld [vmem:[#allocation2 + $0x2c0] sm:$0xff]  ;;  %v1108_v49 = vld [vmem:[%s9377_s1 + $0xe8] sm:$0xff] }
  0x5e   :  { %2616 = vmatprep.subr.mxu1 %v6494_v38  ;;  %1895 = vmatprep.mubr.f32.mxu0 %v1328_v5  ;;  %v1665_v44 = vsel %vm854_vm0, %v1663_v20, %v1664_v21  ;;  %v1668_v46 = vrot.slane %v6698_v26, 2  ;;  %v100_v43 = vmul.f32 %v6644_v2, %v29_v30  ;;  %v1669_v54 = vrot.slane %v6707_v33, 2  ;;  %v31_v18 = vld [vmem:[%s9378_s0 + $0x70] sm:$0xff]  ;;  %v32_v1 = vld [vmem:[%s9378_s0 + $0x78] sm:$0xff]  ;;  %v1207_v15 = vld [vmem:[#allocation2 + $0x2c8] sm:$0x3] }
  0x5f   :  { %5385 = vmatmul.mubr.f32.gmra.mxu1 %v1657_v16  ;;  %5288 = vmatprep.subr.mxu0 %v5707_v36  ;;  %v283_v42 = vmax.f32 %v219_v34, 0.0  ;;  %v284_v60 = vmax.f32 %v220_v39, 0.0  ;;  %v221_v61 = vadd.f32 %v6674_v10, %v150_v0  ;;  %v1667_v3 = vsel %vm854_vm0, %v1664_v21, %v1666_v32  ;;  %v1138_v7 = vld [vmem:[#allocation2 + $0x70] sm:$0x3]  ;;  %v1107_v21 = vld [vmem:[%s9377_s1 + $0xe0] sm:$0xff]  ;;  %v6778_v27 = vld [vmem:[#allocation2 + $0x2d8] sm:$0xff] }
  0x60   :  { %2617 = vmatpush1.msra.mxu1 %v1079_v19  ;;  %5387 = vmatprep.mubr.f32.mxu1 %v1660_v12  ;;  %v1671_v4 = vrot.slane %v6721_v37, 2  ;;  %v222_v62 = vadd.f32 %v6674_v10, %v151_v40  ;;  %v1334_v5 = vrot.slane %v6728_v48, 1  ;;  %v6758_v6 = vrot.slane %v6730_v50, 1  ;;  %v33_v12 = vld [vmem:[%s9378_s0 + $0x80] sm:$0xff]  ;;  %v1208_v26 = vld [vmem:[#allocation2 + $0x2d0] sm:$0xff]  ;;  %v6795_v37 = vld [vmem:[#allocation2 + $0x78] sm:$0xff] }
  0x61   :  { %2618 = vmatprep.subr.mxu1 %v6494_v38  ;;  %1896 = vmatmul.mubr.f32.gmra.mxu0 %v6533_v57  ;;  %433 = vst [vmem:[#allocation2 + $0x319] sm:$0xff] %v283_v42  ;;  %434 = vst [vmem:[#allocation2 + $0x321] sm:$0xff] %v284_v60  ;;  %v285_v8 = vmax.f32 %v221_v61, 0.0  ;;  %v101_v9 = vmul.f32 %v6644_v2, %v30_v52  ;;  %v1673_v13 = vrot.slane %v1205_v55, 2  ;;  %v1674_v14 = vrot.slane %v6742_v58, 2  ;;  %v35_v0 = vld [vmem:[%s9378_s0 + $0x90] sm:$0xff] }
  0x62   :  { %2619 = vmatpush2.msra.mxu1 %v1110_v35  ;;  %1900 = vmatprep.mubr.f32.mxu0 %v6716_v59  ;;  %v286_v16 = vmax.f32 %v222_v62, 0.0  ;;  %v171_v19 = vadd.f32 %v6674_v10, %v100_v43  ;;  %v1333_v20 = vsel %vm629_vm1, %v6667_v63, %v1332_v45  ;;  %v1670_v23 = vsel %vm854_vm0, %v1668_v46, %v1669_v54  ;;  %v6797_v39 = vld [vmem:[#allocation2 + $0x80] sm:$0xff]  ;;  %v1106_v46 = vld [vmem:[%s9377_s1 + $0xd8] sm:$0xff]  ;;  %v6815_v42 = vld [vmem:[#allocation2 + $0x2e8] sm:$0xff] }
  0x63   :  { %5388 = vmatmul.mubr.f32.gmra.mxu1 %v1662_v31  ;;  %2620 = vmatprep.subr.mxu1 %v6494_v38  ;;  %435 = vst [vmem:[#allocation2 + $0x331] sm:$0xff] %v285_v8  ;;  %v172_v24 = vadd.f32 %v6674_v10, %v101_v9  ;;  %v1337_v25 = vrot.slane %v1138_v7, 1  ;;  %v102_v29 = vmul.f32 %v6644_v2, %v31_v18  ;;  %v34_v31 = vld [vmem:[%s9378_s0 + $0x88] sm:$0xff]  ;;  %v1676_v34 = vrot.slane %v1207_v15, 2  ;;  %v36_v55 = vld [vmem:[%s9378_s0 + $0x98] sm:$0xff]  ;;  %v6817_v60 = vld [vmem:[#allocation2 + $0x2f0] sm:$0xff] }
  0x64   :  { %2621 = vmatpush2.msra.mxu1 %v1109_v53  ;;  %5390 = vmatprep.mubr.f32.mxu1 %v1665_v44  ;;  %436 = vst [vmem:[#allocation2 + $0x339] sm:$0xff] %v286_v16  ;;  %v235_v28 = vmax.f32 %v171_v19, 0.0  ;;  %v103_v30 = vmul.f32 %v6644_v2, %v32_v1  ;;  %v1672_v32 = vsel %vm854_vm0, %v1669_v54, %v1671_v4  ;;  %v1678_v52 = vrot.slane %v1208_v26, 2  ;;  %v1105_v4 = vld [vmem:[%s9377_s1 + $0xd0] sm:$0xff]  ;;  %v6831_v8 = vld [vmem:[%s9377_s1 + $0x2e8] sm:$0xff]  ;;  %v37_v16 = vld [vmem:[%s9378_s0 + $0xa0] sm:$0xff] }
  0x65   :  { %2622 = vmatprep.subr.mxu1 %v6494_v38  ;;  %1901 = vmatmul.mubr.f32.gmra.mxu0 %v6622_v51  ;;  %v6789_v33 = vsel %vm629_vm1, %v1334_v5, %v6758_v6  ;;  %v1675_v35 = vsel %vm854_vm0, %v1673_v13, %v1674_v14  ;;  %v236_v40 = vmax.f32 %v172_v24, 0.0  ;;  %v173_v44 = vadd.f32 %v6674_v10, %v102_v29  ;;  %v1141_v9 = vld [vmem:[#allocation2 + $0x88] sm:$0x3]  ;;  %v1214_v24 = vld [vmem:[#allocation2 + $0x300] sm:$0xff] }
  0x66   :  { %2623 = vmatpush2.msra.mxu1 %v1108_v49  ;;  %5289 = vmatpush3.msra.mxu0 %v5707_v36  ;;  %v1210_v36 = vld [vmem:[#allocation2 + $0x2e0] sm:$0x3]  ;;  %385 = vst [vmem:[#allocation2 + $0xa9] sm:$0xff] %v235_v28  ;;  %v174_v45 = vadd.f32 %v6674_v10, %v103_v30  ;;  %v1679_v43 = vrot.slane %v6778_v27, 2  ;;  %v104_v53 = vmul.f32 %v6644_v2, %v33_v12  ;;  %v1339_v5 = vrot.slane %v6795_v37, 1  ;;  %v1104_v1 = vld [vmem:[%s9377_s1 + $0xc8] sm:$0xff] }
  0x67   :  { %5391 = vmatmul.mubr.f32.gmra.mxu1 %v1667_v3  ;;  %2624 = vmatprep.subr.mxu1 %v6494_v38  ;;  %v105_v54 = vmul.f32 %v6644_v2, %v34_v31  ;;  %v1338_v58 = vsel %vm629_vm1, %v6758_v6, %v1337_v25  ;;  %386 = vst [vmem:[#allocation2 + $0xb1] sm:$0xff] %v236_v40  ;;  %v237_v61 = vmax.f32 %v173_v44, 0.0  ;;  %v1681_v18 = vrot.slane %v1210_v36, 2  ;;  %v6848_v12 = vld [vmem:[#allocation2 + $0x308] sm:$0xff]  ;;  %v1103_v31 = vld [vmem:[%s9377_s1 + $0xc0] sm:$0xff] }
  0x68   :  { %1905 = vmatprep.mubr.f32.mxu0 %v1333_v20  ;;  %2625 = vmatpush2.msra.mxu1 %v1107_v21  ;;  %v238_v49 = vmax.f32 %v174_v45, 0.0  ;;  %v106_v3 = vmul.f32 %v6644_v2, %v35_v0  ;;  %v1677_v62 = vsel %vm854_vm0, %v1674_v14, %v1676_v34  ;;  %v6826_v7 = vrot.slane %v6797_v39, 1  ;;  %v38_v29 = vld [vmem:[%s9378_s0 + $0xa8] sm:$0xff]  ;;  %v6868_v45 = vld [vmem:[#allocation2 + $0x90] sm:$0xff] }
  0x69   :  { %1906 = vmatmul.mubr.f32.gmra.mxu0 %v6632_v56  ;;  %5393 = vmatprep.mubr.f32.mxu1 %v1670_v23  ;;  %387 = vst [vmem:[#allocation2 + $0xc1] sm:$0xff] %v237_v61  ;;  %v175_v13 = vadd.f32 %v6674_v10, %v104_v53  ;;  %v176_v14 = vadd.f32 %v6674_v10, %v105_v54  ;;  %v1683_v20 = vrot.slane %v6815_v42, 2  ;;  %v1684_v21 = vrot.slane %v6817_v60, 2  ;;  %v1213_v23 = vld [vmem:[#allocation2 + $0x2f8] sm:$0x3] }
  0x6a   :  { %2626 = vmatprep.subr.mxu1 %v6494_v38  ;;  %1910 = vmatprep.mubr.f32.mxu0 %v6789_v33  ;;  %388 = vst [vmem:[#allocation2 + $0xc9] sm:$0xff] %v238_v49  ;;  %v107_v15 = vmul.f32 %v6644_v2, %v36_v55  ;;  %v1680_v19 = vsel %vm854_vm0, %v1678_v52, %v1679_v43  ;;  %v1342_v26 = vrot.slane %v1141_v9, 1  ;;  %v1686_v36 = vrot.slane %v1213_v23, 2  ;;  %v1102_v53 = vld [vmem:[%s9377_s1 + $0xb8] sm:$0xff]  ;;  %v1216_v55 = vld [vmem:[#allocation2 + $0x310] sm:$0x3] }
  0x6b   :  { %5394 = vmatmul.mubr.f32.gmra.mxu1 %v1672_v32  ;;  %5290 = vmatprep.subr.mxu0 %v6831_v8  ;;  %v177_v25 = vadd.f32 %v6674_v10, %v106_v3  ;;  %v239_v27 = vmax.f32 %v175_v13, 0.0  ;;  %v240_v28 = vmax.f32 %v176_v14, 0.0  ;;  %v1682_v30 = vsel %vm854_vm0, %v1679_v43, %v1681_v18  ;;  %v40_v43 = vld [vmem:[%s9378_s0 + $0xb8] sm:$0xff]  ;;  %v6886_v49 = vld [vmem:[#allocation2 + $0x320] sm:$0xff]  ;;  %v1219_v23 = vld [vmem:[#allocation2 + $0x328] sm:$0x3] }
  0x6c   :  { %2627 = vmatpush2.msra.mxu1 %v1106_v46  ;;  %5396 = vmatprep.mubr.f32.mxu1 %v1675_v35  ;;  %v6861_v32 = vsel %vm629_vm1, %v1339_v5, %v6826_v7  ;;  %v178_v34 = vadd.f32 %v6674_v10, %v107_v15  ;;  %v39_v35 = vld [vmem:[%s9378_s0 + $0xb0] sm:$0xff]  ;;  %v1688_v40 = vrot.slane %v1214_v24, 2  ;;  %v1689_v44 = vrot.slane %v6848_v12, 2  ;;  %v6870_v46 = vld [vmem:[#allocation2 + $0x98] sm:$0xff] }
  0x6d   :  { %2628 = vmatprep.subr.mxu1 %v6494_v38  ;;  %1911 = vmatmul.mubr.f32.gmra.mxu0 %v6728_v48  ;;  %v241_v0 = vmax.f32 %v177_v25, 0.0  ;;  %389 = vst [vmem:[#allocation2 + $0xd9] sm:$0xff] %v239_v27  ;;  %390 = vst [vmem:[#allocation2 + $0xe1] sm:$0xff] %v240_v28  ;;  %v108_v52 = vmul.f32 %v6644_v2, %v37_v16  ;;  %v1685_v54 = vsel %vm854_vm0, %v1683_v20, %v1684_v21  ;;  %v1220_v25 = vld [vmem:[#allocation2 + $0x330] sm:$0xff] }
  0x6e   :  { %2629 = vmatpush2.msra.mxu1 %v1105_v4  ;;  %1915 = vmatprep.mubr.f32.mxu0 %v1338_v58  ;;  %v1217_v58 = vld [vmem:[#allocation2 + $0x318] sm:$0xff]  ;;  %v242_v42 = vmax.f32 %v178_v34, 0.0  ;;  %v109_v60 = vmul.f32 %v6644_v2, %v38_v29  ;;  %v1343_v61 = vsel %vm629_vm1, %v6826_v7, %v1342_v26  ;;  %v110_v4 = vmul.f32 %v6644_v2, %v39_v35  ;;  %v6917_v34 = vld [vmem:[#allocation2 + $0xa8] sm:$0xff]  ;;  %v1099_v35 = vld [vmem:[%s9377_s1 + $0xa0] sm:$0xff] }
  0x6f   :  { %5397 = vmatmul.mubr.f32.gmra.mxu1 %v1677_v62  ;;  %2630 = vmatprep.subr.mxu1 %v6494_v38  ;;  %391 = vst [vmem:[#allocation2 + $0xf1] sm:$0xff] %v241_v0  ;;  %v179_v3 = vadd.f32 %v6674_v10, %v108_v52  ;;  %v1101_v62 = vld [vmem:[%s9377_s1 + $0xb0] sm:$0xff]  ;;  %v1344_v18 = vrot.slane %v6868_v45, 1  ;;  %v6896_v5 = vrot.slane %v6870_v46, 1  ;;  %v1687_v13 = vsel %vm854_vm0, %v1684_v21, %v1686_v36  ;;  %v1100_v21 = vld [vmem:[%s9377_s1 + $0xa8] sm:$0xff]  ;;  %v1221_v26 = vld [vmem:[#allocation2 + $0x338] sm:$0xff] }
  0x70   :  { %2631 = vmatpush2.msra.mxu1 %v1104_v1  ;;  %5399 = vmatprep.mubr.f32.mxu1 %v1680_v19  ;;  %392 = vst [vmem:[#allocation2 + $0xf9] sm:$0xff] %v242_v42  ;;  %v180_v9 = vadd.f32 %v6674_v10, %v109_v60  ;;  %v111_v1 = vmul.f32 %v6644_v2, %v40_v43  ;;  %v1691_v15 = vrot.slane %v1216_v55, 2  ;;  %v1693_v16 = vrot.slane %v1217_v58, 2  ;;  %v1144_v19 = vld [vmem:[#allocation2 + $0xa0] sm:$0x3]  ;;  %v6919_v0 = vld [vmem:[#allocation2 + $0xb0] sm:$0xff] }
  0x71   :  { %1916 = vmatmul.mubr.f32.gmra.mxu0 %v6730_v50  ;;  %2632 = vmatprep.subr.mxu1 %v6494_v38  ;;  %v1690_v14 = vsel %vm854_vm0, %v1688_v40, %v1689_v44  ;;  %v1694_v20 = vrot.slane %v6886_v49, 2  ;;  %v243_v24 = vmax.f32 %v179_v3, 0.0  ;;  %v181_v2 = vadd.f32 %v6674_v10, %v110_v4  ;;  %v1222_v43 = vld [vmem:[#allocation2 + $0x340] sm:$0x3]  ;;  %v1147_v49 = vld [vmem:[#allocation2 + $0xb8] sm:$0x3] }
  0x72   :  { %2633 = vmatpush2.msra.mxu1 %v1103_v31  ;;  %1920 = vmatprep.mubr.f32.mxu0 %v6861_v32  ;;  %v244_v12 = vmax.f32 %v180_v9, 0.0  ;;  %v182_v27 = vadd.f32 %v6674_v10, %v111_v1  ;;  %v6913_v28 = vsel %vm629_vm1, %v1344_v18, %v6896_v5  ;;  %v1347_v29 = vrot.slane %v1144_v19, 1  ;;  %v5709_v42 = vld [vmem:[%s9377_s1 + $0x2e0] sm:$0xff]  ;;  %v1097_v4 = vld [vmem:[%s9377_s1 + $0x90] sm:$0xff]  ;;  %v1096_v1 = vld [vmem:[%s9377_s1 + $0x88] sm:$0xff] }
  0x73   :  { %5400 = vmatmul.mubr.f32.gmra.mxu1 %v1682_v30  ;;  %2634 = vmatprep.subr.mxu1 %v6494_v38  ;;  %393 = vst [vmem:[#allocation2 + $0x109] sm:$0xff] %v243_v24  ;;  %v245_v30 = vmax.f32 %v181_v2, 0.0  ;;  %v1696_v31 = vrot.slane %v1219_v23, 2  ;;  %v1695_v36 = vsel %vm854_vm0, %v1693_v16, %v1694_v20  ;;  %v1698_v40 = vrot.slane %v1220_v25, 2  ;;  %v439_v9 = vld [vmem:[#allocation2 + $0x10] sm:$0x3] }
  0x74   :  { %2635 = vmatpush2.msra.mxu1 %v1102_v53  ;;  %5402 = vmatprep.mubr.f32.mxu1 %v1685_v54  ;;  %394 = vst [vmem:[#allocation2 + $0x111] sm:$0xff] %v244_v12  ;;  %v246_v10 = vmax.f32 %v182_v27, 0.0  ;;  %v1699_v52 = vrot.slane %v1221_v26, 2  ;;  %v1098_v53 = vld [vmem:[%s9377_s1 + $0x98] sm:$0xff]  ;;  %v1348_v54 = vsel %vm629_vm1, %v6896_v5, %v1347_v29  ;;  %v1349_v55 = vrot.slane %v6917_v34, 1  ;;  %v6959_v16 = vld [vmem:[#allocation2 + $0xc0] sm:$0xff] }
  0x75   :  { %1921 = vmatmul.mubr.f32.gmra.mxu0 %v6795_v37  ;;  %2636 = vmatprep.subr.mxu1 %v6494_v38  ;;  %395 = vst [vmem:[#allocation2 + $0x121] sm:$0xff] %v245_v30  ;;  %v6935_v58 = vrot.slane %v6919_v0, 1  ;;  %v1697_v60 = vsel %vm854_vm0, %v1694_v20, %v1696_v31  ;;  %v6948_v18 = vrot.slane %v6494_v38, 1  ;;  %v6961_v19 = vld [vmem:[#allocation2 + $0xc8] sm:$0xff]  ;;  %v1095_v20 = vld [vmem:[%s9377_s1 + $0x80] sm:$0xff]  ;;  %v633_v24 = vrot.slane %v439_v9, 1 }
  0x76   :  { %5291 = vmatpush3.msra.mxu0 %v6831_v8  ;;  %2637 = vmatpush2.msra.mxu1 %v1101_v62  ;;  %v1692_v8 = vsel %vm854_vm0, %v1689_v44, %v1691_v15  ;;  %v437_v44 = vld [vmem:[#allocation2] sm:$0xff]  ;;  %396 = vst [vmem:[#allocation2 + $0x129] sm:$0xff] %v246_v10  ;;  %v1700_v3 = vsel %vm854_vm0, %v1698_v40, %v1699_v52  ;;  %v1354_v2 = vrot.slane %v6959_v16, 1  ;;  %v1150_v25 = vld [vmem:[#allocation2 + $0xd0] sm:$0x3]  ;;  %v5013_v26 = vld [vmem:[%s9377_s1 + $0x378] sm:$0xff] }
  0x77   :  { %5403 = vmatmul.mubr.f32.gmra.mxu1 %v1687_v13  ;;  %1925 = vmatprep.mubr.f32.mxu0 %v1343_v61  ;;  %v1701_v61 = vrot.slane %v1222_v43, 2  ;;  %v630_v62 = vrot.slane %v437_v44, 1  ;;  %v6956_v13 = vsel %vm629_vm1, %v1349_v55, %v6935_v58  ;;  %v634_v27 = vsel %vm629_vm1, %v6948_v18, %v633_v24  ;;  %v442_v29 = vld [vmem:[#allocation2 + $0x28] sm:$0x3]  ;;  %v5012_v31 = vld [vmem:[%s9377_s1 + $0x370] sm:$0xff]  ;;  %v5710_v10 = vld [vmem:[%s9377_s1 + $0x2d8] sm:$0xff] }
  0x78   :  { %2638 = vmatprep.subr.mxu1 %v6494_v38  ;;  %5405 = vmatprep.mubr.f32.mxu1 %v1690_v14  ;;  %v1352_v14 = vrot.slane %v1147_v49, 1  ;;  %v638_v40 = vrot.slane %v442_v29, 1  ;;  %v5009_v9 = vld [vmem:[%s9377_s1 + $0x358] sm:$0xff]  ;;  %v5714_v24 = vld [vmem:[%s9377_s1 + $0x2c8] sm:$0xff] }
  0x79   :  { %1926 = vmatmul.mubr.f32.gmra.mxu0 %v6797_v39  ;;  %2639 = vmatpush2.msra.mxu1 %v1100_v21  ;;  %v1702_v15 = vsel %vm854_vm0, %v1699_v52, %v1701_v61  ;;  %v632_v23 = vsel %vm629_vm1, %v630_v62, %v6948_v18  ;;  %v6976_v21 = vrot.slane %v6961_v19, 1  ;;  %v5011_v52 = vld [vmem:[%s9377_s1 + $0x368] sm:$0xff]  ;;  %v5711_v61 = vld [vmem:[#allocation2 + $0x18] sm:$0xff] }
  0x7a   :  { %2640 = vmatprep.subr.mxu1 %v6494_v38  ;;  %1930 = vmatprep.mubr.f32.mxu0 %v6913_v28  ;;  %v1353_v12 = vsel %vm629_vm1, %v6935_v58, %v1352_v14  ;;  %v639_v55 = vsel %vm629_vm1, %v6470_v22, %v638_v40  ;;  %v5712_v22 = vld [vmem:[%s9377_s1 + $0x2d0] sm:$0xff]  ;;  %v7063_v29 = vld [vmem:[#allocation2 + $0x108] sm:$0xff] }
  0x7b   :  { %5406 = vmatmul.mubr.f32.gmra.mxu1 %v1692_v8  ;;  %5292 = vmatprep.subr.mxu0 %v5709_v42  ;;  %v6987_v30 = vsel %vm629_vm1, %v1354_v2, %v6976_v21  ;;  %v1357_v8 = vrot.slane %v1150_v25, 1  ;;  %v448_v25 = vld [vmem:[#allocation2 + $0x58] sm:$0x3] }
  0x7c   :  { %2641 = vmatpush2.msra.mxu1 %v1099_v35  ;;  %5408 = vmatprep.mubr.f32.mxu1 %v1695_v36  ;;  %v6995_v35 = vld [vmem:[#allocation2 + $0xd8] sm:$0xff]  ;;  %v6997_v36 = vld [vmem:[#allocation2 + $0xe0] sm:$0xff] }
  0x7d   :  { %1931 = vmatmul.mubr.f32.gmra.mxu0 %v6868_v45  ;;  %2642 = vmatprep.subr.mxu1 %v6494_v38  ;;  %v1358_v43 = vsel %vm629_vm1, %v6976_v21, %v1357_v8  ;;  %v648_v8 = vrot.slane %v448_v25, 1 }
  0x7e   :  { %2643 = vmatpush2.msra.mxu1 %v1098_v53  ;;  %1935 = vmatprep.mubr.f32.mxu0 %v1348_v54  ;;  %v7010_v53 = vrot.slane %v6997_v36, 1  ;;  %v1153_v54 = vld [vmem:[#allocation2 + $0xe8] sm:$0x3] }
  0x7f   :  { %5409 = vmatmul.mubr.f32.gmra.mxu1 %v1697_v60  ;;  %2644 = vmatprep.subr.mxu1 %v6494_v38  ;;  %v445_v60 = vld [vmem:[#allocation2 + $0x40] sm:$0x3]  ;;  %v1362_v49 = vrot.slane %v1153_v54, 1  ;;  %v451_v54 = vld [vmem:[#allocation2 + $0x70] sm:$0x3] }
  0x80   :  { %5411 = vmatprep.mubr.f32.mxu1 %v1700_v3  ;;  %2645 = vmatpush2.msra.mxu1 %v1097_v4  ;;  %v7028_v3 = vld [vmem:[#allocation2 + $0xf0] sm:$0xff]  ;;  %v7030_v4 = vld [vmem:[#allocation2 + $0xf8] sm:$0xff]  ;;  %v643_v62 = vrot.slane %v445_v60, 1  ;;  %v7105_v60 = vld [vmem:[#allocation2 + $0x120] sm:$0xff] }
  0x81   :  { %1936 = vmatmul.mubr.f32.gmra.mxu0 %v6870_v46  ;;  %2646 = vmatprep.subr.mxu1 %v6494_v38  ;;  %v1363_v14 = vsel %vm629_vm1, %v7010_v53, %v1362_v49  ;;  %v5003_v49 = vld [vmem:[%s9377_s1 + $0x328] sm:$0xff] }
  0x82   :  { %2647 = vmatpush2.msra.mxu1 %v1096_v1  ;;  %1940 = vmatprep.mubr.f32.mxu0 %v6956_v13  ;;  %v5713_v1 = vld [vmem:[#allocation2 + $0x20] sm:$0xff]  ;;  %v644_v2 = vsel %vm629_vm1, %v6561_v11, %v643_v62  ;;  %v7065_v11 = vld [vmem:[#allocation2 + $0x110] sm:$0xff]  ;;  %v1374_v62 = vrot.slane %v7105_v60, 1 }
  0x83   :  { %5412 = vmatmul.mubr.f32.gmra.mxu1 %v1702_v15  ;;  %2648 = vmatprep.subr.mxu1 %v6494_v38  ;;  %v1364_v15 = vrot.slane %v7028_v3, 1  ;;  %v7079_v40 = vrot.slane %v7065_v11, 1 }
  0x84   :  { %2649 = vmatpush2.msra.mxu1 %v1095_v20  ;;  %2650 = vmatprep.mubr.f32.mxu1 %v632_v23  ;;  %v7042_v20 = vrot.slane %v7030_v4, 1  ;;  %v5008_v23 = vld [vmem:[%s9377_s1 + $0x350] sm:$0xff] }
  0x85   :  { %1941 = vmatmul.mubr.f32.gmra.mxu0 %v6917_v34  ;;  %4046 = vmatprep.subr.mxu1 %v6494_v38 }
  0x86   :  { %5293 = vmatpush3.msra.mxu0 %v5709_v42  ;;  %1945 = vmatprep.mubr.f32.mxu0 %v1353_v12  ;;  %v5010_v42 = vld [vmem:[%s9377_s1 + $0x360] sm:$0xff] }
  0x87   :  { %2651 = vmatmul.mubr.f32.vlgmr.msra.gmra.mxu1 %v437_v44  ;;  %5294 = vmatprep.subr.mxu0 %v5710_v10  ;;  %v1359_v44 = vrot.slane %v6995_v35, 1  ;;  %v1156_v12 = vld [vmem:[#allocation2 + $0x100] sm:$0x3] }
  0x88   :  { %4047 = vmatpush1.msra.mxu1 %v5013_v26  ;;  %2655 = vmatprep.mubr.f32.mxu1 %v634_v27  ;;  %v5007_v26 = vld [vmem:[%s9377_s1 + $0x348] sm:$0xff]  ;;  %v1367_v27 = vrot.slane %v1156_v12, 1 }
  0x89   :  { %1946 = vmatmul.mubr.f32.gmra.mxu0 %v6919_v0  ;;  %4048 = vmatprep.subr.mxu1 %v6494_v38 }
  0x8a   :  { %1950 = vmatprep.mubr.f32.mxu0 %v6987_v30  ;;  %4049 = vmatpush1.msra.mxu1 %v5012_v31  ;;  %v1368_v31 = vsel %vm629_vm1, %v7042_v20, %v1367_v27 }
  0x8b   :  { %2656 = vmatmul.mubr.f32.gmra.mxu1 %v6494_v38  ;;  %5295 = vmatpush3.msra.mxu0 %v5710_v10  ;;  %v1369_v10 = vrot.slane %v7063_v29, 1 }
  0x8c   :  { %2660 = vmatprep.mubr.f32.mxu1 %v6503_v41  ;;  %4050 = vmatprep.subr.mxu1 %v6494_v38  ;;  %v7023_v41 = vsel %vm629_vm1, %v1359_v44, %v7010_v53  ;;  %v5005_v44 = vld [vmem:[%s9377_s1 + $0x338] sm:$0xff] }
  0x8d   :  { %1951 = vmatmul.mubr.f32.gmra.mxu0 %v6959_v16  ;;  %4051 = vmatpush1.msra.mxu1 %v5011_v52  ;;  %v5715_v52 = vld [vmem:[%s9377_s1 + $0x2c0] sm:$0xff] }
  0x8e   :  { %1955 = vmatprep.mubr.f32.mxu0 %v1358_v43  ;;  %4052 = vmatprep.subr.mxu1 %v6494_v38  ;;  %v1159_v43 = vld [vmem:[#allocation2 + $0x118] sm:$0x3] }
  0x8f   :  { %2661 = vmatmul.mubr.f32.gmra.mxu1 %v5711_v61  ;;  %5296 = vmatprep.subr.mxu0 %v5712_v22  ;;  %v7107_v61 = vld [vmem:[#allocation2 + $0x128] sm:$0xff] }
  0x90   :  { %2665 = vmatprep.mubr.f32.mxu1 %v639_v55  ;;  %4053 = vmatpush1.msra.mxu1 %v5010_v42  ;;  %v1372_v55 = vrot.slane %v1159_v43, 1  ;;  %v5717_v42 = vld [vmem:[%s9377_s1 + $0x2b8] sm:$0xff] }
  0x91   :  { %1956 = vmatmul.mubr.f32.gmra.mxu0 %v6961_v19  ;;  %4054 = vmatprep.subr.mxu1 %v6494_v38 }
  0x92   :  { %1960 = vmatprep.mubr.f32.mxu0 %v7023_v41  ;;  %5297 = vmatpush3.msra.mxu0 %v5712_v22  ;;  %v1373_v22 = vsel %vm629_vm1, %v7079_v40, %v1372_v55  ;;  %v5724_v55 = vld [vmem:[#allocation2 + $0x158] sm:$0xff] }
  0x93   :  { %2666 = vmatmul.mubr.f32.gmra.mxu1 %v5713_v1  ;;  %5298 = vmatprep.subr.mxu0 %v5714_v24  ;;  %v1162_v1 = vld [vmem:[#allocation2 + $0x130] sm:$0x3] }
  0x94   :  { %2670 = vmatprep.mubr.f32.mxu1 %v6618_v17  ;;  %4055 = vmatpush1.msra.mxu1 %v5009_v9  ;;  %v7061_v17 = vsel %vm629_vm1, %v1364_v15, %v7042_v20  ;;  %v7120_v9 = vrot.slane %v7107_v61, 1  ;;  %v454_v15 = vld [vmem:[#allocation2 + $0x88] sm:$0x3] }
  0x95   :  { %1961 = vmatmul.mubr.f32.gmra.mxu0 %v6995_v35  ;;  %4056 = vmatprep.subr.mxu1 %v6494_v38 }
  0x96   :  { %1965 = vmatprep.mubr.f32.mxu0 %v1363_v14  ;;  %4057 = vmatpush1.msra.mxu1 %v5008_v23  ;;  %v1377_v23 = vrot.slane %v1162_v1, 1  ;;  %v5028_v1 = vld [vmem:[%s9377_s1 + $0x3f0] sm:$0xff] }
  0x97   :  { %2671 = vmatmul.mubr.f32.gmra.mxu1 %v6520_v47  ;;  %5299 = vmatpush3.msra.mxu0 %v5714_v24  ;;  %v5006_v47 = vld [vmem:[%s9377_s1 + $0x340] sm:$0xff]  ;;  %v658_v24 = vrot.slane %v454_v15, 1  ;;  %v5728_v15 = vld [vmem:[#allocation2 + $0x168] sm:$0xff] }
  0x98   :  { %2675 = vmatprep.mubr.f32.mxu1 %v644_v2  ;;  %4058 = vmatprep.subr.mxu1 %v6494_v38  ;;  %v1378_v12 = vsel %vm629_vm1, %v7120_v9, %v1377_v23  ;;  %v5719_v2 = vld [vmem:[#allocation2 + $0x138] sm:$0xff]  ;;  %v1389_v23 = vrot.slane %v5728_v15, 1 }
  0x99   :  { %1966 = vmatmul.mubr.f32.gmra.mxu0 %v6997_v36  ;;  %4059 = vmatpush1.msra.mxu1 %v5007_v26  ;;  %v1379_v25 = vrot.slane %v5719_v2, 1  ;;  %v5720_v26 = vld [vmem:[#allocation2 + $0x140] sm:$0xff] }
  0x9a   :  { %1970 = vmatprep.mubr.f32.mxu0 %v7061_v17  ;;  %4060 = vmatprep.subr.mxu1 %v6494_v38  ;;  %v649_v38 = vsel %vm629_vm1, %v6667_v63, %v648_v8  ;;  %v5004_v63 = vld [vmem:[%s9377_s1 + $0x330] sm:$0xff]  ;;  %v1380_v27 = vrot.slane %v5720_v26, 1 }
  0x9b   :  { %2676 = vmatmul.mubr.f32.gmra.mxu1 %v6533_v57  ;;  %5300 = vmatprep.subr.mxu0 %v5715_v52  ;;  %v7088_v57 = vld [vmem:[#allocation2 + $0x8] sm:$0xff]  ;;  %v5000_v8 = vld [vmem:[%s9377_s1 + $0x310] sm:$0xff] }
  0x9c   :  { %2680 = vmatprep.mubr.f32.mxu1 %v6716_v59  ;;  %4061 = vmatpush1.msra.mxu1 %v5006_v47  ;;  %v7097_v59 = vsel %vm629_vm1, %v1369_v10, %v7079_v40  ;;  %v5721_v47 = vld [vmem:[%s9377_s1 + $0x2a8] sm:$0xff] }
  0x9d   :  { %1971 = vmatmul.mubr.f32.gmra.mxu0 %v7028_v3  ;;  %4062 = vmatprep.subr.mxu1 %v7088_v57  ;;  %v4999_v10 = vld [vmem:[%s9377_s1 + $0x308] sm:$0xff] }
  0x9e   :  { %1975 = vmatprep.mubr.f32.mxu0 %v1368_v31  ;;  %5301 = vmatpush3.msra.mxu0 %v5715_v52  ;;  %v457_v31 = vld [vmem:[#allocation2 + $0xa0] sm:$0x3]  ;;  %v1381_v52 = vsel %vm629_vm1, %v1379_v25, %v1380_v27 }
  0x9f   :  { %2681 = vmatmul.mubr.f32.gmra.mxu1 %v6622_v51  ;;  %5302 = vmatprep.subr.mxu0 %v5717_v42  ;;  %v653_v51 = vrot.slane %v451_v54, 1 }
  0xa0   :  { %2685 = vmatprep.mubr.f32.mxu1 %v649_v38  ;;  %4063 = vmatpush1.msra.mxu1 %v5005_v44  ;;  %v4998_v38 = vld [vmem:[%s9377_s1 + $0x300] sm:$0xff]  ;;  %v5723_v44 = vld [vmem:[#allocation2 + $0x150] sm:$0xff] }
  0xa1   :  { %1976 = vmatmul.mubr.f32.gmra.mxu0 %v7030_v4  ;;  %4064 = vmatprep.subr.mxu1 %v7088_v57  ;;  %v654_v14 = vsel %vm629_vm1, %v6758_v6, %v653_v51  ;;  %v5718_v6 = vld [vmem:[%s9377_s1 + $0x2b0] sm:$0xff]  ;;  %v1384_v54 = vrot.slane %v5723_v44, 1 }
  0xa2   :  { %1980 = vmatprep.mubr.f32.mxu0 %v7097_v59  ;;  %4065 = vmatpush1.msra.mxu1 %v5004_v63  ;;  %v1385_v63 = vrot.slane %v5724_v55, 1 }
  0xa3   :  { %2686 = vmatmul.mubr.f32.gmra.mxu1 %v6632_v56  ;;  %5303 = vmatpush3.msra.mxu0 %v5717_v42  ;;  %v5002_v56 = vld [vmem:[%s9377_s1 + $0x320] sm:$0xff] }
  0xa4   :  { %2690 = vmatprep.mubr.f32.mxu1 %v6789_v33  ;;  %4066 = vmatprep.subr.mxu1 %v7088_v57  ;;  %v7134_v33 = vsel %vm629_vm1, %v1374_v62, %v7120_v9  ;;  %v5725_v42 = vld [vmem:[%s9377_s1 + $0x2a0] sm:$0xff] }
  0xa5   :  { %1981 = vmatmul.mubr.f32.gmra.mxu0 %v7063_v29  ;;  %4067 = vmatpush1.msra.mxu1 %v5003_v49  ;;  %v460_v49 = vld [vmem:[#allocation2 + $0xb8] sm:$0x3]  ;;  %v5726_v62 = vld [vmem:[#allocation2 + $0x160] sm:$0x3] }
  0xa6   :  { %1985 = vmatprep.mubr.f32.mxu0 %v1373_v22  ;;  %4068 = vmatprep.subr.mxu1 %v7088_v57  ;;  %v1386_v22 = vsel %vm629_vm1, %v1384_v54, %v1385_v63 }
  0xa7   :  { %2691 = vmatmul.mubr.f32.gmra.mxu1 %v6728_v48  ;;  %5304 = vmatprep.subr.mxu0 %v5718_v6  ;;  %v5001_v48 = vld [vmem:[%s9377_s1 + $0x318] sm:$0xff] }
  0xa8   :  { %2695 = vmatprep.mubr.f32.mxu1 %v654_v14  ;;  %4069 = vmatpush1.msra.mxu1 %v5002_v56  ;;  %v668_v14 = vrot.slane %v460_v49, 1 }
  0xa9   :  { %1986 = vmatmul.mubr.f32.gmra.mxu0 %v7065_v11  ;;  %4070 = vmatprep.subr.mxu1 %v7088_v57 }
  0xaa   :  { %1990 = vmatprep.mubr.f32.mxu0 %v7134_v33  ;;  %5305 = vmatpush3.msra.mxu0 %v5718_v6  ;;  %v5729_v6 = vld [vmem:[#allocation2 + $0x170] sm:$0xff] }
  0xab   :  { %2696 = vmatmul.mubr.f32.gmra.mxu1 %v6730_v50  ;;  %5306 = vmatprep.subr.mxu0 %v5721_v47  ;;  %v659_v50 = vsel %vm629_vm1, %v6826_v7, %v658_v24  ;;  %v663_v7 = vrot.slane %v457_v31, 1  ;;  %v1390_v24 = vrot.slane %v5729_v6, 1 }
  0xac   :  { %2700 = vmatprep.mubr.f32.mxu1 %v6861_v32  ;;  %4071 = vmatpush1.msra.mxu1 %v5001_v48  ;;  %v5722_v32 = vld [vmem:[#allocation2 + $0x148] sm:$0x3]  ;;  %v669_v48 = vsel %vm629_vm1, %v6935_v58, %v668_v14 }
  0xad   :  { %1991 = vmatmul.mubr.f32.gmra.mxu0 %v7105_v60  ;;  %4072 = vmatprep.subr.mxu1 %v7088_v57  ;;  %v1382_v43 = vrot.slane %v5722_v32, 1  ;;  %v664_v51 = vsel %vm629_vm1, %v6896_v5, %v663_v7  ;;  %v5727_v5 = vld [vmem:[%s9377_s1 + $0x298] sm:$0xff]  ;;  %v466_v32 = vld [vmem:[#allocation2 + $0xe8] sm:$0x3] }
  0xae   :  { %1995 = vmatprep.mubr.f32.mxu0 %v1378_v12  ;;  %4073 = vmatpush1.msra.mxu1 %v5000_v8  ;;  %v463_v12 = vld [vmem:[#allocation2 + $0xd0] sm:$0x3]  ;;  %v5732_v8 = vld [vmem:[#allocation2 + $0x180] sm:$0xff] }
  0xaf   :  { %2701 = vmatmul.mubr.f32.gmra.mxu1 %v6795_v37  ;;  %5307 = vmatpush3.msra.mxu0 %v5721_v47  ;;  %v1383_v37 = vsel %vm629_vm1, %v1380_v27, %v1382_v43  ;;  %v673_v58 = vrot.slane %v463_v12, 1  ;;  %v5025_v27 = vld [vmem:[%s9377_s1 + $0x3d8] sm:$0xff]  ;;  %v1394_v47 = vrot.slane %v5732_v8, 1  ;;  %v5023_v43 = vld [vmem:[%s9377_s1 + $0x3c8] sm:$0xff] }
  0xb0   :  { %2705 = vmatprep.mubr.f32.mxu1 %v659_v50  ;;  %4074 = vmatprep.subr.mxu1 %v7088_v57  ;;  %v5733_v50 = vld [vmem:[#allocation2 + $0x188] sm:$0xff] }
  0xb1   :  { %1996 = vmatmul.mubr.f32.gmra.mxu0 %v7107_v61  ;;  %4075 = vmatpush1.msra.mxu1 %v4999_v10  ;;  %v1395_v31 = vrot.slane %v5733_v50, 1  ;;  %v5024_v10 = vld [vmem:[%s9377_s1 + $0x3d0] sm:$0xff] }
  0xb2   :  { %2000 = vmatprep.mubr.f32.mxu0 %v1381_v52  ;;  %4076 = vmatprep.subr.mxu1 %v7088_v57  ;;  %v5734_v52 = vld [vmem:[%s9377_s1 + $0x288] sm:$0xff] }
  0xb3   :  { %2706 = vmatmul.mubr.f32.gmra.mxu1 %v6797_v39  ;;  %5308 = vmatprep.subr.mxu0 %v5725_v42  ;;  %v5029_v39 = vld [vmem:[%s9377_s1 + $0x3f8] sm:$0xff]  ;;  %v1396_v7 = vsel %vm629_vm1, %v1394_v47, %v1395_v31 }
  0xb4   :  { %2710 = vmatprep.mubr.f32.mxu1 %v6913_v28  ;;  %4077 = vmatpush1.msra.mxu1 %v4998_v38  ;;  %v1387_v28 = vrot.slane %v5726_v62, 1  ;;  %v5735_v38 = vld [vmem:[#allocation2 + $0x190] sm:$0x3]  ;;  %v5747_v47 = vld [vmem:[#allocation2 + $0x218] sm:$0xff] }
  0xb5   :  { %2001 = vmatmul.mubr.f32.gmra.mxu0 %v5719_v2  ;;  %4078 = vmatprep.subr.mxu1 %v7088_v57  ;;  %v1391_v2 = vsel %vm629_vm1, %v1389_v23, %v1390_v24  ;;  %v5742_v23 = vld [vmem:[#allocation2 + $0x1f0] sm:$0x3] }
  0xb6   :  { %2005 = vmatprep.mubr.f32.mxu0 %v1383_v37  ;;  %5309 = vmatpush3.msra.mxu0 %v5725_v42  ;;  %v1388_v56 = vsel %vm629_vm1, %v1385_v63, %v1387_v28  ;;  %v5022_v37 = vld [vmem:[%s9377_s1 + $0x3c0] sm:$0xff] }
  0xb7   :  { %2711 = vmatmul.mubr.f32.gmra.mxu1 %v6868_v45  ;;  %5310 = vmatprep.subr.mxu0 %v5727_v5  ;;  %v5027_v45 = vld [vmem:[%s9377_s1 + $0x3e8] sm:$0xff]  ;;  %v5738_v42 = vld [vmem:[%s9377_s1 + $0x280] sm:$0xff] }
  0xb8   :  { %2715 = vmatprep.mubr.f32.mxu1 %v664_v51  ;;  %4079 = vmatpush2.msra.mxu1 %v5029_v39  ;;  %v469_v39 = vld [vmem:[#allocation2 + $0x100] sm:$0x3] }
  0xb9   :  { %2006 = vmatmul.mubr.f32.gmra.mxu0 %v5720_v26  ;;  %4080 = vmatprep.subr.mxu1 %v7088_v57  ;;  %v5731_v26 = vld [vmem:[%s9377_s1 + $0x290] sm:$0xff]  ;;  %v683_v62 = vrot.slane %v469_v39, 1  ;;  %v5740_v28 = vld [vmem:[#allocation2 + $0x1e0] sm:$0xff] }
  0xba   :  { %2010 = vmatprep.mubr.f32.mxu0 %v1386_v22  ;;  %4081 = vmatpush2.msra.mxu1 %v5028_v1  ;;  %v5739_v22 = vld [vmem:[#allocation2 + $0x1d8] sm:$0x3]  ;;  %v1404_v1 = vrot.slane %v5740_v28, 1 }
  0xbb   :  { %2716 = vmatmul.mubr.f32.gmra.mxu1 %v6870_v46  ;;  %5311 = vmatpush3.msra.mxu0 %v5727_v5  ;;  %v5026_v46 = vld [vmem:[%s9377_s1 + $0x3e0] sm:$0xff]  ;;  %v5741_v5 = vld [vmem:[#allocation2 + $0x1e8] sm:$0xff] }
  0xbc   :  { %2720 = vmatprep.mubr.f32.mxu1 %v6956_v13  ;;  %4082 = vmatprep.subr.mxu1 %v7088_v57  ;;  %v5730_v13 = vld [vmem:[#allocation2 + $0x178] sm:$0x3]  ;;  %v1405_v14 = vrot.slane %v5741_v5, 1 }
  0xbd   :  { %2011 = vmatmul.mubr.f32.gmra.mxu0 %v5723_v44  ;;  %4083 = vmatpush2.msra.mxu1 %v5027_v45  ;;  %v1392_v25 = vrot.slane %v5730_v13, 1  ;;  %v5736_v44 = vld [vmem:[#allocation2 + $0x1c8] sm:$0xff]  ;;  %v684_v45 = vsel %vm629_vm1, %v7042_v20, %v683_v62  ;;  %v475_v13 = vld [vmem:[#allocation2 + $0x130] sm:$0x3] }
  0xbe   :  { %2015 = vmatprep.mubr.f32.mxu0 %v1388_v56  ;;  %4084 = vmatprep.subr.mxu1 %v7088_v57  ;;  %v1399_v54 = vrot.slane %v5736_v44, 1  ;;  %v7262_v56 = vld [vmem:[%s9377_s1 + $0x178] sm:$0xff]  ;;  %v5019_v20 = vld [vmem:[%s9377_s1 + $0x3a8] sm:$0xff] }
  0xbf   :  { %2721 = vmatmul.mubr.f32.gmra.mxu1 %v6917_v34  ;;  %5312 = vmatprep.subr.mxu0 %v5731_v26  ;;  %v1393_v34 = vsel %vm629_vm1, %v1390_v24, %v1392_v25  ;;  %v5745_v25 = vld [vmem:[#allocation2 + $0x208] sm:$0x3] }
  0xc0   :  { %2725 = vmatprep.mubr.f32.mxu1 %v669_v48  ;;  %4085 = vmatpush2.msra.mxu1 %v5026_v46  ;;  %v5743_v48 = vld [vmem:[#allocation2 + $0x1f8] sm:$0xff]  ;;  %v482_v62 = vld [vmem:[#allocation2 + $0x168] sm:$0xff] }
  0xc1   :  { %2016 = vmatmul.mubr.f32.gmra.mxu0 %v5724_v55  ;;  %4086 = vmatprep.subr.mxu1 %v7088_v57  ;;  %v5737_v55 = vld [vmem:[#allocation2 + $0x1d0] sm:$0xff]  ;;  %v1409_v46 = vrot.slane %v5743_v48, 1 }
  0xc2   :  { %2020 = vmatprep.mubr.f32.mxu0 %v1391_v2  ;;  %5313 = vmatpush3.msra.mxu0 %v5731_v26  ;;  %v1400_v63 = vrot.slane %v5737_v55, 1  ;;  %v1412_v26 = vrot.slane %v5745_v25, 1 }
  0xc3   :  { %2726 = vmatmul.mubr.f32.gmra.mxu1 %v6919_v0  ;;  %5314 = vmatprep.subr.mxu0 %v5734_v52  ;;  %v674_v0 = vsel %vm629_vm1, %v6976_v21, %v673_v58  ;;  %v678_v21 = vrot.slane %v466_v32, 1  ;;  %v693_v58 = vrot.slane %v475_v13, 1  ;;  %v5748_v32 = vld [vmem:[#allocation2 + $0x220] sm:$0x3]  ;;  %v485_v13 = vld [vmem:[#allocation2 + $0x1b0] sm:$0xff] }
  0xc4   :  { %2730 = vmatprep.mubr.f32.mxu1 %v6987_v30  ;;  %4087 = vmatpush2.msra.mxu1 %v5025_v27  ;;  %v1397_v30 = vrot.slane %v5735_v38, 1  ;;  %v1401_v49 = vsel %vm629_vm1, %v1399_v54, %v1400_v63  ;;  %v5018_v27 = vld [vmem:[%s9377_s1 + $0x3a0] sm:$0xff] }
  0xc5   :  { %2021 = vmatmul.mubr.f32.gmra.mxu0 %v5728_v15  ;;  %4088 = vmatprep.subr.mxu1 %v7088_v57  ;;  %v679_v51 = vsel %vm629_vm1, %v7010_v53, %v678_v21  ;;  %v5020_v53 = vld [vmem:[%s9377_s1 + $0x3b0] sm:$0xff]  ;;  %v1406_v15 = vsel %vm629_vm1, %v1404_v1, %v1405_v14  ;;  %v5749_v21 = vld [vmem:[#allocation2 + $0x228] sm:$0xff] }
  0xc6   :  { %2025 = vmatprep.mubr.f32.mxu0 %v1393_v34  ;;  %4089 = vmatpush2.msra.mxu1 %v5024_v10  ;;  %v477_v34 = vld [vmem:[#allocation2 + $0x140] sm:$0xff] }
  0xc7   :  { %2731 = vmatmul.mubr.f32.gmra.mxu1 %v6959_v16  ;;  %5315 = vmatpush3.msra.mxu0 %v5734_v52  ;;  %v1398_v16 = vsel %vm629_vm1, %v1395_v31, %v1397_v30  ;;  %v694_v31 = vsel %vm629_vm1, %v7120_v9, %v693_v58  ;;  %v696_v52 = vrot.slane %v477_v34, 1  ;;  %v479_v9 = vld [vmem:[#allocation2 + $0x150] sm:$0xff]  ;;  %v480_v30 = vld [vmem:[#allocation2 + $0x158] sm:$0xff] }
  0xc8   :  { %2735 = vmatprep.mubr.f32.mxu1 %v674_v0  ;;  %4090 = vmatprep.subr.mxu1 %v7088_v57  ;;  %v478_v0 = vld [vmem:[#allocation2 + $0x148] sm:$0x3] }
  0xc9   :  { %2026 = vmatmul.mubr.f32.gmra.mxu0 %v5729_v6  ;;  %4091 = vmatpush2.msra.mxu1 %v5023_v43  ;;  %v1407_v6 = vrot.slane %v5742_v23, 1  ;;  %v1417_v43 = vrot.slane %v5748_v32, 1  ;;  %v698_v38 = vrot.slane %v478_v0, 1  ;;  %v5014_v32 = vld [vmem:[%s9377_s1 + $0x380] sm:$0xff] }
  0xca   :  { %2030 = vmatprep.mubr.f32.mxu0 %v1396_v7  ;;  %4092 = vmatprep.subr.mxu1 %v7088_v57 }
  0xcb   :  { %2736 = vmatmul.mubr.f32.gmra.mxu1 %v6961_v19  ;;  %5316 = vmatprep.subr.mxu0 %v5738_v42  ;;  %v5021_v19 = vld [vmem:[%s9377_s1 + $0x3b8] sm:$0xff]  ;;  %v1408_v24 = vsel %vm629_vm1, %v1405_v14, %v1407_v6  ;;  %v699_v54 = vsel %vm629_vm1, %v696_v52, %v698_v38 }
  0xcc   :  { %2740 = vmatprep.mubr.f32.mxu1 %v7023_v41  ;;  %4093 = vmatpush2.msra.mxu1 %v5022_v37  ;;  %v1402_v41 = vrot.slane %v5739_v22, 1  ;;  %v1419_v37 = vrot.slane %v5749_v21, 1  ;;  %v5016_v22 = vld [vmem:[%s9377_s1 + $0x390] sm:$0xff] }
  0xcd   :  { %2031 = vmatmul.mubr.f32.gmra.mxu0 %v5732_v8  ;;  %4094 = vmatprep.subr.mxu1 %v7088_v57 }
  0xce   :  { %2035 = vmatprep.mubr.f32.mxu0 %v1398_v16  ;;  %5317 = vmatpush3.msra.mxu0 %v5738_v42  ;;  %v5750_v16 = vld [vmem:[#allocation2 + $0x230] sm:$0xff]  ;;  %v481_v42 = vld [vmem:[#allocation2 + $0x160] sm:$0x3] }
  0xcf   :  { %2741 = vmatmul.mubr.f32.gmra.mxu1 %v6995_v35  ;;  %v1403_v35 = vsel %vm629_vm1, %v1400_v63, %v1402_v41  ;;  %5414 = vmatprep.subr.mxu0 %v7262_v56  ;;  %v701_v63 = vrot.slane %v480_v30, 1 }
  0xd0   :  { %2745 = vmatprep.mubr.f32.mxu1 %v679_v51  ;;  %4095 = vmatpush2.msra.mxu1 %v5021_v19 }
  0xd1   :  { %2036 = vmatmul.mubr.f32.gmra.mxu0 %v5733_v50  ;;  %4096 = vmatprep.subr.mxu1 %v7088_v57  ;;  %v1415_v50 = vrot.slane %v5747_v47, 1 }
  0xd2   :  { %2040 = vmatprep.mubr.f32.mxu0 %v1401_v49  ;;  %4097 = vmatpush2.msra.mxu1 %v5020_v53  ;;  %v703_v49 = vrot.slane %v481_v42, 1  ;;  %v483_v53 = vld [vmem:[#allocation2 + $0x170] sm:$0xff]  ;;  %v5760_v42 = vld [vmem:[#allocation2 + $0x280] sm:$0x3] }
  0xd3   :  { %2746 = vmatmul.mubr.f32.gmra.mxu1 %v6997_v36  ;;  %4098 = vmatprep.subr.mxu1 %v7088_v57  ;;  %v472_v36 = vld [vmem:[#allocation2 + $0x118] sm:$0x3]  ;;  %v706_v23 = vrot.slane %v483_v53, 1 }
  0xd4   :  { %2750 = vmatprep.mubr.f32.mxu1 %v7061_v17  ;;  %v688_v17 = vrot.slane %v472_v36, 1  ;;  %4099 = vmatpush2.msra.mxu1 %v5019_v20  ;;  %v704_v36 = vsel %vm629_vm1, %v701_v63, %v703_v49  ;;  %v491_v49 = vld [vmem:[#allocation2 + $0x1e0] sm:$0xff] }
  0xd5   :  { %2041 = vmatmul.mubr.f32.gmra.mxu0 %v5736_v44  ;;  %4100 = vmatprep.subr.mxu1 %v7088_v57  ;;  %v1420_v44 = vrot.slane %v5750_v16, 1 }
  0xd6   :  { %2045 = vmatprep.mubr.f32.mxu0 %v1403_v35  ;;  %v689_v2 = vsel %vm629_vm1, %v7079_v40, %v688_v17  ;;  %4101 = vmatpush2.msra.mxu1 %v5018_v27  ;;  %v484_v17 = vld [vmem:[#allocation2 + $0x178] sm:$0x3]  ;;  %v5756_v27 = vld [vmem:[#allocation2 + $0x260] sm:$0xff] }
  0xd7   :  { %2751 = vmatmul.mubr.f32.gmra.mxu1 %v7028_v3  ;;  %v5744_v3 = vld [vmem:[#allocation2 + $0x200] sm:$0xff]  ;;  %4102 = vmatprep.subr.mxu1 %v7088_v57  ;;  %v1421_v51 = vsel %vm629_vm1, %v1419_v37, %v1420_v44 }
  0xd8   :  { %2755 = vmatprep.mubr.f32.mxu1 %v684_v45  ;;  %v1410_v12 = vrot.slane %v5744_v3, 1 }
  0xd9   :  { %2046 = vmatmul.mubr.f32.gmra.mxu0 %v5737_v55  ;;  %v700_v55 = vrot.slane %v479_v9, 1 }
  0xda   :  { %2050 = vmatprep.mubr.f32.mxu0 %v1406_v15  ;;  %v1413_v40 = vsel %vm629_vm1, %v1410_v12, %v1412_v26  ;;  %v705_v15 = vrot.slane %v482_v62, 1  ;;  %v5755_v26 = vld [vmem:[#allocation2 + $0x258] sm:$0xff] }
  0xdb   :  { %2756 = vmatmul.mubr.f32.gmra.mxu1 %v7030_v4  ;;  %v1411_v4 = vsel %vm629_vm1, %v1409_v46, %v1410_v12  ;;  %v702_v39 = vsel %vm629_vm1, %v700_v55, %v701_v63  ;;  %v708_v12 = vrot.slane %v484_v17, 1  ;;  %v1429_v58 = vrot.slane %v5755_v26, 1  ;;  %v490_v55 = vld [vmem:[#allocation2 + $0x1d8] sm:$0x3] }
  0xdc   :  { %2760 = vmatprep.mubr.f32.mxu1 %v7097_v59  ;;  %v476_v59 = vld [vmem:[#allocation2 + $0x138] sm:$0xff] }
  0xdd   :  { %2051 = vmatmul.mubr.f32.gmra.mxu0 %v5740_v28  ;;  %v695_v10 = vrot.slane %v476_v59, 1  ;;  %v5752_v28 = vld [vmem:[#allocation2 + $0x240] sm:$0xff] }
  0xde   :  { %2055 = vmatprep.mubr.f32.mxu0 %v1408_v24  ;;  %v1424_v1 = vrot.slane %v5752_v28, 1  ;;  %v5754_v24 = vld [vmem:[#allocation2 + $0x250] sm:$0x3] }
  0xdf   :  { %2761 = vmatmul.mubr.f32.gmra.mxu1 %v7063_v29  ;;  %v5746_v29 = vld [vmem:[#allocation2 + $0x210] sm:$0xff]  ;;  %v697_v7 = vsel %vm629_vm1, %v695_v10, %v696_v52 }
  0xe0   :  { %2765 = vmatprep.mubr.f32.mxu1 %v689_v2  ;;  %v1414_v8 = vrot.slane %v5746_v29, 1  ;;  %v5015_v2 = vld [vmem:[%s9377_s1 + $0x388] sm:$0xff] }
  0xe1   :  { %2056 = vmatmul.mubr.f32.gmra.mxu0 %v5741_v5  ;;  %v5753_v5 = vld [vmem:[#allocation2 + $0x248] sm:$0xff] }
  0xe2   :  { %2060 = vmatprep.mubr.f32.mxu0 %v1411_v4  ;;  %v1425_v14 = vrot.slane %v5753_v5, 1 }
  0xe3   :  { %2766 = vmatmul.mubr.f32.gmra.mxu1 %v7065_v11  ;;  %v1416_v11 = vsel %vm629_vm1, %v1414_v8, %v1415_v50  ;;  %v487_v8 = vld [vmem:[#allocation2 + $0x1c0] sm:$0x3] }
  0xe4   :  { %2770 = vmatprep.mubr.f32.mxu1 %v7134_v33  ;;  %v5017_v33 = vld [vmem:[%s9377_s1 + $0x398] sm:$0xff]  ;;  %v1426_v20 = vsel %vm629_vm1, %v1424_v1, %v1425_v14 }
  0xe5   :  { %2061 = vmatmul.mubr.f32.gmra.mxu0 %v5743_v48  ;;  %4103 = vmatpush2.msra.mxu1 %v5017_v33  ;;  %v1427_v48 = vrot.slane %v5754_v24, 1  ;;  %v5758_v33 = vld [vmem:[#allocation2 + $0x270] sm:$0xff] }
  0xe6   :  { %2065 = vmatprep.mubr.f32.mxu0 %v1413_v40  ;;  %4104 = vmatprep.subr.mxu1 %v7088_v57  ;;  %v709_v40 = vsel %vm629_vm1, %v706_v23, %v708_v12 }
  0xe7   :  { %2771 = vmatmul.mubr.f32.gmra.mxu1 %v7105_v60  ;;  %v1418_v60 = vsel %vm629_vm1, %v1415_v50, %v1417_v43  ;;  %v1428_v25 = vsel %vm629_vm1, %v1425_v14, %v1427_v48  ;;  %v488_v43 = vld [vmem:[#allocation2 + $0x1c8] sm:$0xff] }
  0xe8   :  { %2775 = vmatprep.mubr.f32.mxu1 %v694_v31  ;;  %4105 = vmatpush2.msra.mxu1 %v5016_v22  ;;  %v5757_v31 = vld [vmem:[#allocation2 + $0x268] sm:$0x3] }
  0xe9   :  { %2066 = vmatmul.mubr.f32.gmra.mxu0 %v5744_v3  ;;  %4106 = vmatprep.subr.mxu1 %v7088_v57  ;;  %v707_v3 = vsel %vm629_vm1, %v705_v15, %v706_v23  ;;  %v1432_v10 = vrot.slane %v5757_v31, 1  ;;  %v492_v22 = vld [vmem:[#allocation2 + $0x1e8] sm:$0xff]  ;;  %v493_v23 = vld [vmem:[#allocation2 + $0x1f0] sm:$0x3] }
  0xea   :  { %2070 = vmatprep.mubr.f32.mxu0 %v1416_v11  ;;  %4107 = vmatpush2.msra.mxu1 %v5015_v2  ;;  %v713_v11 = vrot.slane %v487_v8, 1  ;;  %v721_v15 = vrot.slane %v492_v22, 1  ;;  %v494_v2 = vld [vmem:[#allocation2 + $0x1f8] sm:$0xff] }
  0xeb   :  { %2776 = vmatmul.mubr.f32.gmra.mxu1 %v7107_v61  ;;  %v5751_v61 = vld [vmem:[#allocation2 + $0x238] sm:$0x3]  ;;  %4108 = vmatprep.subr.mxu1 %v7088_v57 }
  0xec   :  { %2780 = vmatprep.mubr.f32.mxu1 %v697_v7  ;;  %v1422_v19 = vrot.slane %v5751_v61, 1  ;;  %v489_v7 = vld [vmem:[#allocation2 + $0x1d0] sm:$0xff]  ;;  %4109 = vmatpush2.msra.mxu1 %v5014_v32  ;;  %v714_v37 = vsel %vm629_vm1, %v6948_v18, %v713_v11 }
  0xed   :  { %2071 = vmatmul.mubr.f32.gmra.mxu0 %v5746_v29  ;;  %v710_v29 = vrot.slane %v485_v13, 1 }
  0xee   :  { %2075 = vmatprep.mubr.f32.mxu0 %v1418_v60  ;;  %v1423_v35 = vsel %vm629_vm1, %v1420_v44, %v1422_v19  ;;  %v716_v44 = vrot.slane %v489_v7, 1 }
  0xef   :  { %2781 = vmatmul.mubr.f32.gmra.mxu1 %v476_v59  ;;  %v1430_v59 = vrot.slane %v5756_v27, 1  ;;  %v712_v0 = vsel %vm629_vm1, %v710_v29, %v6948_v18 }
  0xf0   :  { %2785 = vmatprep.mubr.f32.mxu1 %v699_v54 }
  0xf1   :  { %2076 = vmatmul.mubr.f32.gmra.mxu0 %v5747_v47  ;;  %v1431_v50 = vsel %vm629_vm1, %v1429_v58, %v1430_v59  ;;  %v1433_v38 = vsel %vm629_vm1, %v1430_v59, %v1432_v10  ;;  %v496_v10 = vld [vmem:[#allocation2 + $0x208] sm:$0x3] }
  0xf2   :  { %2080 = vmatprep.mubr.f32.mxu0 %v1421_v51  ;;  %v1437_v51 = vrot.slane %v5760_v42, 1 }
  0xf3   :  { %2786 = vmatmul.mubr.f32.gmra.mxu1 %v477_v34 }
  0xf4   :  { %2790 = vmatprep.mubr.f32.mxu1 %v702_v39  ;;  %v718_v39 = vrot.slane %v490_v55, 1 }
  0xf5   :  { %2081 = vmatmul.mubr.f32.gmra.mxu0 %v5749_v21 }
  0xf6   :  { %v7302_v41 = vpop.f32.mrf.mxu1  ;;  %2085 = vmatprep.mubr.f32.mxu0 %v1423_v35  ;;  %v719_v14 = vsel %vm629_vm1, %v716_v44, %v718_v39 }
  0xf7   :  { %2791 = vmatmul.mubr.f32.gmra.mxu1 %v479_v9  ;;  %v1434_v9 = vrot.slane %v5758_v33, 1 }
  0xf8   :  { %v7306_v45 = vpop.f32.mrf.mxu1  ;;  %2795 = vmatprep.mubr.f32.mxu1 %v704_v36  ;;  %v720_v36 = vrot.slane %v491_v49, 1 }
  0xf9   :  { %2086 = vmatmul.mubr.f32.gmra.mxu0 %v5750_v16  ;;  %v715_v16 = vrot.slane %v488_v43, 1 }
  0xfa   :  { %v7309_v6 = vpop.f32.mrf.mxu1  ;;  %2090 = vmatprep.mubr.f32.mxu0 %v1426_v20  ;;  %v5763_v20 = vld [vmem:[#allocation2 + $0x298] sm:$0x3]  ;;  %v722_v48 = vsel %vm629_vm1, %v720_v36, %v721_v15  ;;  %v5769_v36 = vld [vmem:[#allocation2 + $0x2c8] sm:$0x3] }
  0xfb   :  { %2796 = vmatmul.mubr.f32.gmra.mxu1 %v480_v30  ;;  %v5759_v30 = vld [vmem:[#allocation2 + $0x278] sm:$0xff]  ;;  %v717_v19 = vsel %vm629_vm1, %v715_v16, %v716_v44  ;;  %v1442_v24 = vrot.slane %v5763_v20, 1 }
  0xfc   :  { %v7312_v46 = vpop.f32.mrf.mxu1  ;;  %2800 = vmatprep.mubr.f32.mxu1 %v707_v3  ;;  %v1435_v60 = vrot.slane %v5759_v30, 1  ;;  %v723_v3 = vrot.slane %v493_v23, 1 }
  0xfd   :  { %2091 = vmatmul.mubr.f32.gmra.mxu0 %v5752_v28  ;;  %v5762_v28 = vld [vmem:[#allocation2 + $0x290] sm:$0xff] }
  0xfe   :  { %v7318_v4 = vpop.f32.mrf.mxu1  ;;  %2095 = vmatprep.mubr.f32.mxu0 %v1428_v25  ;;  %v1436_v63 = vsel %vm629_vm1, %v1434_v9, %v1435_v60  ;;  %v1440_v1 = vrot.slane %v5762_v28, 1  ;;  %v724_v8 = vsel %vm629_vm1, %v721_v15, %v723_v3  ;;  %v1452_v15 = vrot.slane %v5769_v36, 1  ;;  %v7395_v3 = vld [vmem:[#allocation2 + $0x230] sm:$0xff] }
  0xff   :  { %2801 = vmatmul.mubr.f32.gmra.mxu1 %v482_v62  ;;  %v1438_v62 = vsel %vm629_vm1, %v1435_v60, %v1437_v51  ;;  %v497_v60 = vld [vmem:[#allocation2 + $0x210] sm:$0xff]  ;;  %v5768_v51 = vld [vmem:[#allocation2 + $0x2c0] sm:$0xff] }
 0x100   :  { %v7322_v34 = vpop.f32.mrf.mxu1  ;;  %2805 = vmatprep.mubr.f32.mxu1 %v709_v40  ;;  %v1443_v25 = vsel %vm629_vm1, %v1440_v1, %v1442_v24  ;;  %v5774_v36 = vld [vmem:[#allocation2 + $0x2f0] sm:$0xff] }
 0x101   :  { %2096 = vmatmul.mubr.f32.gmra.mxu0 %v5753_v5 }
 0x102   :  { %v7325_v47 = vpop.f32.mrf.mxu1  ;;  %2100 = vmatprep.mubr.f32.mxu0 %v1431_v50  ;;  %v725_v50 = vrot.slane %v494_v2, 1 }
 0x103   :  { %2806 = vmatmul.mubr.f32.gmra.mxu1 %v483_v53  ;;  %v5761_v53 = vld [vmem:[#allocation2 + $0x288] sm:$0xff] }
 0x104   :  { %v7328_v52 = vpop.f32.mrf.mxu1  ;;  %2810 = vmatprep.mubr.f32.mxu1 %v712_v0  ;;  %v1439_v35 = vrot.slane %v5761_v53, 1 }
 0x105   :  { %2101 = vmatmul.mubr.f32.gmra.mxu0 %v5755_v26  ;;  %v5764_v26 = vld [vmem:[#allocation2 + $0x2a0] sm:$0xff] }
 0x106   :  { %v7336_v21 = vpop.f32.mrf.mxu1  ;;  %2105 = vmatprep.mubr.f32.mxu0 %v1433_v38  ;;  %v1444_v58 = vrot.slane %v5764_v26, 1 }
 0x107   :  { %2811 = vmatmul.mubr.f32.gmra.mxu1 %v485_v13  ;;  %v7359_v13 = vld [vmem:[#allocation2 + $0x200] sm:$0xff] }
 0x108   :  { %v7340_v54 = vpop.f32.mrf.mxu1  ;;  %2815 = vmatprep.mubr.f32.mxu1 %v714_v37  ;;  %v726_v31 = vrot.slane %v7359_v13, 1  ;;  %v7376_v37 = vld [vmem:[#allocation2 + $0x218] sm:$0xff] }
 0x109   :  { %2106 = vmatmul.mubr.f32.gmra.mxu0 %v5756_v27  ;;  %v5765_v27 = vld [vmem:[#allocation2 + $0x2a8] sm:$0xff] }
 0x10a   :  { %v7343_v61 = vpop.f32.mrf.mxu1  ;;  %2110 = vmatprep.mubr.f32.mxu0 %v1436_v63  ;;  %v1445_v59 = vrot.slane %v5765_v27, 1  ;;  %v727_v9 = vsel %vm629_vm1, %v725_v50, %v726_v31  ;;  %v5767_v63 = vld [vmem:[#allocation2 + $0x2b8] sm:$0xff] }
 0x10b   :  { %2816 = vmatmul.mubr.f32.gmra.mxu1 %v7088_v57  ;;  %v1441_v57 = vsel %vm629_vm1, %v1439_v35, %v1440_v1  ;;  %v1449_v42 = vrot.slane %v5767_v63, 1  ;;  %v731_v35 = vrot.slane %v7376_v37, 1 }
 0x10c   :  { %v7346_v18 = vpop.f32.mrf.mxu1  ;;  %2820 = vmatprep.mubr.f32.mxu1 %v717_v19  ;;  %v1446_v32 = vsel %vm629_vm1, %v1444_v58, %v1445_v59  ;;  %v1450_v19 = vrot.slane %v5768_v51, 1  ;;  %v5770_v58 = vld [vmem:[#allocation2 + $0x2d0] sm:$0xff] }
 0x10d   :  { %2111 = vmatmul.mubr.f32.gmra.mxu0 %v5758_v33 }
 0x10e   :  { %v7350_v5 = vpop.f32.mrf.mxu1  ;;  %2115 = vmatprep.mubr.f32.mxu0 %v1438_v62 }
 0x10f   :  { %2821 = vmatmul.mubr.f32.gmra.mxu1 %v488_v43  ;;  %v5766_v43 = vld [vmem:[#allocation2 + $0x2b0] sm:$0x3] }
 0x110   :  { %v7353_v17 = vpop.f32.mrf.mxu1  ;;  %2825 = vmatprep.mubr.f32.mxu1 %v719_v14  ;;  %v1451_v14 = vsel %vm629_vm1, %v1449_v42, %v1450_v19 }
 0x111   :  { %2116 = vmatmul.mubr.f32.gmra.mxu0 %v5759_v30  ;;  %v728_v30 = vrot.slane %v496_v10, 1 }
 0x112   :  { %v7357_v12 = vpop.f32.mrf.mxu1  ;;  %2120 = vmatprep.mubr.f32.mxu0 %v1441_v57 }
 0x113   :  { %9394 = vst [vmem:[#allocation3_spill] sm:$0xff] %v7357_v12  ;;  %2826 = vmatmul.mubr.f32.gmra.mxu1 %v489_v7  ;;  %v1447_v7 = vrot.slane %v5766_v43, 1  ;;  %v729_v62 = vsel %vm629_vm1, %v726_v31, %v728_v30  ;;  %v5772_v30 = vld [vmem:[#allocation2 + $0x2e0] sm:$0x3]  ;;  %v5824_v12 = vld [vmem:[#allocation2 + $0x28] sm:$0x3] }
 0x114   :  { %v7362_v40 = vpop.f32.mrf.mxu1  ;;  %2830 = vmatprep.mubr.f32.mxu1 %v722_v48  ;;  %v500_v48 = vld [vmem:[#allocation2 + $0x228] sm:$0xff] }
 0x115   :  { %9395 = vst [vmem:[#allocation4_spill] sm:$0xff] %v7362_v40  ;;  %v7364_v29 = vpop.f32.mrf.mxu0  ;;  %2121 = vmatmul.mubr.f32.gmra.mxu0 %v5761_v53  ;;  %v1448_v55 = vsel %vm629_vm1, %v1445_v59, %v1447_v7  ;;  %v730_v53 = vrot.slane %v497_v60, 1  ;;  %v1454_v59 = vrot.slane %v5770_v58, 1  ;;  %v3360_v40 = vld [vmem:[#allocation2 + $0x48] sm:$0xff] }
 0x116   :  { %9396 = vst [vmem:[#allocation5_spill] sm:$0xff] %v7364_v29  ;;  %2125 = vmatprep.mubr.f32.mxu0 %v1443_v25 }
 0x117   :  { %v7368_v0 = vpop.f32.mrf.mxu1  ;;  %2831 = vmatmul.mubr.f32.gmra.mxu1 %v491_v49  ;;  %v1884_v11 = vpop.f32.mrf.mxu0  ;;  %v732_v20 = vsel %vm629_vm1, %v730_v53, %v731_v35  ;;  %v7415_v53 = vld [vmem:[#allocation2 + $0x248] sm:$0xff] }
 0x118   :  { %9397 = vst [vmem:[#allocation6_spill] sm:$0xff] %v7368_v0  ;;  %2835 = vmatprep.mubr.f32.mxu1 %v724_v8  ;;  %v5771_v8 = vld [vmem:[#allocation2 + $0x2d8] sm:$0xff]  ;;  %v735_v11 = vrot.slane %v500_v48, 1 }
 0x119   :  { %v7371_v38 = vpop.f32.mrf.mxu1  ;;  %v7373_v33 = vpop.f32.mrf.mxu0  ;;  %2126 = vmatmul.mubr.f32.gmra.mxu0 %v5762_v28  ;;  %v1455_v50 = vrot.slane %v5771_v8, 1 }
 0x11a   :  { %9398 = vst [vmem:[#allocation7_spill] sm:$0xff] %v7371_v38  ;;  %9399 = vst [vmem:[#allocation8_spill] sm:$0xff] %v7373_v33  ;;  %2130 = vmatprep.mubr.f32.mxu0 %v1446_v32  ;;  %v736_v32 = vrot.slane %v7395_v3, 1 }
 0x11b   :  { %v7378_v16 = vpop.f32.mrf.mxu1  ;;  %2836 = vmatmul.mubr.f32.gmra.mxu1 %v492_v22  ;;  %v1889_v44 = vpop.f32.mrf.mxu0  ;;  %v499_v22 = vld [vmem:[#allocation2 + $0x220] sm:$0x3] }
 0x11c   :  { %9400 = vst [vmem:[#allocation9_spill] sm:$0xff] %v7378_v16  ;;  %2840 = vmatprep.mubr.f32.mxu1 %v727_v9  ;;  %v733_v24 = vrot.slane %v499_v22, 1  ;;  %v1456_v9 = vsel %vm629_vm1, %v1454_v59, %v1455_v50  ;;  %v1457_v44 = vrot.slane %v5772_v30, 1  ;;  %v506_v30 = vld [vmem:[#allocation2 + $0x258] sm:$0xff]  ;;  %v3357_v16 = vld [vmem:[#allocation2 + $0x30] sm:$0xff] }
 0x11d   :  { %v7381_v39 = vpop.f32.mrf.mxu1  ;;  %v7383_v49 = vpop.f32.mrf.mxu0  ;;  %2131 = vmatmul.mubr.f32.gmra.mxu0 %v5764_v26  ;;  %v1453_v26 = vsel %vm629_vm1, %v1450_v19, %v1452_v15  ;;  %v1460_v15 = vrot.slane %v5774_v36, 1 }
 0x11e   :  { %9401 = vst [vmem:[#allocation10_spill] sm:$0xff] %v7381_v39  ;;  %9402 = vst [vmem:[#allocation11_spill] sm:$0xff] %v7383_v49  ;;  %2135 = vmatprep.mubr.f32.mxu0 %v1448_v55  ;;  %v734_v10 = vsel %vm629_vm1, %v731_v35, %v733_v24  ;;  %v1458_v22 = vsel %vm629_vm1, %v1455_v50, %v1457_v44  ;;  %v7435_v44 = vld [vmem:[#allocation2 + $0x260] sm:$0xff] }
 0x11f   :  { %v7387_v28 = vpop.f32.mrf.mxu1  ;;  %2841 = vmatmul.mubr.f32.gmra.mxu1 %v494_v2  ;;  %v1894_v1 = vpop.f32.mrf.mxu0 }
 0x120   :  { %9403 = vst [vmem:[#allocation12_spill] sm:$0xff] %v7387_v28  ;;  %2845 = vmatprep.mubr.f32.mxu1 %v729_v62  ;;  %v503_v62 = vld [vmem:[#allocation2 + $0x240] sm:$0xff]  ;;  %v5773_v1 = vld [vmem:[#allocation2 + $0x2e8] sm:$0xff] }
 0x121   :  { %v7390_v23 = vpop.f32.mrf.mxu1  ;;  %v7392_v57 = vpop.f32.mrf.mxu0  ;;  %2136 = vmatmul.mubr.f32.gmra.mxu0 %v5765_v27 }
 0x122   :  { %9404 = vst [vmem:[#allocation13_spill] sm:$0xff] %v7390_v23  ;;  %9405 = vst [vmem:[#allocation14_spill] sm:$0xff] %v7392_v57  ;;  %2140 = vmatprep.mubr.f32.mxu0 %v1451_v14  ;;  %v1459_v14 = vrot.slane %v5773_v1, 1 }
 0x123   :  { %v7397_v25 = vpop.f32.mrf.mxu1  ;;  %2846 = vmatmul.mubr.f32.gmra.mxu1 %v7359_v13  ;;  %v1899_v2 = vpop.f32.mrf.mxu0  ;;  %v502_v13 = vld [vmem:[#allocation2 + $0x238] sm:$0x3] }
 0x124   :  { %9406 = vst [vmem:[#allocation15_spill] sm:$0xff] %v7397_v25  ;;  %2850 = vmatprep.mubr.f32.mxu1 %v732_v20  ;;  %v738_v19 = vrot.slane %v502_v13, 1  ;;  %v740_v2 = vrot.slane %v503_v62, 1 }
 0x125   :  { %v7401_v27 = vpop.f32.mrf.mxu1  ;;  %v7403_v31 = vpop.f32.mrf.mxu0  ;;  %2141 = vmatmul.mubr.f32.gmra.mxu0 %v5767_v63  ;;  %v737_v63 = vsel %vm629_vm1, %v735_v11, %v736_v32  ;;  %v5775_v11 = vld [vmem:[#allocation2 + $0x2f8] sm:$0x3] }
 0x126   :  { %9407 = vst [vmem:[#allocation16_spill] sm:$0xff] %v7401_v27  ;;  %9408 = vst [vmem:[#allocation17_spill] sm:$0xff] %v7403_v31  ;;  %2145 = vmatprep.mubr.f32.mxu0 %v1453_v26  ;;  %v739_v24 = vsel %vm629_vm1, %v736_v32, %v738_v19  ;;  %v741_v26 = vrot.slane %v7415_v53, 1  ;;  %v1462_v13 = vrot.slane %v5775_v11, 1  ;;  %v5819_v27 = vld [vmem:[#allocation2 + $0x128] sm:$0xff] }
 0x127   :  { %v7407_v43 = vpop.f32.mrf.mxu1  ;;  %2851 = vmatmul.mubr.f32.gmra.mxu1 %v497_v60  ;;  %v1904_v7 = vpop.f32.mrf.mxu0  ;;  %v7746_v28 = vrot.slane %v5819_v27, 2 }
 0x128   :  { %9409 = vst [vmem:[#allocation18_spill] sm:$0xff] %v7407_v43  ;;  %2855 = vmatprep.mubr.f32.mxu1 %v734_v10  ;;  %v1461_v10 = vsel %vm629_vm1, %v1459_v14, %v1460_v15  ;;  %v1463_v19 = vsel %vm629_vm1, %v1460_v15, %v1462_v13  ;;  %v5777_v14 = vld [vmem:[#allocation2 + $0x308] sm:$0xff] }
 0x129   :  { %v7410_v55 = vpop.f32.mrf.mxu1  ;;  %v7412_v42 = vpop.f32.mrf.mxu0  ;;  %2146 = vmatmul.mubr.f32.gmra.mxu0 %v5768_v51 }
 0x12a   :  { %9410 = vst [vmem:[#allocation19_spill] sm:$0xff] %v7410_v55  ;;  %9411 = vst [vmem:[#allocation20_spill] sm:$0xff] %v7412_v42  ;;  %2150 = vmatprep.mubr.f32.mxu0 %v1456_v9  ;;  %v5781_v42 = vld [vmem:[#allocation2 + $0x328] sm:$0x3] }
 0x12b   :  { %v7417_v35 = vpop.f32.mrf.mxu1  ;;  %2856 = vmatmul.mubr.f32.gmra.mxu1 %v7376_v37  ;;  %v1909_v60 = vpop.f32.mrf.mxu0  ;;  %v505_v37 = vld [vmem:[#allocation2 + $0x250] sm:$0x3] }
 0x12c   :  { %9412 = vst [vmem:[#allocation21_spill] sm:$0xff] %v7417_v35  ;;  %2860 = vmatprep.mubr.f32.mxu1 %v737_v63  ;;  %v743_v32 = vrot.slane %v505_v37, 1  ;;  %v5776_v60 = vld [vmem:[#allocation2 + $0x300] sm:$0xff] }
 0x12d   :  { %v7421_v51 = vpop.f32.mrf.mxu1  ;;  %v7423_v20 = vpop.f32.mrf.mxu0  ;;  %2151 = vmatmul.mubr.f32.gmra.mxu0 %v5770_v58  ;;  %v742_v58 = vsel %vm629_vm1, %v740_v2, %v741_v26 }
 0x12e   :  { %9413 = vst [vmem:[#allocation22_spill] sm:$0xff] %v7421_v51  ;;  %9414 = vst [vmem:[#allocation23_spill] sm:$0xff] %v7423_v20  ;;  %2155 = vmatprep.mubr.f32.mxu0 %v1458_v22  ;;  %v1464_v22 = vrot.slane %v5776_v60, 1  ;;  %v744_v37 = vsel %vm629_vm1, %v741_v26, %v743_v32  ;;  %v509_v32 = vld [vmem:[#allocation2 + $0x270] sm:$0xff] }
 0x12f   :  { %v7427_v59 = vpop.f32.mrf.mxu1  ;;  %2861 = vmatmul.mubr.f32.gmra.mxu1 %v500_v48  ;;  %v1914_v50 = vpop.f32.mrf.mxu0 }
 0x130   :  { %9415 = vst [vmem:[#allocation24_spill] sm:$0xff] %v7427_v59  ;;  %2865 = vmatprep.mubr.f32.mxu1 %v739_v24  ;;  %v1465_v24 = vrot.slane %v5777_v14, 1  ;;  %v745_v50 = vrot.slane %v506_v30, 1 }
 0x131   :  { %v7430_v7 = vpop.f32.mrf.mxu1  ;;  %v7432_v9 = vpop.f32.mrf.mxu0  ;;  %2156 = vmatmul.mubr.f32.gmra.mxu0 %v5771_v8 }
 0x132   :  { %9416 = vst [vmem:[#allocation25_spill] sm:$0xff] %v7430_v7  ;;  %9417 = vst [vmem:[#allocation26_spill] sm:$0xff] %v7432_v9  ;;  %2160 = vmatprep.mubr.f32.mxu0 %v1461_v10  ;;  %v746_v10 = vrot.slane %v7435_v44, 1  ;;  %v1466_v13 = vsel %vm629_vm1, %v1464_v22, %v1465_v24  ;;  %v1113_v7 = vld [vmem:[%s9377_s1 + $0x110] sm:$0xff] }
 0x133   :  { %v7437_v63 = vpop.f32.mrf.mxu1  ;;  %2866 = vmatmul.mubr.f32.gmra.mxu1 %v7395_v3  ;;  %v1919_v48 = vpop.f32.mrf.mxu0  ;;  %v508_v3 = vld [vmem:[#allocation2 + $0x268] sm:$0x3] }
 0x134   :  { %9418 = vst [vmem:[#allocation27_spill] sm:$0xff] %v7437_v63  ;;  %2870 = vmatprep.mubr.f32.mxu1 %v742_v58  ;;  %v5778_v48 = vld [vmem:[#allocation2 + $0x310] sm:$0x3]  ;;  %v748_v26 = vrot.slane %v508_v3, 1 }
 0x135   :  { %v7441_v8 = vpop.f32.mrf.mxu1  ;;  %v7443_v2 = vpop.f32.mrf.mxu0  ;;  %2161 = vmatmul.mubr.f32.gmra.mxu0 %v5773_v1  ;;  %v1467_v58 = vrot.slane %v5778_v48, 1  ;;  %v747_v1 = vsel %vm629_vm1, %v745_v50, %v746_v10  ;;  %v5780_v48 = vld [vmem:[#allocation2 + $0x320] sm:$0xff] }
 0x136   :  { %9419 = vst [vmem:[#allocation28_spill] sm:$0xff] %v7441_v8  ;;  %9420 = vst [vmem:[#allocation29_spill] sm:$0xff] %v7443_v2  ;;  %2165 = vmatprep.mubr.f32.mxu0 %v1463_v19  ;;  %v7455_v19 = vld [vmem:[#allocation2 + $0x278] sm:$0xff]  ;;  %v1470_v31 = vrot.slane %v5780_v48, 1  ;;  %v749_v3 = vsel %vm629_vm1, %v746_v10, %v748_v26  ;;  %v512_v26 = vld [vmem:[#allocation2 + $0x288] sm:$0xff] }
 0x137   :  { %v7447_v11 = vpop.f32.mrf.mxu1  ;;  %2871 = vmatmul.mubr.f32.gmra.mxu1 %v503_v62  ;;  %v1924_v15 = vpop.f32.mrf.mxu0  ;;  %v1468_v22 = vsel %vm629_vm1, %v1465_v24, %v1467_v58 }
 0x138   :  { %9421 = vst [vmem:[#allocation30_spill] sm:$0xff] %v7447_v11  ;;  %2875 = vmatprep.mubr.f32.mxu1 %v744_v37  ;;  %v5779_v37 = vld [vmem:[#allocation2 + $0x318] sm:$0xff] }
 0x139   :  { %v7450_v20 = vpop.f32.mrf.mxu1  ;;  %v7452_v2 = vpop.f32.mrf.mxu0  ;;  %2166 = vmatmul.mubr.f32.gmra.mxu0 %v5774_v36  ;;  %v1469_v15 = vrot.slane %v5779_v37, 1 }
 0x13a   :  { %9422 = vst [vmem:[#allocation31_spill] sm:$0xff] %v7450_v20  ;;  %9423 = vst [vmem:[#allocation32_spill] sm:$0xff] %v7452_v2  ;;  %2170 = vmatprep.mubr.f32.mxu0 %v1466_v13  ;;  %v750_v13 = vrot.slane %v509_v32, 1  ;;  %v751_v2 = vrot.slane %v7455_v19, 1  ;;  %v1117_v20 = vld [vmem:[%s9377_s1 + $0x130] sm:$0xff] }
 0x13b   :  { %v7457_v9 = vpop.f32.mrf.mxu1  ;;  %2876 = vmatmul.mubr.f32.gmra.mxu1 %v7415_v53  ;;  %v1929_v62 = vpop.f32.mrf.mxu0  ;;  %v511_v53 = vld [vmem:[#allocation2 + $0x280] sm:$0x3]  ;;  %v1471_v58 = vsel %vm629_vm1, %v1469_v15, %v1470_v31  ;;  %v5782_v15 = vld [vmem:[#allocation2 + $0x330] sm:$0xff] }
 0x13c   :  { %9424 = vst [vmem:[#allocation33_spill] sm:$0xff] %v7457_v9  ;;  %2880 = vmatprep.mubr.f32.mxu1 %v747_v1  ;;  %v1472_v1 = vrot.slane %v5781_v42, 1  ;;  %v753_v10 = vrot.slane %v511_v53, 1 }
 0x13d   :  { %v7461_v36 = vpop.f32.mrf.mxu1  ;;  %v7463_v50 = vpop.f32.mrf.mxu0  ;;  %2171 = vmatmul.mubr.f32.gmra.mxu0 %v5776_v60  ;;  %v752_v60 = vsel %vm629_vm1, %v750_v13, %v751_v2 }
 0x13e   :  { %9425 = vst [vmem:[#allocation34_spill] sm:$0xff] %v7461_v36  ;;  %9426 = vst [vmem:[#allocation35_spill] sm:$0xff] %v7463_v50  ;;  %2175 = vmatprep.mubr.f32.mxu0 %v1468_v22  ;;  %v7475_v22 = vld [vmem:[#allocation2 + $0x290] sm:$0xff]  ;;  %v1473_v42 = vsel %vm629_vm1, %v1470_v31, %v1472_v1  ;;  %v754_v53 = vsel %vm629_vm1, %v751_v2, %v753_v10  ;;  %v7493_v10 = vld [vmem:[#allocation2 + $0x2a0] sm:$0xff] }
 0x13f   :  { %v7467_v62 = vpop.f32.mrf.mxu1  ;;  %2881 = vmatmul.mubr.f32.gmra.mxu1 %v506_v30  ;;  %v1934_v24 = vpop.f32.mrf.mxu0 }
 0x140   :  { %9427 = vst [vmem:[#allocation36_spill] sm:$0xff] %v7467_v62  ;;  %2885 = vmatprep.mubr.f32.mxu1 %v749_v3  ;;  %v1474_v3 = vrot.slane %v5782_v15, 1  ;;  %v5783_v24 = vld [vmem:[#allocation2 + $0x338] sm:$0xff] }
 0x141   :  { %v7470_v49 = vpop.f32.mrf.mxu1  ;;  %v7472_v50 = vpop.f32.mrf.mxu0  ;;  %2176 = vmatmul.mubr.f32.gmra.mxu0 %v5777_v14  ;;  %v1475_v29 = vrot.slane %v5783_v24, 1 }
 0x142   :  { %9428 = vst [vmem:[#allocation37_spill] sm:$0xff] %v7470_v49  ;;  %9429 = vst [vmem:[#allocation38_spill] sm:$0xff] %v7472_v50  ;;  %2180 = vmatprep.mubr.f32.mxu0 %v1471_v58  ;;  %v755_v58 = vrot.slane %v512_v26, 1  ;;  %v756_v50 = vrot.slane %v7475_v22, 1  ;;  %v1121_v49 = vld [vmem:[%s9377_s1 + $0x150] sm:$0xff] }
 0x143   :  { %v7477_v57 = vpop.f32.mrf.mxu1  ;;  %2886 = vmatmul.mubr.f32.gmra.mxu1 %v7435_v44  ;;  %v1939_v30 = vpop.f32.mrf.mxu0  ;;  %v514_v44 = vld [vmem:[#allocation2 + $0x298] sm:$0x3]  ;;  %v1476_v1 = vsel %vm629_vm1, %v1474_v3, %v1475_v29 }
 0x144   :  { %9430 = vst [vmem:[#allocation39_spill] sm:$0xff] %v7477_v57  ;;  %2890 = vmatprep.mubr.f32.mxu1 %v752_v60  ;;  %v5784_v57 = vld [vmem:[#allocation2 + $0x340] sm:$0x3]  ;;  %v757_v2 = vsel %vm629_vm1, %v755_v58, %v756_v50  ;;  %v5785_v3 = vld [vmem:[#allocation2 + $0x18] sm:$0xff] }
 0x145   :  { %v7481_v14 = vpop.f32.mrf.mxu1  ;;  %v7483_v13 = vpop.f32.mrf.mxu0  ;;  %2181 = vmatmul.mubr.f32.gmra.mxu0 %v5779_v37  ;;  %v1477_v60 = vrot.slane %v5784_v57, 1  ;;  %v758_v37 = vrot.slane %v514_v44, 1 }
 0x146   :  { %9431 = vst [vmem:[#allocation40_spill] sm:$0xff] %v7481_v14  ;;  %9432 = vst [vmem:[#allocation41_spill] sm:$0xff] %v7483_v13  ;;  %2185 = vmatprep.mubr.f32.mxu0 %v1473_v42  ;;  %v7495_v42 = vld [vmem:[#allocation2 + $0x2a8] sm:$0xff] }
 0x147   :  { %v7487_v30 = vpop.f32.mrf.mxu1  ;;  %2891 = vmatmul.mubr.f32.gmra.mxu1 %v509_v32  ;;  %v1944_v31 = vpop.f32.mrf.mxu0  ;;  %v1478_v57 = vsel %vm629_vm1, %v1475_v29, %v1477_v60  ;;  %v759_v44 = vsel %vm629_vm1, %v756_v50, %v758_v37  ;;  %v517_v29 = vld [vmem:[#allocation2 + $0x2b0] sm:$0x3] }
 0x148   :  { %9433 = vst [vmem:[#allocation42_spill] sm:$0xff] %v7487_v30  ;;  %2895 = vmatprep.mubr.f32.mxu1 %v754_v53  ;;  %v5786_v53 = vld [vmem:[#allocation2 + $0x20] sm:$0xff] }
 0x149   :  { %v2654_v33 = vpop.f32.mrf.mxu1  ;;  %v7490_v14 = vpop.f32.mrf.mxu0  ;;  %2186 = vmatmul.mubr.f32.gmra.mxu0 %v5780_v48  ;;  %v7501_v31 = vrot.slane %v5786_v53, 2  ;;  %v5788_v53 = vld [vmem:[#allocation2 + $0x30] sm:$0xff] }
 0x14a   :  { %9434 = vst [vmem:[#allocation43_spill] sm:$0xff] %v7490_v14  ;;  %2190 = vmatprep.mubr.f32.mxu0 %v1476_v1  ;;  %v1543_v33 = vrot.slane %v5785_v3, 2  ;;  %v760_v1 = vrot.slane %v7493_v10, 1  ;;  %v761_v14 = vrot.slane %v7495_v42, 1 }
 0x14b   :  { %v7497_v13 = vpop.f32.mrf.mxu1  ;;  %2896 = vmatmul.mubr.f32.gmra.mxu1 %v7455_v19  ;;  %v1949_v32 = vpop.f32.mrf.mxu0  ;;  %v5787_v19 = vld [vmem:[#allocation2 + $0x28] sm:$0x3] }
 0x14c   :  { %9435 = vst [vmem:[#allocation44_spill] sm:$0xff] %v7497_v13  ;;  %2900 = vmatprep.mubr.f32.mxu1 %v757_v2  ;;  %v1546_v32 = vrot.slane %v5787_v19, 2  ;;  %v7512_v2 = vsel %vm854_vm0, %v1543_v33, %v7501_v31  ;;  %v763_v19 = vrot.slane %v517_v29, 1  ;;  %v5790_v33 = vld [vmem:[#allocation2 + $0x40] sm:$0x3] }
 0x14d   :  { %v2659_v48 = vpop.f32.mrf.mxu1  ;;  %v7503_v58 = vpop.f32.mrf.mxu0  ;;  %2191 = vmatmul.mubr.f32.gmra.mxu0 %v5782_v15  ;;  %v1548_v15 = vrot.slane %v5788_v53, 2  ;;  %v7524_v53 = vld [vmem:[#allocation2 + $0x2c0] sm:$0xff] }
 0x14e   :  { %9436 = vst [vmem:[#allocation45_spill] sm:$0xff] %v7503_v58  ;;  %2195 = vmatprep.mubr.f32.mxu0 %v1478_v57  ;;  %v5789_v48 = vld [vmem:[#allocation2 + $0x38] sm:$0xff]  ;;  %v762_v57 = vsel %vm629_vm1, %v760_v1, %v761_v14  ;;  %v5791_v1 = vld [vmem:[#allocation2 + $0x48] sm:$0xff] }
 0x14f   :  { %v7508_v60 = vpop.f32.mrf.mxu1  ;;  %2901 = vmatmul.mubr.f32.gmra.mxu1 %v512_v26  ;;  %v1954_v3 = vpop.f32.mrf.mxu0  ;;  %v7514_v50 = vrot.slane %v5789_v48, 2  ;;  %v1547_v26 = vsel %vm854_vm0, %v7501_v31, %v1546_v32  ;;  %v1553_v29 = vrot.slane %v5791_v1, 2  ;;  %v1125_v32 = vld [vmem:[%s9377_s1 + $0x170] sm:$0xff]  ;;  %v1124_v1 = vld [vmem:[%s9377_s1 + $0x168] sm:$0xff] }
 0x150   :  { %9437 = vst [vmem:[#allocation46_spill] sm:$0xff] %v7508_v60  ;;  %2905 = vmatprep.mubr.f32.mxu1 %v759_v44  ;;  %v1551_v3 = vrot.slane %v5790_v33, 2  ;;  %v7522_v60 = vld [vmem:[#allocation2 + $0x2b8] sm:$0xff] }
 0x151   :  { %v2664_v37 = vpop.f32.mrf.mxu1  ;;  %v7516_v58 = vpop.f32.mrf.mxu0  ;;  %2196 = vmatmul.mubr.f32.gmra.mxu0 %v5783_v24  ;;  %v7531_v24 = vsel %vm854_vm0, %v1548_v15, %v7514_v50  ;;  %v766_v15 = vrot.slane %v7524_v53, 1 }
 0x152   :  { %9438 = vst [vmem:[#allocation47_spill] sm:$0xff] %v7516_v58  ;;  %5318 = vmatprep.mubr.f32.mxu0 %v7512_v2  ;;  %v5792_v37 = vld [vmem:[#allocation2 + $0x50] sm:$0xff] }
 0x153   :  { %v7526_v48 = vpop.f32.mrf.mxu1  ;;  %2906 = vmatmul.mubr.f32.gmra.mxu1 %v7475_v22  ;;  %v1959_v44 = vpop.f32.mrf.mxu0  ;;  %v7533_v58 = vrot.slane %v5792_v37, 2  ;;  %v764_v22 = vsel %vm629_vm1, %v761_v14, %v763_v19  ;;  %v5793_v37 = vld [vmem:[#allocation2 + $0x58] sm:$0x3]  ;;  %v5794_v19 = vld [vmem:[#allocation2 + $0x60] sm:$0xff] }
 0x154   :  { %9439 = vst [vmem:[#allocation48_spill] sm:$0xff] %v7526_v48  ;;  %2910 = vmatprep.mubr.f32.mxu1 %v762_v57  ;;  %v765_v44 = vrot.slane %v7522_v60, 1  ;;  %v1552_v57 = vsel %vm854_vm0, %v7514_v50, %v1551_v3  ;;  %v1558_v48 = vrot.slane %v5794_v19, 2  ;;  %v5795_v3 = vld [vmem:[#allocation2 + $0x68] sm:$0xff]  ;;  %v1122_v19 = vld [vmem:[%s9377_s1 + $0x158] sm:$0xff] }
 0x155   :  { %v2669_v33 = vpop.f32.mrf.mxu1  ;;  %v7538_v30 = vpop.f32.mrf.mxu0  ;;  %5319 = vmatmul.mubr.f32.vlgmr.msra.gmra.mxu0 %v1547_v26  ;;  %v520_v26 = vld [vmem:[#allocation2 + $0x2c8] sm:$0x3]  ;;  %v7557_v13 = vrot.slane %v5795_v3, 2  ;;  %v7573_v3 = vld [vmem:[#allocation2 + $0x2d8] sm:$0xff] }
 0x156   :  { %9440 = vst [vmem:[#allocation49_spill] sm:$0xff] %v7538_v30  ;;  %5415 = vmatpush3.msra.mxu0 %v7262_v56  ;;  %5321 = vmatprep.mubr.f32.mxu0 %v7531_v24  ;;  %v1556_v33 = vrot.slane %v5793_v37, 2  ;;  %v7555_v56 = vsel %vm854_vm0, %v1553_v29, %v7533_v58  ;;  %v1123_v37 = vld [vmem:[%s9377_s1 + $0x160] sm:$0xff]  ;;  %v768_v29 = vrot.slane %v520_v26, 1 }
 0x157   :  { %v7550_v30 = vpop.f32.mrf.mxu1  ;;  %2911 = vmatmul.mubr.f32.gmra.mxu1 %v7493_v10  ;;  %v1964_v14 = vpop.f32.mrf.mxu0  ;;  %5416 = vmatprep.subr.mxu0 %v1125_v32  ;;  %v767_v10 = vsel %vm629_vm1, %v765_v44, %v766_v15 }
 0x158   :  { %9441 = vst [vmem:[#allocation50_spill] sm:$0xff] %v7550_v30  ;;  %2915 = vmatprep.mubr.f32.mxu1 %v764_v22  ;;  %5417 = vmatpush3.msra.mxu0 %v1125_v32  ;;  %v1557_v14 = vsel %vm854_vm0, %v7533_v58, %v1556_v33  ;;  %v5796_v22 = vld [vmem:[#allocation2 + $0x70] sm:$0x3]  ;;  %v5797_v33 = vld [vmem:[#allocation2 + $0x78] sm:$0xff] }
 0x159   :  { %v2674_v30 = vpop.f32.mrf.mxu1  ;;  %v7562_v62 = vpop.f32.mrf.mxu0  ;;  %5322 = vmatmul.mubr.f32.gmra.mxu0 %v1552_v57  ;;  %5418 = vmatprep.subr.mxu0 %v1124_v1  ;;  %v1561_v32 = vrot.slane %v5796_v22, 2  ;;  %v1563_v26 = vrot.slane %v5797_v33, 2  ;;  %v5798_v22 = vld [vmem:[#allocation2 + $0x80] sm:$0xff] }
 0x15a   :  { %9442 = vst [vmem:[#allocation51_spill] sm:$0xff] %v7562_v62  ;;  %5324 = vmatprep.mubr.f32.mxu0 %v7555_v56  ;;  %5419 = vmatpush3.msra.mxu0 %v1124_v1  ;;  %v7571_v30 = vld [vmem:[#allocation2 + $0x2d0] sm:$0xff]  ;;  %v7580_v1 = vsel %vm854_vm0, %v1558_v48, %v7557_v13  ;;  %v7582_v62 = vrot.slane %v5798_v22, 2 }
 0x15b   :  { %v7575_v57 = vpop.f32.mrf.mxu1  ;;  %2916 = vmatmul.mubr.f32.gmra.mxu1 %v7495_v42  ;;  %v1969_v44 = vpop.f32.mrf.mxu0  ;;  %5420 = vmatprep.subr.mxu0 %v1123_v37  ;;  %v769_v42 = vsel %vm629_vm1, %v766_v15, %v768_v29  ;;  %v770_v48 = vrot.slane %v7571_v30, 1 }
 0x15c   :  { %9443 = vst [vmem:[#allocation52_spill] sm:$0xff] %v7575_v57  ;;  %2920 = vmatprep.mubr.f32.mxu1 %v767_v10  ;;  %5421 = vmatpush3.msra.mxu0 %v1123_v37  ;;  %v771_v44 = vrot.slane %v7573_v3, 1  ;;  %v1562_v37 = vsel %vm854_vm0, %v7557_v13, %v1561_v32  ;;  %v5799_v10 = vld [vmem:[#allocation2 + $0x88] sm:$0x3]  ;;  %v7603_v29 = vsel %vm854_vm0, %v1563_v26, %v7582_v62 }
 0x15d   :  { %v2679_v57 = vpop.f32.mrf.mxu1  ;;  %v7587_v9 = vpop.f32.mrf.mxu0  ;;  %5325 = vmatmul.mubr.f32.gmra.mxu0 %v1557_v14  ;;  %5422 = vmatprep.subr.mxu0 %v1122_v19  ;;  %v1566_v33 = vrot.slane %v5799_v10, 2  ;;  %v523_v14 = vld [vmem:[#allocation2 + $0x2e0] sm:$0x3] }
 0x15e   :  { %9444 = vst [vmem:[#allocation53_spill] sm:$0xff] %v7587_v9  ;;  %5327 = vmatprep.mubr.f32.mxu0 %v7580_v1  ;;  %5423 = vmatpush3.msra.mxu0 %v1122_v19  ;;  %v1120_v57 = vld [vmem:[%s9377_s1 + $0x148] sm:$0xff]  ;;  %v5800_v9 = vld [vmem:[#allocation2 + $0x90] sm:$0xff]  ;;  %v5801_v19 = vld [vmem:[#allocation2 + $0x98] sm:$0xff]  ;;  %v773_v26 = vrot.slane %v523_v14, 1 }
 0x15f   :  { %v7598_v22 = vpop.f32.mrf.mxu1  ;;  %2921 = vmatmul.mubr.f32.gmra.mxu1 %v7522_v60  ;;  %v1974_v15 = vpop.f32.mrf.mxu0  ;;  %5424 = vmatprep.subr.mxu0 %v1121_v49  ;;  %v1568_v32 = vrot.slane %v5800_v9, 2  ;;  %v7605_v36 = vrot.slane %v5801_v19, 2  ;;  %v1119_v10 = vld [vmem:[%s9377_s1 + $0x140] sm:$0xff]  ;;  %v772_v60 = vsel %vm629_vm1, %v770_v48, %v771_v44  ;;  %v1567_v9 = vsel %vm854_vm0, %v7582_v62, %v1566_v33  ;;  %v7618_v19 = vld [vmem:[#allocation2 + $0x2f0] sm:$0xff]  ;;  %v5803_v33 = vld [vmem:[#allocation2 + $0xa8] sm:$0xff] }
 0x160   :  { %9445 = vst [vmem:[#allocation54_spill] sm:$0xff] %v7598_v22  ;;  %2925 = vmatprep.mubr.f32.mxu1 %v769_v42  ;;  %5425 = vmatpush3.msra.mxu0 %v1121_v49  ;;  %v5802_v42 = vld [vmem:[#allocation2 + $0xa0] sm:$0x3]  ;;  %v7616_v15 = vld [vmem:[#allocation2 + $0x2e8] sm:$0xff] }
 0x161   :  { %v2684_v22 = vpop.f32.mrf.mxu1  ;;  %v7610_v11 = vpop.f32.mrf.mxu0  ;;  %5328 = vmatmul.mubr.f32.gmra.mxu0 %v1562_v37  ;;  %5426 = vmatprep.subr.mxu0 %v1120_v57  ;;  %v1571_v49 = vrot.slane %v5802_v42, 2  ;;  %v1118_v37 = vld [vmem:[%s9377_s1 + $0x138] sm:$0xff]  ;;  %v7628_v14 = vsel %vm854_vm0, %v1568_v32, %v7605_v36  ;;  %v5804_v42 = vld [vmem:[#allocation2 + $0xb0] sm:$0xff]  ;;  %v775_v32 = vrot.slane %v7616_v15, 1 }
 0x162   :  { %9446 = vst [vmem:[#allocation55_spill] sm:$0xff] %v7610_v11  ;;  %5330 = vmatprep.mubr.f32.mxu0 %v7603_v29  ;;  %5427 = vmatpush3.msra.mxu0 %v1120_v57  ;;  %v1573_v57 = vrot.slane %v5803_v33, 2  ;;  %v7630_v11 = vrot.slane %v5804_v42, 2  ;;  %v526_v42 = vld [vmem:[#allocation2 + $0x2f8] sm:$0x3] }
 0x163   :  { %v7623_v22 = vpop.f32.mrf.mxu1  ;;  %2926 = vmatmul.mubr.f32.gmra.mxu1 %v7524_v53  ;;  %v1979_v48 = vpop.f32.mrf.mxu0  ;;  %5428 = vmatprep.subr.mxu0 %v1119_v10  ;;  %v774_v53 = vsel %vm629_vm1, %v771_v44, %v773_v26 }
 0x164   :  { %9447 = vst [vmem:[#allocation56_spill] sm:$0xff] %v7623_v22  ;;  %2930 = vmatprep.mubr.f32.mxu1 %v772_v60  ;;  %5429 = vmatpush3.msra.mxu0 %v1119_v10  ;;  %v776_v48 = vrot.slane %v7618_v19, 1  ;;  %v1572_v10 = vsel %vm854_vm0, %v7605_v36, %v1571_v49  ;;  %v5805_v60 = vld [vmem:[#allocation2 + $0xb8] sm:$0x3]  ;;  %v7651_v26 = vsel %vm854_vm0, %v1573_v57, %v7630_v11  ;;  %v5807_v49 = vld [vmem:[#allocation2 + $0xc8] sm:$0xff]  ;;  %v778_v57 = vrot.slane %v526_v42, 1 }
 0x165   :  { %v2689_v22 = vpop.f32.mrf.mxu1  ;;  %v7635_v63 = vpop.f32.mrf.mxu0  ;;  %5331 = vmatmul.mubr.f32.gmra.mxu0 %v1567_v9  ;;  %5430 = vmatprep.subr.mxu0 %v1118_v37  ;;  %v1576_v33 = vrot.slane %v5805_v60, 2  ;;  %v1116_v9 = vld [vmem:[%s9377_s1 + $0x128] sm:$0xff]  ;;  %v7653_v59 = vrot.slane %v5807_v49, 2 }
 0x166   :  { %9448 = vst [vmem:[#allocation57_spill] sm:$0xff] %v7635_v63  ;;  %5333 = vmatprep.mubr.f32.mxu0 %v7628_v14  ;;  %5431 = vmatpush3.msra.mxu0 %v1118_v37  ;;  %v5806_v63 = vld [vmem:[#allocation2 + $0xc0] sm:$0xff]  ;;  %v7666_v49 = vld [vmem:[#allocation2 + $0x308] sm:$0xff] }
 0x167   :  { %v7646_v22 = vpop.f32.mrf.mxu1  ;;  %2931 = vmatmul.mubr.f32.gmra.mxu1 %v7571_v30  ;;  %v1984_v44 = vpop.f32.mrf.mxu0  ;;  %v1578_v8 = vrot.slane %v5806_v63, 2  ;;  %5432 = vmatprep.subr.mxu0 %v1117_v20  ;;  %v1115_v37 = vld [vmem:[%s9377_s1 + $0x120] sm:$0xff]  ;;  %v777_v30 = vsel %vm629_vm1, %v775_v32, %v776_v48  ;;  %v1577_v63 = vsel %vm854_vm0, %v7630_v11, %v1576_v33  ;;  %v5809_v33 = vld [vmem:[#allocation2 + $0xd8] sm:$0xff] }
 0x168   :  { %9449 = vst [vmem:[#allocation58_spill] sm:$0xff] %v7646_v22  ;;  %2935 = vmatprep.mubr.f32.mxu1 %v774_v53  ;;  %5433 = vmatpush3.msra.mxu0 %v1117_v20  ;;  %v5808_v44 = vld [vmem:[#allocation2 + $0xd0] sm:$0x3]  ;;  %v7664_v20 = vld [vmem:[#allocation2 + $0x300] sm:$0xff] }
 0x169   :  { %v2694_v60 = vpop.f32.mrf.mxu1  ;;  %v7658_v22 = vpop.f32.mrf.mxu0  ;;  %5334 = vmatmul.mubr.f32.gmra.mxu0 %v1572_v10  ;;  %5434 = vmatprep.subr.mxu0 %v1116_v9  ;;  %v1581_v53 = vrot.slane %v5808_v44, 2  ;;  %v1114_v10 = vld [vmem:[%s9377_s1 + $0x118] sm:$0xff]  ;;  %v7676_v42 = vsel %vm854_vm0, %v1578_v8, %v7653_v59  ;;  %v1583_v44 = vrot.slane %v5809_v33, 2  ;;  %v780_v8 = vrot.slane %v7664_v20, 1 }
 0x16a   :  { %9450 = vst [vmem:[#allocation59_spill] sm:$0xff] %v7658_v22  ;;  %5336 = vmatprep.mubr.f32.mxu0 %v7651_v26  ;;  %5435 = vmatpush3.msra.mxu0 %v1116_v9  ;;  %v5810_v9 = vld [vmem:[#allocation2 + $0xe0] sm:$0xff] }
 0x16b   :  { %v7671_v60 = vpop.f32.mrf.mxu1  ;;  %2936 = vmatmul.mubr.f32.gmra.mxu1 %v7573_v3  ;;  %v1989_v32 = vpop.f32.mrf.mxu0  ;;  %v7678_v22 = vrot.slane %v5810_v9, 2  ;;  %5436 = vmatprep.subr.mxu0 %v1115_v37  ;;  %v779_v3 = vsel %vm629_vm1, %v776_v48, %v778_v57  ;;  %v529_v9 = vld [vmem:[#allocation2 + $0x310] sm:$0x3] }
 0x16c   :  { %9451 = vst [vmem:[#allocation60_spill] sm:$0xff] %v7671_v60  ;;  %2940 = vmatprep.mubr.f32.mxu1 %v777_v30  ;;  %5437 = vmatpush3.msra.mxu0 %v1115_v37  ;;  %v781_v32 = vrot.slane %v7666_v49, 1  ;;  %v1582_v37 = vsel %vm854_vm0, %v7653_v59, %v1581_v53  ;;  %v5811_v30 = vld [vmem:[#allocation2 + $0xe8] sm:$0x3]  ;;  %v5813_v53 = vld [vmem:[#allocation2 + $0xf8] sm:$0xff] }
 0x16d   :  { %v2699_v60 = vpop.f32.mrf.mxu1  ;;  %v7683_v35 = vpop.f32.mrf.mxu0  ;;  %5337 = vmatmul.mubr.f32.gmra.mxu0 %v1577_v63  ;;  %5438 = vmatprep.subr.mxu0 %v1114_v10  ;;  %v1586_v33 = vrot.slane %v5811_v30, 2  ;;  %v1112_v63 = vld [vmem:[%s9377_s1 + $0x108] sm:$0xff]  ;;  %v7699_v57 = vsel %vm854_vm0, %v1583_v44, %v7678_v22  ;;  %v7701_v43 = vrot.slane %v5813_v53, 2  ;;  %v783_v44 = vrot.slane %v529_v9, 1  ;;  %v7714_v53 = vld [vmem:[#allocation2 + $0x320] sm:$0xff] }
 0x16e   :  { %9452 = vst [vmem:[#allocation61_spill] sm:$0xff] %v7683_v35  ;;  %5339 = vmatprep.mubr.f32.mxu0 %v7676_v42  ;;  %5439 = vmatpush3.msra.mxu0 %v1114_v10  ;;  %v5812_v35 = vld [vmem:[#allocation2 + $0xf0] sm:$0xff]  ;;  %v1111_v10 = vld [vmem:[%s9377_s1 + $0x100] sm:$0xff] }
 0x16f   :  { %v7694_v60 = vpop.f32.mrf.mxu1  ;;  %2941 = vmatmul.mubr.f32.gmra.mxu1 %v7616_v15  ;;  %v1994_v48 = vpop.f32.mrf.mxu0  ;;  %v1588_v51 = vrot.slane %v5812_v35, 2  ;;  %5440 = vmatprep.subr.mxu0 %v1113_v7  ;;  %v782_v15 = vsel %vm629_vm1, %v780_v8, %v781_v32  ;;  %v1587_v35 = vsel %vm854_vm0, %v7678_v22, %v1586_v33 }
 0x170   :  { %9453 = vst [vmem:[#allocation62_spill] sm:$0xff] %v7694_v60  ;;  %2945 = vmatprep.mubr.f32.mxu1 %v779_v3  ;;  %5441 = vmatpush3.msra.mxu0 %v1113_v7  ;;  %v5814_v48 = vld [vmem:[#allocation2 + $0x100] sm:$0x3]  ;;  %v7712_v7 = vld [vmem:[#allocation2 + $0x318] sm:$0xff] }
 0x171   :  { %v2704_v30 = vpop.f32.mrf.mxu1  ;;  %v7706_v60 = vpop.f32.mrf.mxu0  ;;  %5340 = vmatmul.mubr.f32.gmra.mxu0 %v1582_v37  ;;  %5442 = vmatprep.subr.mxu0 %v1112_v63  ;;  %v1591_v3 = vrot.slane %v5814_v48, 2  ;;  %v7719_v37 = vld [vmem:[%s9377_s1 + $0x478] sm:$0xff]  ;;  %v7726_v33 = vsel %vm854_vm0, %v1588_v51, %v7701_v43 }
 0x172   :  { %9454 = vst [vmem:[#allocation63_spill] sm:$0xff] %v7706_v60  ;;  %5342 = vmatprep.mubr.f32.mxu0 %v7699_v57  ;;  %5443 = vmatpush3.msra.mxu0 %v1112_v63  ;;  %v5815_v30 = vld [vmem:[#allocation2 + $0x108] sm:$0xff]  ;;  %v5816_v60 = vld [vmem:[#allocation2 + $0x110] sm:$0xff] }
 0x173   :  { %v7721_v8 = vpop.f32.mrf.mxu1  ;;  %2946 = vmatmul.mubr.f32.gmra.mxu1 %v7618_v19  ;;  %v1999_v9 = vpop.f32.mrf.mxu0  ;;  %v1593_v48 = vrot.slane %v5815_v30, 2  ;;  %v7728_v55 = vrot.slane %v5816_v60, 2  ;;  %5444 = vmatprep.subr.mxu0 %v1111_v10  ;;  %v785_v19 = vrot.slane %v7712_v7, 1  ;;  %v1592_v51 = vsel %vm854_vm0, %v7701_v43, %v1591_v3  ;;  %v5817_v60 = vld [vmem:[#allocation2 + $0x118] sm:$0x3] }
 0x174   :  { %9455 = vst [vmem:[#allocation64_spill] sm:$0xff] %v7721_v8  ;;  %2950 = vmatprep.mubr.f32.mxu1 %v782_v15  ;;  %5445 = vmatpush3.msra.mxu0 %v1111_v10  ;;  %v784_v8 = vsel %vm629_vm1, %v781_v32, %v783_v44  ;;  %v786_v9 = vrot.slane %v7714_v53, 1  ;;  %v1596_v15 = vrot.slane %v5817_v60, 2  ;;  %v532_v10 = vld [vmem:[#allocation2 + $0x328] sm:$0x3]  ;;  %v5818_v44 = vld [vmem:[#allocation2 + $0x120] sm:$0xff] }
 0x175   :  { %v2709_v63 = vpop.f32.mrf.mxu1  ;;  %v7730_v25 = vpop.f32.mrf.mxu0  ;;  %5343 = vmatmul.mubr.f32.gmra.mxu0 %v1587_v35  ;;  %5542 = vmatprep.subr.mxu0 %v7719_v37  ;;  %v7744_v32 = vsel %vm854_vm0, %v1593_v48, %v7728_v55  ;;  %v5820_v48 = vld [vmem:[#allocation2 + $0x130] sm:$0x3] }
 0x176   :  { %5345 = vmatprep.mubr.f32.mxu0 %v7726_v33  ;;  %v1598_v63 = vrot.slane %v5818_v44, 2  ;;  %v787_v60 = vsel %vm629_vm1, %v785_v19, %v786_v9  ;;  %v7754_v44 = vld [vmem:[#allocation2 + $0x38] sm:$0xff]  ;;  %v5821_v19 = vld [vmem:[#allocation2] sm:$0xff] }
 0x177   :  { %v7739_v30 = vpop.f32.mrf.mxu1  ;;  %2951 = vmatmul.mubr.f32.gmra.mxu1 %v7664_v20  ;;  %v2004_v35 = vpop.f32.mrf.mxu0  ;;  %v1597_v20 = vsel %vm854_vm0, %v7728_v55, %v1596_v15 }
 0x178   :  { %9456 = vst [vmem:[#allocation65_spill] sm:$0xff] %v7739_v30  ;;  %2955 = vmatprep.mubr.f32.mxu1 %v784_v8  ;;  %v788_v30 = vrot.slane %v532_v10, 1  ;;  %v1601_v35 = vrot.slane %v5820_v48, 2  ;;  %v7761_v8 = vsel %vm854_vm0, %v1598_v63, %v7746_v28  ;;  %v5822_v10 = vld [vmem:[#allocation2 + $0x8] sm:$0xff] }
 0x179   :  { %v2714_v23 = vpop.f32.mrf.mxu1  ;;  %v7748_v3 = vpop.f32.mrf.mxu0  ;;  %5346 = vmatmul.mubr.f32.gmra.mxu0 %v1592_v51  ;;  %v855_v51 = vrot.slane %v5821_v19, 2  ;;  %v7763_v39 = vrot.slane %v5822_v10, 2  ;;  %v3359_v19 = vld [vmem:[#allocation2 + $0x40] sm:$0x3] }
 0x17a   :  { %5348 = vmatprep.mubr.f32.mxu0 %v7744_v32  ;;  %v789_v0 = vsel %vm629_vm1, %v786_v9, %v788_v30  ;;  %v1602_v63 = vsel %vm854_vm0, %v7746_v28, %v1601_v35 }
 0x17b   :  { %v7756_v27 = vpop.f32.mrf.mxu1  ;;  %2956 = vmatmul.mubr.f32.gmra.mxu1 %v7666_v49  ;;  %v2009_v23 = vpop.f32.mrf.mxu0  ;;  %v3550_v49 = vrot.slane %v7754_v44, 1 }
 0x17c   :  { %9457 = vst [vmem:[#allocation66_spill] sm:$0xff] %v7756_v27  ;;  %2960 = vmatprep.mubr.f32.mxu1 %v787_v60  ;;  %v3549_v27 = vrot.slane %v3357_v16, 1  ;;  %v5823_v23 = vld [vmem:[#allocation2 + $0x10] sm:$0x3] }
 0x17d   :  { %v2719_v15 = vpop.f32.mrf.mxu1  ;;  %v7765_v48 = vpop.f32.mrf.mxu0  ;;  %5349 = vmatmul.mubr.f32.gmra.mxu0 %v1597_v20  ;;  %v858_v38 = vrot.slane %v5823_v23, 2  ;;  %v857_v20 = vsel %vm854_vm0, %v855_v51, %v7763_v39  ;;  %v3552_v23 = vrot.slane %v3359_v19, 1 }
 0x17e   :  { %5351 = vmatprep.mubr.f32.mxu0 %v7761_v8  ;;  %v3551_v15 = vsel %vm629_vm1, %v3549_v27, %v3550_v49  ;;  %v5044_v27 = vld [vmem:[%s9377_s1 + $0x470] sm:$0xff] }
 0x17f   :  { %v7772_v10 = vpop.f32.mrf.mxu1  ;;  %2961 = vmatmul.mubr.f32.gmra.mxu1 %v7712_v7  ;;  %v2014_v60 = vpop.f32.mrf.mxu0  ;;  %v859_v35 = vsel %vm854_vm0, %v7763_v39, %v858_v38  ;;  %v7782_v7 = vld [vmem:[#allocation2 + $0x50] sm:$0xff]  ;;  %v3553_v38 = vsel %vm629_vm1, %v3550_v49, %v3552_v23 }
 0x180   :  { %9458 = vst [vmem:[#allocation67_spill] sm:$0xff] %v7772_v10  ;;  %2965 = vmatprep.mubr.f32.mxu1 %v789_v0  ;;  %v863_v10 = vrot.slane %v5824_v12, 2  ;;  %v3554_v12 = vrot.slane %v3360_v40, 1  ;;  %v3555_v19 = vrot.slane %v7782_v7, 1 }
 0x181   :  { %v2724_v9 = vpop.f32.mrf.mxu1  ;;  %v7777_v30 = vpop.f32.mrf.mxu0  ;;  %5352 = vmatmul.mubr.f32.gmra.mxu0 %v1602_v63 }
 0x182   :  { %5446 = vmatprep.mubr.f32.mxu0 %v857_v20  ;;  %v5825_v20 = vld [vmem:[#allocation2 + $0x40] sm:$0x3] }
 0x183   :  { %v7784_v60 = vpop.f32.mrf.mxu1  ;;  %2966 = vmatmul.mubr.f32.gmra.mxu1 %v7714_v53  ;;  %v2019_v0 = vpop.f32.mrf.mxu0  ;;  %v864_v53 = vsel %vm854_vm0, %v7501_v31, %v863_v10  ;;  %v868_v9 = vrot.slane %v5825_v20, 2  ;;  %v3556_v10 = vsel %vm629_vm1, %v3554_v12, %v3555_v19  ;;  %v7814_v20 = vld [vmem:[#allocation2 + $0x68] sm:$0xff] }
 0x184   :  { %9459 = vst [vmem:[#allocation68_spill] sm:$0xff] %v7784_v60  ;;  %4110 = vmatprep.mubr.f32.mxu1 %v3551_v15  ;;  %v3362_v15 = vld [vmem:[#allocation2 + $0x58] sm:$0x3]  ;;  %v5043_v0 = vld [vmem:[%s9377_s1 + $0x468] sm:$0xff] }
 0x185   :  { %v2729_v51 = vpop.f32.mrf.mxu1  ;;  %v7790_v63 = vpop.f32.mrf.mxu0  ;;  %5447 = vmatmul.mubr.f32.vlgmr.msra.gmra.mxu0 %v859_v35  ;;  %v3557_v23 = vrot.slane %v3362_v15, 1 }
 0x186   :  { %5543 = vmatpush3.msra.mxu0 %v7719_v37  ;;  %5449 = vmatprep.mubr.f32.mxu0 %v7512_v2  ;;  %v5042_v2 = vld [vmem:[%s9377_s1 + $0x460] sm:$0xff]  ;;  %v5826_v51 = vld [vmem:[#allocation2 + $0x58] sm:$0x3] }
 0x187   :  { %v7801_v35 = vpop.f32.mrf.mxu1  ;;  %4111 = vmatmul.mubr.f32.vlgmr.msra.gmra.mxu1 %v3357_v16  ;;  %v2024_v49 = vpop.f32.mrf.mxu0  ;;  %5544 = vmatprep.subr.mxu0 %v5044_v27  ;;  %v869_v16 = vsel %vm854_vm0, %v7514_v50, %v868_v9  ;;  %v5040_v50 = vld [vmem:[%s9377_s1 + $0x450] sm:$0xff]  ;;  %v3558_v15 = vsel %vm629_vm1, %v3555_v19, %v3557_v23 }
 0x188   :  { %9460 = vst [vmem:[#allocation69_spill] sm:$0xff] %v7801_v35  ;;  %4115 = vmatprep.mubr.f32.mxu1 %v3553_v38  ;;  %5545 = vmatpush3.msra.mxu0 %v5044_v27  ;;  %v873_v38 = vrot.slane %v5826_v51, 2  ;;  %v7812_v27 = vld [vmem:[#allocation2 + $0x60] sm:$0xff]  ;;  %v3365_v51 = vld [vmem:[#allocation2 + $0x70] sm:$0x3] }
 0x189   :  { %v2734_v37 = vpop.f32.mrf.mxu1  ;;  %v7806_v31 = vpop.f32.mrf.mxu0  ;;  %5450 = vmatmul.mubr.f32.gmra.mxu0 %v864_v53  ;;  %5546 = vmatprep.subr.mxu0 %v5043_v0  ;;  %v5041_v53 = vld [vmem:[%s9377_s1 + $0x458] sm:$0xff] }
 0x18a   :  { %5452 = vmatprep.mubr.f32.mxu0 %v7531_v24  ;;  %5547 = vmatpush3.msra.mxu0 %v5043_v0  ;;  %v3559_v0 = vrot.slane %v7812_v27, 1  ;;  %v3560_v37 = vrot.slane %v7814_v20, 1 }
 0x18b   :  { %v7819_v49 = vpop.f32.mrf.mxu1  ;;  %4116 = vmatmul.mubr.f32.gmra.mxu1 %v7754_v44  ;;  %v2029_v12 = vpop.f32.mrf.mxu0  ;;  %5548 = vmatprep.subr.mxu0 %v5042_v2  ;;  %v874_v44 = vsel %vm854_vm0, %v7533_v58, %v873_v38 }
 0x18c   :  { %9461 = vst [vmem:[#allocation70_spill] sm:$0xff] %v7819_v49  ;;  %4120 = vmatprep.mubr.f32.mxu1 %v3556_v10  ;;  %5549 = vmatpush3.msra.mxu0 %v5042_v2  ;;  %v5827_v2 = vld [vmem:[#allocation2 + $0x70] sm:$0x3]  ;;  %v3561_v38 = vsel %vm629_vm1, %v3559_v0, %v3560_v37 }
 0x18d   :  { %v2739_v24 = vpop.f32.mrf.mxu1  ;;  %v7825_v9 = vpop.f32.mrf.mxu0  ;;  %5453 = vmatmul.mubr.f32.gmra.mxu0 %v869_v16  ;;  %5550 = vmatprep.subr.mxu0 %v5041_v53  ;;  %v878_v10 = vrot.slane %v5827_v2, 2  ;;  %v5039_v16 = vld [vmem:[%s9377_s1 + $0x448] sm:$0xff]  ;;  %v7849_v2 = vld [vmem:[#allocation2 + $0x80] sm:$0xff] }
 0x18e   :  { %5455 = vmatprep.mubr.f32.mxu0 %v7555_v56  ;;  %5551 = vmatpush3.msra.mxu0 %v5041_v53  ;;  %v5038_v56 = vld [vmem:[%s9377_s1 + $0x440] sm:$0xff]  ;;  %v3562_v53 = vrot.slane %v3365_v51, 1  ;;  %v5828_v24 = vld [vmem:[#allocation2 + $0x88] sm:$0x3] }
 0x18f   :  { %v7836_v12 = vpop.f32.mrf.mxu1  ;;  %4121 = vmatmul.mubr.f32.gmra.mxu1 %v3360_v40  ;;  %v2034_v19 = vpop.f32.mrf.mxu0  ;;  %5552 = vmatprep.subr.mxu0 %v5040_v50  ;;  %v879_v40 = vsel %vm854_vm0, %v7557_v13, %v878_v10  ;;  %v5036_v13 = vld [vmem:[%s9377_s1 + $0x430] sm:$0xff] }
 0x190   :  { %9462 = vst [vmem:[#allocation71_spill] sm:$0xff] %v7836_v12  ;;  %4125 = vmatprep.mubr.f32.mxu1 %v3558_v15  ;;  %5553 = vmatpush3.msra.mxu0 %v5040_v50  ;;  %v883_v15 = vrot.slane %v5828_v24, 2  ;;  %v7847_v50 = vld [vmem:[#allocation2 + $0x78] sm:$0xff]  ;;  %v3563_v51 = vsel %vm629_vm1, %v3560_v37, %v3562_v53  ;;  %v3368_v24 = vld [vmem:[#allocation2 + $0x88] sm:$0x3] }
 0x191   :  { %v2744_v58 = vpop.f32.mrf.mxu1  ;;  %v7841_v23 = vpop.f32.mrf.mxu0  ;;  %5456 = vmatmul.mubr.f32.gmra.mxu0 %v874_v44  ;;  %5554 = vmatprep.subr.mxu0 %v5039_v16  ;;  %v5037_v44 = vld [vmem:[%s9377_s1 + $0x438] sm:$0xff] }
 0x192   :  { %5458 = vmatprep.mubr.f32.mxu0 %v7580_v1  ;;  %5555 = vmatpush3.msra.mxu0 %v5039_v16  ;;  %v3564_v16 = vrot.slane %v7847_v50, 1  ;;  %v3565_v58 = vrot.slane %v7849_v2, 1 }
 0x193   :  { %v7854_v19 = vpop.f32.mrf.mxu1  ;;  %4126 = vmatmul.mubr.f32.gmra.mxu1 %v7782_v7  ;;  %v2039_v0 = vpop.f32.mrf.mxu0  ;;  %5556 = vmatprep.subr.mxu0 %v5038_v56  ;;  %v884_v7 = vsel %vm854_vm0, %v7582_v62, %v883_v15  ;;  %v5034_v62 = vld [vmem:[%s9377_s1 + $0x420] sm:$0xff] }
 0x194   :  { %9463 = vst [vmem:[#allocation72_spill] sm:$0xff] %v7854_v19  ;;  %4130 = vmatprep.mubr.f32.mxu1 %v3561_v38  ;;  %5557 = vmatpush3.msra.mxu0 %v5038_v56  ;;  %v5829_v56 = vld [vmem:[#allocation2 + $0xa0] sm:$0x3]  ;;  %v3566_v15 = vsel %vm629_vm1, %v3564_v16, %v3565_v58 }
 0x195   :  { %v2749_v1 = vpop.f32.mrf.mxu1  ;;  %v7860_v10 = vpop.f32.mrf.mxu0  ;;  %5459 = vmatmul.mubr.f32.gmra.mxu0 %v879_v40  ;;  %5558 = vmatprep.subr.mxu0 %v5037_v44  ;;  %v888_v38 = vrot.slane %v5829_v56, 2  ;;  %v5035_v40 = vld [vmem:[%s9377_s1 + $0x428] sm:$0xff]  ;;  %v7885_v56 = vld [vmem:[#allocation2 + $0x98] sm:$0xff] }
 0x196   :  { %5461 = vmatprep.mubr.f32.mxu0 %v7603_v29  ;;  %5559 = vmatpush3.msra.mxu0 %v5037_v44  ;;  %v3567_v44 = vrot.slane %v3368_v24, 1  ;;  %v5830_v1 = vld [vmem:[#allocation2 + $0xb8] sm:$0x3] }
 0x197   :  { %v7871_v0 = vpop.f32.mrf.mxu1  ;;  %4131 = vmatmul.mubr.f32.gmra.mxu1 %v7812_v27  ;;  %v2044_v37 = vpop.f32.mrf.mxu0  ;;  %5560 = vmatprep.subr.mxu0 %v5036_v13  ;;  %v889_v27 = vsel %vm854_vm0, %v7605_v36, %v888_v38  ;;  %v5032_v36 = vld [vmem:[%s9377_s1 + $0x410] sm:$0xff] }
 0x198   :  { %9464 = vst [vmem:[#allocation73_spill] sm:$0xff] %v7871_v0  ;;  %4135 = vmatprep.mubr.f32.mxu1 %v3563_v51  ;;  %5561 = vmatpush3.msra.mxu0 %v5036_v13  ;;  %v893_v51 = vrot.slane %v5830_v1, 2  ;;  %v7883_v13 = vld [vmem:[#allocation2 + $0x90] sm:$0xff]  ;;  %v3568_v24 = vsel %vm629_vm1, %v3565_v58, %v3567_v44  ;;  %v3371_v1 = vld [vmem:[#allocation2 + $0xa0] sm:$0x3] }
 0x199   :  { %v2754_v29 = vpop.f32.mrf.mxu1  ;;  %v7877_v53 = vpop.f32.mrf.mxu0  ;;  %5462 = vmatmul.mubr.f32.gmra.mxu0 %v884_v7  ;;  %5562 = vmatprep.subr.mxu0 %v5035_v40  ;;  %v5033_v7 = vld [vmem:[%s9377_s1 + $0x418] sm:$0xff] }
 0x19a   :  { %5464 = vmatprep.mubr.f32.mxu0 %v7628_v14  ;;  %5563 = vmatpush3.msra.mxu0 %v5035_v40  ;;  %v3569_v40 = vrot.slane %v7883_v13, 1  ;;  %v3570_v29 = vrot.slane %v7885_v56, 1 }
 0x19b   :  { %v7890_v37 = vpop.f32.mrf.mxu1  ;;  %4136 = vmatmul.mubr.f32.gmra.mxu1 %v7814_v20  ;;  %v2049_v16 = vpop.f32.mrf.mxu0  ;;  %5564 = vmatprep.subr.mxu0 %v5034_v62  ;;  %v894_v20 = vsel %vm854_vm0, %v7630_v11, %v893_v51  ;;  %v5030_v11 = vld [vmem:[%s9377_s1 + $0x400] sm:$0xff] }
 0x19c   :  { %9465 = vst [vmem:[#allocation74_spill] sm:$0xff] %v7890_v37  ;;  %4140 = vmatprep.mubr.f32.mxu1 %v3566_v15  ;;  %5565 = vmatpush3.msra.mxu0 %v5034_v62  ;;  %v5831_v62 = vld [vmem:[#allocation2 + $0xd0] sm:$0x3]  ;;  %v3571_v51 = vsel %vm629_vm1, %v3569_v40, %v3570_v29 }
 0x19d   :  { %v2759_v14 = vpop.f32.mrf.mxu1  ;;  %v7896_v38 = vpop.f32.mrf.mxu0  ;;  %5465 = vmatmul.mubr.f32.gmra.mxu0 %v889_v27  ;;  %5566 = vmatprep.subr.mxu0 %v5033_v7  ;;  %v898_v15 = vrot.slane %v5831_v62, 2  ;;  %v5031_v27 = vld [vmem:[%s9377_s1 + $0x408] sm:$0xff]  ;;  %v7921_v62 = vld [vmem:[#allocation2 + $0xb0] sm:$0xff] }
 0x19e   :  { %5467 = vmatprep.mubr.f32.mxu0 %v7651_v26  ;;  %5567 = vmatpush3.msra.mxu0 %v5033_v7  ;;  %v3572_v7 = vrot.slane %v3371_v1, 1  ;;  %v5832_v14 = vld [vmem:[#allocation2 + $0xe8] sm:$0x3]  ;;  %v3575_v1 = vrot.slane %v7921_v62, 1 }
 0x19f   :  { %v7907_v16 = vpop.f32.mrf.mxu1  ;;  %4141 = vmatmul.mubr.f32.gmra.mxu1 %v7847_v50  ;;  %v2054_v58 = vpop.f32.mrf.mxu0  ;;  %5568 = vmatprep.subr.mxu0 %v5032_v36  ;;  %v899_v50 = vsel %vm854_vm0, %v7653_v59, %v898_v15 }
 0x1a0   :  { %9466 = vst [vmem:[#allocation75_spill] sm:$0xff] %v7907_v16  ;;  %4145 = vmatprep.mubr.f32.mxu1 %v3568_v24  ;;  %5569 = vmatpush3.msra.mxu0 %v5032_v36  ;;  %v903_v24 = vrot.slane %v5832_v14, 2  ;;  %v7919_v36 = vld [vmem:[#allocation2 + $0xa8] sm:$0xff]  ;;  %v3573_v59 = vsel %vm629_vm1, %v3570_v29, %v3572_v7 }
 0x1a1   :  { %v2764_v26 = vpop.f32.mrf.mxu1  ;;  %v7913_v44 = vpop.f32.mrf.mxu0  ;;  %5468 = vmatmul.mubr.f32.gmra.mxu0 %v894_v20  ;;  %5570 = vmatprep.subr.mxu0 %v5031_v27  ;;  %v3574_v15 = vrot.slane %v7919_v36, 1 }
 0x1a2   :  { %5470 = vmatprep.mubr.f32.mxu0 %v7676_v42  ;;  %5571 = vmatpush3.msra.mxu0 %v5031_v27  ;;  %v2388_v27 = vadd.f32 %v7306_v45, %v7730_v25  ;;  %v5833_v26 = vld [vmem:[#allocation2 + $0x100] sm:$0x3] }
 0x1a3   :  { %v7923_v58 = vpop.f32.mrf.mxu1  ;;  %4146 = vmatmul.mubr.f32.gmra.mxu1 %v7849_v2  ;;  %v2059_v20 = vpop.f32.mrf.mxu0  ;;  %5572 = vmatprep.subr.mxu0 %v5030_v11  ;;  %v904_v2 = vsel %vm854_vm0, %v7678_v22, %v903_v24  ;;  %v3576_v45 = vsel %vm629_vm1, %v3574_v15, %v3575_v1  ;;  %v2393_v22 = vadd.f32 %v7302_v41, %v7748_v3 }
 0x1a4   :  { %9467 = vst [vmem:[#allocation76_spill] sm:$0xff] %v7923_v58  ;;  %4150 = vmatprep.mubr.f32.mxu1 %v3571_v51  ;;  %5573 = vmatpush3.msra.mxu0 %v5030_v11  ;;  %v908_v11 = vrot.slane %v5833_v26, 2  ;;  %v7936_v51 = vld [vmem:[#allocation2 + $0xb8] sm:$0x3] }
 0x1a5   :  { %v2769_v40 = vpop.f32.mrf.mxu1  ;;  %v7926_v42 = vpop.f32.mrf.mxu0  ;;  %5471 = vmatmul.mubr.f32.gmra.mxu0 %v899_v50  ;;  %v3577_v25 = vrot.slane %v7936_v51, 1 }
 0x1a6   :  { %5473 = vmatprep.mubr.f32.mxu0 %v7699_v57  ;;  %v909_v57 = vsel %vm854_vm0, %v7701_v43, %v908_v11  ;;  %v7950_v40 = vld [vmem:[#allocation2 + $0xc0] sm:$0xff]  ;;  %v2398_v11 = vadd.f32 %v7312_v46, %v7765_v48 }
 0x1a7   :  { %v2772_v14 = vpop.f32.mrf.mxu1  ;;  %4151 = vmatmul.mubr.f32.gmra.mxu1 %v7883_v13  ;;  %v2064_v29 = vpop.f32.mrf.mxu0  ;;  %v5834_v13 = vld [vmem:[#allocation2 + $0x118] sm:$0x3]  ;;  %v3579_v43 = vrot.slane %v7950_v40, 1 }
 0x1a8   :  { %v7939_v7 = vadd.f32 %v2772_v14, %v2388_v27  ;;  %4155 = vmatprep.mubr.f32.mxu1 %v3573_v59  ;;  %v913_v24 = vrot.slane %v5834_v13, 2  ;;  %v7952_v59 = vld [vmem:[#allocation2 + $0xc8] sm:$0xff]  ;;  %v5835_v14 = vld [vmem:[#allocation2 + $0x130] sm:$0x3] }
 0x1a9   :  { %v2774_v50 = vpop.f32.mrf.mxu1  ;;  %v7941_v20 = vpop.f32.mrf.mxu0  ;;  %5474 = vmatmul.mubr.f32.gmra.mxu0 %v904_v2  ;;  %v3580_v3 = vrot.slane %v7952_v59, 1  ;;  %v918_v29 = vrot.slane %v5835_v14, 2  ;;  %v7981_v14 = vld [vmem:[#allocation2 + $0xd8] sm:$0xff] }
 0x1aa   :  { %9468 = vst [vmem:[#allocation77_spill] sm:$0xff] %v7939_v7  ;;  %5476 = vmatprep.mubr.f32.mxu0 %v7726_v33  ;;  %v3578_v33 = vsel %vm629_vm1, %v3575_v1, %v3577_v25  ;;  %v7967_v50 = vld [vmem:[#allocation2 + $0xd0] sm:$0x3]  ;;  %v5836_v25 = vld [vmem:[#allocation2 + $0x138] sm:$0xff] }
 0x1ab   :  { %v2777_v27 = vpop.f32.mrf.mxu1  ;;  %4156 = vmatmul.mubr.f32.gmra.mxu1 %v7885_v56  ;;  %v2069_v15 = vpop.f32.mrf.mxu0  ;;  %v914_v56 = vsel %vm854_vm0, %v7728_v55, %v913_v24  ;;  %v3581_v55 = vsel %vm629_vm1, %v3579_v43, %v3580_v3  ;;  %v3582_v48 = vrot.slane %v7967_v50, 1  ;;  %v2403_v24 = vadd.f32 %v7309_v6, %v7777_v30  ;;  %v5840_v6 = vld [vmem:[#allocation2 + $0x158] sm:$0xff] }
 0x1ac   :  { %v7955_v2 = vadd.f32 %v2777_v27, %v2393_v22  ;;  %4160 = vmatprep.mubr.f32.mxu1 %v3576_v45  ;;  %v920_v22 = vrot.slane %v5836_v25, 2  ;;  %v919_v15 = vsel %vm854_vm0, %v7746_v28, %v918_v29  ;;  %v926_v30 = vrot.slane %v5840_v6, 2 }
 0x1ad   :  { %v2779_v26 = vpop.f32.mrf.mxu1  ;;  %v7957_v41 = vpop.f32.mrf.mxu0  ;;  %5477 = vmatmul.mubr.f32.gmra.mxu0 %v909_v57  ;;  %v5837_v57 = vld [vmem:[#allocation2 + $0x140] sm:$0xff] }
 0x1ae   :  { %9469 = vst [vmem:[#allocation78_spill] sm:$0xff] %v7955_v2  ;;  %5479 = vmatprep.mubr.f32.mxu0 %v7744_v32  ;;  %v921_v13 = vrot.slane %v5837_v57, 2  ;;  %v5838_v26 = vld [vmem:[#allocation2 + $0x148] sm:$0x3]  ;;  %v3583_v57 = vsel %vm629_vm1, %v3580_v3, %v3582_v48 }
 0x1af   :  { %v2782_v45 = vpop.f32.mrf.mxu1  ;;  %4161 = vmatmul.mubr.f32.gmra.mxu1 %v7919_v36  ;;  %v2074_v1 = vpop.f32.mrf.mxu0  ;;  %v5842_v48 = vld [vmem:[#allocation2 + $0x168] sm:$0xff] }
 0x1b0   :  { %v7970_v27 = vadd.f32 %v2782_v45, %v2398_v11  ;;  %4165 = vmatprep.mubr.f32.mxu1 %v3578_v33  ;;  %v923_v11 = vrot.slane %v5838_v26, 2  ;;  %v7983_v33 = vld [vmem:[#allocation2 + $0xe0] sm:$0xff]  ;;  %v5839_v1 = vld [vmem:[#allocation2 + $0x150] sm:$0xff]  ;;  %v930_v6 = vrot.slane %v5842_v48, 2 }
 0x1b1   :  { %v2784_v46 = vpop.f32.mrf.mxu1  ;;  %v7972_v32 = vpop.f32.mrf.mxu0  ;;  %5480 = vmatmul.mubr.f32.gmra.mxu0 %v914_v56  ;;  %v922_v56 = vsel %vm854_vm0, %v920_v22, %v921_v13  ;;  %v925_v25 = vrot.slane %v5839_v1, 2  ;;  %v3585_v26 = vrot.slane %v7983_v33, 1  ;;  %v2408_v22 = vadd.f32 %v7322_v34, %v7790_v63  ;;  %v5841_v1 = vld [vmem:[#allocation2 + $0x160] sm:$0x3]  ;;  %v8010_v48 = vld [vmem:[#allocation2 + $0xf0] sm:$0xff] }
 0x1b2   :  { %9470 = vst [vmem:[#allocation79_spill] sm:$0xff] %v7970_v27  ;;  %5482 = vmatprep.mubr.f32.mxu0 %v7761_v8  ;;  %v3584_v46 = vrot.slane %v7981_v14, 1 }
 0x1b3   :  { %v2787_v45 = vpop.f32.mrf.mxu1  ;;  %4166 = vmatmul.mubr.f32.gmra.mxu1 %v7921_v62  ;;  %v2079_v43 = vpop.f32.mrf.mxu0  ;;  %v927_v3 = vsel %vm854_vm0, %v925_v25, %v926_v30 }
 0x1b4   :  { %v7987_v8 = vadd.f32 %v2787_v45, %v2403_v24  ;;  %4170 = vmatprep.mubr.f32.mxu1 %v3581_v55  ;;  %v924_v43 = vsel %vm854_vm0, %v921_v13, %v923_v11  ;;  %v928_v24 = vrot.slane %v5841_v1, 2  ;;  %v7997_v45 = vld [vmem:[#allocation2 + $0xe8] sm:$0x3]  ;;  %v3586_v13 = vsel %vm629_vm1, %v3584_v46, %v3585_v26  ;;  %v5844_v1 = vld [vmem:[#allocation2 + $0x178] sm:$0x3] }
 0x1b5   :  { %v2789_v28 = vpop.f32.mrf.mxu1  ;;  %v7989_v29 = vpop.f32.mrf.mxu0  ;;  %5483 = vmatmul.mubr.f32.gmra.mxu0 %v919_v15  ;;  %v3587_v11 = vrot.slane %v7997_v45, 1 }
 0x1b6   :  { %9471 = vst [vmem:[#allocation80_spill] sm:$0xff] %v7987_v8  ;;  %5485 = vmatprep.mubr.f32.mxu0 %v922_v56  ;;  %v5843_v28 = vld [vmem:[#allocation2 + $0x170] sm:$0xff]  ;;  %v2413_v56 = vadd.f32 %v7318_v4, %v7806_v31  ;;  %v929_v25 = vsel %vm854_vm0, %v926_v30, %v928_v24  ;;  %v3589_v24 = vrot.slane %v8010_v48, 1 }
 0x1b7   :  { %v2792_v55 = vpop.f32.mrf.mxu1  ;;  %4171 = vmatmul.mubr.f32.gmra.mxu1 %v7950_v40  ;;  %v2084_v15 = vpop.f32.mrf.mxu0  ;;  %v931_v27 = vrot.slane %v5843_v28, 2  ;;  %v3588_v30 = vsel %vm629_vm1, %v3585_v26, %v3587_v11  ;;  %v5847_v11 = vld [vmem:[#allocation2 + $0x1c8] sm:$0xff] }
 0x1b8   :  { %v8001_v8 = vadd.f32 %v2792_v55, %v2408_v22  ;;  %4175 = vmatprep.mubr.f32.mxu1 %v3583_v57  ;;  %v933_v15 = vrot.slane %v5844_v1, 2  ;;  %v8012_v22 = vld [vmem:[#allocation2 + $0xf8] sm:$0xff]  ;;  %v5845_v55 = vld [vmem:[#allocation2 + $0x1b0] sm:$0xff]  ;;  %v2418_v1 = vadd.f32 %v7328_v52, %v7825_v9 }
 0x1b9   :  { %v2794_v34 = vpop.f32.mrf.mxu1  ;;  %v8003_v63 = vpop.f32.mrf.mxu0  ;;  %5486 = vmatmul.mubr.f32.gmra.mxu0 %v924_v43  ;;  %v932_v46 = vsel %vm854_vm0, %v930_v6, %v931_v27  ;;  %v935_v28 = vrot.slane %v5845_v55, 2  ;;  %v940_v55 = vrot.slane %v5847_v11, 2  ;;  %v5850_v11 = vld [vmem:[#allocation2 + $0x1e0] sm:$0xff] }
 0x1ba   :  { %9472 = vst [vmem:[#allocation81_spill] sm:$0xff] %v8001_v8  ;;  %5488 = vmatprep.mubr.f32.mxu0 %v927_v3  ;;  %v3590_v3 = vrot.slane %v8012_v22, 1  ;;  %v934_v6 = vsel %vm854_vm0, %v931_v27, %v933_v15 }
 0x1bb   :  { %v2797_v57 = vpop.f32.mrf.mxu1  ;;  %4176 = vmatmul.mubr.f32.gmra.mxu1 %v7952_v59  ;;  %v2089_v43 = vpop.f32.mrf.mxu0  ;;  %v937_v26 = vsel %vm854_vm0, %v935_v28, %v7763_v39 }
 0x1bc   :  { %v8016_v34 = vadd.f32 %v2797_v57, %v2413_v56  ;;  %4180 = vmatprep.mubr.f32.mxu1 %v3586_v13  ;;  %v5846_v43 = vld [vmem:[#allocation2 + $0x1c0] sm:$0x3]  ;;  %v3591_v27 = vsel %vm629_vm1, %v3589_v24, %v3590_v3 }
 0x1bd   :  { %v2799_v4 = vpop.f32.mrf.mxu1  ;;  %v8018_v31 = vpop.f32.mrf.mxu0  ;;  %5489 = vmatmul.mubr.f32.gmra.mxu0 %v929_v25  ;;  %v938_v56 = vrot.slane %v5846_v43, 2  ;;  %v8026_v57 = vld [vmem:[#allocation2 + $0x100] sm:$0x3]  ;;  %v5849_v43 = vld [vmem:[#allocation2 + $0x1d8] sm:$0x3] }
 0x1be   :  { %9473 = vst [vmem:[#allocation82_spill] sm:$0xff] %v8016_v34  ;;  %5491 = vmatprep.mubr.f32.mxu0 %v932_v46  ;;  %v5848_v4 = vld [vmem:[#allocation2 + $0x1d0] sm:$0xff]  ;;  %v3592_v15 = vrot.slane %v8026_v57, 1  ;;  %v2423_v46 = vadd.f32 %v7325_v47, %v7841_v23 }
 0x1bf   :  { %v2802_v13 = vpop.f32.mrf.mxu1  ;;  %4181 = vmatmul.mubr.f32.gmra.mxu1 %v7981_v14  ;;  %v2094_v25 = vpop.f32.mrf.mxu0  ;;  %v941_v8 = vrot.slane %v5848_v4, 2  ;;  %v939_v28 = vsel %vm854_vm0, %v7763_v39, %v938_v56  ;;  %v945_v4 = vrot.slane %v5850_v11, 2  ;;  %v5852_v11 = vld [vmem:[#allocation2 + $0x1f0] sm:$0x3] }
 0x1c0   :  { %v8031_v34 = vadd.f32 %v2802_v13, %v2418_v1  ;;  %4185 = vmatprep.mubr.f32.mxu1 %v3588_v30  ;;  %v943_v25 = vrot.slane %v5849_v43, 2  ;;  %v8041_v1 = vld [vmem:[#allocation2 + $0x108] sm:$0xff]  ;;  %v8043_v30 = vld [vmem:[#allocation2 + $0x110] sm:$0xff] }
 0x1c1   :  { %v2804_v52 = vpop.f32.mrf.mxu1  ;;  %v8033_v9 = vpop.f32.mrf.mxu0  ;;  %5492 = vmatmul.mubr.f32.gmra.mxu0 %v934_v6  ;;  %v942_v24 = vsel %vm854_vm0, %v940_v55, %v941_v8  ;;  %v3594_v43 = vrot.slane %v8041_v1, 1  ;;  %v2428_v55 = vadd.f32 %v7340_v54, %v7860_v10 }
 0x1c2   :  { %9474 = vst [vmem:[#allocation83_spill] sm:$0xff] %v8031_v34  ;;  %5494 = vmatprep.mubr.f32.mxu0 %v937_v26  ;;  %v5851_v52 = vld [vmem:[#allocation2 + $0x1e8] sm:$0xff]  ;;  %v3593_v26 = vsel %vm629_vm1, %v3590_v3, %v3592_v15  ;;  %v3595_v34 = vrot.slane %v8043_v30, 1  ;;  %v5853_v15 = vld [vmem:[#allocation2 + $0x1f8] sm:$0xff] }
 0x1c3   :  { %v2807_v13 = vpop.f32.mrf.mxu1  ;;  %4186 = vmatmul.mubr.f32.gmra.mxu1 %v7983_v33  ;;  %v2099_v6 = vpop.f32.mrf.mxu0  ;;  %v946_v47 = vrot.slane %v5851_v52, 2  ;;  %v950_v52 = vrot.slane %v5853_v15, 2  ;;  %v8070_v15 = vld [vmem:[#allocation2 + $0x120] sm:$0xff] }
 0x1c4   :  { %v8047_v23 = vadd.f32 %v2807_v13, %v2423_v46  ;;  %4190 = vmatprep.mubr.f32.mxu1 %v3591_v27  ;;  %v944_v6 = vsel %vm854_vm0, %v941_v8, %v943_v25  ;;  %v948_v46 = vrot.slane %v5852_v11, 2  ;;  %v8057_v13 = vld [vmem:[#allocation2 + $0x118] sm:$0x3]  ;;  %v3596_v8 = vsel %vm629_vm1, %v3594_v43, %v3595_v34  ;;  %v5855_v11 = vld [vmem:[#allocation2 + $0x208] sm:$0x3] }
 0x1c5   :  { %v2809_v39 = vpop.f32.mrf.mxu1  ;;  %v8049_v56 = vpop.f32.mrf.mxu0  ;;  %5495 = vmatmul.mubr.f32.gmra.mxu0 %v939_v28  ;;  %v947_v3 = vsel %vm854_vm0, %v945_v4, %v946_v47  ;;  %v3597_v25 = vrot.slane %v8057_v13, 1 }
 0x1c6   :  { %9475 = vst [vmem:[#allocation84_spill] sm:$0xff] %v8047_v23  ;;  %5497 = vmatprep.mubr.f32.mxu0 %v942_v24  ;;  %v5854_v39 = vld [vmem:[#allocation2 + $0x200] sm:$0xff]  ;;  %v2433_v24 = vadd.f32 %v7336_v21, %v7877_v53  ;;  %v949_v4 = vsel %vm854_vm0, %v946_v47, %v948_v46 }
 0x1c7   :  { %v2812_v27 = vpop.f32.mrf.mxu1  ;;  %4191 = vmatmul.mubr.f32.gmra.mxu1 %v8010_v48  ;;  %v2104_v28 = vpop.f32.mrf.mxu0  ;;  %v951_v23 = vrot.slane %v5854_v39, 2  ;;  %v3598_v46 = vsel %vm629_vm1, %v3595_v34, %v3597_v25  ;;  %v5859_v25 = vld [vmem:[#allocation2 + $0x228] sm:$0xff] }
 0x1c8   :  { %v8061_v7 = vadd.f32 %v2812_v27, %v2428_v55  ;;  %4195 = vmatprep.mubr.f32.mxu1 %v3593_v26  ;;  %v953_v28 = vrot.slane %v5855_v11, 2  ;;  %v8072_v55 = vld [vmem:[#allocation2 + $0x128] sm:$0xff]  ;;  %v5856_v27 = vld [vmem:[#allocation2 + $0x210] sm:$0xff] }
 0x1c9   :  { %v2814_v54 = vpop.f32.mrf.mxu1  ;;  %v8063_v10 = vpop.f32.mrf.mxu0  ;;  %5498 = vmatmul.mubr.f32.gmra.mxu0 %v944_v6  ;;  %v952_v43 = vsel %vm854_vm0, %v950_v52, %v951_v23  ;;  %v955_v39 = vrot.slane %v5856_v27, 2  ;;  %v3600_v11 = vrot.slane %v8072_v55, 1  ;;  %v2438_v52 = vadd.f32 %v7346_v18, %v7896_v38  ;;  %v5858_v27 = vld [vmem:[#allocation2 + $0x220] sm:$0x3] }
 0x1ca   :  { %9476 = vst [vmem:[#allocation85_spill] sm:$0xff] %v8061_v7  ;;  %5500 = vmatprep.mubr.f32.mxu0 %v947_v3  ;;  %v5857_v54 = vld [vmem:[#allocation2 + $0x218] sm:$0xff]  ;;  %v3599_v3 = vrot.slane %v8070_v15, 1 }
 0x1cb   :  { %v2817_v26 = vpop.f32.mrf.mxu1  ;;  %4196 = vmatmul.mubr.f32.gmra.mxu1 %v8012_v22  ;;  %v2109_v6 = vpop.f32.mrf.mxu0  ;;  %v956_v7 = vrot.slane %v5857_v54, 2  ;;  %v960_v54 = vrot.slane %v5859_v25, 2  ;;  %v8099_v25 = vld [vmem:[#allocation2 + $0x138] sm:$0xff] }
 0x1cc   :  { %v8076_v21 = vadd.f32 %v2817_v26, %v2433_v24  ;;  %4200 = vmatprep.mubr.f32.mxu1 %v3596_v8  ;;  %v954_v6 = vsel %vm854_vm0, %v951_v23, %v953_v28  ;;  %v958_v24 = vrot.slane %v5858_v27, 2  ;;  %v8086_v26 = vld [vmem:[#allocation2 + $0x130] sm:$0x3]  ;;  %v3601_v23 = vsel %vm629_vm1, %v3599_v3, %v3600_v11  ;;  %v5861_v27 = vld [vmem:[#allocation2 + $0x238] sm:$0x3] }
 0x1cd   :  { %v2819_v53 = vpop.f32.mrf.mxu1  ;;  %v8078_v47 = vpop.f32.mrf.mxu0  ;;  %5501 = vmatmul.mubr.f32.gmra.mxu0 %v949_v4  ;;  %v957_v34 = vsel %vm854_vm0, %v955_v39, %v956_v7  ;;  %v3602_v28 = vrot.slane %v8086_v26, 1 }
 0x1ce   :  { %9477 = vst [vmem:[#allocation86_spill] sm:$0xff] %v8076_v21  ;;  %5503 = vmatprep.mubr.f32.mxu0 %v952_v43  ;;  %v5860_v53 = vld [vmem:[#allocation2 + $0x230] sm:$0xff]  ;;  %v2443_v43 = vadd.f32 %v7343_v61, %v7913_v44  ;;  %v959_v39 = vsel %vm854_vm0, %v956_v7, %v958_v24 }
 0x1cf   :  { %v2822_v8 = vpop.f32.mrf.mxu1  ;;  %4201 = vmatmul.mubr.f32.gmra.mxu1 %v8041_v1  ;;  %v2114_v4 = vpop.f32.mrf.mxu0  ;;  %v961_v21 = vrot.slane %v5860_v53, 2  ;;  %v3603_v24 = vsel %vm629_vm1, %v3600_v11, %v3602_v28  ;;  %v5865_v28 = vld [vmem:[#allocation2 + $0x258] sm:$0xff] }
 0x1d0   :  { %v8090_v2 = vadd.f32 %v2822_v8, %v2438_v52  ;;  %4205 = vmatprep.mubr.f32.mxu1 %v3598_v46  ;;  %v963_v4 = vrot.slane %v5861_v27, 2  ;;  %v8101_v52 = vld [vmem:[#allocation2 + $0x140] sm:$0xff] }
 0x1d1   :  { %v2824_v18 = vpop.f32.mrf.mxu1  ;;  %v8092_v38 = vpop.f32.mrf.mxu0  ;;  %5504 = vmatmul.mubr.f32.gmra.mxu0 %v954_v6  ;;  %v962_v3 = vsel %vm854_vm0, %v960_v54, %v961_v21  ;;  %v5862_v8 = vld [vmem:[#allocation2 + $0x240] sm:$0xff]  ;;  %v3605_v27 = vrot.slane %v8101_v52, 1  ;;  %v2448_v54 = vadd.f32 %v7353_v17, %v7926_v42 }
 0x1d2   :  { %9478 = vst [vmem:[#allocation87_spill] sm:$0xff] %v8090_v2  ;;  %5506 = vmatprep.mubr.f32.mxu0 %v957_v34  ;;  %v965_v53 = vrot.slane %v5862_v8, 2  ;;  %v5863_v18 = vld [vmem:[#allocation2 + $0x248] sm:$0xff]  ;;  %v3604_v34 = vrot.slane %v8099_v25, 1  ;;  %v5864_v8 = vld [vmem:[#allocation2 + $0x250] sm:$0x3] }
 0x1d3   :  { %v2827_v46 = vpop.f32.mrf.mxu1  ;;  %4206 = vmatmul.mubr.f32.gmra.mxu1 %v8043_v30  ;;  %v2119_v6 = vpop.f32.mrf.mxu0  ;;  %v966_v2 = vrot.slane %v5863_v18, 2  ;;  %v970_v18 = vrot.slane %v5865_v28, 2  ;;  %v8128_v28 = vld [vmem:[#allocation2 + $0x150] sm:$0xff] }
 0x1d4   :  { %v8105_v61 = vadd.f32 %v2827_v46, %v2443_v43  ;;  %4210 = vmatprep.mubr.f32.mxu1 %v3601_v23  ;;  %v964_v6 = vsel %vm854_vm0, %v961_v21, %v963_v4  ;;  %v968_v43 = vrot.slane %v5864_v8, 2  ;;  %v8115_v46 = vld [vmem:[#allocation2 + $0x148] sm:$0x3]  ;;  %v3606_v21 = vsel %vm629_vm1, %v3604_v34, %v3605_v27 }
 0x1d5   :  { %v2829_v44 = vpop.f32.mrf.mxu1  ;;  %v8107_v7 = vpop.f32.mrf.mxu0  ;;  %5507 = vmatmul.mubr.f32.gmra.mxu0 %v959_v39  ;;  %v967_v11 = vsel %vm854_vm0, %v965_v53, %v966_v2  ;;  %v3607_v4 = vrot.slane %v8115_v46, 1  ;;  %v5867_v8 = vld [vmem:[#allocation2 + $0x268] sm:$0x3] }
 0x1d6   :  { %9479 = vst [vmem:[#allocation88_spill] sm:$0xff] %v8105_v61  ;;  %5509 = vmatprep.mubr.f32.mxu0 %v962_v3  ;;  %v5866_v44 = vld [vmem:[#allocation2 + $0x260] sm:$0xff]  ;;  %v2453_v3 = vadd.f32 %v7350_v5, %v7941_v20  ;;  %v969_v53 = vsel %vm854_vm0, %v966_v2, %v968_v43 }
 0x1d7   :  { %v2832_v23 = vpop.f32.mrf.mxu1  ;;  %4211 = vmatmul.mubr.f32.gmra.mxu1 %v8070_v15  ;;  %v2124_v39 = vpop.f32.mrf.mxu0  ;;  %v971_v61 = vrot.slane %v5866_v44, 2  ;;  %v3608_v43 = vsel %vm629_vm1, %v3605_v27, %v3607_v4  ;;  %v5871_v4 = vld [vmem:[#allocation2 + $0x288] sm:$0xff] }
 0x1d8   :  { %v8119_v16 = vadd.f32 %v2832_v23, %v2448_v54  ;;  %4215 = vmatprep.mubr.f32.mxu1 %v3603_v24  ;;  %v973_v39 = vrot.slane %v5867_v8, 2  ;;  %v8130_v54 = vld [vmem:[#allocation2 + $0x158] sm:$0xff]  ;;  %v5868_v23 = vld [vmem:[#allocation2 + $0x270] sm:$0xff] }
 0x1d9   :  { %v2834_v17 = vpop.f32.mrf.mxu1  ;;  %v8121_v42 = vpop.f32.mrf.mxu0  ;;  %5510 = vmatmul.mubr.f32.gmra.mxu0 %v964_v6  ;;  %v972_v34 = vsel %vm854_vm0, %v970_v18, %v971_v61  ;;  %v975_v44 = vrot.slane %v5868_v23, 2  ;;  %v3610_v8 = vrot.slane %v8130_v54, 1 }
 0x1da   :  { %9480 = vst [vmem:[#allocation89_spill] sm:$0xff] %v8119_v16  ;;  %5512 = vmatprep.mubr.f32.mxu0 %v967_v11  ;;  %v5869_v17 = vld [vmem:[#allocation2 + $0x278] sm:$0xff]  ;;  %v3609_v11 = vrot.slane %v8128_v28, 1  ;;  %v974_v23 = vsel %vm854_vm0, %v971_v61, %v973_v39 }
 0x1db   :  { %v2837_v24 = vpop.f32.mrf.mxu1  ;;  %4216 = vmatmul.mubr.f32.gmra.mxu1 %v8072_v55  ;;  %v2129_v6 = vpop.f32.mrf.mxu0  ;;  %v976_v16 = vrot.slane %v5869_v17, 2  ;;  %v5870_v17 = vld [vmem:[#allocation2 + $0x280] sm:$0x3] }
 0x1dc   :  { %v8134_v5 = vadd.f32 %v2837_v24, %v2453_v3  ;;  %4220 = vmatprep.mubr.f32.mxu1 %v3606_v21  ;;  %v9482_v6 = vld [vmem:[#allocation4_spill] sm:$0xff]  ;;  %v978_v3 = vrot.slane %v5870_v17, 2  ;;  %v8144_v24 = vld [vmem:[#allocation2 + $0x160] sm:$0x3]  ;;  %v3611_v61 = vsel %vm629_vm1, %v3609_v11, %v3610_v8 }
 0x1dd   :  { %v2839_v20 = vpop.f32.mrf.mxu1  ;;  %v8136_v2 = vpop.f32.mrf.mxu0  ;;  %5513 = vmatmul.mubr.f32.gmra.mxu0 %v969_v53  ;;  %v2458_v18 = vadd.f32 %v9482_v6, %v7957_v41  ;;  %v977_v27 = vsel %vm854_vm0, %v975_v44, %v976_v16  ;;  %v3612_v39 = vrot.slane %v8144_v24, 1  ;;  %v9484_v6 = vld [vmem:[#allocation3_spill] sm:$0xff] }
 0x1de   :  { %9481 = vst [vmem:[#allocation90_spill] sm:$0xff] %v8134_v5  ;;  %5515 = vmatprep.mubr.f32.mxu0 %v972_v34  ;;  %v980_v20 = vrot.slane %v5871_v4, 2  ;;  %v5872_v5 = vld [vmem:[#allocation2 + $0x290] sm:$0xff]  ;;  %v2463_v17 = vadd.f32 %v9484_v6, %v7972_v32  ;;  %v979_v44 = vsel %vm854_vm0, %v976_v16, %v978_v3 }
 0x1df   :  { %v2842_v21 = vpop.f32.mrf.mxu1  ;;  %4221 = vmatmul.mubr.f32.gmra.mxu1 %v8099_v25  ;;  %v2134_v53 = vpop.f32.mrf.mxu0  ;;  %v981_v58 = vrot.slane %v5872_v5, 2  ;;  %v8157_v5 = vld [vmem:[#allocation2 + $0x168] sm:$0xff] }
 0x1e0   :  { %v8148_v0 = vadd.f32 %v2842_v21, %v2458_v18  ;;  %4225 = vmatprep.mubr.f32.mxu1 %v3608_v43  ;;  %v5873_v53 = vld [vmem:[#allocation2 + $0x298] sm:$0x3]  ;;  %v8159_v18 = vld [vmem:[#allocation2 + $0x170] sm:$0xff]  ;;  %v5874_v21 = vld [vmem:[#allocation2 + $0x2a0] sm:$0xff]  ;;  %v3614_v6 = vrot.slane %v8157_v5, 1 }
 0x1e1   :  { %v2844_v41 = vpop.f32.mrf.mxu1  ;;  %v8150_v34 = vpop.f32.mrf.mxu0  ;;  %5516 = vmatmul.mubr.f32.gmra.mxu0 %v974_v23  ;;  %v983_v4 = vrot.slane %v5873_v53, 2  ;;  %9485 = vst [vmem:[#allocation3_spill] sm:$0xff] %v8159_v18  ;;  %v982_v11 = vsel %vm854_vm0, %v980_v20, %v981_v58  ;;  %v3615_v53 = vrot.slane %v8159_v18, 1 }
 0x1e2   :  { %9483 = vst [vmem:[#allocation4_spill] sm:$0xff] %v8148_v0  ;;  %5518 = vmatprep.mubr.f32.mxu0 %v977_v27  ;;  %v985_v41 = vrot.slane %v5874_v21, 2  ;;  %v5875_v0 = vld [vmem:[#allocation2 + $0x2a8] sm:$0xff]  ;;  %v3613_v27 = vsel %vm629_vm1, %v3610_v8, %v3612_v39  ;;  %v5877_v39 = vld [vmem:[#allocation2 + $0x2b8] sm:$0xff] }
 0x1e3   :  { %v2847_v43 = vpop.f32.mrf.mxu1  ;;  %4226 = vmatmul.mubr.f32.gmra.mxu1 %v8101_v52  ;;  %v2139_v23 = vpop.f32.mrf.mxu0  ;;  %v986_v37 = vrot.slane %v5875_v0, 2  ;;  %v984_v21 = vsel %vm854_vm0, %v981_v58, %v983_v4  ;;  %v5876_v0 = vld [vmem:[#allocation2 + $0x2b0] sm:$0x3]  ;;  %v3616_v58 = vsel %vm629_vm1, %v3614_v6, %v3615_v53 }
 0x1e4   :  { %v8163_v32 = vadd.f32 %v2847_v43, %v2463_v17  ;;  %4230 = vmatprep.mubr.f32.mxu1 %v3611_v61  ;;  %v9487_v23 = vld [vmem:[#allocation7_spill] sm:$0xff]  ;;  %v988_v17 = vrot.slane %v5876_v0, 2  ;;  %v8173_v43 = vld [vmem:[#allocation2 + $0x178] sm:$0x3] }
 0x1e5   :  { %v2849_v16 = vpop.f32.mrf.mxu1  ;;  %v8165_v3 = vpop.f32.mrf.mxu0  ;;  %5519 = vmatmul.mubr.f32.gmra.mxu0 %v979_v44  ;;  %v2468_v20 = vadd.f32 %v9487_v23, %v7989_v29  ;;  %9488 = vst [vmem:[#allocation7_spill] sm:$0xff] %v8173_v43  ;;  %v987_v8 = vsel %vm854_vm0, %v985_v41, %v986_v37  ;;  %v3617_v4 = vrot.slane %v8173_v43, 1  ;;  %v9490_v23 = vld [vmem:[#allocation6_spill] sm:$0xff] }
 0x1e6   :  { %9486 = vst [vmem:[#allocation91_spill] sm:$0xff] %v8163_v32  ;;  %5521 = vmatprep.mubr.f32.mxu0 %v982_v11  ;;  %v990_v16 = vrot.slane %v5877_v39, 2  ;;  %v5878_v32 = vld [vmem:[#allocation2 + $0x2c0] sm:$0xff]  ;;  %v2473_v0 = vadd.f32 %v9490_v23, %v8003_v63  ;;  %v989_v41 = vsel %vm854_vm0, %v986_v37, %v988_v17 }
 0x1e7   :  { %v2852_v61 = vpop.f32.mrf.mxu1  ;;  %4231 = vmatmul.mubr.f32.gmra.mxu1 %v8128_v28  ;;  %v2144_v44 = vpop.f32.mrf.mxu0  ;;  %v991_v12 = vrot.slane %v5878_v32, 2  ;;  %v8186_v32 = vld [vmem:[#allocation2 + $0x180] sm:$0xff] }
 0x1e8   :  { %v8177_v19 = vadd.f32 %v2852_v61, %v2468_v20  ;;  %4235 = vmatprep.mubr.f32.mxu1 %v3613_v27  ;;  %v5879_v44 = vld [vmem:[#allocation2 + $0x2c8] sm:$0x3]  ;;  %9491 = vst [vmem:[#allocation6_spill] sm:$0xff] %v8186_v32  ;;  %v5880_v61 = vld [vmem:[#allocation2 + $0x2d0] sm:$0xff]  ;;  %v3619_v23 = vrot.slane %v8186_v32, 1 }
 0x1e9   :  { %v2854_v29 = vpop.f32.mrf.mxu1  ;;  %v8179_v11 = vpop.f32.mrf.mxu0  ;;  %5522 = vmatmul.mubr.f32.gmra.mxu0 %v984_v21  ;;  %v993_v39 = vrot.slane %v5879_v44, 2  ;;  %v8188_v20 = vld [vmem:[#allocation2 + $0x188] sm:$0xff]  ;;  %v992_v6 = vsel %vm854_vm0, %v990_v16, %v991_v12 }
 0x1ea   :  { %9489 = vst [vmem:[#allocation92_spill] sm:$0xff] %v8177_v19  ;;  %5524 = vmatprep.mubr.f32.mxu0 %v987_v8  ;;  %9492 = vst [vmem:[#allocation93_spill] sm:$0xff] %v8188_v20  ;;  %v995_v29 = vrot.slane %v5880_v61, 2  ;;  %v5881_v19 = vld [vmem:[#allocation2 + $0x2d8] sm:$0xff]  ;;  %v3618_v8 = vsel %vm629_vm1, %v3615_v53, %v3617_v4  ;;  %v3620_v44 = vrot.slane %v8188_v20, 1  ;;  %v5883_v4 = vld [vmem:[#allocation2 + $0x2e8] sm:$0xff] }
 0x1eb   :  { %v2857_v27 = vpop.f32.mrf.mxu1  ;;  %4236 = vmatmul.mubr.f32.gmra.mxu1 %v8130_v54  ;;  %v2149_v21 = vpop.f32.mrf.mxu0  ;;  %v996_v35 = vrot.slane %v5881_v19, 2  ;;  %v994_v61 = vsel %vm854_vm0, %v991_v12, %v993_v39  ;;  %v5882_v19 = vld [vmem:[#allocation2 + $0x2e0] sm:$0x3] }
 0x1ec   :  { %v8192_v63 = vadd.f32 %v2857_v27, %v2473_v0  ;;  %4240 = vmatprep.mubr.f32.mxu1 %v3616_v58  ;;  %v9494_v21 = vld [vmem:[#allocation10_spill] sm:$0xff]  ;;  %v998_v0 = vrot.slane %v5882_v19, 2  ;;  %v8202_v27 = vld [vmem:[#allocation2 + $0x190] sm:$0x3]  ;;  %v3621_v12 = vsel %vm629_vm1, %v3619_v23, %v3620_v44 }
 0x1ed   :  { %v2859_v37 = vpop.f32.mrf.mxu1  ;;  %v8194_v17 = vpop.f32.mrf.mxu0  ;;  %5525 = vmatmul.mubr.f32.gmra.mxu0 %v989_v41  ;;  %v2478_v16 = vadd.f32 %v9494_v21, %v8018_v31  ;;  %9495 = vst [vmem:[#allocation10_spill] sm:$0xff] %v8202_v27  ;;  %v997_v53 = vsel %vm854_vm0, %v995_v29, %v996_v35  ;;  %v3622_v39 = vrot.slane %v8202_v27, 1  ;;  %v9497_v21 = vld [vmem:[#allocation9_spill] sm:$0xff] }
 0x1ee   :  { %9493 = vst [vmem:[#allocation94_spill] sm:$0xff] %v8192_v63  ;;  %5527 = vmatprep.mubr.f32.mxu0 %v992_v6  ;;  %v1000_v37 = vrot.slane %v5883_v4, 2  ;;  %v5884_v63 = vld [vmem:[#allocation2 + $0x2f0] sm:$0xff]  ;;  %v2483_v19 = vadd.f32 %v9497_v21, %v8033_v9  ;;  %v999_v29 = vsel %vm854_vm0, %v996_v35, %v998_v0  ;;  %v8225_v21 = vld [vmem:[#allocation2 + $0x8] sm:$0xff] }
 0x1ef   :  { %v2862_v58 = vpop.f32.mrf.mxu1  ;;  %4241 = vmatmul.mubr.f32.gmra.mxu1 %v8157_v5  ;;  %v2154_v41 = vpop.f32.mrf.mxu0  ;;  %v1001_v49 = vrot.slane %v5884_v63, 2  ;;  %v8215_v63 = vld [vmem:[#allocation2 + $0x198] sm:$0xff]  ;;  %v3623_v35 = vsel %vm629_vm1, %v3620_v44, %v3622_v39  ;;  %9500 = vst [vmem:[#allocation97_spill] sm:$0xff] %v8225_v21 }
 0x1f0   :  { %v8206_v60 = vadd.f32 %v2862_v58, %v2478_v16  ;;  %4245 = vmatprep.mubr.f32.mxu1 %v3618_v8  ;;  %v5885_v41 = vld [vmem:[#allocation2 + $0x2f8] sm:$0x3]  ;;  %9498 = vst [vmem:[#allocation9_spill] sm:$0xff] %v8215_v63  ;;  %v5886_v58 = vld [vmem:[#allocation2 + $0x300] sm:$0xff]  ;;  %v3624_v0 = vrot.slane %v8215_v63, 1 }
 0x1f1   :  { %v2864_v31 = vpop.f32.mrf.mxu1  ;;  %v8208_v6 = vpop.f32.mrf.mxu0  ;;  %5528 = vmatmul.mubr.f32.gmra.mxu0 %v994_v61  ;;  %v1003_v4 = vrot.slane %v5885_v41, 2  ;;  %v1002_v61 = vsel %vm854_vm0, %v1000_v37, %v1001_v49  ;;  %v1005_v23 = vrot.slane %v5886_v58, 2  ;;  %v3625_v41 = vrot.slane %v8225_v21, 1  ;;  %v9501_v37 = vld [vmem:[#allocation13_spill] sm:$0xff]  ;;  %v8231_v58 = vld [vmem:[#allocation2 + $0x1a8] sm:$0x3] }
 0x1f2   :  { %9496 = vst [vmem:[#allocation95_spill] sm:$0xff] %v8206_v60  ;;  %5530 = vmatprep.mubr.f32.mxu0 %v997_v53  ;;  %v5887_v31 = vld [vmem:[#allocation2 + $0x308] sm:$0xff]  ;;  %9502 = vst [vmem:[#allocation13_spill] sm:$0xff] %v8231_v58 }
 0x1f3   :  { %v2867_v16 = vpop.f32.mrf.mxu1  ;;  %4246 = vmatmul.mubr.f32.gmra.mxu1 %v8159_v18  ;;  %v2159_v8 = vpop.f32.mrf.mxu0  ;;  %v1006_v60 = vrot.slane %v5887_v31, 2 }
 0x1f4   :  { %v8219_v27 = vadd.f32 %v2867_v16, %v2483_v19  ;;  %4250 = vmatprep.mubr.f32.mxu1 %v3621_v12  ;;  %v2488_v8 = vadd.f32 %v9501_v37, %v8049_v56  ;;  %v1004_v19 = vsel %vm854_vm0, %v1001_v49, %v1003_v4  ;;  %v5889_v16 = vld [vmem:[#allocation2 + $0x310] sm:$0x3]  ;;  %v3626_v49 = vsel %vm629_vm1, %v3624_v0, %v3625_v41  ;;  %v9504_v37 = vld [vmem:[#allocation12_spill] sm:$0xff] }
 0x1f5   :  { %v2869_v9 = vpop.f32.mrf.mxu1  ;;  %v8221_v53 = vpop.f32.mrf.mxu0  ;;  %5531 = vmatmul.mubr.f32.gmra.mxu0 %v999_v29  ;;  %v1008_v12 = vrot.slane %v5889_v16, 2  ;;  %v1007_v39 = vsel %vm854_vm0, %v1005_v23, %v1006_v60  ;;  %v5890_v29 = vld [vmem:[#allocation2 + $0x318] sm:$0xff]  ;;  %v3627_v4 = vrot.slane %v8231_v58, 1  ;;  %v2493_v16 = vadd.f32 %v9504_v37, %v8063_v10 }
 0x1f6   :  { %9499 = vst [vmem:[#allocation96_spill] sm:$0xff] %v8219_v27  ;;  %5533 = vmatprep.mubr.f32.mxu0 %v1002_v61  ;;  %v1010_v9 = vrot.slane %v5890_v29, 2  ;;  %v5891_v27 = vld [vmem:[#allocation2 + $0x320] sm:$0xff] }
 0x1f7   :  { %v2872_v31 = vpop.f32.mrf.mxu1  ;;  %4251 = vmatmul.mubr.f32.gmra.mxu1 %v8186_v32  ;;  %v2164_v44 = vpop.f32.mrf.mxu0  ;;  %v1011_v43 = vrot.slane %v5891_v27, 2  ;;  %v1009_v23 = vsel %vm854_vm0, %v1006_v60, %v1008_v12  ;;  %v8244_v27 = vld [vmem:[#allocation2 + $0x1e0] sm:$0xff] }
 0x1f8   :  { %v8235_v18 = vadd.f32 %v2872_v31, %v2488_v8  ;;  %4255 = vmatprep.mubr.f32.mxu1 %v3623_v35  ;;  %v5892_v44 = vld [vmem:[#allocation2 + $0x328] sm:$0x3]  ;;  %v5893_v31 = vld [vmem:[#allocation2 + $0x30] sm:$0xff]  ;;  %v3629_v37 = vrot.slane %v8244_v27, 1 }
 0x1f9   :  { %v2874_v56 = vpop.f32.mrf.mxu1  ;;  %v8237_v61 = vpop.f32.mrf.mxu0  ;;  %5534 = vmatmul.mubr.f32.gmra.mxu0 %v1004_v19  ;;  %v1013_v29 = vrot.slane %v5892_v44, 2  ;;  %v8246_v8 = vld [vmem:[#allocation2 + $0x1e8] sm:$0xff]  ;;  %v1012_v0 = vsel %vm854_vm0, %v1010_v9, %v1011_v43 }
 0x1fa   :  { %9503 = vst [vmem:[#allocation98_spill] sm:$0xff] %v8235_v18  ;;  %5536 = vmatprep.mubr.f32.mxu0 %v1007_v39  ;;  %v3773_v56 = vrot.slane %v5893_v31, 2  ;;  %v5894_v18 = vld [vmem:[#allocation2 + $0x38] sm:$0xff]  ;;  %v3628_v39 = vsel %vm629_vm1, %v3625_v41, %v3627_v4  ;;  %v3630_v44 = vrot.slane %v8246_v8, 1  ;;  %v9506_v9 = vld [vmem:[#allocation16_spill] sm:$0xff] }
 0x1fb   :  { %v2877_v35 = vpop.f32.mrf.mxu1  ;;  %4256 = vmatmul.mubr.f32.gmra.mxu1 %v8188_v20  ;;  %v2169_v19 = vpop.f32.mrf.mxu0  ;;  %v3774_v58 = vrot.slane %v5894_v18, 2  ;;  %v2498_v31 = vadd.f32 %v9506_v9, %v8078_v47  ;;  %v1014_v18 = vsel %vm854_vm0, %v1011_v43, %v1013_v29  ;;  %v5896_v4 = vld [vmem:[#allocation2 + $0x48] sm:$0xff] }
 0x1fc   :  { %v8250_v10 = vadd.f32 %v2877_v35, %v2493_v16  ;;  %4260 = vmatprep.mubr.f32.mxu1 %v3626_v49  ;;  %v5895_v19 = vld [vmem:[#allocation2 + $0x40] sm:$0x3]  ;;  %v8260_v16 = vld [vmem:[#allocation2 + $0x1f0] sm:$0x3]  ;;  %v3778_v35 = vrot.slane %v5896_v4, 2  ;;  %v3631_v43 = vsel %vm629_vm1, %v3629_v37, %v3630_v44 }
 0x1fd   :  { %v2879_v60 = vpop.f32.mrf.mxu1  ;;  %v8252_v12 = vpop.f32.mrf.mxu0  ;;  %5537 = vmatmul.mubr.f32.gmra.mxu0 %v1009_v23  ;;  %v3776_v20 = vrot.slane %v5895_v19, 2  ;;  %9507 = vst [vmem:[#allocation16_spill] sm:$0xff] %v8260_v16  ;;  %v3775_v41 = vsel %vm854_vm0, %v3773_v56, %v3774_v58  ;;  %v3632_v29 = vrot.slane %v8260_v16, 1 }
 0x1fe   :  { %9505 = vst [vmem:[#allocation12_spill] sm:$0xff] %v8250_v10  ;;  %5539 = vmatprep.mubr.f32.mxu0 %v1012_v0  ;;  %v5897_v60 = vld [vmem:[#allocation2 + $0x50] sm:$0xff]  ;;  %v9509_v0 = vld [vmem:[#allocation15_spill] sm:$0xff] }
 0x1ff   :  { %v2882_v49 = vpop.f32.mrf.mxu1  ;;  %4261 = vmatmul.mubr.f32.gmra.mxu1 %v8215_v63  ;;  %v2174_v23 = vpop.f32.mrf.mxu0  ;;  %v3779_v10 = vrot.slane %v5897_v60, 2  ;;  %v2503_v9 = vadd.f32 %v9509_v0, %v8092_v38  ;;  %v3777_v56 = vsel %vm854_vm0, %v3774_v58, %v3776_v20  ;;  %v8273_v60 = vld [vmem:[#allocation2 + $0x1f8] sm:$0xff] }
 0x200   :  { %v8264_v32 = vadd.f32 %v2882_v49, %v2498_v31  ;;  %4265 = vmatprep.mubr.f32.mxu1 %v3628_v39  ;;  %v5898_v23 = vld [vmem:[#allocation2 + $0x58] sm:$0x3]  ;;  %v8275_v31 = vld [vmem:[#allocation2 + $0x200] sm:$0xff]  ;;  %v3634_v0 = vrot.slane %v8273_v60, 1 }
 0x201   :  { %v2884_v19 = vpop.f32.mrf.mxu1  ;;  %v8266_v47 = vpop.f32.mrf.mxu0  ;;  %5540 = vmatmul.mubr.f32.gmra.mxu0 %v1014_v18  ;;  %v3781_v4 = vrot.slane %v5898_v23, 2  ;;  %v3780_v37 = vsel %vm854_vm0, %v3778_v35, %v3779_v10  ;;  %v5899_v49 = vld [vmem:[#allocation2 + $0x60] sm:$0xff]  ;;  %v3635_v23 = vrot.slane %v8275_v31, 1 }
 0x202   :  { %9508 = vst [vmem:[#allocation99_spill] sm:$0xff] %v8264_v32  ;;  %5574 = vmatprep.mubr.f32.mxu0 %v3775_v41  ;;  %v3783_v19 = vrot.slane %v5899_v49, 2  ;;  %v5900_v32 = vld [vmem:[#allocation2 + $0x68] sm:$0xff]  ;;  %v3633_v41 = vsel %vm629_vm1, %v3630_v44, %v3632_v29  ;;  %v5902_v29 = vld [vmem:[#allocation2 + $0x78] sm:$0xff] }
 0x203   :  { %v2887_v39 = vpop.f32.mrf.mxu1  ;;  %4266 = vmatmul.mubr.f32.gmra.mxu1 %v8225_v21  ;;  %v2179_v18 = vpop.f32.mrf.mxu0  ;;  %v3784_v16 = vrot.slane %v5900_v32, 2  ;;  %v3782_v49 = vsel %vm854_vm0, %v3779_v10, %v3781_v4  ;;  %v5901_v32 = vld [vmem:[#allocation2 + $0x70] sm:$0x3]  ;;  %v3636_v10 = vsel %vm629_vm1, %v3634_v0, %v3635_v23 }
 0x204   :  { %v8279_v38 = vadd.f32 %v2887_v39, %v2503_v9  ;;  %4270 = vmatprep.mubr.f32.mxu1 %v3631_v43  ;;  %v9511_v18 = vld [vmem:[#allocation19_spill] sm:$0xff]  ;;  %v3786_v9 = vrot.slane %v5901_v32, 2  ;;  %v8289_v39 = vld [vmem:[#allocation2 + $0x208] sm:$0x3] }
 0x205   :  { %v2889_v20 = vpop.f32.mrf.mxu1  ;;  %v8281_v58 = vpop.f32.mrf.mxu0  ;;  %5575 = vmatmul.mubr.f32.vlgmr.msra.gmra.mxu0 %v3777_v56  ;;  %v2508_v35 = vadd.f32 %v9511_v18, %v8107_v7  ;;  %9512 = vst [vmem:[#allocation19_spill] sm:$0xff] %v8289_v39  ;;  %v3785_v44 = vsel %vm854_vm0, %v3783_v19, %v3784_v16  ;;  %v3637_v4 = vrot.slane %v8289_v39, 1  ;;  %v9514_v18 = vld [vmem:[#allocation18_spill] sm:$0xff] }
 0x206   :  { %9510 = vst [vmem:[#allocation15_spill] sm:$0xff] %v8279_v38  ;;  %5577 = vmatprep.mubr.f32.mxu0 %v3780_v37  ;;  %v3788_v20 = vrot.slane %v5902_v29, 2  ;;  %v5903_v38 = vld [vmem:[#allocation2 + $0x80] sm:$0xff]  ;;  %v2513_v32 = vadd.f32 %v9514_v18, %v8121_v42  ;;  %v3787_v19 = vsel %vm854_vm0, %v3784_v16, %v3786_v9 }
 0x207   :  { %v2892_v43 = vpop.f32.mrf.mxu1  ;;  %4271 = vmatmul.mubr.f32.gmra.mxu1 %v8244_v27  ;;  %v2184_v56 = vpop.f32.mrf.mxu0  ;;  %v3789_v21 = vrot.slane %v5903_v38, 2  ;;  %v8302_v38 = vld [vmem:[#allocation2 + $0x210] sm:$0xff] }
 0x208   :  { %v8293_v63 = vadd.f32 %v2892_v43, %v2508_v35  ;;  %4275 = vmatprep.mubr.f32.mxu1 %v3633_v41  ;;  %v5904_v56 = vld [vmem:[#allocation2 + $0x88] sm:$0x3]  ;;  %v8304_v35 = vld [vmem:[#allocation2 + $0x218] sm:$0xff]  ;;  %v5905_v43 = vld [vmem:[#allocation2 + $0x90] sm:$0xff]  ;;  %v3639_v18 = vrot.slane %v8302_v38, 1 }
 0x209   :  { %v2894_v7 = vpop.f32.mrf.mxu1  ;;  %v8295_v37 = vpop.f32.mrf.mxu0  ;;  %5578 = vmatmul.mubr.f32.gmra.mxu0 %v3782_v49  ;;  %v3791_v29 = vrot.slane %v5904_v56, 2  ;;  %v3790_v0 = vsel %vm854_vm0, %v3788_v20, %v3789_v21  ;;  %v3640_v56 = vrot.slane %v8304_v35, 1 }
 0x20a   :  { %9513 = vst [vmem:[#allocation100_spill] sm:$0xff] %v8293_v63  ;;  %5580 = vmatprep.mubr.f32.mxu0 %v3785_v44  ;;  %v3793_v7 = vrot.slane %v5905_v43, 2  ;;  %v5906_v63 = vld [vmem:[#allocation2 + $0x98] sm:$0xff]  ;;  %v3638_v44 = vsel %vm629_vm1, %v3635_v23, %v3637_v4  ;;  %v3798_v4 = vrot.slane %v7919_v36, 2  ;;  %v3801_v36 = vrot.slane %v7936_v51, 2 }
 0x20b   :  { %v2897_v41 = vpop.f32.mrf.mxu1  ;;  %4276 = vmatmul.mubr.f32.gmra.mxu1 %v8246_v8  ;;  %v2189_v49 = vpop.f32.mrf.mxu0  ;;  %v3794_v39 = vrot.slane %v5906_v63, 2  ;;  %v3792_v43 = vsel %vm854_vm0, %v3789_v21, %v3791_v29  ;;  %v5907_v63 = vld [vmem:[#allocation2 + $0xa0] sm:$0x3]  ;;  %v3641_v21 = vsel %vm629_vm1, %v3639_v18, %v3640_v56 }
 0x20c   :  { %v8308_v42 = vadd.f32 %v2897_v41, %v2513_v32  ;;  %4280 = vmatprep.mubr.f32.mxu1 %v3636_v10  ;;  %v9516_v49 = vld [vmem:[#allocation22_spill] sm:$0xff]  ;;  %v3796_v32 = vrot.slane %v5907_v63, 2  ;;  %v8318_v41 = vld [vmem:[#allocation2 + $0x220] sm:$0x3] }
 0x20d   :  { %v2899_v16 = vpop.f32.mrf.mxu1  ;;  %v8310_v9 = vpop.f32.mrf.mxu0  ;;  %5581 = vmatmul.mubr.f32.gmra.mxu0 %v3787_v19  ;;  %v2518_v20 = vadd.f32 %v9516_v49, %v8136_v2  ;;  %v3795_v23 = vsel %vm854_vm0, %v3793_v7, %v3794_v39  ;;  %v3642_v29 = vrot.slane %v8318_v41, 1  ;;  %v9518_v49 = vld [vmem:[#allocation21_spill] sm:$0xff] }
 0x20e   :  { %9515 = vst [vmem:[#allocation18_spill] sm:$0xff] %v8308_v42  ;;  %5583 = vmatprep.mubr.f32.mxu0 %v3790_v0  ;;  %v3799_v16 = vrot.slane %v7921_v62, 2  ;;  %v2523_v63 = vadd.f32 %v9518_v49, %v8150_v34  ;;  %v3797_v7 = vsel %vm854_vm0, %v3794_v39, %v3796_v32  ;;  %v8334_v62 = vld [vmem:[#allocation2 + $0x228] sm:$0xff]  ;;  %v9520_v49 = vld [vmem:[#allocation25_spill] sm:$0xff] }
 0x20f   :  { %v2902_v10 = vpop.f32.mrf.mxu1  ;;  %4281 = vmatmul.mubr.f32.gmra.mxu1 %v8273_v60  ;;  %v2194_v19 = vpop.f32.mrf.mxu0  ;;  %v3643_v51 = vsel %vm629_vm1, %v3640_v56, %v3642_v29  ;;  %v3808_v29 = vrot.slane %v7981_v14, 2  ;;  %v3811_v14 = vrot.slane %v7997_v45, 2 }
 0x210   :  { %v8324_v42 = vadd.f32 %v2902_v10, %v2518_v20  ;;  %4285 = vmatprep.mubr.f32.mxu1 %v3638_v44  ;;  %v8336_v20 = vld [vmem:[#allocation2 + $0x230] sm:$0xff]  ;;  %v3800_v18 = vsel %vm854_vm0, %v3798_v4, %v3799_v16  ;;  %v3803_v10 = vrot.slane %v7950_v40, 2  ;;  %v3804_v19 = vrot.slane %v7952_v59, 2 }
 0x211   :  { %v2904_v2 = vpop.f32.mrf.mxu1  ;;  %v8326_v0 = vpop.f32.mrf.mxu0  ;;  %5584 = vmatmul.mubr.f32.gmra.mxu0 %v3792_v43  ;;  %v2528_v4 = vadd.f32 %v9520_v49, %v8165_v3  ;;  %v3802_v40 = vsel %vm854_vm0, %v3799_v16, %v3801_v36  ;;  %v3806_v59 = vrot.slane %v7967_v50, 2  ;;  %v8373_v49 = vld [vmem:[#allocation2 + $0x248] sm:$0xff] }
 0x212   :  { %9517 = vst [vmem:[#allocation22_spill] sm:$0xff] %v8324_v42  ;;  %5586 = vmatprep.mubr.f32.mxu0 %v3795_v23  ;;  %v3644_v23 = vrot.slane %v8334_v62, 1  ;;  %v3645_v2 = vrot.slane %v8336_v20, 1  ;;  %v3805_v56 = vsel %vm854_vm0, %v3803_v10, %v3804_v19 }
 0x213   :  { %v2907_v44 = vpop.f32.mrf.mxu1  ;;  %4286 = vmatmul.mubr.f32.gmra.mxu1 %v8275_v31  ;;  %v2199_v43 = vpop.f32.mrf.mxu0  ;;  %v3807_v10 = vsel %vm854_vm0, %v3804_v19, %v3806_v59 }
 0x214   :  { %v8342_v34 = vadd.f32 %v2907_v44, %v2523_v63  ;;  %4290 = vmatprep.mubr.f32.mxu1 %v3641_v21  ;;  %v8353_v63 = vld [vmem:[#allocation2 + $0x238] sm:$0x3]  ;;  %v3809_v44 = vrot.slane %v7983_v33, 2  ;;  %v3646_v50 = vsel %vm629_vm1, %v3644_v23, %v3645_v2  ;;  %v8371_v33 = vld [vmem:[#allocation2 + $0x240] sm:$0xff] }
 0x215   :  { %v2909_v39 = vpop.f32.mrf.mxu1  ;;  %v8344_v32 = vpop.f32.mrf.mxu0  ;;  %5587 = vmatmul.mubr.f32.gmra.mxu0 %v3797_v7  ;;  %v3647_v36 = vrot.slane %v8353_v63, 1 }
 0x216   :  { %9519 = vst [vmem:[#allocation21_spill] sm:$0xff] %v8342_v34  ;;  %5589 = vmatprep.mubr.f32.mxu0 %v3800_v18  ;;  %v9522_v18 = vld [vmem:[#allocation24_spill] sm:$0xff]  ;;  %v3810_v23 = vsel %vm854_vm0, %v3808_v29, %v3809_v44 }
 0x217   :  { %v2912_v21 = vpop.f32.mrf.mxu1  ;;  %4291 = vmatmul.mubr.f32.gmra.mxu1 %v8302_v38  ;;  %v8356_v7 = vpop.f32.mrf.mxu0  ;;  %v2533_v39 = vadd.f32 %v9522_v18, %v8179_v11  ;;  %v3814_v11 = vrot.slane %v8012_v22, 2  ;;  %v3648_v59 = vsel %vm629_vm1, %v3645_v2, %v3647_v36  ;;  %v9524_v18 = vld [vmem:[#allocation28_spill] sm:$0xff]  ;;  %v3816_v22 = vrot.slane %v8026_v57, 2 }
 0x218   :  { %v8361_v43 = vadd.f32 %v2912_v21, %v2528_v4  ;;  %4295 = vmatprep.mubr.f32.mxu1 %v3643_v51  ;;  %v2538_v29 = vadd.f32 %v9524_v18, %v8194_v17  ;;  %v3818_v36 = vrot.slane %v8041_v1, 2  ;;  %v3821_v1 = vrot.slane %v8057_v13, 2 }
 0x219   :  { %v2914_v3 = vpop.f32.mrf.mxu1  ;;  %v8363_v16 = vpop.f32.mrf.mxu0  ;;  %5590 = vmatmul.mubr.f32.gmra.mxu0 %v3802_v40  ;;  %v3813_v40 = vrot.slane %v8010_v48, 2  ;;  %v3812_v48 = vsel %vm854_vm0, %v3809_v44, %v3811_v14 }
 0x21a   :  { %9521 = vst [vmem:[#allocation25_spill] sm:$0xff] %v8361_v43  ;;  %5592 = vmatprep.mubr.f32.mxu0 %v3805_v56  ;;  %v3649_v56 = vrot.slane %v8371_v33, 1  ;;  %v3650_v3 = vrot.slane %v8373_v49, 1 }
 0x21b   :  { %v2917_v51 = vpop.f32.mrf.mxu1  ;;  %4296 = vmatmul.mubr.f32.gmra.mxu1 %v8304_v35  ;;  %v8376_v4 = vpop.f32.mrf.mxu0  ;;  %v3815_v2 = vsel %vm854_vm0, %v3813_v40, %v3814_v11  ;;  %v3817_v40 = vsel %vm854_vm0, %v3814_v11, %v3816_v22 }
 0x21c   :  { %v8381_v21 = vadd.f32 %v2917_v51, %v2533_v39  ;;  %4300 = vmatprep.mubr.f32.mxu1 %v3646_v50  ;;  %v8392_v39 = vld [vmem:[#allocation2 + $0x250] sm:$0x3]  ;;  %v3819_v51 = vrot.slane %v8043_v30, 2  ;;  %v3651_v57 = vsel %vm629_vm1, %v3649_v56, %v3650_v3  ;;  %v8410_v30 = vld [vmem:[#allocation2 + $0x258] sm:$0xff] }
 0x21d   :  { %v2919_v19 = vpop.f32.mrf.mxu1  ;;  %v8383_v45 = vpop.f32.mrf.mxu0  ;;  %5593 = vmatmul.mubr.f32.gmra.mxu0 %v3807_v10  ;;  %v3652_v14 = vrot.slane %v8392_v39, 1 }
 0x21e   :  { %9523 = vst [vmem:[#allocation24_spill] sm:$0xff] %v8381_v21  ;;  %5595 = vmatprep.mubr.f32.mxu0 %v3810_v23  ;;  %v9526_v23 = vld [vmem:[#allocation27_spill] sm:$0xff]  ;;  %v3820_v56 = vsel %vm854_vm0, %v3818_v36, %v3819_v51  ;;  %v9540_v21 = vld [vmem:[#allocation37_spill] sm:$0xff] }
 0x21f   :  { %v2922_v50 = vpop.f32.mrf.mxu1  ;;  %4301 = vmatmul.mubr.f32.gmra.mxu1 %v8334_v62  ;;  %v8395_v10 = vpop.f32.mrf.mxu0  ;;  %v2543_v18 = vadd.f32 %v9526_v23, %v8208_v6  ;;  %v3824_v6 = vrot.slane %v8072_v55, 2  ;;  %v3653_v22 = vsel %vm629_vm1, %v3650_v3, %v3652_v14  ;;  %v3826_v55 = vrot.slane %v8086_v26, 2 }
 0x220   :  { %v8400_v19 = vadd.f32 %v2922_v50, %v2538_v29  ;;  %4305 = vmatprep.mubr.f32.mxu1 %v3648_v59  ;;  %v8412_v29 = vld [vmem:[#allocation2 + $0x260] sm:$0xff]  ;;  %v3823_v50 = vrot.slane %v8070_v15, 2  ;;  %v3822_v15 = vsel %vm854_vm0, %v3819_v51, %v3821_v1  ;;  %v3828_v14 = vrot.slane %v8099_v25, 2  ;;  %v9530_v1 = vld [vmem:[#allocation30_spill] sm:$0xff] }
 0x221   :  { %v2924_v17 = vpop.f32.mrf.mxu1  ;;  %v8402_v44 = vpop.f32.mrf.mxu0  ;;  %5596 = vmatmul.mubr.f32.gmra.mxu0 %v3812_v48  ;;  %v3655_v23 = vrot.slane %v8412_v29, 1  ;;  %v3831_v25 = vrot.slane %v8115_v46, 2 }
 0x222   :  { %9525 = vst [vmem:[#allocation28_spill] sm:$0xff] %v8400_v19  ;;  %5598 = vmatprep.mubr.f32.mxu0 %v3815_v2  ;;  %v3654_v17 = vrot.slane %v8410_v30, 1  ;;  %v9528_v19 = vld [vmem:[#allocation31_spill] sm:$0xff]  ;;  %v3825_v3 = vsel %vm854_vm0, %v3823_v50, %v3824_v6  ;;  %v3827_v50 = vsel %vm854_vm0, %v3824_v6, %v3826_v55 }
 0x223   :  { %v2927_v59 = vpop.f32.mrf.mxu1  ;;  %4306 = vmatmul.mubr.f32.gmra.mxu1 %v8336_v20  ;;  %v8415_v48 = vpop.f32.mrf.mxu0  ;;  %v2548_v36 = vadd.f32 %v9528_v19, %v8221_v53 }
 0x224   :  { %v8420_v2 = vadd.f32 %v2927_v59, %v2543_v18  ;;  %4310 = vmatprep.mubr.f32.mxu1 %v3651_v57  ;;  %v8431_v18 = vld [vmem:[#allocation2 + $0x268] sm:$0x3]  ;;  %v3829_v59 = vrot.slane %v8101_v52, 2  ;;  %v3656_v26 = vsel %vm629_vm1, %v3654_v17, %v3655_v23  ;;  %v8449_v52 = vld [vmem:[#allocation2 + $0x270] sm:$0xff] }
 0x225   :  { %v2929_v11 = vpop.f32.mrf.mxu1  ;;  %v8422_v13 = vpop.f32.mrf.mxu0  ;;  %5599 = vmatmul.mubr.f32.gmra.mxu0 %v3817_v40  ;;  %v3657_v19 = vrot.slane %v8431_v18, 1 }
 0x226   :  { %9527 = vst [vmem:[#allocation27_spill] sm:$0xff] %v8420_v2  ;;  %5601 = vmatprep.mubr.f32.mxu0 %v3820_v56  ;;  %v2553_v56 = vadd.f32 %v9530_v1, %v8237_v61  ;;  %v3830_v17 = vsel %vm854_vm0, %v3828_v14, %v3829_v59  ;;  %v3834_v61 = vrot.slane %v8130_v54, 2  ;;  %v3836_v54 = vrot.slane %v8144_v24, 2 }
 0x227   :  { %v2932_v57 = vpop.f32.mrf.mxu1  ;;  %4311 = vmatmul.mubr.f32.gmra.mxu1 %v8371_v33  ;;  %v8434_v40 = vpop.f32.mrf.mxu0  ;;  %v3658_v55 = vsel %vm629_vm1, %v3655_v23, %v3657_v19  ;;  %v3838_v19 = vrot.slane %v8157_v5, 2  ;;  %v9536_v5 = vld [vmem:[#allocation7_spill] sm:$0xff] }
 0x228   :  { %v8439_v11 = vadd.f32 %v2932_v57, %v2548_v36  ;;  %4315 = vmatprep.mubr.f32.mxu1 %v3653_v22  ;;  %v8451_v36 = vld [vmem:[#allocation2 + $0x278] sm:$0xff]  ;;  %v3833_v57 = vrot.slane %v8128_v28, 2  ;;  %v3832_v28 = vsel %vm854_vm0, %v3829_v59, %v3831_v25  ;;  %v9535_v25 = vld [vmem:[#allocation33_spill] sm:$0xff]  ;;  %v3841_v2 = vrot.slane %v9536_v5, 2 }
 0x229   :  { %v2934_v53 = vpop.f32.mrf.mxu1  ;;  %v8441_v51 = vpop.f32.mrf.mxu0  ;;  %5602 = vmatmul.mubr.f32.gmra.mxu0 %v3822_v15  ;;  %v3660_v1 = vrot.slane %v8451_v36, 1 }
 0x22a   :  { %9529 = vst [vmem:[#allocation31_spill] sm:$0xff] %v8439_v11  ;;  %5604 = vmatprep.mubr.f32.mxu0 %v3825_v3  ;;  %v3659_v53 = vrot.slane %v8449_v52, 1  ;;  %v9532_v11 = vld [vmem:[#allocation34_spill] sm:$0xff]  ;;  %v3835_v23 = vsel %vm854_vm0, %v3833_v57, %v3834_v61  ;;  %v3837_v57 = vsel %vm854_vm0, %v3834_v61, %v3836_v54 }
 0x22b   :  { %v2937_v22 = vpop.f32.mrf.mxu1  ;;  %4316 = vmatmul.mubr.f32.gmra.mxu1 %v8373_v49  ;;  %v8454_v15 = vpop.f32.mrf.mxu0  ;;  %v2558_v14 = vadd.f32 %v9532_v11, %v8252_v12 }
 0x22c   :  { %v8459_v3 = vadd.f32 %v2937_v22, %v2553_v56  ;;  %4320 = vmatprep.mubr.f32.mxu1 %v3656_v26  ;;  %v8470_v56 = vld [vmem:[#allocation2 + $0x280] sm:$0x3]  ;;  %v3661_v24 = vsel %vm629_vm1, %v3659_v53, %v3660_v1 }
 0x22d   :  { %v2939_v6 = vpop.f32.mrf.mxu1  ;;  %v8461_v46 = vpop.f32.mrf.mxu0  ;;  %5605 = vmatmul.mubr.f32.gmra.mxu0 %v3827_v50  ;;  %v9533_v22 = vld [vmem:[#allocation3_spill] sm:$0xff]  ;;  %v3662_v11 = vrot.slane %v8470_v56, 1 }
 0x22e   :  { %9531 = vst [vmem:[#allocation30_spill] sm:$0xff] %v8459_v3  ;;  %5607 = vmatprep.mubr.f32.mxu0 %v3830_v17  ;;  %v3839_v6 = vrot.slane %v9533_v22, 2  ;;  %v2563_v17 = vadd.f32 %v9535_v25, %v8266_v47  ;;  %v8488_v22 = vld [vmem:[#allocation2 + $0x288] sm:$0xff] }
 0x22f   :  { %v2942_v26 = vpop.f32.mrf.mxu1  ;;  %4321 = vmatmul.mubr.f32.gmra.mxu1 %v8410_v30  ;;  %v8473_v50 = vpop.f32.mrf.mxu0  ;;  %v3663_v25 = vsel %vm629_vm1, %v3660_v1, %v3662_v11  ;;  %v3664_v5 = vrot.slane %v8488_v22, 1  ;;  %v9543_v11 = vld [vmem:[#allocation9_spill] sm:$0xff] }
 0x230   :  { %v8478_v3 = vadd.f32 %v2942_v26, %v2558_v14  ;;  %4325 = vmatprep.mubr.f32.mxu1 %v3658_v55  ;;  %v8490_v14 = vld [vmem:[#allocation2 + $0x290] sm:$0xff]  ;;  %v3840_v53 = vsel %vm854_vm0, %v3838_v19, %v3839_v6  ;;  %v9537_v26 = vld [vmem:[#allocation6_spill] sm:$0xff]  ;;  %v2568_v19 = vadd.f32 %v9540_v21, %v8281_v58 }
 0x231   :  { %v2944_v12 = vpop.f32.mrf.mxu1  ;;  %v8480_v59 = vpop.f32.mrf.mxu0  ;;  %5608 = vmatmul.mubr.f32.gmra.mxu0 %v3832_v28  ;;  %v3665_v43 = vrot.slane %v8490_v14, 1 }
 0x232   :  { %9534 = vst [vmem:[#allocation34_spill] sm:$0xff] %v8478_v3  ;;  %5610 = vmatprep.mubr.f32.mxu0 %v3835_v23  ;;  %v3843_v12 = vrot.slane %v9537_v26, 2  ;;  %v9538_v3 = vld [vmem:[#allocation93_spill] sm:$0xff]  ;;  %v3842_v26 = vsel %vm854_vm0, %v3839_v6, %v3841_v2 }
 0x233   :  { %v2947_v55 = vpop.f32.mrf.mxu1  ;;  %4326 = vmatmul.mubr.f32.gmra.mxu1 %v8412_v29  ;;  %v8493_v28 = vpop.f32.mrf.mxu0  ;;  %v3844_v47 = vrot.slane %v9538_v3, 2  ;;  %v9541_v3 = vld [vmem:[#allocation10_spill] sm:$0xff]  ;;  %v3666_v6 = vsel %vm629_vm1, %v3664_v5, %v3665_v43 }
 0x234   :  { %v8498_v23 = vadd.f32 %v2947_v55, %v2563_v17  ;;  %4330 = vmatprep.mubr.f32.mxu1 %v3661_v24  ;;  %v3846_v17 = vrot.slane %v9541_v3, 2  ;;  %v8509_v55 = vld [vmem:[#allocation2 + $0x298] sm:$0x3]  ;;  %v9547_v3 = vld [vmem:[#allocation36_spill] sm:$0xff] }
 0x235   :  { %v2949_v61 = vpop.f32.mrf.mxu1  ;;  %v8500_v54 = vpop.f32.mrf.mxu0  ;;  %5611 = vmatmul.mubr.f32.gmra.mxu0 %v3837_v57  ;;  %v3845_v1 = vsel %vm854_vm0, %v3843_v12, %v3844_v47  ;;  %v2573_v34 = vadd.f32 %v9547_v3, %v8295_v37  ;;  %v3854_v37 = vrot.slane %v8246_v8, 2  ;;  %v9553_v8 = vld [vmem:[#allocation16_spill] sm:$0xff] }
 0x236   :  { %9539 = vst [vmem:[#allocation3_spill] sm:$0xff] %v8498_v23  ;;  %5613 = vmatprep.mubr.f32.mxu0 %v3840_v53  ;;  %v3848_v61 = vrot.slane %v9543_v11, 2  ;;  %v9544_v23 = vld [vmem:[#allocation97_spill] sm:$0xff]  ;;  %v3667_v53 = vrot.slane %v8509_v55, 1  ;;  %v3847_v12 = vsel %vm854_vm0, %v3844_v47, %v3846_v17 }
 0x237   :  { %v2952_v24 = vpop.f32.mrf.mxu1  ;;  %4331 = vmatmul.mubr.f32.gmra.mxu1 %v8449_v52  ;;  %v8512_v57 = vpop.f32.mrf.mxu0  ;;  %v8517_v42 = vrot.slane %v9544_v23, 2  ;;  %v9548_v11 = vld [vmem:[#allocation13_spill] sm:$0xff] }
 0x238   :  { %9542 = vst [vmem:[#allocation33_spill] sm:$0xff] %v8512_v57  ;;  %v8519_v58 = vadd.f32 %v2952_v24, %v2568_v19  ;;  %4335 = vmatprep.mubr.f32.mxu1 %v3663_v25  ;;  %v3851_v23 = vrot.slane %v9548_v11, 2  ;;  %v8529_v57 = vld [vmem:[#allocation2 + $0x2a0] sm:$0xff]  ;;  %v8531_v19 = vld [vmem:[#allocation2 + $0x2a8] sm:$0xff]  ;;  %v3853_v24 = vrot.slane %v8244_v27, 2 }
 0x239   :  { %9545 = vst [vmem:[#allocation7_spill] sm:$0xff] %v8517_v42  ;;  %v2954_v21 = vpop.f32.mrf.mxu1  ;;  %v8521_v2 = vpop.f32.mrf.mxu0  ;;  %5614 = vmatmul.mubr.f32.gmra.mxu0 %v3842_v26  ;;  %v3850_v5 = vsel %vm854_vm0, %v3848_v61, %v8517_v42  ;;  %v3669_v3 = vrot.slane %v8529_v57, 1  ;;  %v3670_v11 = vrot.slane %v8531_v19, 1 }
 0x23a   :  { %9546 = vst [vmem:[#allocation6_spill] sm:$0xff] %v8519_v58  ;;  %5616 = vmatprep.mubr.f32.mxu0 %v3845_v1  ;;  %v3668_v21 = vsel %vm629_vm1, %v3665_v43, %v3667_v53  ;;  %v9552_v58 = vld [vmem:[#allocation40_spill] sm:$0xff]  ;;  %v3852_v27 = vsel %vm854_vm0, %v8517_v42, %v3851_v23  ;;  %v3855_v43 = vsel %vm854_vm0, %v3853_v24, %v3854_v37  ;;  %v3858_v53 = vrot.slane %v8273_v60, 2  ;;  %v9558_v60 = vld [vmem:[#allocation39_spill] sm:$0xff] }
 0x23b   :  { %v2957_v25 = vpop.f32.mrf.mxu1  ;;  %4336 = vmatmul.mubr.f32.gmra.mxu1 %v8451_v36  ;;  %v8534_v26 = vpop.f32.mrf.mxu0  ;;  %v2578_v61 = vadd.f32 %v9552_v58, %v8310_v9  ;;  %v9555_v9 = vld [vmem:[#allocation8_spill] sm:$0xff] }
 0x23c   :  { %9549 = vst [vmem:[#allocation93_spill] sm:$0xff] %v8534_v26  ;;  %v8540_v1 = vadd.f32 %v2957_v25, %v2573_v34  ;;  %4340 = vmatprep.mubr.f32.mxu1 %v3666_v6  ;;  %v3856_v34 = vrot.slane %v9553_v8, 2  ;;  %v8552_v6 = vld [vmem:[#allocation2 + $0x2b0] sm:$0x3]  ;;  %v2273_v58 = vadd.f32 %v8344_v32, %v9555_v9  ;;  %v9561_v9 = vld [vmem:[#allocation14_spill] sm:$0xff] }
 0x23d   :  { %v2959_v47 = vpop.f32.mrf.mxu1  ;;  %v8542_v17 = vpop.f32.mrf.mxu0  ;;  %5617 = vmatmul.mubr.f32.gmra.mxu0 %v3847_v12  ;;  %v3672_v42 = vrot.slane %v8552_v6, 1 }
 0x23e   :  { %9550 = vst [vmem:[#allocation37_spill] sm:$0xff] %v8540_v1  ;;  %9551 = vst [vmem:[#allocation10_spill] sm:$0xff] %v8542_v17  ;;  %5619 = vmatprep.mubr.f32.mxu0 %v3850_v5  ;;  %v3859_v47 = vrot.slane %v8275_v31, 2  ;;  %v3671_v1 = vsel %vm629_vm1, %v3669_v3, %v3670_v11  ;;  %v2583_v17 = vadd.f32 %v9558_v60, %v8326_v0  ;;  %v9559_v31 = vld [vmem:[#allocation5_spill] sm:$0xff]  ;;  %v3864_v0 = vrot.slane %v8304_v35, 2  ;;  %v9563_v35 = vld [vmem:[#allocation11_spill] sm:$0xff] }
 0x23f   :  { %v2962_v25 = vpop.f32.mrf.mxu1  ;;  %4341 = vmatmul.mubr.f32.gmra.mxu1 %v8488_v22  ;;  %v8555_v12 = vpop.f32.mrf.mxu0  ;;  %v2268_v26 = vadd.f32 %v8356_v7, %v9559_v31  ;;  %v3857_v32 = vsel %vm854_vm0, %v3854_v37, %v3856_v34  ;;  %v2283_v7 = vadd.f32 %v8363_v16, %v9561_v9  ;;  %v9562_v37 = vld [vmem:[#allocation44_spill] sm:$0xff]  ;;  %v3673_v31 = vsel %vm629_vm1, %v3670_v11, %v3672_v42 }
 0x240   :  { %9554 = vst [vmem:[#allocation9_spill] sm:$0xff] %v8555_v12  ;;  %v8562_v5 = vadd.f32 %v2962_v25, %v2578_v61  ;;  %4345 = vmatprep.mubr.f32.mxu1 %v3668_v21  ;;  %v9557_v12 = vld [vmem:[#allocation19_spill] sm:$0xff]  ;;  %v8574_v21 = vld [vmem:[#allocation2 + $0x2b8] sm:$0xff]  ;;  %v3860_v25 = vsel %vm854_vm0, %v3858_v53, %v3859_v47  ;;  %v2658_v34 = vadd.f32 %v9562_v37, %v2273_v58  ;;  %v8599_v58 = vld [vmem:[#allocation2 + $0x2c8] sm:$0x3] }
 0x241   :  { %v2964_v23 = vpop.f32.mrf.mxu1  ;;  %v8564_v8 = vpop.f32.mrf.mxu0  ;;  %5620 = vmatmul.mubr.f32.gmra.mxu0 %v3852_v27  ;;  %v3861_v24 = vrot.slane %v9557_v12, 2  ;;  %v8576_v61 = vld [vmem:[#allocation2 + $0x2c0] sm:$0xff]  ;;  %v3863_v12 = vrot.slane %v8302_v38, 2  ;;  %v3674_v53 = vrot.slane %v8574_v21, 1 }
 0x242   :  { %9556 = vst [vmem:[#allocation97_spill] sm:$0xff] %v8562_v5  ;;  %5622 = vmatprep.mubr.f32.mxu0 %v3855_v43  ;;  %v3675_v38 = vrot.slane %v8576_v61, 1 }
 0x243   :  { %v2967_v27 = vpop.f32.mrf.mxu1  ;;  %4346 = vmatmul.mubr.f32.gmra.mxu1 %v8490_v14  ;;  %v8579_v3 = vpop.f32.mrf.mxu0  ;;  %v3862_v5 = vsel %vm854_vm0, %v3859_v47, %v3861_v24  ;;  %v3865_v11 = vsel %vm854_vm0, %v3863_v12, %v3864_v0  ;;  %v3868_v47 = vrot.slane %v8334_v62, 2  ;;  %v9565_v24 = vld [vmem:[#allocation20_spill] sm:$0xff]  ;;  %v3871_v12 = vrot.slane %v8353_v63, 2  ;;  %v9567_v62 = vld [vmem:[#allocation17_spill] sm:$0xff] }
 0x244   :  { %9560 = vst [vmem:[#allocation36_spill] sm:$0xff] %v8579_v3  ;;  %v8586_v43 = vadd.f32 %v2967_v27, %v2583_v17  ;;  %4350 = vmatprep.mubr.f32.mxu1 %v3671_v1  ;;  %v2278_v3 = vadd.f32 %v8376_v4, %v9563_v35  ;;  %v9564_v17 = vld [vmem:[#allocation42_spill] sm:$0xff]  ;;  %v3866_v1 = vrot.slane %v8318_v41, 2  ;;  %v3869_v4 = vrot.slane %v8336_v20, 2 }
 0x245   :  { %v2969_v23 = vpop.f32.mrf.mxu1  ;;  %v5448_v60 = vpop.f32.mrf.mxu0  ;;  %5623 = vmatmul.mubr.f32.gmra.mxu0 %v3857_v32  ;;  %v2653_v27 = vadd.f32 %v9564_v17, %v2268_v26  ;;  %v2293_v9 = vadd.f32 %v8383_v45, %v9565_v24  ;;  %v2288_v20 = vadd.f32 %v8395_v10, %v9567_v62  ;;  %v9568_v45 = vld [vmem:[#allocation46_spill] sm:$0xff]  ;;  %v3873_v10 = vrot.slane %v8371_v33, 2 }
 0x246   :  { %v8595_v16 = vadd.f32 %v5448_v60, %v2658_v34  ;;  %5625 = vmatprep.mubr.f32.mxu0 %v3860_v25  ;;  %v9566_v25 = vld [vmem:[#allocation48_spill] sm:$0xff]  ;;  %v3676_v23 = vsel %vm629_vm1, %v3674_v53, %v3675_v38  ;;  %v3677_v60 = vrot.slane %v8599_v58, 1  ;;  %v2663_v17 = vadd.f32 %v9568_v45, %v2278_v3  ;;  %v9569_v24 = vld [vmem:[#allocation26_spill] sm:$0xff] }
 0x247   :  { %v8601_v32 = vpop.f32.mrf.mxu1  ;;  %4351 = vmatmul.mubr.f32.gmra.mxu1 %v8529_v57  ;;  %v3037_v42 = vpop.f32.mrf.mxu0  ;;  %v2668_v41 = vadd.f32 %v9566_v25, %v2283_v7  ;;  %v3867_v7 = vsel %vm854_vm0, %v3864_v0, %v3866_v1  ;;  %v3870_v63 = vsel %vm854_vm0, %v3868_v47, %v3869_v4  ;;  %v2303_v3 = vadd.f32 %v8402_v44, %v9569_v24  ;;  %v9570_v0 = vld [vmem:[#allocation52_spill] sm:$0xff]  ;;  %v9572_v45 = vld [vmem:[#allocation50_spill] sm:$0xff] }
 0x248   :  { %v8609_v26 = vadd.f32 %v3037_v42, %v2653_v27  ;;  %4355 = vmatprep.mubr.f32.mxu1 %v3673_v31  ;;  %v8621_v31 = vld [vmem:[#allocation2 + $0x2d0] sm:$0xff]  ;;  %v8623_v27 = vld [vmem:[#allocation2 + $0x2d8] sm:$0xff]  ;;  %v3874_v42 = vrot.slane %v8373_v49, 2  ;;  %v2678_v1 = vadd.f32 %v9570_v0, %v2293_v9  ;;  %v9571_v49 = vld [vmem:[#allocation23_spill] sm:$0xff]  ;;  %v3876_v9 = vrot.slane %v8392_v39, 2 }
 0x249   :  { %v4114_v37 = vpop.f32.mrf.mxu1  ;;  %v5451_v34 = vpop.f32.mrf.mxu0  ;;  %5626 = vmatmul.mubr.f32.gmra.mxu0 %v3862_v5  ;;  %v3679_v47 = vrot.slane %v8621_v31, 1  ;;  %v3680_v33 = vrot.slane %v8623_v27, 1  ;;  %v2298_v62 = vadd.f32 %v8415_v48, %v9571_v49  ;;  %v3879_v48 = vrot.slane %v8412_v29, 2 }
 0x24a   :  { %v8617_v35 = vadd.f32 %v5451_v34, %v2668_v41  ;;  %5628 = vmatprep.mubr.f32.mxu0 %v3865_v11  ;;  %v3678_v37 = vsel %vm629_vm1, %v3675_v38, %v3677_v60  ;;  %v3872_v34 = vsel %vm854_vm0, %v3869_v4, %v3871_v12  ;;  %v3875_v4 = vsel %vm854_vm0, %v3873_v10, %v3874_v42  ;;  %v9573_v12 = vld [vmem:[#allocation32_spill] sm:$0xff] }
 0x24b   :  { %v8625_v5 = vpop.f32.mrf.mxu1  ;;  %4356 = vmatmul.mubr.f32.gmra.mxu1 %v8531_v19  ;;  %v3047_v53 = vpop.f32.mrf.mxu0  ;;  %v3878_v60 = vrot.slane %v8410_v30, 2  ;;  %v3881_v10 = vrot.slane %v8431_v18, 2  ;;  %v9575_v30 = vld [vmem:[#allocation29_spill] sm:$0xff] }
 0x24c   :  { %v8633_v11 = vadd.f32 %v3047_v53, %v2663_v17  ;;  %4360 = vmatprep.mubr.f32.mxu1 %v3676_v23  ;;  %v2673_v17 = vadd.f32 %v9572_v45, %v2288_v20  ;;  %v8646_v23 = vld [vmem:[#allocation2 + $0x2e0] sm:$0x3]  ;;  %v2313_v53 = vadd.f32 %v8422_v13, %v9573_v12  ;;  %v2308_v29 = vadd.f32 %v8434_v40, %v9575_v30  ;;  %v9576_v13 = vld [vmem:[#allocation54_spill] sm:$0xff]  ;;  %v8670_v45 = vld [vmem:[#allocation2 + $0x2f0] sm:$0xff] }
 0x24d   :  { %v4119_v25 = vpop.f32.mrf.mxu1  ;;  %v5454_v41 = vpop.f32.mrf.mxu0  ;;  %5629 = vmatmul.mubr.f32.gmra.mxu0 %v3867_v7  ;;  %v2683_v49 = vadd.f32 %v9576_v13, %v2298_v62  ;;  %v3880_v18 = vsel %vm854_vm0, %v3878_v60, %v3879_v48  ;;  %v3883_v40 = vrot.slane %v8449_v52, 2  ;;  %v3685_v52 = vrot.slane %v8670_v45, 1  ;;  %v9580_v30 = vld [vmem:[#allocation58_spill] sm:$0xff] }
 0x24e   :  { %v8642_v44 = vadd.f32 %v5454_v41, %v2678_v1  ;;  %5631 = vmatprep.mubr.f32.mxu0 %v3870_v63  ;;  %v9574_v63 = vld [vmem:[#allocation56_spill] sm:$0xff]  ;;  %v3681_v1 = vsel %vm629_vm1, %v3679_v47, %v3680_v33  ;;  %v3682_v25 = vrot.slane %v8646_v23, 1  ;;  %v2693_v13 = vadd.f32 %v9580_v30, %v2308_v29 }
 0x24f   :  { %v8648_v7 = vpop.f32.mrf.mxu1  ;;  %4361 = vmatmul.mubr.f32.gmra.mxu1 %v8574_v21  ;;  %v3057_v38 = vpop.f32.mrf.mxu0  ;;  %v2688_v39 = vadd.f32 %v9574_v63, %v2303_v3  ;;  %v3877_v3 = vsel %vm854_vm0, %v3874_v42, %v3876_v9  ;;  %v9578_v42 = vld [vmem:[#allocation60_spill] sm:$0xff]  ;;  %v3894_v30 = vrot.slane %v8531_v19, 2  ;;  %v9587_v19 = vld [vmem:[#allocation45_spill] sm:$0xff] }
 0x250   :  { %v8656_v20 = vadd.f32 %v3057_v38, %v2673_v17  ;;  %4365 = vmatprep.mubr.f32.mxu1 %v3678_v37  ;;  %v8668_v37 = vld [vmem:[#allocation2 + $0x2e8] sm:$0xff]  ;;  %v3884_v17 = vrot.slane %v8451_v36, 2  ;;  %v9577_v38 = vld [vmem:[#allocation38_spill] sm:$0xff]  ;;  %v2698_v9 = vadd.f32 %v9578_v42, %v2313_v53  ;;  %v9579_v36 = vld [vmem:[#allocation35_spill] sm:$0xff]  ;;  %v3886_v53 = vrot.slane %v8470_v56, 2 }
 0x251   :  { %v4124_v24 = vpop.f32.mrf.mxu1  ;;  %v5457_v0 = vpop.f32.mrf.mxu0  ;;  %5632 = vmatmul.mubr.f32.gmra.mxu0 %v3872_v34  ;;  %v2323_v62 = vadd.f32 %v8441_v51, %v9577_v38  ;;  %v3684_v60 = vrot.slane %v8668_v37, 1 }
 0x252   :  { %v8664_v41 = vadd.f32 %v5457_v0, %v2688_v39  ;;  %5634 = vmatprep.mubr.f32.mxu0 %v3875_v4  ;;  %v3683_v39 = vsel %vm629_vm1, %v3680_v33, %v3682_v25  ;;  %v3882_v24 = vsel %vm854_vm0, %v3879_v48, %v3881_v10  ;;  %v2318_v0 = vadd.f32 %v8454_v15, %v9579_v36  ;;  %v9581_v10 = vld [vmem:[#allocation43_spill] sm:$0xff]  ;;  %v8717_v36 = vld [vmem:[#allocation2 + $0x308] sm:$0xff] }
 0x253   :  { %v8672_v34 = vpop.f32.mrf.mxu1  ;;  %4366 = vmatmul.mubr.f32.gmra.mxu1 %v8576_v61  ;;  %v3067_v47 = vpop.f32.mrf.mxu0  ;;  %v3885_v48 = vsel %vm854_vm0, %v3883_v40, %v3884_v17  ;;  %v3888_v25 = vrot.slane %v8488_v22, 2  ;;  %v3889_v15 = vrot.slane %v8490_v14, 2  ;;  %v3686_v42 = vsel %vm629_vm1, %v3684_v60, %v3685_v52  ;;  %v9583_v22 = vld [vmem:[#allocation41_spill] sm:$0xff] }
 0x254   :  { %v8680_v4 = vadd.f32 %v3067_v47, %v2683_v49  ;;  %4370 = vmatprep.mubr.f32.mxu1 %v3681_v1  ;;  %v8693_v1 = vld [vmem:[#allocation2 + $0x2f8] sm:$0x3]  ;;  %v9582_v47 = vld [vmem:[#allocation64_spill] sm:$0xff]  ;;  %v3891_v40 = vrot.slane %v8509_v55, 2  ;;  %v2328_v14 = vadd.f32 %v8473_v50, %v9583_v22  ;;  %v3893_v50 = vrot.slane %v8529_v57, 2 }
 0x255   :  { %v4129_v12 = vpop.f32.mrf.mxu1  ;;  %v5460_v63 = vpop.f32.mrf.mxu0  ;;  %5635 = vmatmul.mubr.f32.gmra.mxu0 %v3877_v3  ;;  %v2333_v3 = vadd.f32 %v8461_v46, %v9581_v10  ;;  %v2708_v56 = vadd.f32 %v9582_v47, %v2323_v62  ;;  %v9584_v46 = vld [vmem:[#allocation62_spill] sm:$0xff]  ;;  %v3887_v62 = vsel %vm854_vm0, %v3884_v17, %v3886_v53  ;;  %v3890_v55 = vsel %vm854_vm0, %v3888_v25, %v3889_v15 }
 0x256   :  { %v8689_v51 = vadd.f32 %v5460_v63, %v2698_v9  ;;  %5637 = vmatprep.mubr.f32.mxu0 %v3880_v18  ;;  %v3687_v9 = vrot.slane %v8693_v1, 1  ;;  %v2703_v63 = vadd.f32 %v9584_v46, %v2318_v0  ;;  %v9586_v17 = vld [vmem:[#allocation66_spill] sm:$0xff]  ;;  %v3690_v57 = vrot.slane %v8717_v36, 1 }
 0x257   :  { %v8695_v49 = vpop.f32.mrf.mxu1  ;;  %4371 = vmatmul.mubr.f32.gmra.mxu1 %v8621_v31  ;;  %v3077_v33 = vpop.f32.mrf.mxu0  ;;  %v2718_v53 = vadd.f32 %v9586_v17, %v2333_v3  ;;  %v3896_v3 = vrot.slane %v8552_v6, 2 }
 0x258   :  { %v8703_v29 = vadd.f32 %v3077_v33, %v2693_v13  ;;  %4375 = vmatprep.mubr.f32.mxu1 %v3683_v39  ;;  %v8715_v39 = vld [vmem:[#allocation2 + $0x300] sm:$0xff]  ;;  %v3688_v47 = vsel %vm629_vm1, %v3685_v52, %v3687_v9  ;;  %v3898_v9 = vrot.slane %v8574_v21, 2  ;;  %v9591_v21 = vld [vmem:[#allocation49_spill] sm:$0xff] }
 0x259   :  { %v4134_v18 = vpop.f32.mrf.mxu1  ;;  %v5463_v38 = vpop.f32.mrf.mxu0  ;;  %5638 = vmatmul.mubr.f32.gmra.mxu0 %v3882_v24  ;;  %v9585_v13 = vld [vmem:[#allocation47_spill] sm:$0xff]  ;;  %v3689_v25 = vrot.slane %v8715_v39, 1 }
 0x25a   :  { %v8711_v12 = vadd.f32 %v5463_v38, %v2708_v56  ;;  %5640 = vmatprep.mubr.f32.mxu0 %v3885_v48  ;;  %v2343_v0 = vadd.f32 %v8480_v59, %v9585_v13  ;;  %v3892_v56 = vsel %vm854_vm0, %v3889_v15, %v3891_v40  ;;  %v2338_v18 = vadd.f32 %v8493_v28, %v9587_v19  ;;  %v9588_v38 = vld [vmem:[#allocation65_spill] sm:$0xff]  ;;  %v9589_v40 = vld [vmem:[#allocation51_spill] sm:$0xff] }
 0x25b   :  { %v8719_v24 = vpop.f32.mrf.mxu1  ;;  %4376 = vmatmul.mubr.f32.gmra.mxu1 %v8623_v27  ;;  %v3087_v60 = vpop.f32.mrf.mxu0  ;;  %v2713_v22 = vadd.f32 %v9588_v38, %v2328_v14  ;;  %v3895_v15 = vsel %vm854_vm0, %v3893_v50, %v3894_v30  ;;  %v3899_v28 = vrot.slane %v8576_v61, 2  ;;  %v3691_v13 = vsel %vm629_vm1, %v3689_v25, %v3690_v57  ;;  %v8764_v19 = vld [vmem:[#allocation2 + $0x320] sm:$0xff] }
 0x25c   :  { %v8727_v33 = vadd.f32 %v3087_v60, %v2703_v63  ;;  %4380 = vmatprep.mubr.f32.mxu1 %v3686_v42  ;;  %v8740_v42 = vld [vmem:[#allocation2 + $0x310] sm:$0x3]  ;;  %v2353_v63 = vadd.f32 %v8500_v54, %v9589_v40  ;;  %v3901_v50 = vrot.slane %v8599_v58, 2  ;;  %v9593_v54 = vld [vmem:[#allocation67_spill] sm:$0xff]  ;;  %v3903_v38 = vrot.slane %v8621_v31, 2 }
 0x25d   :  { %v4139_v48 = vpop.f32.mrf.mxu1  ;;  %v5466_v10 = vpop.f32.mrf.mxu0  ;;  %5641 = vmatmul.mubr.f32.gmra.mxu0 %v3887_v62  ;;  %v9590_v62 = vld [vmem:[#allocation68_spill] sm:$0xff]  ;;  %v3692_v17 = vrot.slane %v8740_v42, 1  ;;  %v3900_v58 = vsel %vm854_vm0, %v3898_v9, %v3899_v28  ;;  %v3695_v31 = vrot.slane %v8764_v19, 1 }
 0x25e   :  { %v8736_v59 = vadd.f32 %v5466_v10, %v2718_v53  ;;  %5643 = vmatprep.mubr.f32.mxu0 %v3890_v55  ;;  %v2728_v6 = vadd.f32 %v9590_v62, %v2343_v0  ;;  %v9592_v53 = vld [vmem:[#allocation33_spill] sm:$0xff]  ;;  %v2723_v10 = vadd.f32 %v9593_v54, %v2338_v18  ;;  %v3897_v0 = vsel %vm854_vm0, %v3894_v30, %v3896_v3  ;;  %v9595_v30 = vld [vmem:[#allocation70_spill] sm:$0xff] }
 0x25f   :  { %v8742_v46 = vpop.f32.mrf.mxu1  ;;  %4381 = vmatmul.mubr.f32.gmra.mxu1 %v8668_v37  ;;  %v3097_v52 = vpop.f32.mrf.mxu0  ;;  %v2348_v61 = vadd.f32 %v9592_v53, %v9591_v21  ;;  %v2738_v3 = vadd.f32 %v9595_v30, %v2353_v63  ;;  %v9598_v53 = vld [vmem:[#allocation69_spill] sm:$0xff]  ;;  %v3906_v63 = vrot.slane %v8646_v23, 2 }
 0x260   :  { %v8750_v14 = vadd.f32 %v3097_v52, %v2713_v22  ;;  %4385 = vmatprep.mubr.f32.mxu1 %v3688_v47  ;;  %v8762_v47 = vld [vmem:[#allocation2 + $0x318] sm:$0xff]  ;;  %v3904_v22 = vrot.slane %v8623_v27, 2  ;;  %v9594_v52 = vld [vmem:[#allocation55_spill] sm:$0xff]  ;;  %v9596_v27 = vld [vmem:[#allocation53_spill] sm:$0xff] }
 0x261   :  { %v4144_v60 = vpop.f32.mrf.mxu1  ;;  %v5469_v55 = vpop.f32.mrf.mxu0  ;;  %5644 = vmatmul.mubr.f32.gmra.mxu0 %v3892_v56  ;;  %v2363_v18 = vadd.f32 %v8521_v2, %v9594_v52  ;;  %v3694_v9 = vrot.slane %v8762_v47, 1  ;;  %v2733_v54 = vadd.f32 %v9598_v53, %v2348_v61  ;;  %v9604_v53 = vld [vmem:[#allocation71_spill] sm:$0xff] }
 0x262   :  { %v8758_v48 = vadd.f32 %v5469_v55, %v2728_v6  ;;  %5646 = vmatprep.mubr.f32.mxu0 %v3895_v15  ;;  %v3693_v6 = vsel %vm629_vm1, %v3690_v57, %v3692_v17  ;;  %v3902_v60 = vsel %vm854_vm0, %v3899_v28, %v3901_v50  ;;  %v9597_v55 = vld [vmem:[#allocation93_spill] sm:$0xff]  ;;  %v3905_v28 = vsel %vm854_vm0, %v3903_v38, %v3904_v22 }
 0x263   :  { %v8766_v56 = vpop.f32.mrf.mxu1  ;;  %4386 = vmatmul.mubr.f32.gmra.mxu1 %v8670_v45  ;;  %v3107_v25 = vpop.f32.mrf.mxu0  ;;  %v2358_v21 = vadd.f32 %v9597_v55, %v9596_v27  ;;  %v3908_v17 = vrot.slane %v8668_v37, 2  ;;  %v3909_v50 = vrot.slane %v8670_v45, 2  ;;  %v3911_v38 = vrot.slane %v8693_v1, 2  ;;  %v9602_v37 = vld [vmem:[#allocation57_spill] sm:$0xff] }
 0x264   :  { %v8774_v15 = vadd.f32 %v3107_v25, %v2723_v10  ;;  %4390 = vmatprep.mubr.f32.mxu1 %v3691_v13  ;;  %v8787_v13 = vld [vmem:[#allocation2 + $0x328] sm:$0x3]  ;;  %v9600_v25 = vld [vmem:[#allocation10_spill] sm:$0xff]  ;;  %v9603_v27 = vld [vmem:[#allocation9_spill] sm:$0xff] }
 0x265   :  { %v4149_v40 = vpop.f32.mrf.mxu1  ;;  %v5472_v62 = vpop.f32.mrf.mxu0  ;;  %5647 = vmatmul.mubr.f32.gmra.mxu0 %v3897_v0  ;;  %v9599_v0 = vld [vmem:[#allocation59_spill] sm:$0xff]  ;;  %v2368_v45 = vadd.f32 %v9603_v27, %v9602_v37  ;;  %v3910_v1 = vsel %vm854_vm0, %v3908_v17, %v3909_v50  ;;  %v3912_v37 = vsel %vm854_vm0, %v3909_v50, %v3911_v38  ;;  %v9608_v27 = vld [vmem:[#allocation36_spill] sm:$0xff]  ;;  %v3919_v38 = vrot.slane %v8764_v19, 2 }
 0x266   :  { %v8783_v2 = vadd.f32 %v5472_v62, %v2738_v3  ;;  %5649 = vmatprep.mubr.f32.mxu0 %v3900_v58  ;;  %v2373_v52 = vadd.f32 %v9600_v25, %v9599_v0  ;;  %v9601_v58 = vld [vmem:[#allocation72_spill] sm:$0xff]  ;;  %v3696_v40 = vsel %vm629_vm1, %v3694_v9, %v3695_v31  ;;  %v3697_v62 = vrot.slane %v8787_v13, 1 }
 0x267   :  { %v8789_v10 = vpop.f32.mrf.mxu1  ;;  %4391 = vmatmul.mubr.f32.gmra.mxu1 %v8715_v39  ;;  %v3117_v57 = vpop.f32.mrf.mxu0  ;;  %v2748_v23 = vadd.f32 %v9601_v58, %v2363_v18  ;;  %v3907_v18 = vsel %vm854_vm0, %v3904_v22, %v3906_v63  ;;  %v3913_v0 = vrot.slane %v8715_v39, 2  ;;  %v3914_v25 = vrot.slane %v8717_v36, 2  ;;  %v9605_v58 = vld [vmem:[#allocation63_spill] sm:$0xff]  ;;  %v9606_v22 = vld [vmem:[#allocation74_spill] sm:$0xff] }
 0x268   :  { %v8797_v61 = vadd.f32 %v3117_v57, %v2733_v54  ;;  %4395 = vmatprep.mubr.f32.mxu1 %v3693_v6  ;;  %v2743_v54 = vadd.f32 %v9604_v53, %v2358_v21  ;;  %v8809_v6 = vld [vmem:[#allocation2 + $0x330] sm:$0xff]  ;;  %v8811_v57 = vld [vmem:[#allocation2 + $0x338] sm:$0xff]  ;;  %v2383_v21 = vadd.f32 %v8564_v8, %v9605_v58  ;;  %v2758_v63 = vadd.f32 %v9606_v22, %v2373_v52  ;;  %v9610_v22 = vld [vmem:[#allocation76_spill] sm:$0xff] }
 0x269   :  { %v4154_v30 = vpop.f32.mrf.mxu1  ;;  %v5475_v3 = vpop.f32.mrf.mxu0  ;;  %5650 = vmatmul.mubr.f32.gmra.mxu0 %v3902_v60  ;;  %v3699_v17 = vrot.slane %v8809_v6, 1  ;;  %v3700_v39 = vrot.slane %v8811_v57, 1  ;;  %v3916_v52 = vrot.slane %v8740_v42, 2  ;;  %v3915_v50 = vsel %vm854_vm0, %v3913_v0, %v3914_v25 }
 0x26a   :  { %v8805_v55 = vadd.f32 %v5475_v3, %v2748_v23  ;;  %5652 = vmatprep.mubr.f32.mxu0 %v3905_v28  ;;  %v3698_v3 = vsel %vm629_vm1, %v3695_v31, %v3697_v62  ;;  %v3918_v62 = vrot.slane %v8762_v47, 2  ;;  %v3921_v0 = vrot.slane %v8787_v13, 2 }
 0x26b   :  { %v8813_v60 = vpop.f32.mrf.mxu1  ;;  %4396 = vmatmul.mubr.f32.gmra.mxu1 %v8717_v36  ;;  %v3127_v9 = vpop.f32.mrf.mxu0  ;;  %v9607_v36 = vld [vmem:[#allocation61_spill] sm:$0xff]  ;;  %v3701_v42 = vsel %vm629_vm1, %v3699_v17, %v3700_v39  ;;  %v3924_v17 = vrot.slane %v8811_v57, 2 }
 0x26c   :  { %v8821_v28 = vadd.f32 %v3127_v9, %v2743_v54  ;;  %4400 = vmatprep.mubr.f32.mxu1 %v3696_v40  ;;  %v2378_v53 = vadd.f32 %v9608_v27, %v9607_v36  ;;  %v9609_v54 = vld [vmem:[#allocation73_spill] sm:$0xff]  ;;  %v3449_v40 = vld [vmem:[#allocation2 + $0x340] sm:$0x3] }
 0x26d   :  { %v4159_v23 = vpop.f32.mrf.mxu1  ;;  %v5478_v30 = vpop.f32.mrf.mxu0  ;;  %5653 = vmatmul.mubr.f32.gmra.mxu0 %v3907_v18  ;;  %v2753_v9 = vadd.f32 %v9609_v54, %v2368_v45  ;;  %v9611_v36 = vld [vmem:[#allocation75_spill] sm:$0xff]  ;;  %v3450_v54 = vld [vmem:[#allocation2 + $0x348] sm:$0xff] }
 0x26e   :  { %v8830_v8 = vadd.f32 %v5478_v30, %v2758_v63  ;;  %5655 = vmatprep.mubr.f32.mxu0 %v3910_v1  ;;  %v2768_v63 = vadd.f32 %v9610_v22, %v2383_v21  ;;  %v3702_v23 = vrot.slane %v3449_v40, 1  ;;  %v2763_v27 = vadd.f32 %v9611_v36, %v2378_v53 }
 0x26f   :  { %v8834_v18 = vpop.f32.mrf.mxu1  ;;  %4401 = vmatmul.mubr.f32.gmra.mxu1 %v8762_v47  ;;  %v3137_v31 = vpop.f32.mrf.mxu0  ;;  %v3917_v47 = vsel %vm854_vm0, %v3914_v25, %v3916_v52  ;;  %v3704_v25 = vrot.slane %v3450_v54, 1  ;;  %v5908_v52 = vld [vmem:[#allocation2 + $0x8] sm:$0xff] }
 0x270   :  { %v8840_v58 = vadd.f32 %v3137_v31, %v2753_v9  ;;  %4405 = vmatprep.mubr.f32.mxu1 %v3698_v3  ;;  %v3920_v3 = vsel %vm854_vm0, %v3918_v62, %v3919_v38  ;;  %v3703_v13 = vsel %vm629_vm1, %v3700_v39, %v3702_v23  ;;  %v3705_v22 = vrot.slane %v5908_v52, 1  ;;  %v9615_v39 = vld [vmem:[#allocation77_spill] sm:$0xff] }
 0x271   :  { %v4164_v45 = vpop.f32.mrf.mxu1  ;;  %v5481_v1 = vpop.f32.mrf.mxu0  ;;  %5656 = vmatmul.mubr.f32.gmra.mxu0 %v3912_v37  ;;  %v3923_v37 = vrot.slane %v8809_v6, 2  ;;  %v3922_v62 = vsel %vm854_vm0, %v3919_v38, %v3921_v0 }
 0x272   :  { %v8844_v30 = vadd.f32 %v5481_v1, %v2768_v63  ;;  %5658 = vmatprep.mubr.f32.mxu0 %v3915_v50  ;;  %v9613_v63 = vld [vmem:[#allocation78_spill] sm:$0xff]  ;;  %v3926_v45 = vrot.slane %v3449_v40, 2  ;;  %v9617_v40 = vld [vmem:[#allocation80_spill] sm:$0xff] }
 0x273   :  { %v8849_v9 = vpop.f32.mrf.mxu1  ;;  %4406 = vmatmul.mubr.f32.gmra.mxu1 %v8764_v19  ;;  %v3147_v21 = vpop.f32.mrf.mxu0  ;;  %v3452_v1 = vld [vmem:[#allocation2 + $0x358] sm:$0x3] }
 0x274   :  { %v8855_v31 = vadd.f32 %v3147_v21, %v2763_v27  ;;  %4410 = vmatprep.mubr.f32.mxu1 %v3701_v42  ;;  %v3925_v27 = vsel %vm854_vm0, %v3923_v37, %v3924_v17  ;;  %v3707_v38 = vrot.slane %v3452_v1, 1 }
 0x275   :  { %v4169_v53 = vpop.f32.mrf.mxu1  ;;  %v5484_v50 = vpop.f32.mrf.mxu0  ;;  %5659 = vmatmul.mubr.f32.gmra.mxu0 %v3917_v47  ;;  %v3928_v47 = vrot.slane %v3450_v54, 2 }
 0x276   :  { %9612 = vst [vmem:[#allocation13_spill] sm:$0xff] %v8855_v31  ;;  %v8859_v19 = vadd.f32 %v5484_v50, %v9613_v63  ;;  %5661 = vmatprep.mubr.f32.mxu0 %v3920_v3  ;;  %v3706_v3 = vsel %vm629_vm1, %v3704_v25, %v3705_v22  ;;  %v3931_v50 = vrot.slane %v3452_v1, 2 }
 0x277   :  { %v8862_v36 = vpop.f32.mrf.mxu1  ;;  %4411 = vmatmul.mubr.f32.gmra.mxu1 %v8809_v6  ;;  %v3157_v42 = vpop.f32.mrf.mxu0  ;;  %v3927_v6 = vsel %vm854_vm0, %v3924_v17, %v3926_v45 }
 0x278   :  { %9614 = vst [vmem:[#allocation40_spill] sm:$0xff] %v8859_v19  ;;  %v8867_v23 = vadd.f32 %v3157_v42, %v9615_v39  ;;  %4415 = vmatprep.mubr.f32.mxu1 %v3703_v13  ;;  %v9619_v42 = vld [vmem:[#allocation7_spill] sm:$0xff] }
 0x279   :  { %v4174_v21 = vpop.f32.mrf.mxu1  ;;  %v5487_v53 = vpop.f32.mrf.mxu0  ;;  %5662 = vmatmul.mubr.f32.gmra.mxu0 %v3922_v62  ;;  %v3930_v13 = vsel %vm854_vm0, %v3928_v47, %v9619_v42  ;;  %v9620_v39 = vld [vmem:[#allocation79_spill] sm:$0xff]  ;;  %v9624_v47 = vld [vmem:[#allocation81_spill] sm:$0xff] }
 0x27a   :  { %9616 = vst [vmem:[#allocation16_spill] sm:$0xff] %v8867_v23  ;;  %v8871_v0 = vadd.f32 %v5487_v53, %v9617_v40  ;;  %5664 = vmatprep.mubr.f32.mxu0 %v3925_v27  ;;  %v3708_v27 = vsel %vm629_vm1, %v3705_v22, %v3707_v38  ;;  %v9622_v53 = vld [vmem:[#allocation82_spill] sm:$0xff] }
 0x27b   :  { %v8874_v63 = vpop.f32.mrf.mxu1  ;;  %4416 = vmatmul.mubr.f32.gmra.mxu1 %v8811_v57  ;;  %v3167_v37 = vpop.f32.mrf.mxu0  ;;  %v3932_v57 = vsel %vm854_vm0, %v9619_v42, %v3931_v50 }
 0x27c   :  { %9618 = vst [vmem:[#allocation8_spill] sm:$0xff] %v8871_v0  ;;  %v8880_v62 = vadd.f32 %v3167_v37, %v9620_v39  ;;  %4420 = vmatprep.mubr.f32.mxu1 %v3706_v3  ;;  %v9628_v39 = vld [vmem:[#allocation83_spill] sm:$0xff] }
 0x27d   :  { %v4179_v25 = vpop.f32.mrf.mxu1  ;;  %v5490_v21 = vpop.f32.mrf.mxu0  ;;  %5665 = vmatmul.mubr.f32.gmra.mxu0 %v3927_v6  ;;  %v9626_v6 = vld [vmem:[#allocation84_spill] sm:$0xff] }
 0x27e   :  { %9621 = vst [vmem:[#allocation19_spill] sm:$0xff] %v8880_v62  ;;  %v8884_v17 = vadd.f32 %v5490_v21, %v9622_v53  ;;  %5667 = vmatprep.mubr.f32.mxu0 %v3930_v13  ;;  %v9630_v25 = vld [vmem:[#allocation86_spill] sm:$0xff] }
 0x27f   :  { %v8888_v45 = vpop.f32.mrf.mxu1  ;;  %4421 = vmatmul.mubr.f32.gmra.mxu1 %v3450_v54  ;;  %v3177_v1 = vpop.f32.mrf.mxu0 }
 0x280   :  { %9623 = vst [vmem:[#allocation39_spill] sm:$0xff] %v8884_v17  ;;  %v8891_v40 = vadd.f32 %v3177_v1, %v9624_v47  ;;  %4425 = vmatprep.mubr.f32.mxu1 %v3708_v27  ;;  %v9632_v1 = vld [vmem:[#allocation85_spill] sm:$0xff] }
 0x281   :  { %v4184_v3 = vpop.f32.mrf.mxu1  ;;  %v5493_v37 = vpop.f32.mrf.mxu0  ;;  %5668 = vmatmul.mubr.f32.gmra.mxu0 %v3932_v57 }
 0x282   :  { %9625 = vst [vmem:[#allocation5_spill] sm:$0xff] %v8891_v40  ;;  %v8894_v22 = vadd.f32 %v5493_v37, %v9626_v6  ;;  %v9634_v37 = vld [vmem:[#allocation88_spill] sm:$0xff] }
 0x283   :  { %v8896_v38 = vpop.f32.mrf.mxu1  ;;  %4426 = vmatmul.mubr.f32.gmra.mxu1 %v5908_v52  ;;  %v3187_v13 = vpop.f32.mrf.mxu0 }
 0x284   :  { %9627 = vst [vmem:[#allocation14_spill] sm:$0xff] %v8894_v22  ;;  %v8899_v50 = vadd.f32 %v3187_v13, %v9628_v39  ;;  %v9636_v39 = vld [vmem:[#allocation87_spill] sm:$0xff] }
 0x285   :  { %v4189_v42 = vpop.f32.mrf.mxu1  ;;  %v5496_v54 = vpop.f32.mrf.mxu0 }
 0x286   :  { %9629 = vst [vmem:[#allocation44_spill] sm:$0xff] %v8899_v50  ;;  %v8902_v21 = vadd.f32 %v5496_v54, %v9630_v25  ;;  %v9638_v25 = vld [vmem:[#allocation90_spill] sm:$0xff] }
 0x287   :  { %v8904_v53 = vpop.f32.mrf.mxu1  ;;  %v3197_v27 = vpop.f32.mrf.mxu0 }
 0x288   :  { %9631 = vst [vmem:[#allocation11_spill] sm:$0xff] %v8902_v21  ;;  %v8907_v57 = vadd.f32 %v3197_v27, %v9632_v1  ;;  %v9640_v1 = vld [vmem:[#allocation89_spill] sm:$0xff] }
 0x289   :  { %v4194_v47 = vpop.f32.mrf.mxu1  ;;  %v5499_v3 = vpop.f32.mrf.mxu0 }
 0x28a   :  { %9633 = vst [vmem:[#allocation42_spill] sm:$0xff] %v8907_v57  ;;  %v8910_v6 = vadd.f32 %v5499_v3, %v9634_v37  ;;  %v9642_v37 = vld [vmem:[#allocation91_spill] sm:$0xff] }
 0x28b   :  { %v8912_v52 = vpop.f32.mrf.mxu1  ;;  %v3207_v13 = vpop.f32.mrf.mxu0 }
 0x28c   :  { %9635 = vst [vmem:[#allocation20_spill] sm:$0xff] %v8910_v6  ;;  %v8915_v42 = vadd.f32 %v3207_v13, %v9636_v39  ;;  %v9644_v39 = vld [vmem:[#allocation4_spill] sm:$0xff] }
 0x28d   :  { %v4199_v50 = vpop.f32.mrf.mxu1  ;;  %v5502_v54 = vpop.f32.mrf.mxu0 }
 0x28e   :  { %9637 = vst [vmem:[#allocation48_spill] sm:$0xff] %v8915_v42  ;;  %v8918_v21 = vadd.f32 %v5502_v54, %v9638_v25  ;;  %v9646_v25 = vld [vmem:[#allocation94_spill] sm:$0xff] }
 0x28f   :  { %v8920_v22 = vpop.f32.mrf.mxu1  ;;  %v3217_v27 = vpop.f32.mrf.mxu0 }
 0x290   :  { %9639 = vst [vmem:[#allocation17_spill] sm:$0xff] %v8918_v21  ;;  %v8923_v47 = vadd.f32 %v3217_v27, %v9640_v1  ;;  %v9648_v1 = vld [vmem:[#allocation92_spill] sm:$0xff] }
 0x291   :  { %v4204_v57 = vpop.f32.mrf.mxu1  ;;  %v5505_v3 = vpop.f32.mrf.mxu0 }
 0x292   :  { %9641 = vst [vmem:[#allocation46_spill] sm:$0xff] %v8923_v47  ;;  %v8926_v6 = vadd.f32 %v5505_v3, %v9642_v37  ;;  %v9650_v37 = vld [vmem:[#allocation96_spill] sm:$0xff] }
 0x293   :  { %v8928_v40 = vpop.f32.mrf.mxu1  ;;  %v3227_v13 = vpop.f32.mrf.mxu0 }
 0x294   :  { %9643 = vst [vmem:[#allocation26_spill] sm:$0xff] %v8926_v6  ;;  %v8931_v50 = vadd.f32 %v3227_v13, %v9644_v39  ;;  %v9652_v39 = vld [vmem:[#allocation95_spill] sm:$0xff] }
 0x295   :  { %v4209_v42 = vpop.f32.mrf.mxu1  ;;  %v5508_v54 = vpop.f32.mrf.mxu0 }
 0x296   :  { %9645 = vst [vmem:[#allocation52_spill] sm:$0xff] %v8931_v50  ;;  %v8934_v21 = vadd.f32 %v5508_v54, %v9646_v25  ;;  %v9654_v25 = vld [vmem:[#allocation12_spill] sm:$0xff] }
 0x297   :  { %v8936_v17 = vpop.f32.mrf.mxu1  ;;  %v3237_v27 = vpop.f32.mrf.mxu0 }
 0x298   :  { %9647 = vst [vmem:[#allocation23_spill] sm:$0xff] %v8934_v21  ;;  %v8939_v57 = vadd.f32 %v3237_v27, %v9648_v1  ;;  %v9656_v1 = vld [vmem:[#allocation98_spill] sm:$0xff] }
 0x299   :  { %v4214_v47 = vpop.f32.mrf.mxu1  ;;  %v5511_v3 = vpop.f32.mrf.mxu0 }
 0x29a   :  { %9649 = vst [vmem:[#allocation50_spill] sm:$0xff] %v8939_v57  ;;  %v8942_v6 = vadd.f32 %v5511_v3, %v9650_v37  ;;  %v9658_v37 = vld [vmem:[#allocation15_spill] sm:$0xff] }
 0x29b   :  { %v8944_v62 = vpop.f32.mrf.mxu1  ;;  %v3247_v13 = vpop.f32.mrf.mxu0 }
 0x29c   :  { %9651 = vst [vmem:[#allocation32_spill] sm:$0xff] %v8942_v6  ;;  %v8947_v42 = vadd.f32 %v3247_v13, %v9652_v39  ;;  %v9660_v39 = vld [vmem:[#allocation99_spill] sm:$0xff] }
 0x29d   :  { %v4219_v50 = vpop.f32.mrf.mxu1  ;;  %v5514_v54 = vpop.f32.mrf.mxu0 }
 0x29e   :  { %9653 = vst [vmem:[#allocation56_spill] sm:$0xff] %v8947_v42  ;;  %v8950_v21 = vadd.f32 %v5514_v54, %v9654_v25  ;;  %v9662_v25 = vld [vmem:[#allocation18_spill] sm:$0xff] }
 0x29f   :  { %v8952_v0 = vpop.f32.mrf.mxu1  ;;  %v3257_v27 = vpop.f32.mrf.mxu0 }
 0x2a0   :  { %9655 = vst [vmem:[#allocation29_spill] sm:$0xff] %v8950_v21  ;;  %v8955_v47 = vadd.f32 %v3257_v27, %v9656_v1  ;;  %v9665_v1 = vld [vmem:[#allocation100_spill] sm:$0xff] }
 0x2a1   :  { %v4224_v57 = vpop.f32.mrf.mxu1  ;;  %v5517_v3 = vpop.f32.mrf.mxu0 }
 0x2a2   :  { %9657 = vst [vmem:[#allocation54_spill] sm:$0xff] %v8955_v47  ;;  %v8958_v6 = vadd.f32 %v5517_v3, %v9658_v37  ;;  %v9667_v37 = vld [vmem:[#allocation21_spill] sm:$0xff] }
 0x2a3   :  { %v8960_v23 = vpop.f32.mrf.mxu1  ;;  %v3267_v13 = vpop.f32.mrf.mxu0 }
 0x2a4   :  { %9659 = vst [vmem:[#allocation38_spill] sm:$0xff] %v8958_v6  ;;  %v8963_v50 = vadd.f32 %v3267_v13, %v9660_v39  ;;  %v9670_v39 = vld [vmem:[#allocation22_spill] sm:$0xff] }
 0x2a5   :  { %v4229_v42 = vpop.f32.mrf.mxu1  ;;  %v5520_v54 = vpop.f32.mrf.mxu0 }
 0x2a6   :  { %9661 = vst [vmem:[#allocation60_spill] sm:$0xff] %v8963_v50  ;;  %v8966_v21 = vadd.f32 %v5520_v54, %v9662_v25  ;;  %v9672_v25 = vld [vmem:[#allocation24_spill] sm:$0xff] }
 0x2a7   :  { %v8968_v19 = vpop.f32.mrf.mxu1  ;;  %v3277_v27 = vpop.f32.mrf.mxu0 }
 0x2a8   :  { %9663 = vst [vmem:[#allocation35_spill] sm:$0xff] %v8966_v21  ;;  %9664 = vst [vmem:[#allocation58_spill] sm:$0xff] %v8968_v19  ;;  %v8971_v57 = vadd.f32 %v3277_v27, %v9665_v1  ;;  %v9675_v1 = vld [vmem:[#allocation25_spill] sm:$0xff] }
 0x2a9   :  { %v4234_v47 = vpop.f32.mrf.mxu1  ;;  %v5523_v3 = vpop.f32.mrf.mxu0 }
 0x2aa   :  { %9666 = vst [vmem:[#allocation43_spill] sm:$0xff] %v8971_v57  ;;  %v8974_v6 = vadd.f32 %v5523_v3, %v9667_v37  ;;  %v9677_v37 = vld [vmem:[#allocation27_spill] sm:$0xff] }
 0x2ab   :  { %v8976_v31 = vpop.f32.mrf.mxu1  ;;  %v3287_v13 = vpop.f32.mrf.mxu0 }
 0x2ac   :  { %9668 = vst [vmem:[#allocation64_spill] sm:$0xff] %v8974_v6  ;;  %9669 = vst [vmem:[#allocation41_spill] sm:$0xff] %v8976_v31  ;;  %v8979_v42 = vadd.f32 %v3287_v13, %v9670_v39  ;;  %v9680_v39 = vld [vmem:[#allocation28_spill] sm:$0xff] }
 0x2ad   :  { %v4239_v50 = vpop.f32.mrf.mxu1  ;;  %v5526_v54 = vpop.f32.mrf.mxu0 }
 0x2ae   :  { %9671 = vst [vmem:[#allocation62_spill] sm:$0xff] %v8979_v42  ;;  %v8982_v21 = vadd.f32 %v5526_v54, %v9672_v25  ;;  %v9682_v25 = vld [vmem:[#allocation30_spill] sm:$0xff] }
 0x2af   :  { %v8984_v19 = vpop.f32.mrf.mxu1  ;;  %v3297_v27 = vpop.f32.mrf.mxu0 }
 0x2b0   :  { %9673 = vst [vmem:[#allocation47_spill] sm:$0xff] %v8982_v21  ;;  %9674 = vst [vmem:[#allocation66_spill] sm:$0xff] %v8984_v19  ;;  %v8987_v47 = vadd.f32 %v3297_v27, %v9675_v1  ;;  %v9685_v1 = vld [vmem:[#allocation31_spill] sm:$0xff] }
 0x2b1   :  { %v4244_v57 = vpop.f32.mrf.mxu1  ;;  %v5529_v3 = vpop.f32.mrf.mxu0 }
 0x2b2   :  { %9676 = vst [vmem:[#allocation45_spill] sm:$0xff] %v8987_v47  ;;  %v8990_v6 = vadd.f32 %v5529_v3, %v9677_v37  ;;  %v9687_v37 = vld [vmem:[#allocation3_spill] sm:$0xff] }
 0x2b3   :  { %v8992_v31 = vpop.f32.mrf.mxu1  ;;  %v3307_v13 = vpop.f32.mrf.mxu0 }
 0x2b4   :  { %9678 = vst [vmem:[#allocation65_spill] sm:$0xff] %v8990_v6  ;;  %9679 = vst [vmem:[#allocation51_spill] sm:$0xff] %v8992_v31  ;;  %v8995_v50 = vadd.f32 %v3307_v13, %v9680_v39  ;;  %v9689_v39 = vld [vmem:[#allocation34_spill] sm:$0xff] }
 0x2b5   :  { %v4249_v42 = vpop.f32.mrf.mxu1  ;;  %v5532_v54 = vpop.f32.mrf.mxu0 }
 0x2b6   :  { %9681 = vst [vmem:[#allocation68_spill] sm:$0xff] %v8995_v50  ;;  %v8998_v21 = vadd.f32 %v5532_v54, %v9682_v25  ;;  %v9691_v25 = vld [vmem:[#allocation37_spill] sm:$0xff] }
 0x2b7   :  { %v9000_v19 = vpop.f32.mrf.mxu1  ;;  %v3317_v27 = vpop.f32.mrf.mxu0 }
 0x2b8   :  { %9683 = vst [vmem:[#allocation49_spill] sm:$0xff] %v8998_v21  ;;  %9684 = vst [vmem:[#allocation33_spill] sm:$0xff] %v9000_v19  ;;  %v9003_v57 = vadd.f32 %v3317_v27, %v9685_v1  ;;  %v9694_v1 = vld [vmem:[#allocation6_spill] sm:$0xff] }
 0x2b9   :  { %v4254_v47 = vpop.f32.mrf.mxu1  ;;  %v5535_v3 = vpop.f32.mrf.mxu0 }
 0x2ba   :  { %9686 = vst [vmem:[#allocation67_spill] sm:$0xff] %v9003_v57  ;;  %v9006_v6 = vadd.f32 %v5535_v3, %v9687_v37 }
 0x2bb   :  { %v9008_v31 = vpop.f32.mrf.mxu1  ;;  %v3327_v13 = vpop.f32.mrf.mxu0 }
 0x2bc   :  { %9688 = vst [vmem:[#allocation55_spill] sm:$0xff] %v9006_v6  ;;  %v9011_v42 = vadd.f32 %v3327_v13, %v9689_v39  ;;  %v9695_v39 = vld [vmem:[#allocation97_spill] sm:$0xff] }
 0x2bd   :  { %v4259_v50 = vpop.f32.mrf.mxu1  ;;  %v5538_v54 = vpop.f32.mrf.mxu0 }
 0x2be   :  { %9690 = vst [vmem:[#allocation70_spill] sm:$0xff] %v9011_v42  ;;  %v9014_v21 = vadd.f32 %v5538_v54, %v9691_v25 }
 0x2bf   :  { %v9016_v19 = vpop.f32.mrf.mxu1  ;;  %v3337_v27 = vpop.f32.mrf.mxu0 }
 0x2c0   :  { %9692 = vst [vmem:[#allocation53_spill] sm:$0xff] %v9014_v21  ;;  %9693 = vst [vmem:[#allocation93_spill] sm:$0xff] %v9016_v19  ;;  %v9019_v47 = vadd.f32 %v3337_v27, %v9694_v1 }
 0x2c1   :  { %v4264_v57 = vpop.f32.mrf.mxu1  ;;  %v5541_v3 = vpop.f32.mrf.mxu0 }
 0x2c2   :  { %v9022_v37 = vadd.f32 %v5541_v3, %v8586_v43 }
 0x2c3   :  { %v9024_v6 = vpop.f32.mrf.mxu1  ;;  %v3347_v13 = vpop.f32.mrf.mxu0 }
 0x2c4   :  { %v9027_v50 = vadd.f32 %v3347_v13, %v9695_v39 }
 0x2c5   :  { %v4269_v42 = vpop.f32.mrf.mxu1  ;;  %v5576_v54 = vpop.f32.mrf.mxu0 }
 0x2c6   :  { %v4503_v25 = vadd.f32 %v5576_v54, %v8625_v5 }
 0x2c7   :  { %v9030_v21 = vpop.f32.mrf.mxu1  ;;  %v4497_v19 = vpop.f32.mrf.mxu0 }
 0x2c8   :  { %v4817_v27 = vadd.f32 %v4503_v25, %v8595_v16  ;;  %v4498_v57 = vadd.f32 %v4497_v19, %v8601_v32 }
 0x2c9   :  { %v4274_v1 = vpop.f32.mrf.mxu1  ;;  %v5579_v43 = vpop.f32.mrf.mxu0 }
 0x2ca   :  { %4881 = vst [vmem:[%s9381_s4 + $0x8] sm:$0xff] %v4817_v27  ;;  %v4816_v3 = vadd.f32 %v4498_v57, %v8609_v26  ;;  %v4513_v42 = vadd.f32 %v5579_v43, %v8672_v34 }
 0x2cb   :  { %v9039_v13 = vpop.f32.mrf.mxu1  ;;  %v4507_v5 = vpop.f32.mrf.mxu0 }
 0x2cc   :  { %4880 = vst [vmem:[%s9381_s4] sm:$0xff] %v4816_v3  ;;  %v4819_v16 = vadd.f32 %v4513_v42, %v8617_v35  ;;  %v4508_v32 = vadd.f32 %v4507_v5, %v8648_v7 }
 0x2cd   :  { %v4279_v19 = vpop.f32.mrf.mxu1  ;;  %v5582_v39 = vpop.f32.mrf.mxu0 }
 0x2ce   :  { %4883 = vst [vmem:[%s9381_s4 + $0x18] sm:$0xff] %v4819_v16  ;;  %v4818_v26 = vadd.f32 %v4508_v32, %v8633_v11  ;;  %v4523_v34 = vadd.f32 %v5582_v39, %v8719_v24 }
 0x2cf   :  { %v9051_v54 = vpop.f32.mrf.mxu1  ;;  %v4517_v25 = vpop.f32.mrf.mxu0 }
 0x2d0   :  { %4882 = vst [vmem:[%s9381_s4 + $0x10] sm:$0xff] %v4818_v26  ;;  %v4821_v35 = vadd.f32 %v4523_v34, %v8642_v44  ;;  %v4518_v7 = vadd.f32 %v4517_v25, %v8695_v49 }
 0x2d1   :  { %v4284_v27 = vpop.f32.mrf.mxu1  ;;  %v5585_v57 = vpop.f32.mrf.mxu0 }
 0x2d2   :  { %4885 = vst [vmem:[%s9381_s4 + $0x28] sm:$0xff] %v4821_v35  ;;  %v4820_v11 = vadd.f32 %v4518_v7, %v8656_v20  ;;  %v4533_v24 = vadd.f32 %v5585_v57, %v8766_v56 }
 0x2d3   :  { %v9063_v1 = vpop.f32.mrf.mxu1  ;;  %v4527_v43 = vpop.f32.mrf.mxu0 }
 0x2d4   :  { %4884 = vst [vmem:[%s9381_s4 + $0x20] sm:$0xff] %v4820_v11  ;;  %v4823_v44 = vadd.f32 %v4533_v24, %v8664_v41  ;;  %v4528_v49 = vadd.f32 %v4527_v43, %v8742_v46 }
 0x2d5   :  { %v4289_v3 = vpop.f32.mrf.mxu1  ;;  %v5588_v42 = vpop.f32.mrf.mxu0 }
 0x2d6   :  { %4887 = vst [vmem:[%s9381_s4 + $0x38] sm:$0xff] %v4823_v44  ;;  %v4822_v20 = vadd.f32 %v4528_v49, %v8680_v4  ;;  %v4543_v56 = vadd.f32 %v5588_v42, %v8813_v60 }
 0x2d7   :  { %v9075_v5 = vpop.f32.mrf.mxu1  ;;  %v4537_v16 = vpop.f32.mrf.mxu0 }
 0x2d8   :  { %4886 = vst [vmem:[%s9381_s4 + $0x30] sm:$0xff] %v4822_v20  ;;  %v4825_v41 = vadd.f32 %v4543_v56, %v8689_v51  ;;  %v4538_v46 = vadd.f32 %v4537_v16, %v8789_v10 }
 0x2d9   :  { %v4294_v32 = vpop.f32.mrf.mxu1  ;;  %v5591_v19 = vpop.f32.mrf.mxu0 }
 0x2da   :  { %4889 = vst [vmem:[%s9381_s4 + $0x48] sm:$0xff] %v4825_v41  ;;  %v4824_v4 = vadd.f32 %v4538_v46, %v8703_v29  ;;  %v4553_v60 = vadd.f32 %v5591_v19, %v8849_v9 }
 0x2db   :  { %v9087_v39 = vpop.f32.mrf.mxu1  ;;  %v4547_v26 = vpop.f32.mrf.mxu0 }
 0x2dc   :  { %4888 = vst [vmem:[%s9381_s4 + $0x40] sm:$0xff] %v4824_v4  ;;  %v4827_v51 = vadd.f32 %v4553_v60, %v8711_v12  ;;  %v4548_v10 = vadd.f32 %v4547_v26, %v8834_v18 }
 0x2dd   :  { %v4299_v34 = vpop.f32.mrf.mxu1  ;;  %v5594_v25 = vpop.f32.mrf.mxu0 }
 0x2de   :  { %4891 = vst [vmem:[%s9381_s4 + $0x58] sm:$0xff] %v4827_v51  ;;  %v4826_v29 = vadd.f32 %v4548_v10, %v8727_v33  ;;  %v4563_v9 = vadd.f32 %v5594_v25, %v8874_v63 }
 0x2df   :  { %v9099_v35 = vpop.f32.mrf.mxu1  ;;  %v4557_v7 = vpop.f32.mrf.mxu0 }
 0x2e0   :  { %4890 = vst [vmem:[%s9381_s4 + $0x50] sm:$0xff] %v4826_v29  ;;  %v4829_v12 = vadd.f32 %v4563_v9, %v8736_v59  ;;  %v4558_v18 = vadd.f32 %v4557_v7, %v8862_v36 }
 0x2e1   :  { %v4304_v27 = vpop.f32.mrf.mxu1  ;;  %v5597_v57 = vpop.f32.mrf.mxu0 }
 0x2e2   :  { %4893 = vst [vmem:[%s9381_s4 + $0x68] sm:$0xff] %v4829_v12  ;;  %v4828_v33 = vadd.f32 %v4558_v18, %v8750_v14  ;;  %v4573_v63 = vadd.f32 %v5597_v57, %v8896_v38 }
 0x2e3   :  { %v9111_v11 = vpop.f32.mrf.mxu1  ;;  %v4567_v24 = vpop.f32.mrf.mxu0 }
 0x2e4   :  { %4892 = vst [vmem:[%s9381_s4 + $0x60] sm:$0xff] %v4828_v33  ;;  %v4831_v59 = vadd.f32 %v4573_v63, %v8758_v48  ;;  %v4568_v36 = vadd.f32 %v4567_v24, %v8888_v45  ;;  %v9700_v33 = vld [vmem:[#allocation16_spill] sm:$0xff]  ;;  %v9701_v24 = vld [vmem:[#allocation51_spill] sm:$0xff] }
 0x2e5   :  { %v4309_v43 = vpop.f32.mrf.mxu1  ;;  %v5600_v44 = vpop.f32.mrf.mxu0 }
 0x2e6   :  { %4895 = vst [vmem:[%s9381_s4 + $0x78] sm:$0xff] %v4831_v59  ;;  %v4830_v14 = vadd.f32 %v4568_v36, %v8774_v15  ;;  %v4583_v38 = vadd.f32 %v5600_v44, %v8912_v52  ;;  %v9702_v44 = vld [vmem:[#allocation8_spill] sm:$0xff] }
 0x2e7   :  { %v9123_v49 = vpop.f32.mrf.mxu1  ;;  %v4577_v3 = vpop.f32.mrf.mxu0 }
 0x2e8   :  { %4894 = vst [vmem:[%s9381_s4 + $0x70] sm:$0xff] %v4830_v14  ;;  %v4833_v48 = vadd.f32 %v4583_v38, %v8783_v2  ;;  %v4578_v45 = vadd.f32 %v4577_v3, %v8904_v53  ;;  %v9703_v38 = vld [vmem:[#allocation66_spill] sm:$0xff] }
 0x2e9   :  { %v4314_v42 = vpop.f32.mrf.mxu1  ;;  %v5603_v20 = vpop.f32.mrf.mxu0 }
 0x2ea   :  { %4897 = vst [vmem:[%s9381_s4 + $0x88] sm:$0xff] %v4833_v48  ;;  %v4832_v15 = vadd.f32 %v4578_v45, %v8797_v61  ;;  %v4593_v52 = vadd.f32 %v5603_v20, %v8928_v40  ;;  %v9704_v42 = vld [vmem:[#allocation19_spill] sm:$0xff] }
 0x2eb   :  { %v9135_v56 = vpop.f32.mrf.mxu1  ;;  %v4587_v16 = vpop.f32.mrf.mxu0 }
 0x2ec   :  { %4896 = vst [vmem:[%s9381_s4 + $0x80] sm:$0xff] %v4832_v15  ;;  %v4835_v2 = vadd.f32 %v4593_v52, %v8805_v55  ;;  %v4588_v53 = vadd.f32 %v4587_v16, %v8920_v22 }
 0x2ed   :  { %v4319_v41 = vpop.f32.mrf.mxu1  ;;  %v5606_v46 = vpop.f32.mrf.mxu0 }
 0x2ee   :  { %4899 = vst [vmem:[%s9381_s4 + $0x98] sm:$0xff] %v4835_v2  ;;  %v4834_v61 = vadd.f32 %v4588_v53, %v8821_v28  ;;  %v4603_v40 = vadd.f32 %v5606_v46, %v8944_v62  ;;  %v9705_v2 = vld [vmem:[#allocation39_spill] sm:$0xff]  ;;  %v9706_v41 = vld [vmem:[#allocation33_spill] sm:$0xff] }
 0x2ef   :  { %v9147_v32 = vpop.f32.mrf.mxu1  ;;  %v4597_v19 = vpop.f32.mrf.mxu0 }
 0x2f0   :  { %4898 = vst [vmem:[%s9381_s4 + $0x90] sm:$0xff] %v4834_v61  ;;  %v4837_v55 = vadd.f32 %v4603_v40, %v8830_v8  ;;  %v4598_v22 = vadd.f32 %v4597_v19, %v8936_v17  ;;  %v9707_v19 = vld [vmem:[#allocation5_spill] sm:$0xff] }
 0x2f1   :  { %v4324_v4 = vpop.f32.mrf.mxu1  ;;  %v5609_v60 = vpop.f32.mrf.mxu0 }
 0x2f2   :  { %4901 = vst [vmem:[%s9381_s4 + $0xa8] sm:$0xff] %v4837_v55  ;;  %v4836_v28 = vadd.f32 %v4598_v22, %v8840_v58  ;;  %v4613_v62 = vadd.f32 %v5609_v60, %v8960_v23  ;;  %v9696_v58 = vld [vmem:[#allocation13_spill] sm:$0xff]  ;;  %v9708_v60 = vld [vmem:[#allocation14_spill] sm:$0xff] }
 0x2f3   :  { %v9159_v26 = vpop.f32.mrf.mxu1  ;;  %v4607_v51 = vpop.f32.mrf.mxu0  ;;  %v9697_v23 = vld [vmem:[#allocation41_spill] sm:$0xff] }
 0x2f4   :  { %4900 = vst [vmem:[%s9381_s4 + $0xa0] sm:$0xff] %v4836_v28  ;;  %v4839_v8 = vadd.f32 %v4613_v62, %v8844_v30  ;;  %v4608_v17 = vadd.f32 %v4607_v51, %v8952_v0  ;;  %v9698_v30 = vld [vmem:[#allocation40_spill] sm:$0xff]  ;;  %v9699_v0 = vld [vmem:[#allocation58_spill] sm:$0xff]  ;;  %v9709_v62 = vld [vmem:[#allocation93_spill] sm:$0xff] }
 0x2f5   :  { %v4329_v10 = vpop.f32.mrf.mxu1  ;;  %v5612_v34 = vpop.f32.mrf.mxu0 }
 0x2f6   :  { %4903 = vst [vmem:[%s9381_s4 + $0xb8] sm:$0xff] %v4839_v8  ;;  %v4838_v25 = vadd.f32 %v4608_v17, %v9696_v58  ;;  %v4623_v29 = vadd.f32 %v5612_v34, %v9697_v23  ;;  %v9710_v10 = vld [vmem:[#allocation44_spill] sm:$0xff]  ;;  %v9711_v23 = vld [vmem:[#allocation11_spill] sm:$0xff] }
 0x2f7   :  { %v9171_v9 = vpop.f32.mrf.mxu1  ;;  %v4617_v7 = vpop.f32.mrf.mxu0 }
 0x2f8   :  { %4902 = vst [vmem:[%s9381_s4 + $0xb0] sm:$0xff] %v4838_v25  ;;  %v4841_v12 = vadd.f32 %v4623_v29, %v9698_v30  ;;  %v4618_v18 = vadd.f32 %v4617_v7, %v9699_v0  ;;  %v9712_v0 = vld [vmem:[#allocation42_spill] sm:$0xff] }
 0x2f9   :  { %v4334_v27 = vpop.f32.mrf.mxu1  ;;  %v5615_v57 = vpop.f32.mrf.mxu0 }
 0x2fa   :  { %4905 = vst [vmem:[%s9381_s4 + $0xc8] sm:$0xff] %v4841_v12  ;;  %v4840_v63 = vadd.f32 %v4618_v18, %v9700_v33  ;;  %v4633_v59 = vadd.f32 %v5615_v57, %v9701_v24  ;;  %v9713_v33 = vld [vmem:[#allocation20_spill] sm:$0xff] }
 0x2fb   :  { %v9183_v36 = vpop.f32.mrf.mxu1  ;;  %v4627_v43 = vpop.f32.mrf.mxu0 }
 0x2fc   :  { %4904 = vst [vmem:[%s9381_s4 + $0xc0] sm:$0xff] %v4840_v63  ;;  %v4843_v14 = vadd.f32 %v4633_v59, %v9702_v44  ;;  %v4628_v3 = vadd.f32 %v4627_v43, %v9703_v38  ;;  %v9714_v43 = vld [vmem:[#allocation48_spill] sm:$0xff] }
 0x2fd   :  { %v4339_v48 = vpop.f32.mrf.mxu1  ;;  %v5618_v45 = vpop.f32.mrf.mxu0 }
 0x2fe   :  { %4907 = vst [vmem:[%s9381_s4 + $0xd8] sm:$0xff] %v4843_v14  ;;  %v4842_v20 = vadd.f32 %v4628_v3, %v9704_v42  ;;  %v4643_v15 = vadd.f32 %v5618_v45, %v9008_v31  ;;  %v9715_v3 = vld [vmem:[#allocation17_spill] sm:$0xff] }
 0x2ff   :  { %v9195_v52 = vpop.f32.mrf.mxu1  ;;  %v4637_v16 = vpop.f32.mrf.mxu0 }
 0x300   :  { %4906 = vst [vmem:[%s9381_s4 + $0xd0] sm:$0xff] %v4842_v20  ;;  %v4845_v53 = vadd.f32 %v4643_v15, %v9705_v2  ;;  %v4638_v46 = vadd.f32 %v4637_v16, %v9706_v41  ;;  %v9716_v20 = vld [vmem:[#allocation46_spill] sm:$0xff] }
 0x301   :  { %v4344_v61 = vpop.f32.mrf.mxu1  ;;  %v5621_v40 = vpop.f32.mrf.mxu0 }
 0x302   :  { %4909 = vst [vmem:[%s9381_s4 + $0xe8] sm:$0xff] %v4845_v53  ;;  %v4844_v55 = vadd.f32 %v4638_v46, %v9707_v19  ;;  %v4653_v31 = vadd.f32 %v5621_v40, %v9024_v6  ;;  %v9717_v53 = vld [vmem:[#allocation26_spill] sm:$0xff]  ;;  %v9718_v40 = vld [vmem:[#allocation52_spill] sm:$0xff] }
 0x303   :  { %v9207_v22 = vpop.f32.mrf.mxu1  ;;  %v4647_v4 = vpop.f32.mrf.mxu0 }
 0x304   :  { %4908 = vst [vmem:[%s9381_s4 + $0xe0] sm:$0xff] %v4844_v55  ;;  %v4847_v28 = vadd.f32 %v4653_v31, %v9708_v60  ;;  %v4648_v51 = vadd.f32 %v4647_v4, %v9709_v62  ;;  %v9719_v4 = vld [vmem:[#allocation23_spill] sm:$0xff] }
 0x305   :  { %v4349_v8 = vpop.f32.mrf.mxu1  ;;  %v5624_v17 = vpop.f32.mrf.mxu0 }
 0x306   :  { %4911 = vst [vmem:[%s9381_s4 + $0xf8] sm:$0xff] %v4847_v28  ;;  %v4846_v34 = vadd.f32 %v4648_v51, %v9710_v10  ;;  %v4663_v6 = vadd.f32 %v5624_v17, %v9039_v13  ;;  %v9720_v51 = vld [vmem:[#allocation50_spill] sm:$0xff] }
 0x307   :  { %v9219_v58 = vpop.f32.mrf.mxu1  ;;  %v4657_v25 = vpop.f32.mrf.mxu0 }
 0x308   :  { %4910 = vst [vmem:[%s9381_s4 + $0xf0] sm:$0xff] %v4846_v34  ;;  %v4849_v29 = vadd.f32 %v4663_v6, %v9711_v23  ;;  %v4658_v7 = vadd.f32 %v4657_v25, %v9030_v21  ;;  %v9721_v34 = vld [vmem:[#allocation32_spill] sm:$0xff] }
 0x309   :  { %v4354_v30 = vpop.f32.mrf.mxu1  ;;  %v5627_v12 = vpop.f32.mrf.mxu0 }
 0x30a   :  { %4913 = vst [vmem:[%s9381_s4 + $0x108] sm:$0xff] %v4849_v29  ;;  %v4848_v18 = vadd.f32 %v4658_v7, %v9712_v0  ;;  %v4673_v13 = vadd.f32 %v5627_v12, %v9063_v1  ;;  %v9722_v29 = vld [vmem:[#allocation56_spill] sm:$0xff]  ;;  %v9723_v0 = vld [vmem:[#allocation29_spill] sm:$0xff] }
 0x30b   :  { %v9231_v27 = vpop.f32.mrf.mxu1  ;;  %v4667_v57 = vpop.f32.mrf.mxu0 }
 0x30c   :  { %4912 = vst [vmem:[%s9381_s4 + $0x100] sm:$0xff] %v4848_v18  ;;  %v4851_v63 = vadd.f32 %v4673_v13, %v9713_v33  ;;  %v4668_v21 = vadd.f32 %v4667_v57, %v9051_v54  ;;  %v9724_v33 = vld [vmem:[#allocation54_spill] sm:$0xff] }
 0x30d   :  { %v4359_v24 = vpop.f32.mrf.mxu1  ;;  %v5630_v59 = vpop.f32.mrf.mxu0 }
 0x30e   :  { %4915 = vst [vmem:[%s9381_s4 + $0x118] sm:$0xff] %v4851_v63  ;;  %v4850_v44 = vadd.f32 %v4668_v21, %v9714_v43  ;;  %v4683_v1 = vadd.f32 %v5630_v59, %v9087_v39  ;;  %v9725_v59 = vld [vmem:[#allocation38_spill] sm:$0xff] }
 0x30f   :  { %v9243_v14 = vpop.f32.mrf.mxu1  ;;  %v4677_v38 = vpop.f32.mrf.mxu0 }
 0x310   :  { %4914 = vst [vmem:[%s9381_s4 + $0x110] sm:$0xff] %v4850_v44  ;;  %v4853_v48 = vadd.f32 %v4683_v1, %v9715_v3  ;;  %v4678_v54 = vadd.f32 %v4677_v38, %v9075_v5  ;;  %v9726_v38 = vld [vmem:[#allocation60_spill] sm:$0xff] }
 0x311   :  { %v4364_v45 = vpop.f32.mrf.mxu1  ;;  %v5633_v42 = vpop.f32.mrf.mxu0 }
 0x312   :  { %4917 = vst [vmem:[%s9381_s4 + $0x128] sm:$0xff] %v4853_v48  ;;  %v4852_v15 = vadd.f32 %v4678_v54, %v9716_v20  ;;  %v4693_v39 = vadd.f32 %v5633_v42, %v9111_v11  ;;  %v9727_v45 = vld [vmem:[#allocation35_spill] sm:$0xff] }
 0x313   :  { %v4367_v16 = vpop.f32.mrf.mxu1  ;;  %v4687_v2 = vpop.f32.mrf.mxu0 }
 0x314   :  { %4916 = vst [vmem:[%s9381_s4 + $0x120] sm:$0xff] %v4852_v15  ;;  %v4855_v41 = vadd.f32 %v4693_v39, %v9717_v53  ;;  %v4688_v5 = vadd.f32 %v4687_v2, %v9099_v35  ;;  %v9728_v39 = vld [vmem:[#allocation43_spill] sm:$0xff] }
 0x315   :  { %v4369_v46 = vpop.f32.mrf.mxu1  ;;  %v5636_v61 = vpop.f32.mrf.mxu0 }
 0x316   :  { %4919 = vst [vmem:[%s9381_s4 + $0x138] sm:$0xff] %v4855_v41  ;;  %v4854_v19 = vadd.f32 %v4688_v5, %v9718_v40  ;;  %v4703_v11 = vadd.f32 %v5636_v61, %v9135_v56  ;;  %v9729_v5 = vld [vmem:[#allocation64_spill] sm:$0xff] }
 0x317   :  { %v9265_v55 = vpop.f32.mrf.mxu1  ;;  %v4697_v31 = vpop.f32.mrf.mxu0 }
 0x318   :  { %4918 = vst [vmem:[%s9381_s4 + $0x130] sm:$0xff] %v4854_v19  ;;  %v4857_v60 = vadd.f32 %v4703_v11, %v9719_v4  ;;  %v4698_v35 = vadd.f32 %v4697_v31, %v9123_v49  ;;  %v9730_v19 = vld [vmem:[#allocation62_spill] sm:$0xff] }
 0x319   :  { %v4374_v28 = vpop.f32.mrf.mxu1  ;;  %v5639_v62 = vpop.f32.mrf.mxu0 }
 0x31a   :  { %4921 = vst [vmem:[%s9381_s4 + $0x148] sm:$0xff] %v4857_v60  ;;  %v4856_v8 = vadd.f32 %v4698_v35, %v9720_v51  ;;  %v4713_v56 = vadd.f32 %v5639_v62, %v9159_v26  ;;  %v9731_v60 = vld [vmem:[#allocation47_spill] sm:$0xff]  ;;  %v9732_v51 = vld [vmem:[#allocation45_spill] sm:$0xff] }
 0x31b   :  { %v4377_v17 = vpop.f32.mrf.mxu1  ;;  %v4707_v10 = vpop.f32.mrf.mxu0 }
 0x31c   :  { %4920 = vst [vmem:[%s9381_s4 + $0x140] sm:$0xff] %v4856_v8  ;;  %v4859_v6 = vadd.f32 %v4713_v56, %v9721_v34  ;;  %v4708_v49 = vadd.f32 %v4707_v10, %v9147_v32  ;;  %v9733_v34 = vld [vmem:[#allocation65_spill] sm:$0xff] }
 0x31d   :  { %v4379_v25 = vpop.f32.mrf.mxu1  ;;  %v5642_v23 = vpop.f32.mrf.mxu0 }
 0x31e   :  { %4923 = vst [vmem:[%s9381_s4 + $0x158] sm:$0xff] %v4859_v6  ;;  %v4858_v7 = vadd.f32 %v4708_v49, %v9722_v29  ;;  %v4723_v26 = vadd.f32 %v5642_v23, %v9183_v36  ;;  %v9734_v23 = vld [vmem:[#allocation68_spill] sm:$0xff] }
 0x31f   :  { %v4382_v30 = vpop.f32.mrf.mxu1  ;;  %v4717_v12 = vpop.f32.mrf.mxu0 }
 0x320   :  { %4922 = vst [vmem:[%s9381_s4 + $0x150] sm:$0xff] %v4858_v7  ;;  %v4861_v18 = vadd.f32 %v4723_v26, %v9723_v0  ;;  %v4718_v32 = vadd.f32 %v4717_v12, %v9171_v9  ;;  %v9735_v0 = vld [vmem:[#allocation49_spill] sm:$0xff] }
 0x321   :  { %v4384_v13 = vpop.f32.mrf.mxu1  ;;  %v5645_v57 = vpop.f32.mrf.mxu0 }
 0x322   :  { %4925 = vst [vmem:[%s9381_s4 + $0x168] sm:$0xff] %v4861_v18  ;;  %v4860_v63 = vadd.f32 %v4718_v32, %v9724_v33  ;;  %v4733_v36 = vadd.f32 %v5645_v57, %v9207_v22  ;;  %v9736_v57 = vld [vmem:[#allocation67_spill] sm:$0xff] }
 0x323   :  { %v4387_v21 = vpop.f32.mrf.mxu1  ;;  %v4727_v24 = vpop.f32.mrf.mxu0 }
 0x324   :  { %4924 = vst [vmem:[%s9381_s4 + $0x160] sm:$0xff] %v4860_v63  ;;  %v4863_v43 = vadd.f32 %v4733_v36, %v9725_v59  ;;  %v4728_v9 = vadd.f32 %v4727_v24, %v9195_v52  ;;  %v9737_v24 = vld [vmem:[#allocation55_spill] sm:$0xff] }
 0x325   :  { %v4389_v44 = vpop.f32.mrf.mxu1  ;;  %v5648_v1 = vpop.f32.mrf.mxu0 }
 0x326   :  { %4927 = vst [vmem:[%s9381_s4 + $0x178] sm:$0xff] %v4863_v43  ;;  %v4862_v3 = vadd.f32 %v4728_v9, %v9726_v38  ;;  %v4743_v22 = vadd.f32 %v5648_v1, %v9231_v27  ;;  %v9738_v1 = vld [vmem:[#allocation70_spill] sm:$0xff] }
 0x327   :  { %v4392_v48 = vpop.f32.mrf.mxu1  ;;  %v4737_v54 = vpop.f32.mrf.mxu0 }
 0x328   :  { %4926 = vst [vmem:[%s9381_s4 + $0x170] sm:$0xff] %v4862_v3  ;;  %v4865_v42 = vadd.f32 %v4743_v22, %v9727_v45  ;;  %v4738_v52 = vadd.f32 %v4737_v54, %v9219_v58  ;;  %v9739_v54 = vld [vmem:[#allocation53_spill] sm:$0xff] }
 0x329   :  { %v4394_v20 = vpop.f32.mrf.mxu1  ;;  %v5651_v15 = vpop.f32.mrf.mxu0 }
 0x32a   :  { %4929 = vst [vmem:[%s9381_s4 + $0x188] sm:$0xff] %v4865_v42  ;;  %v4864_v2 = vadd.f32 %v4738_v52, %v9728_v39  ;;  %v4753_v53 = vadd.f32 %v5651_v15, %v4367_v16 }
 0x32b   :  { %v4397_v27 = vpop.f32.mrf.mxu1  ;;  %v4747_v41 = vpop.f32.mrf.mxu0 }
 0x32c   :  { %4928 = vst [vmem:[%s9381_s4 + $0x180] sm:$0xff] %v4864_v2  ;;  %v4867_v46 = vadd.f32 %v4753_v53, %v9729_v5  ;;  %v4748_v61 = vadd.f32 %v4747_v41, %v9243_v14 }
 0x32d   :  { %v4399_v58 = vpop.f32.mrf.mxu1  ;;  %v5654_v40 = vpop.f32.mrf.mxu0 }
 0x32e   :  { %4931 = vst [vmem:[%s9381_s4 + $0x198] sm:$0xff] %v4867_v46  ;;  %v4866_v11 = vadd.f32 %v4748_v61, %v9730_v19  ;;  %v4763_v31 = vadd.f32 %v5654_v40, %v4377_v17 }
 0x32f   :  { %v4402_v16 = vpop.f32.mrf.mxu1  ;;  %v4757_v4 = vpop.f32.mrf.mxu0 }
 0x330   :  { %4930 = vst [vmem:[%s9381_s4 + $0x190] sm:$0xff] %v4866_v11  ;;  %v4869_v35 = vadd.f32 %v4763_v31, %v9731_v60  ;;  %v4758_v28 = vadd.f32 %v4757_v4, %v9265_v55 }
 0x331   :  { %v4404_v14 = vpop.f32.mrf.mxu1  ;;  %v5657_v62 = vpop.f32.mrf.mxu0 }
 0x332   :  { %4933 = vst [vmem:[%s9381_s4 + $0x1a8] sm:$0xff] %v4869_v35  ;;  %v4868_v8 = vadd.f32 %v4758_v28, %v9732_v51  ;;  %v4773_v56 = vadd.f32 %v5657_v62, %v4387_v21 }
 0x333   :  { %v4407_v17 = vpop.f32.mrf.mxu1  ;;  %v4767_v10 = vpop.f32.mrf.mxu0 }
 0x334   :  { %4932 = vst [vmem:[%s9381_s4 + $0x1a0] sm:$0xff] %v4868_v8  ;;  %v4871_v6 = vadd.f32 %v4773_v56, %v9733_v34  ;;  %v4768_v49 = vadd.f32 %v4767_v10, %v4382_v30 }
 0x335   :  { %v4409_v25 = vpop.f32.mrf.mxu1  ;;  %v5660_v55 = vpop.f32.mrf.mxu0 }
 0x336   :  { %4935 = vst [vmem:[%s9381_s4 + $0x1b8] sm:$0xff] %v4871_v6  ;;  %v4870_v29 = vadd.f32 %v4768_v49, %v9734_v23  ;;  %v4783_v7 = vadd.f32 %v5660_v55, %v4397_v27 }
 0x337   :  { %v4412_v26 = vpop.f32.mrf.mxu1  ;;  %v4777_v12 = vpop.f32.mrf.mxu0 }
 0x338   :  { %4934 = vst [vmem:[%s9381_s4 + $0x1b0] sm:$0xff] %v4870_v29  ;;  %v4873_v18 = vadd.f32 %v4783_v7, %v9735_v0  ;;  %v4778_v32 = vadd.f32 %v4777_v12, %v4392_v48 }
 0x339   :  { %v4414_v13 = vpop.f32.mrf.mxu1  ;;  %v5663_v30 = vpop.f32.mrf.mxu0 }
 0x33a   :  { %4937 = vst [vmem:[%s9381_s4 + $0x1c8] sm:$0xff] %v4873_v18  ;;  %v4872_v33 = vadd.f32 %v4778_v32, %v9736_v57  ;;  %v4793_v63 = vadd.f32 %v5663_v30, %v4407_v17 }
 0x33b   :  { %v4417_v36 = vpop.f32.mrf.mxu1  ;;  %v4787_v21 = vpop.f32.mrf.mxu0 }
 0x33c   :  { %4936 = vst [vmem:[%s9381_s4 + $0x1c0] sm:$0xff] %v4872_v33  ;;  %v4875_v59 = vadd.f32 %v4793_v63, %v9737_v24  ;;  %v4788_v43 = vadd.f32 %v4787_v21, %v4402_v16 }
 0x33d   :  { %v4419_v9 = vpop.f32.mrf.mxu1  ;;  %v5666_v44 = vpop.f32.mrf.mxu0 }
 0x33e   :  { %4939 = vst [vmem:[%s9381_s4 + $0x1d8] sm:$0xff] %v4875_v59  ;;  %v4874_v38 = vadd.f32 %v4788_v43, %v9738_v1  ;;  %v4803_v3 = vadd.f32 %v5666_v44, %v4417_v36 }
 0x33f   :  { %v4422_v22 = vpop.f32.mrf.mxu1  ;;  %v4797_v48 = vpop.f32.mrf.mxu0 }
 0x340   :  { %4938 = vst [vmem:[%s9381_s4 + $0x1d0] sm:$0xff] %v4874_v38  ;;  %v4877_v45 = vadd.f32 %v4803_v3, %v9739_v54  ;;  %v4798_v42 = vadd.f32 %v4797_v48, %v4412_v26 }
 0x341   :  { %v4424_v52 = vpop.f32.mrf.mxu1  ;;  %v5669_v20 = vpop.f32.mrf.mxu0 }
 0x342   :  { %4941 = vst [vmem:[%s9381_s4 + $0x1e8] sm:$0xff] %v4877_v45  ;;  %v4876_v15 = vadd.f32 %v4798_v42, %v9019_v47 }
 0x343   :  { %v4427_v39 = vpop.f32.mrf.mxu1  ;;  %v4807_v2 = vpop.f32.mrf.mxu0 }
 0x344   :  { %4940 = vst [vmem:[%s9381_s4 + $0x1e0] sm:$0xff] %v4876_v15  ;;  %v4813_v53 = vadd.f32 %v5669_v20, %v4427_v39  ;;  %v4808_v27 = vadd.f32 %v4807_v2, %v4422_v22 }
 0x345   :  { %v4429_v41 = vpop.f32.mrf.mxu1 }
 0x346   :  { %v4879_v5 = vadd.f32 %v4813_v53, %v9022_v37  ;;  %v4878_v46 = vadd.f32 %v4808_v27, %v9027_v50 }
 0x348   :  { %4943 = vst [vmem:[%s9381_s4 + $0x1f8] sm:$0xff] %v4879_v5  ;;  %4942 = vst [vmem:[%s9381_s4 + $0x1f0] sm:$0xff] %v4878_v46 }

</bundles_post_ra>
